<compile_context>
chip_gen: v7x
topology: tpu7x:2x2x1
jax: 0.10.0
libtpu: 0.0.40
codegen_flags: <defaults>
</compile_context>

<pallas_src>
import functools
import math

import jax
import jax.numpy as jnp
from jax.experimental import pallas as pl
from jax.experimental.pallas import tpu as pltpu

_COMPUTE_DTYPE = jnp.bfloat16
_TM = 256                      # M tile for the fused matmul kernel
_VMEM_LIMIT = 32 * 1024 * 1024  # safe on v5e/v6e/v7x; tiles use ~2 MB


def _round_up(x, m):
    return (x + m - 1) // m * m


def _choose_tile(dim_p, candidates):
    """Largest candidate that evenly divides dim_p (dim_p is 128-aligned)."""
    for t in candidates:
        if dim_p % t == 0:
            return t
    return dim_p


def _choose_m_tiling(m, tile, align=16):
    """Return (padded_M, tm) such that tm divides padded_M."""
    if m <= tile:
        m_p = _round_up(m, align)
        return m_p, m_p
    return _round_up(m, tile), tile


def _pad2d(x, rows, cols, dtype, value=0.0):
    x = x.astype(dtype)
    r, c = x.shape
    if r == rows and c == cols:
        return x
    return jnp.pad(x, ((0, rows - r), (0, cols - c)), constant_values=value)


# ---------------------------------------------------------------------------
# Pallas kernels
# ---------------------------------------------------------------------------
def _mm_bn_kernel(x_ref, w_ref, b_ref, o_ref, acc_ref, *, relu):
    """out = maybe_relu(x @ w_scaled + bias); K-reduction over grid axis 2."""
    k = pl.program_id(2)

    @pl.when(k == 0)
    def _():
        acc_ref[...] = jnp.zeros_like(acc_ref)

    acc_ref[...] += jnp.dot(x_ref[...], w_ref[...],
                            preferred_element_type=jnp.float32)

    @pl.when(k == pl.num_programs(2) - 1)
    def _():
        y = acc_ref[...] + b_ref[...]
        if relu:
            y = jnp.maximum(y, 0.0)
        o_ref[...] = y.astype(o_ref.dtype)


def _mm_bn_res_kernel(x_ref, w_ref, b_ref, r_ref, o_ref, acc_ref, *, relu):
    """out = maybe_relu(x @ w_scaled + bias + residual)."""
    k = pl.program_id(2)

    @pl.when(k == 0)
    def _():
        acc_ref[...] = jnp.zeros_like(acc_ref)

    acc_ref[...] += jnp.dot(x_ref[...], w_ref[...],
                            preferred_element_type=jnp.float32)

    @pl.when(k == pl.num_programs(2) - 1)
    def _():
        y = acc_ref[...] + b_ref[...] + r_ref[...].astype(jnp.float32)
        if relu:
            y = jnp.maximum(y, 0.0)
        o_ref[...] = y.astype(o_ref.dtype)


def _maxpool_reduce_kernel(x_ref, o_ref):
    # x_ref: (9, tm, C) stacked shifted windows -> elementwise max over axis 0.
    o_ref[...] = jnp.max(x_ref[...], axis=0)


# ---------------------------------------------------------------------------
# Wrappers around pallas_call
# ---------------------------------------------------------------------------
def matmul_bn(patches, w_scaled, bias, residual=None, relu=True):
    """patches:(M,K)  w_scaled:(K,N)  bias:(N,)  residual:(M,N)|None -> (M,N)."""
    M, K = patches.shape
    N = w_scaled.shape[1]

    M_p, tm = _choose_m_tiling(M, _TM)
    K_p = _round_up(K, 128)
    tk = _choose_tile(K_p, (512, 384, 256, 128))
    N_p = _round_up(N, 128)
    tn = 256 if N_p % 256 == 0 else 128

    x_p = _pad2d(patches, M_p, K_p, _COMPUTE_DTYPE)
    w_p = _pad2d(w_scaled, K_p, N_p, _COMPUTE_DTYPE)
    b_p = _pad2d(bias.reshape(1, N), 1, N_p, jnp.float32)

    grid = (M_p // tm, N_p // tn, K_p // tk)
    in_specs = [
        pl.BlockSpec((tm, tk), lambda i, j, k: (i, k)),
        pl.BlockSpec((tk, tn), lambda i, j, k: (k, j)),
        pl.BlockSpec((1, tn), lambda i, j, k: (0, j)),   # bias resident across k
    ]
    args = [x_p, w_p, b_p]
    if residual is not None:
        r_p = _pad2d(residual, M_p, N_p, _COMPUTE_DTYPE)
        in_specs.append(pl.BlockSpec((tm, tn), lambda i, j, k: (i, j)))
        args.append(r_p)
        kernel = functools.partial(_mm_bn_res_kernel, relu=relu)
    else:
        kernel = functools.partial(_mm_bn_kernel, relu=relu)

    out = pl.pallas_call(
        kernel,
        out_shape=jax.ShapeDtypeStruct((M_p, N_p), _COMPUTE_DTYPE),
        grid_spec=pltpu.PrefetchScalarGridSpec(
            num_scalar_prefetch=0,
            grid=grid,
            in_specs=in_specs,
            out_specs=pl.BlockSpec((tm, tn), lambda i, j, k: (i, j)),
            scratch_shapes=[pltpu.VMEM((tm, tn), jnp.float32)],
        ),
        compiler_params=pltpu.CompilerParams(
            dimension_semantics=("parallel", "parallel", "arbitrary"),
            vmem_limit_bytes=_VMEM_LIMIT,
        ),
    )(*args)
    if M_p == M and N_p == N:
        return out
    return out[:M, :N]


def _im2col(x, kh, kw, stride, padding):
    """x:(N,H,W,C) NHWC -> (N,Ho,Wo,kh*kw*C) with (kh,kw,C) minor ordering."""
    n, h, w, c = x.shape
    xp = jnp.pad(x, ((0, 0), (padding, padding), (padding, padding), (0, 0)))
    ho = (h + 2 * padding - kh) // stride + 1
    wo = (w + 2 * padding - kw) // stride + 1
    cols = []
    for i in range(kh):
        for j in range(kw):
            cols.append(xp[:, i:i + stride * ho:stride, j:j + stride * wo:stride, :])
    # TODO(synk): read shifted windows directly inside the matmul kernel to
    # avoid materializing the (M, kh*kw*C) patch array in HBM for 3x3 convs.
    return jnp.concatenate(cols, axis=-1), ho, wo


def conv_bn(x, w, bn, stride=1, padding=0, relu=True, residual=None):
    """x: NHWC (bf16), w: torch-layout (Cout,Cin,kh,kw) f32, bn: (g,b,mean,var)."""
    cout, cin, kh, kw = w.shape
    n = x.shape[0]
    if kh == 1 and kw == 1 and padding == 0:
        xs = x[:, ::stride, ::stride, :]
        ho, wo = xs.shape[1], xs.shape[2]
        patches = xs.reshape(n * ho * wo, cin)
    else:
        patches, ho, wo = _im2col(x, kh, kw, stride, padding)
        patches = patches.reshape(n * ho * wo, kh * kw * cin)

    gamma, beta, mean, var = bn
    scale = gamma * jax.lax.rsqrt(var + 1e-5)
    bias = beta - mean * scale

    # Fold the BN scale into the weight matrix (in f32, once per conv).
    wm = jnp.transpose(w, (2, 3, 1, 0)).reshape(kh * kw * cin, cout)
    wm = wm * scale[None, :]

    res2d = None if residual is None else residual.reshape(n * ho * wo, cout)
    y = matmul_bn(patches, wm, bias, residual=res2d, relu=relu)
    return y.reshape(n, ho, wo, cout)


def maxpool_3x3_s2(x):
    """MaxPool2d(kernel_size=3, stride=2, padding=1) on NHWC input."""
    n, h, w, c = x.shape
    k, s, pad = 3, 2, 1
    ho = (h + 2 * pad - k) // s + 1
    wo = (w + 2 * pad - k) // s + 1
    xp = jnp.pad(x, ((0, 0), (pad, pad), (pad, pad), (0, 0)),
                 constant_values=float("-inf"))
    wins = [xp[:, i:i + s * ho:s, j:j + s * wo:s, :]
            for i in range(k) for j in range(k)]
    stacked = jnp.stack(wins, axis=0).reshape(k * k, n * ho * wo, c)

    M = n * ho * wo
    M_p, tm = _choose_m_tiling(M, 512)
    C_p = _round_up(c, 128)
    if M_p != M or C_p != c:
        stacked = jnp.pad(stacked, ((0, 0), (0, M_p - M), (0, C_p - c)),
                          constant_values=float("-inf"))

    out = pl.pallas_call(
        _maxpool_reduce_kernel,
        out_shape=jax.ShapeDtypeStruct((M_p, C_p), x.dtype),
        grid_spec=pltpu.PrefetchScalarGridSpec(
            num_scalar_prefetch=0,
            grid=(M_p // tm,),
            in_specs=[pl.BlockSpec((k * k, tm, C_p), lambda i: (0, i, 0))],
            out_specs=pl.BlockSpec((tm, C_p), lambda i: (i, 0)),
        ),
        compiler_params=pltpu.CompilerParams(
            dimension_semantics=("parallel",),
            vmem_limit_bytes=_VMEM_LIMIT,
        ),
    )(stacked)
    if M_p != M or C_p != c:
        out = out[:M, :c]
    return out.reshape(n, ho, wo, c)


# ---------------------------------------------------------------------------
# ResNet50 parameters & forward
# ---------------------------------------------------------------------------
def _conv_init(key, cout, cin, kh, kw):
    # matches ResNet50.random_init: N(0, sqrt(2 / (kh*kw*cout)))
    n = kh * kw * cout
    return jax.random.normal(key, (cout, cin, kh, kw), jnp.float32) * math.sqrt(2.0 / n)


def _bn_init(c):
    # gamma=1, beta=0, running_mean=0, running_var=1
    return (jnp.ones((c,), jnp.float32), jnp.zeros((c,), jnp.float32),
            jnp.zeros((c,), jnp.float32), jnp.ones((c,), jnp.float32))


def init_resnet50_params(key, last_stride=2):
    layers = [3, 4, 6, 3]
    planes_list = [64, 128, 256, 512]
    strides = [1, 2, 2, last_stride]
    keys = iter(jax.random.split(key, 256))

    params = {'conv1_w': _conv_init(next(keys), 64, 3, 7, 7), 'bn1': _bn_init(64)}
    inplanes = 64
    layer_params = []
    for li in range(4):
        planes = planes_list[li]
        blocks = []
        for bi in range(layers[li]):
            stride = strides[li] if bi == 0 else 1
            bp = {
                'conv1_w': _conv_init(next(keys), planes, inplanes, 1, 1),
                'bn1': _bn_init(planes),
                'conv2_w': _conv_init(next(keys), planes, planes, 3, 3),
                'bn2': _bn_init(planes),
                'conv3_w': _conv_init(next(keys), planes * 4, planes, 1, 1),
                'bn3': _bn_init(planes * 4),
            }
            if bi == 0 and (stride != 1 or inplanes != planes * 4):
                bp['ds_w'] = _conv_init(next(keys), planes * 4, inplanes, 1, 1)
                bp['ds_bn'] = _bn_init(planes * 4)
            blocks.append(bp)
            inplanes = planes * 4
        layer_params.append(blocks)
    params['layers'] = layer_params
    return params


def bottleneck_forward(x, bp, stride):
    out = conv_bn(x, bp['conv1_w'], bp['bn1'], stride=1, padding=0, relu=True)
    out = conv_bn(out, bp['conv2_w'], bp['bn2'], stride=stride, padding=1, relu=True)
    if 'ds_w' in bp:
        residual = conv_bn(x, bp['ds_w'], bp['ds_bn'], stride=stride, padding=0,
                           relu=False)
    else:
        residual = x
    # conv3 -> bn3 -> (+ residual) -> relu, fused in one kernel
    out = conv_bn(out, bp['conv3_w'], bp['bn3'], stride=1, padding=0, relu=True,
                  residual=residual)
    return out


def resnet50_forward(params, x_nchw, last_stride=2):
    # convert PyTorch NCHW -> NHWC bf16 for the TPU kernels
    x = jnp.transpose(x_nchw, (0, 2, 3, 1)).astype(_COMPUTE_DTYPE)
    x = conv_bn(x, params['conv1_w'], params['bn1'], stride=2, padding=3, relu=True)
    x = maxpool_3x3_s2(x)
    strides = [1, 2, 2, last_stride]
    for li, blocks in enumerate(params['layers']):
        for bi, bp in enumerate(blocks):
            stride = strides[li] if bi == 0 else 1
            x = bottleneck_forward(x, bp, stride)
    # back to NCHW / f32 to match the PyTorch module output convention
    return jnp.transpose(x, (0, 3, 1, 2)).astype(jnp.float32)


if __name__ == "__main__":
    key = jax.random.PRNGKey(0)
    pkey, xkey = jax.random.split(key)

    params = init_resnet50_params(pkey, last_stride=2)
    x = jax.random.normal(xkey, (2, 3, 16, 16), jnp.float32)  # small NCHW input

    fwd = jax.jit(functools.partial(resnet50_forward, last_stride=2))
    y = fwd(params, x)
    y = jax.block_until_ready(y)

    assert y.shape == (2, 2048, 1, 1), y.shape
    assert bool(jnp.isfinite(y).all())
    print("KERNEL_OK")
</pallas_src>

<mosaic_0001>
module attributes {stable_mosaic.version = 11 : i64} {
  func.func @_mm_bn_kernel(%arg0: i32, %arg1: i32, %arg2: i32, %arg3: memref<128x256xbf16, #tpu.memory_space<vmem>>, %arg4: memref<256x128xbf16, #tpu.memory_space<vmem>>, %arg5: memref<1x128xf32, #tpu.memory_space<vmem>>, %arg6: memref<128x128xbf16, #tpu.memory_space<vmem>>, %arg7: memref<128x128xf32, #tpu.memory_space<vmem>>) attributes {dimension_semantics = [#tpu.dimension_semantics<parallel>, #tpu.dimension_semantics<parallel>, #tpu.dimension_semantics<arbitrary>], iteration_bounds = array<i64: 1, 1, 1>, scalar_prefetch = 0 : i64, scratch_operands = 1 : i64, tpu.core_type = #tpu.core_type<tc>, window_params = [{transform_indices = @transform_0, window_bounds = array<i64: 128, 256>}, {transform_indices = @transform_1, window_bounds = array<i64: 256, 128>}, {transform_indices = @transform_2, window_bounds = array<i64: 1, 128>}, {transform_indices = @transform_3, window_bounds = array<i64: 128, 128>}]} {
    %c0_i32 = arith.constant 0 : i32
    %0 = arith.cmpi eq, %arg2, %c0_i32 : i32
    %1 = arith.extui %0 : i1 to i32
    %c0_i32_0 = arith.constant 0 : i32
    %2 = arith.cmpi ne, %1, %c0_i32_0 : i32
    scf.if %2 {
      %cst_10 = arith.constant 0.000000e+00 : f32
      %12 = vector.broadcast %cst_10 : f32 to vector<128x128xf32>
      %c0_11 = arith.constant 0 : index
      %c0_12 = arith.constant 0 : index
      %13 = vector.load %arg7[%c0_11, %c0_12] : memref<128x128xf32, #tpu.memory_space<vmem>>, vector<128x128xf32>
      tpu.vector_store %arg7[%c0_11, %c0_12], %12 {strides = array<i32>} : memref<128x128xf32, #tpu.memory_space<vmem>>, vector<128x128xf32>,
    } else {
    }
    %c0 = arith.constant 0 : index
    %c0_1 = arith.constant 0 : index
    %3 = vector.load %arg7[%c0, %c0_1] : memref<128x128xf32, #tpu.memory_space<vmem>>, vector<128x128xf32>
    %c0_2 = arith.constant 0 : index
    %c0_3 = arith.constant 0 : index
    %4 = vector.load %arg3[%c0_2, %c0_3] : memref<128x256xbf16, #tpu.memory_space<vmem>>, vector<128x256xbf16>
    %c0_4 = arith.constant 0 : index
    %c0_5 = arith.constant 0 : index
    %5 = vector.load %arg4[%c0_4, %c0_5] : memref<256x128xbf16, #tpu.memory_space<vmem>>, vector<256x128xbf16>
    %cst = arith.constant dense<0.000000e+00> : vector<128x128xf32>
    %6 = tpu.matmul %4, %5, %cst {dimension_numbers = #tpu.dot_dimension_numbers<[1], [0], [0], [1], [0, 0, 1, 1], [], []>} : vector<128x256xbf16>, vector<256x128xbf16>, vector<128x128xf32> -> vector<128x128xf32>
    %7 = arith.addf %3, %6 : vector<128x128xf32>
    %c0_6 = arith.constant 0 : index
    %c0_7 = arith.constant 0 : index
    %8 = vector.load %arg7[%c0_6, %c0_7] : memref<128x128xf32, #tpu.memory_space<vmem>>, vector<128x128xf32>
    tpu.vector_store %arg7[%c0_6, %c0_7], %7 {strides = array<i32>} : memref<128x128xf32, #tpu.memory_space<vmem>>, vector<128x128xf32>,
    %c0_i32_8 = arith.constant 0 : i32
    %9 = arith.cmpi eq, %arg2, %c0_i32_8 : i32
    %10 = arith.extui %9 : i1 to i32
    %c0_i32_9 = arith.constant 0 : i32
    %11 = arith.cmpi ne, %10, %c0_i32_9 : i32
    scf.if %11 {
      %c0_10 = arith.constant 0 : index
      %c0_11 = arith.constant 0 : index
      %12 = vector.load %arg7[%c0_10, %c0_11] : memref<128x128xf32, #tpu.memory_space<vmem>>, vector<128x128xf32>
      %c0_12 = arith.constant 0 : index
      %c0_13 = arith.constant 0 : index
      %13 = vector.load %arg5[%c0_12, %c0_13] : memref<1x128xf32, #tpu.memory_space<vmem>>, vector<1x128xf32>
      %14 = vector.broadcast %13 : vector<1x128xf32> to vector<128x128xf32>
      %15 = arith.addf %12, %14 : vector<128x128xf32>
      %cst_14 = arith.constant 0.000000e+00 : f32
      %16 = vector.broadcast %cst_14 : f32 to vector<128x128xf32>
      %17 = arith.maximumf %15, %16 : vector<128x128xf32>
      %18 = arith.truncf %17 : vector<128x128xf32> to vector<128x128xbf16>
      %c0_15 = arith.constant 0 : index
      %c0_16 = arith.constant 0 : index
      %19 = vector.load %arg6[%c0_15, %c0_16] : memref<128x128xbf16, #tpu.memory_space<vmem>>, vector<128x128xbf16>
      tpu.vector_store %arg6[%c0_15, %c0_16], %18 {strides = array<i32>} : memref<128x128xbf16, #tpu.memory_space<vmem>>, vector<128x128xbf16>,
    } else {
    }
    return
  }
  func.func @transform_0(%arg0: i32, %arg1: i32, %arg2: i32) -> (i32, i32) {
    %c0_i32 = arith.constant 0 : i32
    return %arg0, %arg2 : i32, i32
  }
  func.func @transform_1(%arg0: i32, %arg1: i32, %arg2: i32) -> (i32, i32) {
    %c0_i32 = arith.constant 0 : i32
    return %arg2, %arg1 : i32, i32
  }
  func.func @transform_2(%arg0: i32, %arg1: i32, %arg2: i32) -> (i32, i32) {
    %c0_i32 = arith.constant 0 : i32
    %c0_i32_0 = arith.constant 0 : i32
    return %c0_i32, %arg1 : i32, i32
  }
  func.func @transform_3(%arg0: i32, %arg1: i32, %arg2: i32) -> (i32, i32) {
    %c0_i32 = arith.constant 0 : i32
    return %arg0, %arg1 : i32, i32
  }
}

module attributes {stable_mosaic.version = 11 : i64} {
  func.func @_maxpool_reduce_kernel(%arg0: i32, %arg1: memref<9x32x128xbf16, #tpu.memory_space<vmem>>, %arg2: memref<32x128xbf16, #tpu.memory_space<vmem>>) attributes {dimension_semantics = [#tpu.dimension_semantics<parallel>], iteration_bounds = array<i64: 1>, scalar_prefetch = 0 : i64, scratch_operands = 0 : i64, tpu.core_type = #tpu.core_type<tc>, window_params = [{transform_indices = @transform_0, window_bounds = array<i64: 9, 32, 128>}, {transform_indices = @transform_1, window_bounds = array<i64: 32, 128>}]} {
    %c0 = arith.constant 0 : index
    %c0_0 = arith.constant 0 : index
    %c0_1 = arith.constant 0 : index
    %0 = vector.load %arg1[%c0, %c0_0, %c0_1] : memref<9x32x128xbf16, #tpu.memory_space<vmem>>, vector<9x32x128xbf16>
    %cst = arith.constant dense<0xFF80> : vector<32x128xbf16>
    %1 = vector.multi_reduction <maximumf>, %0, %cst [0] : vector<9x32x128xbf16> to vector<32x128xbf16>
    %c0_2 = arith.constant 0 : index
    %c0_3 = arith.constant 0 : index
    %2 = vector.load %arg2[%c0_2, %c0_3] : memref<32x128xbf16, #tpu.memory_space<vmem>>, vector<32x128xbf16>
    tpu.vector_store %arg2[%c0_2, %c0_3], %1 {strides = array<i32>} : memref<32x128xbf16, #tpu.memory_space<vmem>>, vector<32x128xbf16>,
    return
  }
  func.func @transform_0(%arg0: i32) -> (i32, i32, i32) {
    %c0_i32 = arith.constant 0 : i32
    %c0_i32_0 = arith.constant 0 : i32
    %c0_i32_1 = arith.constant 0 : i32
    return %c0_i32, %arg0, %c0_i32_0 : i32, i32, i32
  }
  func.func @transform_1(%arg0: i32) -> (i32, i32) {
    %c0_i32 = arith.constant 0 : i32
    %c0_i32_0 = arith.constant 0 : i32
    return %arg0, %c0_i32 : i32, i32
  }
}

module attributes {stable_mosaic.version = 11 : i64} {
  func.func @_mm_bn_kernel(%arg0: i32, %arg1: i32, %arg2: i32, %arg3: memref<32x128xbf16, #tpu.memory_space<vmem>>, %arg4: memref<128x128xbf16, #tpu.memory_space<vmem>>, %arg5: memref<1x128xf32, #tpu.memory_space<vmem>>, %arg6: memref<32x128xbf16, #tpu.memory_space<vmem>>, %arg7: memref<32x128xf32, #tpu.memory_space<vmem>>) attributes {dimension_semantics = [#tpu.dimension_semantics<parallel>, #tpu.dimension_semantics<parallel>, #tpu.dimension_semantics<arbitrary>], iteration_bounds = array<i64: 1, 1, 1>, scalar_prefetch = 0 : i64, scratch_operands = 1 : i64, tpu.core_type = #tpu.core_type<tc>, window_params = [{transform_indices = @transform_0, window_bounds = array<i64: 32, 128>}, {transform_indices = @transform_1, window_bounds = array<i64: 128, 128>}, {transform_indices = @transform_2, window_bounds = array<i64: 1, 128>}, {transform_indices = @transform_3, window_bounds = array<i64: 32, 128>}]} {
    %c0_i32 = arith.constant 0 : i32
    %0 = arith.cmpi eq, %arg2, %c0_i32 : i32
    %1 = arith.extui %0 : i1 to i32
    %c0_i32_0 = arith.constant 0 : i32
    %2 = arith.cmpi ne, %1, %c0_i32_0 : i32
    scf.if %2 {
      %cst_10 = arith.constant 0.000000e+00 : f32
      %12 = vector.broadcast %cst_10 : f32 to vector<32x128xf32>
      %c0_11 = arith.constant 0 : index
      %c0_12 = arith.constant 0 : index
      %13 = vector.load %arg7[%c0_11, %c0_12] : memref<32x128xf32, #tpu.memory_space<vmem>>, vector<32x128xf32>
      tpu.vector_store %arg7[%c0_11, %c0_12], %12 {strides = array<i32>} : memref<32x128xf32, #tpu.memory_space<vmem>>, vector<32x128xf32>,
    } else {
    }
    %c0 = arith.constant 0 : index
    %c0_1 = arith.constant 0 : index
    %3 = vector.load %arg7[%c0, %c0_1] : memref<32x128xf32, #tpu.memory_space<vmem>>, vector<32x128xf32>
    %c0_2 = arith.constant 0 : index
    %c0_3 = arith.constant 0 : index
    %4 = vector.load %arg3[%c0_2, %c0_3] : memref<32x128xbf16, #tpu.memory_space<vmem>>, vector<32x128xbf16>
    %c0_4 = arith.constant 0 : index
    %c0_5 = arith.constant 0 : index
    %5 = vector.load %arg4[%c0_4, %c0_5] : memref<128x128xbf16, #tpu.memory_space<vmem>>, vector<128x128xbf16>
    %cst = arith.constant dense<0.000000e+00> : vector<32x128xf32>
    %6 = tpu.matmul %4, %5, %cst {dimension_numbers = #tpu.dot_dimension_numbers<[1], [0], [0], [1], [0, 0, 1, 1], [], []>} : vector<32x128xbf16>, vector<128x128xbf16>, vector<32x128xf32> -> vector<32x128xf32>
    %7 = arith.addf %3, %6 : vector<32x128xf32>
    %c0_6 = arith.constant 0 : index
    %c0_7 = arith.constant 0 : index
    %8 = vector.load %arg7[%c0_6, %c0_7] : memref<32x128xf32, #tpu.memory_space<vmem>>, vector<32x128xf32>
    tpu.vector_store %arg7[%c0_6, %c0_7], %7 {strides = array<i32>} : memref<32x128xf32, #tpu.memory_space<vmem>>, vector<32x128xf32>,
    %c0_i32_8 = arith.constant 0 : i32
    %9 = arith.cmpi eq, %arg2, %c0_i32_8 : i32
    %10 = arith.extui %9 : i1 to i32
    %c0_i32_9 = arith.constant 0 : i32
    %11 = arith.cmpi ne, %10, %c0_i32_9 : i32
    scf.if %11 {
      %c0_10 = arith.constant 0 : index
      %c0_11 = arith.constant 0 : index
      %12 = vector.load %arg7[%c0_10, %c0_11] : memref<32x128xf32, #tpu.memory_space<vmem>>, vector<32x128xf32>
      %c0_12 = arith.constant 0 : index
      %c0_13 = arith.constant 0 : index
      %13 = vector.load %arg5[%c0_12, %c0_13] : memref<1x128xf32, #tpu.memory_space<vmem>>, vector<1x128xf32>
      %14 = vector.broadcast %13 : vector<1x128xf32> to vector<32x128xf32>
      %15 = arith.addf %12, %14 : vector<32x128xf32>
      %cst_14 = arith.constant 0.000000e+00 : f32
      %16 = vector.broadcast %cst_14 : f32 to vector<32x128xf32>
      %17 = arith.maximumf %15, %16 : vector<32x128xf32>
      %18 = arith.truncf %17 : vector<32x128xf32> to vector<32x128xbf16>
      %c0_15 = arith.constant 0 : index
      %c0_16 = arith.constant 0 : index
      %19 = vector.load %arg6[%c0_15, %c0_16] : memref<32x128xbf16, #tpu.memory_space<vmem>>, vector<32x128xbf16>
      tpu.vector_store %arg6[%c0_15, %c0_16], %18 {strides = array<i32>} : memref<32x128xbf16, #tpu.memory_space<vmem>>, vector<32x128xbf16>,
    } else {
    }
    return
  }
  func.func @transform_0(%arg0: i32, %arg1: i32, %arg2: i32) -> (i32, i32) {
    %c0_i32 = arith.constant 0 : i32
    return %arg0, %arg2 : i32, i32
  }
  func.func @transform_1(%arg0: i32, %arg1: i32, %arg2: i32) -> (i32, i32) {
    %c0_i32 = arith.constant 0 : i32
    return %arg2, %arg1 : i32, i32
  }
  func.func @transform_2(%arg0: i32, %arg1: i32, %arg2: i32) -> (i32, i32) {
    %c0_i32 = arith.constant 0 : i32
    %c0_i32_0 = arith.constant 0 : i32
    return %c0_i32, %arg1 : i32, i32
  }
  func.func @transform_3(%arg0: i32, %arg1: i32, %arg2: i32) -> (i32, i32) {
    %c0_i32 = arith.constant 0 : i32
    return %arg0, %arg1 : i32, i32
  }
}

module attributes {stable_mosaic.version = 11 : i64} {
  func.func @_mm_bn_kernel(%arg0: i32, %arg1: i32, %arg2: i32, %arg3: memref<32x128xbf16, #tpu.memory_space<vmem>>, %arg4: memref<128x128xbf16, #tpu.memory_space<vmem>>, %arg5: memref<1x128xf32, #tpu.memory_space<vmem>>, %arg6: memref<32x128xbf16, #tpu.memory_space<vmem>>, %arg7: memref<32x128xf32, #tpu.memory_space<vmem>>) attributes {dimension_semantics = [#tpu.dimension_semantics<parallel>, #tpu.dimension_semantics<parallel>, #tpu.dimension_semantics<arbitrary>], iteration_bounds = array<i64: 1, 1, 5>, scalar_prefetch = 0 : i64, scratch_operands = 1 : i64, tpu.core_type = #tpu.core_type<tc>, window_params = [{transform_indices = @transform_0, window_bounds = array<i64: 32, 128>}, {transform_indices = @transform_1, window_bounds = array<i64: 128, 128>}, {transform_indices = @transform_2, window_bounds = array<i64: 1, 128>}, {transform_indices = @transform_3, window_bounds = array<i64: 32, 128>}]} {
    %c0_i32 = arith.constant 0 : i32
    %0 = arith.cmpi eq, %arg2, %c0_i32 : i32
    %1 = arith.extui %0 : i1 to i32
    %c0_i32_0 = arith.constant 0 : i32
    %2 = arith.cmpi ne, %1, %c0_i32_0 : i32
    scf.if %2 {
      %cst_9 = arith.constant 0.000000e+00 : f32
      %12 = vector.broadcast %cst_9 : f32 to vector<32x128xf32>
      %c0_10 = arith.constant 0 : index
      %c0_11 = arith.constant 0 : index
      %13 = vector.load %arg7[%c0_10, %c0_11] : memref<32x128xf32, #tpu.memory_space<vmem>>, vector<32x128xf32>
      tpu.vector_store %arg7[%c0_10, %c0_11], %12 {strides = array<i32>} : memref<32x128xf32, #tpu.memory_space<vmem>>, vector<32x128xf32>,
    } else {
    }
    %c0 = arith.constant 0 : index
    %c0_1 = arith.constant 0 : index
    %3 = vector.load %arg7[%c0, %c0_1] : memref<32x128xf32, #tpu.memory_space<vmem>>, vector<32x128xf32>
    %c0_2 = arith.constant 0 : index
    %c0_3 = arith.constant 0 : index
    %4 = vector.load %arg3[%c0_2, %c0_3] : memref<32x128xbf16, #tpu.memory_space<vmem>>, vector<32x128xbf16>
    %c0_4 = arith.constant 0 : index
    %c0_5 = arith.constant 0 : index
    %5 = vector.load %arg4[%c0_4, %c0_5] : memref<128x128xbf16, #tpu.memory_space<vmem>>, vector<128x128xbf16>
    %cst = arith.constant dense<0.000000e+00> : vector<32x128xf32>
    %6 = tpu.matmul %4, %5, %cst {dimension_numbers = #tpu.dot_dimension_numbers<[1], [0], [0], [1], [0, 0, 1, 1], [], []>} : vector<32x128xbf16>, vector<128x128xbf16>, vector<32x128xf32> -> vector<32x128xf32>
    %7 = arith.addf %3, %6 : vector<32x128xf32>
    %c0_6 = arith.constant 0 : index
    %c0_7 = arith.constant 0 : index
    %8 = vector.load %arg7[%c0_6, %c0_7] : memref<32x128xf32, #tpu.memory_space<vmem>>, vector<32x128xf32>
    tpu.vector_store %arg7[%c0_6, %c0_7], %7 {strides = array<i32>} : memref<32x128xf32, #tpu.memory_space<vmem>>, vector<32x128xf32>,
    %c4_i32 = arith.constant 4 : i32
    %9 = arith.cmpi eq, %arg2, %c4_i32 : i32
    %10 = arith.extui %9 : i1 to i32
    %c0_i32_8 = arith.constant 0 : i32
    %11 = arith.cmpi ne, %10, %c0_i32_8 : i32
    scf.if %11 {
      %c0_9 = arith.constant 0 : index
      %c0_10 = arith.constant 0 : index
      %12 = vector.load %arg7[%c0_9, %c0_10] : memref<32x128xf32, #tpu.memory_space<vmem>>, vector<32x128xf32>
      %c0_11 = arith.constant 0 : index
      %c0_12 = arith.constant 0 : index
      %13 = vector.load %arg5[%c0_11, %c0_12] : memref<1x128xf32, #tpu.memory_space<vmem>>, vector<1x128xf32>
      %14 = vector.broadcast %13 : vector<1x128xf32> to vector<32x128xf32>
      %15 = arith.addf %12, %14 : vector<32x128xf32>
      %cst_13 = arith.constant 0.000000e+00 : f32
      %16 = vector.broadcast %cst_13 : f32 to vector<32x128xf32>
      %17 = arith.maximumf %15, %16 : vector<32x128xf32>
      %18 = arith.truncf %17 : vector<32x128xf32> to vector<32x128xbf16>
      %c0_14 = arith.constant 0 : index
      %c0_15 = arith.constant 0 : index
      %19 = vector.load %arg6[%c0_14, %c0_15] : memref<32x128xbf16, #tpu.memory_space<vmem>>, vector<32x128xbf16>
      tpu.vector_store %arg6[%c0_14, %c0_15], %18 {strides = array<i32>} : memref<32x128xbf16, #tpu.memory_space<vmem>>, vector<32x128xbf16>,
    } else {
    }
    return
  }
  func.func @transform_0(%arg0: i32, %arg1: i32, %arg2: i32) -> (i32, i32) {
    %c0_i32 = arith.constant 0 : i32
    return %arg0, %arg2 : i32, i32
  }
  func.func @transform_1(%arg0: i32, %arg1: i32, %arg2: i32) -> (i32, i32) {
    %c0_i32 = arith.constant 0 : i32
    return %arg2, %arg1 : i32, i32
  }
  func.func @transform_2(%arg0: i32, %arg1: i32, %arg2: i32) -> (i32, i32) {
    %c0_i32 = arith.constant 0 : i32
    %c0_i32_0 = arith.constant 0 : i32
    return %c0_i32, %arg1 : i32, i32
  }
  func.func @transform_3(%arg0: i32, %arg1: i32, %arg2: i32) -> (i32, i32) {
    %c0_i32 = arith.constant 0 : i32
    return %arg0, %arg1 : i32, i32
  }
}

module attributes {stable_mosaic.version = 11 : i64} {
  func.func @_mm_bn_kernel(%arg0: i32, %arg1: i32, %arg2: i32, %arg3: memref<32x128xbf16, #tpu.memory_space<vmem>>, %arg4: memref<128x256xbf16, #tpu.memory_space<vmem>>, %arg5: memref<1x256xf32, #tpu.memory_space<vmem>>, %arg6: memref<32x256xbf16, #tpu.memory_space<vmem>>, %arg7: memref<32x256xf32, #tpu.memory_space<vmem>>) attributes {dimension_semantics = [#tpu.dimension_semantics<parallel>, #tpu.dimension_semantics<parallel>, #tpu.dimension_semantics<arbitrary>], iteration_bounds = array<i64: 1, 1, 1>, scalar_prefetch = 0 : i64, scratch_operands = 1 : i64, tpu.core_type = #tpu.core_type<tc>, window_params = [{transform_indices = @transform_0, window_bounds = array<i64: 32, 128>}, {transform_indices = @transform_1, window_bounds = array<i64: 128, 256>}, {transform_indices = @transform_2, window_bounds = array<i64: 1, 256>}, {transform_indices = @transform_3, window_bounds = array<i64: 32, 256>}]} {
    %c0_i32 = arith.constant 0 : i32
    %0 = arith.cmpi eq, %arg2, %c0_i32 : i32
    %1 = arith.extui %0 : i1 to i32
    %c0_i32_0 = arith.constant 0 : i32
    %2 = arith.cmpi ne, %1, %c0_i32_0 : i32
    scf.if %2 {
      %cst_10 = arith.constant 0.000000e+00 : f32
      %12 = vector.broadcast %cst_10 : f32 to vector<32x256xf32>
      %c0_11 = arith.constant 0 : index
      %c0_12 = arith.constant 0 : index
      %13 = vector.load %arg7[%c0_11, %c0_12] : memref<32x256xf32, #tpu.memory_space<vmem>>, vector<32x256xf32>
      tpu.vector_store %arg7[%c0_11, %c0_12], %12 {strides = array<i32>} : memref<32x256xf32, #tpu.memory_space<vmem>>, vector<32x256xf32>,
    } else {
    }
    %c0 = arith.constant 0 : index
    %c0_1 = arith.constant 0 : index
    %3 = vector.load %arg7[%c0, %c0_1] : memref<32x256xf32, #tpu.memory_space<vmem>>, vector<32x256xf32>
    %c0_2 = arith.constant 0 : index
    %c0_3 = arith.constant 0 : index
    %4 = vector.load %arg3[%c0_2, %c0_3] : memref<32x128xbf16, #tpu.memory_space<vmem>>, vector<32x128xbf16>
    %c0_4 = arith.constant 0 : index
    %c0_5 = arith.constant 0 : index
    %5 = vector.load %arg4[%c0_4, %c0_5] : memref<128x256xbf16, #tpu.memory_space<vmem>>, vector<128x256xbf16>
    %cst = arith.constant dense<0.000000e+00> : vector<32x256xf32>
    %6 = tpu.matmul %4, %5, %cst {dimension_numbers = #tpu.dot_dimension_numbers<[1], [0], [0], [1], [0, 0, 1, 1], [], []>} : vector<32x128xbf16>, vector<128x256xbf16>, vector<32x256xf32> -> vector<32x256xf32>
    %7 = arith.addf %3, %6 : vector<32x256xf32>
    %c0_6 = arith.constant 0 : index
    %c0_7 = arith.constant 0 : index
    %8 = vector.load %arg7[%c0_6, %c0_7] : memref<32x256xf32, #tpu.memory_space<vmem>>, vector<32x256xf32>
    tpu.vector_store %arg7[%c0_6, %c0_7], %7 {strides = array<i32>} : memref<32x256xf32, #tpu.memory_space<vmem>>, vector<32x256xf32>,
    %c0_i32_8 = arith.constant 0 : i32
    %9 = arith.cmpi eq, %arg2, %c0_i32_8 : i32
    %10 = arith.extui %9 : i1 to i32
    %c0_i32_9 = arith.constant 0 : i32
    %11 = arith.cmpi ne, %10, %c0_i32_9 : i32
    scf.if %11 {
      %c0_10 = arith.constant 0 : index
      %c0_11 = arith.constant 0 : index
      %12 = vector.load %arg7[%c0_10, %c0_11] : memref<32x256xf32, #tpu.memory_space<vmem>>, vector<32x256xf32>
      %c0_12 = arith.constant 0 : index
      %c0_13 = arith.constant 0 : index
      %13 = vector.load %arg5[%c0_12, %c0_13] : memref<1x256xf32, #tpu.memory_space<vmem>>, vector<1x256xf32>
      %14 = vector.broadcast %13 : vector<1x256xf32> to vector<32x256xf32>
      %15 = arith.addf %12, %14 : vector<32x256xf32>
      %16 = arith.truncf %15 : vector<32x256xf32> to vector<32x256xbf16>
      %c0_14 = arith.constant 0 : index
      %c0_15 = arith.constant 0 : index
      %17 = vector.load %arg6[%c0_14, %c0_15] : memref<32x256xbf16, #tpu.memory_space<vmem>>, vector<32x256xbf16>
      tpu.vector_store %arg6[%c0_14, %c0_15], %16 {strides = array<i32>} : memref<32x256xbf16, #tpu.memory_space<vmem>>, vector<32x256xbf16>,
    } else {
    }
    return
  }
  func.func @transform_0(%arg0: i32, %arg1: i32, %arg2: i32) -> (i32, i32) {
    %c0_i32 = arith.constant 0 : i32
    return %arg0, %arg2 : i32, i32
  }
  func.func @transform_1(%arg0: i32, %arg1: i32, %arg2: i32) -> (i32, i32) {
    %c0_i32 = arith.constant 0 : i32
    return %arg2, %arg1 : i32, i32
  }
  func.func @transform_2(%arg0: i32, %arg1: i32, %arg2: i32) -> (i32, i32) {
    %c0_i32 = arith.constant 0 : i32
    %c0_i32_0 = arith.constant 0 : i32
    return %c0_i32, %arg1 : i32, i32
  }
  func.func @transform_3(%arg0: i32, %arg1: i32, %arg2: i32) -> (i32, i32) {
    %c0_i32 = arith.constant 0 : i32
    return %arg0, %arg1 : i32, i32
  }
}

module attributes {stable_mosaic.version = 11 : i64} {
  func.func @_mm_bn_res_kernel(%arg0: i32, %arg1: i32, %arg2: i32, %arg3: memref<32x128xbf16, #tpu.memory_space<vmem>>, %arg4: memref<128x256xbf16, #tpu.memory_space<vmem>>, %arg5: memref<1x256xf32, #tpu.memory_space<vmem>>, %arg6: memref<32x256xbf16, #tpu.memory_space<vmem>>, %arg7: memref<32x256xbf16, #tpu.memory_space<vmem>>, %arg8: memref<32x256xf32, #tpu.memory_space<vmem>>) attributes {dimension_semantics = [#tpu.dimension_semantics<parallel>, #tpu.dimension_semantics<parallel>, #tpu.dimension_semantics<arbitrary>], iteration_bounds = array<i64: 1, 1, 1>, scalar_prefetch = 0 : i64, scratch_operands = 1 : i64, tpu.core_type = #tpu.core_type<tc>, window_params = [{transform_indices = @transform_0, window_bounds = array<i64: 32, 128>}, {transform_indices = @transform_1, window_bounds = array<i64: 128, 256>}, {transform_indices = @transform_2, window_bounds = array<i64: 1, 256>}, {transform_indices = @transform_3, window_bounds = array<i64: 32, 256>}, {transform_indices = @transform_4, window_bounds = array<i64: 32, 256>}]} {
    %c0_i32 = arith.constant 0 : i32
    %0 = arith.cmpi eq, %arg2, %c0_i32 : i32
    %1 = arith.extui %0 : i1 to i32
    %c0_i32_0 = arith.constant 0 : i32
    %2 = arith.cmpi ne, %1, %c0_i32_0 : i32
    scf.if %2 {
      %cst_10 = arith.constant 0.000000e+00 : f32
      %12 = vector.broadcast %cst_10 : f32 to vector<32x256xf32>
      %c0_11 = arith.constant 0 : index
      %c0_12 = arith.constant 0 : index
      %13 = vector.load %arg8[%c0_11, %c0_12] : memref<32x256xf32, #tpu.memory_space<vmem>>, vector<32x256xf32>
      tpu.vector_store %arg8[%c0_11, %c0_12], %12 {strides = array<i32>} : memref<32x256xf32, #tpu.memory_space<vmem>>, vector<32x256xf32>,
    } else {
    }
    %c0 = arith.constant 0 : index
    %c0_1 = arith.constant 0 : index
    %3 = vector.load %arg8[%c0, %c0_1] : memref<32x256xf32, #tpu.memory_space<vmem>>, vector<32x256xf32>
    %c0_2 = arith.constant 0 : index
    %c0_3 = arith.constant 0 : index
    %4 = vector.load %arg3[%c0_2, %c0_3] : memref<32x128xbf16, #tpu.memory_space<vmem>>, vector<32x128xbf16>
    %c0_4 = arith.constant 0 : index
    %c0_5 = arith.constant 0 : index
    %5 = vector.load %arg4[%c0_4, %c0_5] : memref<128x256xbf16, #tpu.memory_space<vmem>>, vector<128x256xbf16>
    %cst = arith.constant dense<0.000000e+00> : vector<32x256xf32>
    %6 = tpu.matmul %4, %5, %cst {dimension_numbers = #tpu.dot_dimension_numbers<[1], [0], [0], [1], [0, 0, 1, 1], [], []>} : vector<32x128xbf16>, vector<128x256xbf16>, vector<32x256xf32> -> vector<32x256xf32>
    %7 = arith.addf %3, %6 : vector<32x256xf32>
    %c0_6 = arith.constant 0 : index
    %c0_7 = arith.constant 0 : index
    %8 = vector.load %arg8[%c0_6, %c0_7] : memref<32x256xf32, #tpu.memory_space<vmem>>, vector<32x256xf32>
    tpu.vector_store %arg8[%c0_6, %c0_7], %7 {strides = array<i32>} : memref<32x256xf32, #tpu.memory_space<vmem>>, vector<32x256xf32>,
    %c0_i32_8 = arith.constant 0 : i32
    %9 = arith.cmpi eq, %arg2, %c0_i32_8 : i32
    %10 = arith.extui %9 : i1 to i32
    %c0_i32_9 = arith.constant 0 : i32
    %11 = arith.cmpi ne, %10, %c0_i32_9 : i32
    scf.if %11 {
      %c0_10 = arith.constant 0 : index
      %c0_11 = arith.constant 0 : index
      %12 = vector.load %arg8[%c0_10, %c0_11] : memref<32x256xf32, #tpu.memory_space<vmem>>, vector<32x256xf32>
      %c0_12 = arith.constant 0 : index
      %c0_13 = arith.constant 0 : index
      %13 = vector.load %arg5[%c0_12, %c0_13] : memref<1x256xf32, #tpu.memory_space<vmem>>, vector<1x256xf32>
      %14 = vector.broadcast %13 : vector<1x256xf32> to vector<32x256xf32>
      %15 = arith.addf %12, %14 : vector<32x256xf32>
      %c0_14 = arith.constant 0 : index
      %c0_15 = arith.constant 0 : index
      %16 = vector.load %arg6[%c0_14, %c0_15] : memref<32x256xbf16, #tpu.memory_space<vmem>>, vector<32x256xbf16>
      %17 = arith.extf %16 : vector<32x256xbf16> to vector<32x256xf32>
      %18 = arith.addf %15, %17 : vector<32x256xf32>
      %cst_16 = arith.constant 0.000000e+00 : f32
      %19 = vector.broadcast %cst_16 : f32 to vector<32x256xf32>
      %20 = arith.maximumf %18, %19 : vector<32x256xf32>
      %21 = arith.truncf %20 : vector<32x256xf32> to vector<32x256xbf16>
      %c0_17 = arith.constant 0 : index
      %c0_18 = arith.constant 0 : index
      %22 = vector.load %arg7[%c0_17, %c0_18] : memref<32x256xbf16, #tpu.memory_space<vmem>>, vector<32x256xbf16>
      tpu.vector_store %arg7[%c0_17, %c0_18], %21 {strides = array<i32>} : memref<32x256xbf16, #tpu.memory_space<vmem>>, vector<32x256xbf16>,
    } else {
    }
    return
  }
  func.func @transform_0(%arg0: i32, %arg1: i32, %arg2: i32) -> (i32, i32) {
    %c0_i32 = arith.constant 0 : i32
    return %arg0, %arg2 : i32, i32
  }
  func.func @transform_1(%arg0: i32, %arg1: i32, %arg2: i32) -> (i32, i32) {
    %c0_i32 = arith.constant 0 : i32
    return %arg2, %arg1 : i32, i32
  }
  func.func @transform_2(%arg0: i32, %arg1: i32, %arg2: i32) -> (i32, i32) {
    %c0_i32 = arith.constant 0 : i32
    %c0_i32_0 = arith.constant 0 : i32
    return %c0_i32, %arg1 : i32, i32
  }
  func.func @transform_3(%arg0: i32, %arg1: i32, %arg2: i32) -> (i32, i32) {
    %c0_i32 = arith.constant 0 : i32
    return %arg0, %arg1 : i32, i32
  }
  func.func @transform_4(%arg0: i32, %arg1: i32, %arg2: i32) -> (i32, i32) {
    %c0_i32 = arith.constant 0 : i32
    return %arg0, %arg1 : i32, i32
  }
}

module attributes {stable_mosaic.version = 11 : i64} {
  func.func @_mm_bn_kernel(%arg0: i32, %arg1: i32, %arg2: i32, %arg3: memref<32x256xbf16, #tpu.memory_space<vmem>>, %arg4: memref<256x128xbf16, #tpu.memory_space<vmem>>, %arg5: memref<1x128xf32, #tpu.memory_space<vmem>>, %arg6: memref<32x128xbf16, #tpu.memory_space<vmem>>, %arg7: memref<32x128xf32, #tpu.memory_space<vmem>>) attributes {dimension_semantics = [#tpu.dimension_semantics<parallel>, #tpu.dimension_semantics<parallel>, #tpu.dimension_semantics<arbitrary>], iteration_bounds = array<i64: 1, 1, 1>, scalar_prefetch = 0 : i64, scratch_operands = 1 : i64, tpu.core_type = #tpu.core_type<tc>, window_params = [{transform_indices = @transform_0, window_bounds = array<i64: 32, 256>}, {transform_indices = @transform_1, window_bounds = array<i64: 256, 128>}, {transform_indices = @transform_2, window_bounds = array<i64: 1, 128>}, {transform_indices = @transform_3, window_bounds = array<i64: 32, 128>}]} {
    %c0_i32 = arith.constant 0 : i32
    %0 = arith.cmpi eq, %arg2, %c0_i32 : i32
    %1 = arith.extui %0 : i1 to i32
    %c0_i32_0 = arith.constant 0 : i32
    %2 = arith.cmpi ne, %1, %c0_i32_0 : i32
    scf.if %2 {
      %cst_10 = arith.constant 0.000000e+00 : f32
      %12 = vector.broadcast %cst_10 : f32 to vector<32x128xf32>
      %c0_11 = arith.constant 0 : index
      %c0_12 = arith.constant 0 : index
      %13 = vector.load %arg7[%c0_11, %c0_12] : memref<32x128xf32, #tpu.memory_space<vmem>>, vector<32x128xf32>
      tpu.vector_store %arg7[%c0_11, %c0_12], %12 {strides = array<i32>} : memref<32x128xf32, #tpu.memory_space<vmem>>, vector<32x128xf32>,
    } else {
    }
    %c0 = arith.constant 0 : index
    %c0_1 = arith.constant 0 : index
    %3 = vector.load %arg7[%c0, %c0_1] : memref<32x128xf32, #tpu.memory_space<vmem>>, vector<32x128xf32>
    %c0_2 = arith.constant 0 : index
    %c0_3 = arith.constant 0 : index
    %4 = vector.load %arg3[%c0_2, %c0_3] : memref<32x256xbf16, #tpu.memory_space<vmem>>, vector<32x256xbf16>
    %c0_4 = arith.constant 0 : index
    %c0_5 = arith.constant 0 : index
    %5 = vector.load %arg4[%c0_4, %c0_5] : memref<256x128xbf16, #tpu.memory_space<vmem>>, vector<256x128xbf16>
    %cst = arith.constant dense<0.000000e+00> : vector<32x128xf32>
    %6 = tpu.matmul %4, %5, %cst {dimension_numbers = #tpu.dot_dimension_numbers<[1], [0], [0], [1], [0, 0, 1, 1], [], []>} : vector<32x256xbf16>, vector<256x128xbf16>, vector<32x128xf32> -> vector<32x128xf32>
    %7 = arith.addf %3, %6 : vector<32x128xf32>
    %c0_6 = arith.constant 0 : index
    %c0_7 = arith.constant 0 : index
    %8 = vector.load %arg7[%c0_6, %c0_7] : memref<32x128xf32, #tpu.memory_space<vmem>>, vector<32x128xf32>
    tpu.vector_store %arg7[%c0_6, %c0_7], %7 {strides = array<i32>} : memref<32x128xf32, #tpu.memory_space<vmem>>, vector<32x128xf32>,
    %c0_i32_8 = arith.constant 0 : i32
    %9 = arith.cmpi eq, %arg2, %c0_i32_8 : i32
    %10 = arith.extui %9 : i1 to i32
    %c0_i32_9 = arith.constant 0 : i32
    %11 = arith.cmpi ne, %10, %c0_i32_9 : i32
    scf.if %11 {
      %c0_10 = arith.constant 0 : index
      %c0_11 = arith.constant 0 : index
      %12 = vector.load %arg7[%c0_10, %c0_11] : memref<32x128xf32, #tpu.memory_space<vmem>>, vector<32x128xf32>
      %c0_12 = arith.constant 0 : index
      %c0_13 = arith.constant 0 : index
      %13 = vector.load %arg5[%c0_12, %c0_13] : memref<1x128xf32, #tpu.memory_space<vmem>>, vector<1x128xf32>
      %14 = vector.broadcast %13 : vector<1x128xf32> to vector<32x128xf32>
      %15 = arith.addf %12, %14 : vector<32x128xf32>
      %cst_14 = arith.constant 0.000000e+00 : f32
      %16 = vector.broadcast %cst_14 : f32 to vector<32x128xf32>
      %17 = arith.maximumf %15, %16 : vector<32x128xf32>
      %18 = arith.truncf %17 : vector<32x128xf32> to vector<32x128xbf16>
      %c0_15 = arith.constant 0 : index
      %c0_16 = arith.constant 0 : index
      %19 = vector.load %arg6[%c0_15, %c0_16] : memref<32x128xbf16, #tpu.memory_space<vmem>>, vector<32x128xbf16>
      tpu.vector_store %arg6[%c0_15, %c0_16], %18 {strides = array<i32>} : memref<32x128xbf16, #tpu.memory_space<vmem>>, vector<32x128xbf16>,
    } else {
    }
    return
  }
  func.func @transform_0(%arg0: i32, %arg1: i32, %arg2: i32) -> (i32, i32) {
    %c0_i32 = arith.constant 0 : i32
    return %arg0, %arg2 : i32, i32
  }
  func.func @transform_1(%arg0: i32, %arg1: i32, %arg2: i32) -> (i32, i32) {
    %c0_i32 = arith.constant 0 : i32
    return %arg2, %arg1 : i32, i32
  }
  func.func @transform_2(%arg0: i32, %arg1: i32, %arg2: i32) -> (i32, i32) {
    %c0_i32 = arith.constant 0 : i32
    %c0_i32_0 = arith.constant 0 : i32
    return %c0_i32, %arg1 : i32, i32
  }
  func.func @transform_3(%arg0: i32, %arg1: i32, %arg2: i32) -> (i32, i32) {
    %c0_i32 = arith.constant 0 : i32
    return %arg0, %arg1 : i32, i32
  }
}

module attributes {stable_mosaic.version = 11 : i64} {
  func.func @_mm_bn_kernel(%arg0: i32, %arg1: i32, %arg2: i32, %arg3: memref<16x384xbf16, #tpu.memory_space<vmem>>, %arg4: memref<384x128xbf16, #tpu.memory_space<vmem>>, %arg5: memref<1x128xf32, #tpu.memory_space<vmem>>, %arg6: memref<16x128xbf16, #tpu.memory_space<vmem>>, %arg7: memref<16x128xf32, #tpu.memory_space<vmem>>) attributes {dimension_semantics = [#tpu.dimension_semantics<parallel>, #tpu.dimension_semantics<parallel>, #tpu.dimension_semantics<arbitrary>], iteration_bounds = array<i64: 1, 1, 3>, scalar_prefetch = 0 : i64, scratch_operands = 1 : i64, tpu.core_type = #tpu.core_type<tc>, window_params = [{transform_indices = @transform_0, window_bounds = array<i64: 16, 384>}, {transform_indices = @transform_1, window_bounds = array<i64: 384, 128>}, {transform_indices = @transform_2, window_bounds = array<i64: 1, 128>}, {transform_indices = @transform_3, window_bounds = array<i64: 16, 128>}]} {
    %c0_i32 = arith.constant 0 : i32
    %0 = arith.cmpi eq, %arg2, %c0_i32 : i32
    %1 = arith.extui %0 : i1 to i32
    %c0_i32_0 = arith.constant 0 : i32
    %2 = arith.cmpi ne, %1, %c0_i32_0 : i32
    scf.if %2 {
      %cst_9 = arith.constant 0.000000e+00 : f32
      %12 = vector.broadcast %cst_9 : f32 to vector<16x128xf32>
      %c0_10 = arith.constant 0 : index
      %c0_11 = arith.constant 0 : index
      %13 = vector.load %arg7[%c0_10, %c0_11] : memref<16x128xf32, #tpu.memory_space<vmem>>, vector<16x128xf32>
      tpu.vector_store %arg7[%c0_10, %c0_11], %12 {strides = array<i32>} : memref<16x128xf32, #tpu.memory_space<vmem>>, vector<16x128xf32>,
    } else {
    }
    %c0 = arith.constant 0 : index
    %c0_1 = arith.constant 0 : index
    %3 = vector.load %arg7[%c0, %c0_1] : memref<16x128xf32, #tpu.memory_space<vmem>>, vector<16x128xf32>
    %c0_2 = arith.constant 0 : index
    %c0_3 = arith.constant 0 : index
    %4 = vector.load %arg3[%c0_2, %c0_3] : memref<16x384xbf16, #tpu.memory_space<vmem>>, vector<16x384xbf16>
    %c0_4 = arith.constant 0 : index
    %c0_5 = arith.constant 0 : index
    %5 = vector.load %arg4[%c0_4, %c0_5] : memref<384x128xbf16, #tpu.memory_space<vmem>>, vector<384x128xbf16>
    %cst = arith.constant dense<0.000000e+00> : vector<16x128xf32>
    %6 = tpu.matmul %4, %5, %cst {dimension_numbers = #tpu.dot_dimension_numbers<[1], [0], [0], [1], [0, 0, 1, 1], [], []>} : vector<16x384xbf16>, vector<384x128xbf16>, vector<16x128xf32> -> vector<16x128xf32>
    %7 = arith.addf %3, %6 : vector<16x128xf32>
    %c0_6 = arith.constant 0 : index
    %c0_7 = arith.constant 0 : index
    %8 = vector.load %arg7[%c0_6, %c0_7] : memref<16x128xf32, #tpu.memory_space<vmem>>, vector<16x128xf32>
    tpu.vector_store %arg7[%c0_6, %c0_7], %7 {strides = array<i32>} : memref<16x128xf32, #tpu.memory_space<vmem>>, vector<16x128xf32>,
    %c2_i32 = arith.constant 2 : i32
    %9 = arith.cmpi eq, %arg2, %c2_i32 : i32
    %10 = arith.extui %9 : i1 to i32
    %c0_i32_8 = arith.constant 0 : i32
    %11 = arith.cmpi ne, %10, %c0_i32_8 : i32
    scf.if %11 {
      %c0_9 = arith.constant 0 : index
      %c0_10 = arith.constant 0 : index
      %12 = vector.load %arg7[%c0_9, %c0_10] : memref<16x128xf32, #tpu.memory_space<vmem>>, vector<16x128xf32>
      %c0_11 = arith.constant 0 : index
      %c0_12 = arith.constant 0 : index
      %13 = vector.load %arg5[%c0_11, %c0_12] : memref<1x128xf32, #tpu.memory_space<vmem>>, vector<1x128xf32>
      %14 = vector.broadcast %13 : vector<1x128xf32> to vector<16x128xf32>
      %15 = arith.addf %12, %14 : vector<16x128xf32>
      %cst_13 = arith.constant 0.000000e+00 : f32
      %16 = vector.broadcast %cst_13 : f32 to vector<16x128xf32>
      %17 = arith.maximumf %15, %16 : vector<16x128xf32>
      %18 = arith.truncf %17 : vector<16x128xf32> to vector<16x128xbf16>
      %c0_14 = arith.constant 0 : index
      %c0_15 = arith.constant 0 : index
      %19 = vector.load %arg6[%c0_14, %c0_15] : memref<16x128xbf16, #tpu.memory_space<vmem>>, vector<16x128xbf16>
      tpu.vector_store %arg6[%c0_14, %c0_15], %18 {strides = array<i32>} : memref<16x128xbf16, #tpu.memory_space<vmem>>, vector<16x128xbf16>,
    } else {
    }
    return
  }
  func.func @transform_0(%arg0: i32, %arg1: i32, %arg2: i32) -> (i32, i32) {
    %c0_i32 = arith.constant 0 : i32
    return %arg0, %arg2 : i32, i32
  }
  func.func @transform_1(%arg0: i32, %arg1: i32, %arg2: i32) -> (i32, i32) {
    %c0_i32 = arith.constant 0 : i32
    return %arg2, %arg1 : i32, i32
  }
  func.func @transform_2(%arg0: i32, %arg1: i32, %arg2: i32) -> (i32, i32) {
    %c0_i32 = arith.constant 0 : i32
    %c0_i32_0 = arith.constant 0 : i32
    return %c0_i32, %arg1 : i32, i32
  }
  func.func @transform_3(%arg0: i32, %arg1: i32, %arg2: i32) -> (i32, i32) {
    %c0_i32 = arith.constant 0 : i32
    return %arg0, %arg1 : i32, i32
  }
}

module attributes {stable_mosaic.version = 11 : i64} {
  func.func @_mm_bn_kernel(%arg0: i32, %arg1: i32, %arg2: i32, %arg3: memref<16x256xbf16, #tpu.memory_space<vmem>>, %arg4: memref<256x256xbf16, #tpu.memory_space<vmem>>, %arg5: memref<1x256xf32, #tpu.memory_space<vmem>>, %arg6: memref<16x256xbf16, #tpu.memory_space<vmem>>, %arg7: memref<16x256xf32, #tpu.memory_space<vmem>>) attributes {dimension_semantics = [#tpu.dimension_semantics<parallel>, #tpu.dimension_semantics<parallel>, #tpu.dimension_semantics<arbitrary>], iteration_bounds = array<i64: 1, 2, 1>, scalar_prefetch = 0 : i64, scratch_operands = 1 : i64, tpu.core_type = #tpu.core_type<tc>, window_params = [{transform_indices = @transform_0, window_bounds = array<i64: 16, 256>}, {transform_indices = @transform_1, window_bounds = array<i64: 256, 256>}, {transform_indices = @transform_2, window_bounds = array<i64: 1, 256>}, {transform_indices = @transform_3, window_bounds = array<i64: 16, 256>}]} {
    %c0_i32 = arith.constant 0 : i32
    %0 = arith.cmpi eq, %arg2, %c0_i32 : i32
    %1 = arith.extui %0 : i1 to i32
    %c0_i32_0 = arith.constant 0 : i32
    %2 = arith.cmpi ne, %1, %c0_i32_0 : i32
    scf.if %2 {
      %cst_10 = arith.constant 0.000000e+00 : f32
      %12 = vector.broadcast %cst_10 : f32 to vector<16x256xf32>
      %c0_11 = arith.constant 0 : index
      %c0_12 = arith.constant 0 : index
      %13 = vector.load %arg7[%c0_11, %c0_12] : memref<16x256xf32, #tpu.memory_space<vmem>>, vector<16x256xf32>
      tpu.vector_store %arg7[%c0_11, %c0_12], %12 {strides = array<i32>} : memref<16x256xf32, #tpu.memory_space<vmem>>, vector<16x256xf32>,
    } else {
    }
    %c0 = arith.constant 0 : index
    %c0_1 = arith.constant 0 : index
    %3 = vector.load %arg7[%c0, %c0_1] : memref<16x256xf32, #tpu.memory_space<vmem>>, vector<16x256xf32>
    %c0_2 = arith.constant 0 : index
    %c0_3 = arith.constant 0 : index
    %4 = vector.load %arg3[%c0_2, %c0_3] : memref<16x256xbf16, #tpu.memory_space<vmem>>, vector<16x256xbf16>
    %c0_4 = arith.constant 0 : index
    %c0_5 = arith.constant 0 : index
    %5 = vector.load %arg4[%c0_4, %c0_5] : memref<256x256xbf16, #tpu.memory_space<vmem>>, vector<256x256xbf16>
    %cst = arith.constant dense<0.000000e+00> : vector<16x256xf32>
    %6 = tpu.matmul %4, %5, %cst {dimension_numbers = #tpu.dot_dimension_numbers<[1], [0], [0], [1], [0, 0, 1, 1], [], []>} : vector<16x256xbf16>, vector<256x256xbf16>, vector<16x256xf32> -> vector<16x256xf32>
    %7 = arith.addf %3, %6 : vector<16x256xf32>
    %c0_6 = arith.constant 0 : index
    %c0_7 = arith.constant 0 : index
    %8 = vector.load %arg7[%c0_6, %c0_7] : memref<16x256xf32, #tpu.memory_space<vmem>>, vector<16x256xf32>
    tpu.vector_store %arg7[%c0_6, %c0_7], %7 {strides = array<i32>} : memref<16x256xf32, #tpu.memory_space<vmem>>, vector<16x256xf32>,
    %c0_i32_8 = arith.constant 0 : i32
    %9 = arith.cmpi eq, %arg2, %c0_i32_8 : i32
    %10 = arith.extui %9 : i1 to i32
    %c0_i32_9 = arith.constant 0 : i32
    %11 = arith.cmpi ne, %10, %c0_i32_9 : i32
    scf.if %11 {
      %c0_10 = arith.constant 0 : index
      %c0_11 = arith.constant 0 : index
      %12 = vector.load %arg7[%c0_10, %c0_11] : memref<16x256xf32, #tpu.memory_space<vmem>>, vector<16x256xf32>
      %c0_12 = arith.constant 0 : index
      %c0_13 = arith.constant 0 : index
      %13 = vector.load %arg5[%c0_12, %c0_13] : memref<1x256xf32, #tpu.memory_space<vmem>>, vector<1x256xf32>
      %14 = vector.broadcast %13 : vector<1x256xf32> to vector<16x256xf32>
      %15 = arith.addf %12, %14 : vector<16x256xf32>
      %16 = arith.truncf %15 : vector<16x256xf32> to vector<16x256xbf16>
      %c0_14 = arith.constant 0 : index
      %c0_15 = arith.constant 0 : index
      %17 = vector.load %arg6[%c0_14, %c0_15] : memref<16x256xbf16, #tpu.memory_space<vmem>>, vector<16x256xbf16>
      tpu.vector_store %arg6[%c0_14, %c0_15], %16 {strides = array<i32>} : memref<16x256xbf16, #tpu.memory_space<vmem>>, vector<16x256xbf16>,
    } else {
    }
    return
  }
  func.func @transform_0(%arg0: i32, %arg1: i32, %arg2: i32) -> (i32, i32) {
    %c0_i32 = arith.constant 0 : i32
    return %arg0, %arg2 : i32, i32
  }
  func.func @transform_1(%arg0: i32, %arg1: i32, %arg2: i32) -> (i32, i32) {
    %c0_i32 = arith.constant 0 : i32
    return %arg2, %arg1 : i32, i32
  }
  func.func @transform_2(%arg0: i32, %arg1: i32, %arg2: i32) -> (i32, i32) {
    %c0_i32 = arith.constant 0 : i32
    %c0_i32_0 = arith.constant 0 : i32
    return %c0_i32, %arg1 : i32, i32
  }
  func.func @transform_3(%arg0: i32, %arg1: i32, %arg2: i32) -> (i32, i32) {
    %c0_i32 = arith.constant 0 : i32
    return %arg0, %arg1 : i32, i32
  }
}

module attributes {stable_mosaic.version = 11 : i64} {
  func.func @_mm_bn_res_kernel(%arg0: i32, %arg1: i32, %arg2: i32, %arg3: memref<16x128xbf16, #tpu.memory_space<vmem>>, %arg4: memref<128x256xbf16, #tpu.memory_space<vmem>>, %arg5: memref<1x256xf32, #tpu.memory_space<vmem>>, %arg6: memref<16x256xbf16, #tpu.memory_space<vmem>>, %arg7: memref<16x256xbf16, #tpu.memory_space<vmem>>, %arg8: memref<16x256xf32, #tpu.memory_space<vmem>>) attributes {dimension_semantics = [#tpu.dimension_semantics<parallel>, #tpu.dimension_semantics<parallel>, #tpu.dimension_semantics<arbitrary>], iteration_bounds = array<i64: 1, 2, 1>, scalar_prefetch = 0 : i64, scratch_operands = 1 : i64, tpu.core_type = #tpu.core_type<tc>, window_params = [{transform_indices = @transform_0, window_bounds = array<i64: 16, 128>}, {transform_indices = @transform_1, window_bounds = array<i64: 128, 256>}, {transform_indices = @transform_2, window_bounds = array<i64: 1, 256>}, {transform_indices = @transform_3, window_bounds = array<i64: 16, 256>}, {transform_indices = @transform_4, window_bounds = array<i64: 16, 256>}]} {
    %c0_i32 = arith.constant 0 : i32
    %0 = arith.cmpi eq, %arg2, %c0_i32 : i32
    %1 = arith.extui %0 : i1 to i32
    %c0_i32_0 = arith.constant 0 : i32
    %2 = arith.cmpi ne, %1, %c0_i32_0 : i32
    scf.if %2 {
      %cst_10 = arith.constant 0.000000e+00 : f32
      %12 = vector.broadcast %cst_10 : f32 to vector<16x256xf32>
      %c0_11 = arith.constant 0 : index
      %c0_12 = arith.constant 0 : index
      %13 = vector.load %arg8[%c0_11, %c0_12] : memref<16x256xf32, #tpu.memory_space<vmem>>, vector<16x256xf32>
      tpu.vector_store %arg8[%c0_11, %c0_12], %12 {strides = array<i32>} : memref<16x256xf32, #tpu.memory_space<vmem>>, vector<16x256xf32>,
    } else {
    }
    %c0 = arith.constant 0 : index
    %c0_1 = arith.constant 0 : index
    %3 = vector.load %arg8[%c0, %c0_1] : memref<16x256xf32, #tpu.memory_space<vmem>>, vector<16x256xf32>
    %c0_2 = arith.constant 0 : index
    %c0_3 = arith.constant 0 : index
    %4 = vector.load %arg3[%c0_2, %c0_3] : memref<16x128xbf16, #tpu.memory_space<vmem>>, vector<16x128xbf16>
    %c0_4 = arith.constant 0 : index
    %c0_5 = arith.constant 0 : index
    %5 = vector.load %arg4[%c0_4, %c0_5] : memref<128x256xbf16, #tpu.memory_space<vmem>>, vector<128x256xbf16>
    %cst = arith.constant dense<0.000000e+00> : vector<16x256xf32>
    %6 = tpu.matmul %4, %5, %cst {dimension_numbers = #tpu.dot_dimension_numbers<[1], [0], [0], [1], [0, 0, 1, 1], [], []>} : vector<16x128xbf16>, vector<128x256xbf16>, vector<16x256xf32> -> vector<16x256xf32>
    %7 = arith.addf %3, %6 : vector<16x256xf32>
    %c0_6 = arith.constant 0 : index
    %c0_7 = arith.constant 0 : index
    %8 = vector.load %arg8[%c0_6, %c0_7] : memref<16x256xf32, #tpu.memory_space<vmem>>, vector<16x256xf32>
    tpu.vector_store %arg8[%c0_6, %c0_7], %7 {strides = array<i32>} : memref<16x256xf32, #tpu.memory_space<vmem>>, vector<16x256xf32>,
    %c0_i32_8 = arith.constant 0 : i32
    %9 = arith.cmpi eq, %arg2, %c0_i32_8 : i32
    %10 = arith.extui %9 : i1 to i32
    %c0_i32_9 = arith.constant 0 : i32
    %11 = arith.cmpi ne, %10, %c0_i32_9 : i32
    scf.if %11 {
      %c0_10 = arith.constant 0 : index
      %c0_11 = arith.constant 0 : index
      %12 = vector.load %arg8[%c0_10, %c0_11] : memref<16x256xf32, #tpu.memory_space<vmem>>, vector<16x256xf32>
      %c0_12 = arith.constant 0 : index
      %c0_13 = arith.constant 0 : index
      %13 = vector.load %arg5[%c0_12, %c0_13] : memref<1x256xf32, #tpu.memory_space<vmem>>, vector<1x256xf32>
      %14 = vector.broadcast %13 : vector<1x256xf32> to vector<16x256xf32>
      %15 = arith.addf %12, %14 : vector<16x256xf32>
      %c0_14 = arith.constant 0 : index
      %c0_15 = arith.constant 0 : index
      %16 = vector.load %arg6[%c0_14, %c0_15] : memref<16x256xbf16, #tpu.memory_space<vmem>>, vector<16x256xbf16>
      %17 = arith.extf %16 : vector<16x256xbf16> to vector<16x256xf32>
      %18 = arith.addf %15, %17 : vector<16x256xf32>
      %cst_16 = arith.constant 0.000000e+00 : f32
      %19 = vector.broadcast %cst_16 : f32 to vector<16x256xf32>
      %20 = arith.maximumf %18, %19 : vector<16x256xf32>
      %21 = arith.truncf %20 : vector<16x256xf32> to vector<16x256xbf16>
      %c0_17 = arith.constant 0 : index
      %c0_18 = arith.constant 0 : index
      %22 = vector.load %arg7[%c0_17, %c0_18] : memref<16x256xbf16, #tpu.memory_space<vmem>>, vector<16x256xbf16>
      tpu.vector_store %arg7[%c0_17, %c0_18], %21 {strides = array<i32>} : memref<16x256xbf16, #tpu.memory_space<vmem>>, vector<16x256xbf16>,
    } else {
    }
    return
  }
  func.func @transform_0(%arg0: i32, %arg1: i32, %arg2: i32) -> (i32, i32) {
    %c0_i32 = arith.constant 0 : i32
    return %arg0, %arg2 : i32, i32
  }
  func.func @transform_1(%arg0: i32, %arg1: i32, %arg2: i32) -> (i32, i32) {
    %c0_i32 = arith.constant 0 : i32
    return %arg2, %arg1 : i32, i32
  }
  func.func @transform_2(%arg0: i32, %arg1: i32, %arg2: i32) -> (i32, i32) {
    %c0_i32 = arith.constant 0 : i32
    %c0_i32_0 = arith.constant 0 : i32
    return %c0_i32, %arg1 : i32, i32
  }
  func.func @transform_3(%arg0: i32, %arg1: i32, %arg2: i32) -> (i32, i32) {
    %c0_i32 = arith.constant 0 : i32
    return %arg0, %arg1 : i32, i32
  }
  func.func @transform_4(%arg0: i32, %arg1: i32, %arg2: i32) -> (i32, i32) {
    %c0_i32 = arith.constant 0 : i32
    return %arg0, %arg1 : i32, i32
  }
}

module attributes {stable_mosaic.version = 11 : i64} {
  func.func @_mm_bn_kernel(%arg0: i32, %arg1: i32, %arg2: i32, %arg3: memref<16x512xbf16, #tpu.memory_space<vmem>>, %arg4: memref<512x128xbf16, #tpu.memory_space<vmem>>, %arg5: memref<1x128xf32, #tpu.memory_space<vmem>>, %arg6: memref<16x128xbf16, #tpu.memory_space<vmem>>, %arg7: memref<16x128xf32, #tpu.memory_space<vmem>>) attributes {dimension_semantics = [#tpu.dimension_semantics<parallel>, #tpu.dimension_semantics<parallel>, #tpu.dimension_semantics<arbitrary>], iteration_bounds = array<i64: 1, 1, 1>, scalar_prefetch = 0 : i64, scratch_operands = 1 : i64, tpu.core_type = #tpu.core_type<tc>, window_params = [{transform_indices = @transform_0, window_bounds = array<i64: 16, 512>}, {transform_indices = @transform_1, window_bounds = array<i64: 512, 128>}, {transform_indices = @transform_2, window_bounds = array<i64: 1, 128>}, {transform_indices = @transform_3, window_bounds = array<i64: 16, 128>}]} {
    %c0_i32 = arith.constant 0 : i32
    %0 = arith.cmpi eq, %arg2, %c0_i32 : i32
    %1 = arith.extui %0 : i1 to i32
    %c0_i32_0 = arith.constant 0 : i32
    %2 = arith.cmpi ne, %1, %c0_i32_0 : i32
    scf.if %2 {
      %cst_10 = arith.constant 0.000000e+00 : f32
      %12 = vector.broadcast %cst_10 : f32 to vector<16x128xf32>
      %c0_11 = arith.constant 0 : index
      %c0_12 = arith.constant 0 : index
      %13 = vector.load %arg7[%c0_11, %c0_12] : memref<16x128xf32, #tpu.memory_space<vmem>>, vector<16x128xf32>
      tpu.vector_store %arg7[%c0_11, %c0_12], %12 {strides = array<i32>} : memref<16x128xf32, #tpu.memory_space<vmem>>, vector<16x128xf32>,
    } else {
    }
    %c0 = arith.constant 0 : index
    %c0_1 = arith.constant 0 : index
    %3 = vector.load %arg7[%c0, %c0_1] : memref<16x128xf32, #tpu.memory_space<vmem>>, vector<16x128xf32>
    %c0_2 = arith.constant 0 : index
    %c0_3 = arith.constant 0 : index
    %4 = vector.load %arg3[%c0_2, %c0_3] : memref<16x512xbf16, #tpu.memory_space<vmem>>, vector<16x512xbf16>
    %c0_4 = arith.constant 0 : index
    %c0_5 = arith.constant 0 : index
    %5 = vector.load %arg4[%c0_4, %c0_5] : memref<512x128xbf16, #tpu.memory_space<vmem>>, vector<512x128xbf16>
    %cst = arith.constant dense<0.000000e+00> : vector<16x128xf32>
    %6 = tpu.matmul %4, %5, %cst {dimension_numbers = #tpu.dot_dimension_numbers<[1], [0], [0], [1], [0, 0, 1, 1], [], []>} : vector<16x512xbf16>, vector<512x128xbf16>, vector<16x128xf32> -> vector<16x128xf32>
    %7 = arith.addf %3, %6 : vector<16x128xf32>
    %c0_6 = arith.constant 0 : index
    %c0_7 = arith.constant 0 : index
    %8 = vector.load %arg7[%c0_6, %c0_7] : memref<16x128xf32, #tpu.memory_space<vmem>>, vector<16x128xf32>
    tpu.vector_store %arg7[%c0_6, %c0_7], %7 {strides = array<i32>} : memref<16x128xf32, #tpu.memory_space<vmem>>, vector<16x128xf32>,
    %c0_i32_8 = arith.constant 0 : i32
    %9 = arith.cmpi eq, %arg2, %c0_i32_8 : i32
    %10 = arith.extui %9 : i1 to i32
    %c0_i32_9 = arith.constant 0 : i32
    %11 = arith.cmpi ne, %10, %c0_i32_9 : i32
    scf.if %11 {
      %c0_10 = arith.constant 0 : index
      %c0_11 = arith.constant 0 : index
      %12 = vector.load %arg7[%c0_10, %c0_11] : memref<16x128xf32, #tpu.memory_space<vmem>>, vector<16x128xf32>
      %c0_12 = arith.constant 0 : index
      %c0_13 = arith.constant 0 : index
      %13 = vector.load %arg5[%c0_12, %c0_13] : memref<1x128xf32, #tpu.memory_space<vmem>>, vector<1x128xf32>
      %14 = vector.broadcast %13 : vector<1x128xf32> to vector<16x128xf32>
      %15 = arith.addf %12, %14 : vector<16x128xf32>
      %cst_14 = arith.constant 0.000000e+00 : f32
      %16 = vector.broadcast %cst_14 : f32 to vector<16x128xf32>
      %17 = arith.maximumf %15, %16 : vector<16x128xf32>
      %18 = arith.truncf %17 : vector<16x128xf32> to vector<16x128xbf16>
      %c0_15 = arith.constant 0 : index
      %c0_16 = arith.constant 0 : index
      %19 = vector.load %arg6[%c0_15, %c0_16] : memref<16x128xbf16, #tpu.memory_space<vmem>>, vector<16x128xbf16>
      tpu.vector_store %arg6[%c0_15, %c0_16], %18 {strides = array<i32>} : memref<16x128xbf16, #tpu.memory_space<vmem>>, vector<16x128xbf16>,
    } else {
    }
    return
  }
  func.func @transform_0(%arg0: i32, %arg1: i32, %arg2: i32) -> (i32, i32) {
    %c0_i32 = arith.constant 0 : i32
    return %arg0, %arg2 : i32, i32
  }
  func.func @transform_1(%arg0: i32, %arg1: i32, %arg2: i32) -> (i32, i32) {
    %c0_i32 = arith.constant 0 : i32
    return %arg2, %arg1 : i32, i32
  }
  func.func @transform_2(%arg0: i32, %arg1: i32, %arg2: i32) -> (i32, i32) {
    %c0_i32 = arith.constant 0 : i32
    %c0_i32_0 = arith.constant 0 : i32
    return %c0_i32, %arg1 : i32, i32
  }
  func.func @transform_3(%arg0: i32, %arg1: i32, %arg2: i32) -> (i32, i32) {
    %c0_i32 = arith.constant 0 : i32
    return %arg0, %arg1 : i32, i32
  }
}

module attributes {stable_mosaic.version = 11 : i64} {
  func.func @_mm_bn_kernel(%arg0: i32, %arg1: i32, %arg2: i32, %arg3: memref<16x512xbf16, #tpu.memory_space<vmem>>, %arg4: memref<512x256xbf16, #tpu.memory_space<vmem>>, %arg5: memref<1x256xf32, #tpu.memory_space<vmem>>, %arg6: memref<16x256xbf16, #tpu.memory_space<vmem>>, %arg7: memref<16x256xf32, #tpu.memory_space<vmem>>) attributes {dimension_semantics = [#tpu.dimension_semantics<parallel>, #tpu.dimension_semantics<parallel>, #tpu.dimension_semantics<arbitrary>], iteration_bounds = array<i64: 1, 1, 1>, scalar_prefetch = 0 : i64, scratch_operands = 1 : i64, tpu.core_type = #tpu.core_type<tc>, window_params = [{transform_indices = @transform_0, window_bounds = array<i64: 16, 512>}, {transform_indices = @transform_1, window_bounds = array<i64: 512, 256>}, {transform_indices = @transform_2, window_bounds = array<i64: 1, 256>}, {transform_indices = @transform_3, window_bounds = array<i64: 16, 256>}]} {
    %c0_i32 = arith.constant 0 : i32
    %0 = arith.cmpi eq, %arg2, %c0_i32 : i32
    %1 = arith.extui %0 : i1 to i32
    %c0_i32_0 = arith.constant 0 : i32
    %2 = arith.cmpi ne, %1, %c0_i32_0 : i32
    scf.if %2 {
      %cst_10 = arith.constant 0.000000e+00 : f32
      %12 = vector.broadcast %cst_10 : f32 to vector<16x256xf32>
      %c0_11 = arith.constant 0 : index
      %c0_12 = arith.constant 0 : index
      %13 = vector.load %arg7[%c0_11, %c0_12] : memref<16x256xf32, #tpu.memory_space<vmem>>, vector<16x256xf32>
      tpu.vector_store %arg7[%c0_11, %c0_12], %12 {strides = array<i32>} : memref<16x256xf32, #tpu.memory_space<vmem>>, vector<16x256xf32>,
    } else {
    }
    %c0 = arith.constant 0 : index
    %c0_1 = arith.constant 0 : index
    %3 = vector.load %arg7[%c0, %c0_1] : memref<16x256xf32, #tpu.memory_space<vmem>>, vector<16x256xf32>
    %c0_2 = arith.constant 0 : index
    %c0_3 = arith.constant 0 : index
    %4 = vector.load %arg3[%c0_2, %c0_3] : memref<16x512xbf16, #tpu.memory_space<vmem>>, vector<16x512xbf16>
    %c0_4 = arith.constant 0 : index
    %c0_5 = arith.constant 0 : index
    %5 = vector.load %arg4[%c0_4, %c0_5] : memref<512x256xbf16, #tpu.memory_space<vmem>>, vector<512x256xbf16>
    %cst = arith.constant dense<0.000000e+00> : vector<16x256xf32>
    %6 = tpu.matmul %4, %5, %cst {dimension_numbers = #tpu.dot_dimension_numbers<[1], [0], [0], [1], [0, 0, 1, 1], [], []>} : vector<16x512xbf16>, vector<512x256xbf16>, vector<16x256xf32> -> vector<16x256xf32>
    %7 = arith.addf %3, %6 : vector<16x256xf32>
    %c0_6 = arith.constant 0 : index
    %c0_7 = arith.constant 0 : index
    %8 = vector.load %arg7[%c0_6, %c0_7] : memref<16x256xf32, #tpu.memory_space<vmem>>, vector<16x256xf32>
    tpu.vector_store %arg7[%c0_6, %c0_7], %7 {strides = array<i32>} : memref<16x256xf32, #tpu.memory_space<vmem>>, vector<16x256xf32>,
    %c0_i32_8 = arith.constant 0 : i32
    %9 = arith.cmpi eq, %arg2, %c0_i32_8 : i32
    %10 = arith.extui %9 : i1 to i32
    %c0_i32_9 = arith.constant 0 : i32
    %11 = arith.cmpi ne, %10, %c0_i32_9 : i32
    scf.if %11 {
      %c0_10 = arith.constant 0 : index
      %c0_11 = arith.constant 0 : index
      %12 = vector.load %arg7[%c0_10, %c0_11] : memref<16x256xf32, #tpu.memory_space<vmem>>, vector<16x256xf32>
      %c0_12 = arith.constant 0 : index
      %c0_13 = arith.constant 0 : index
      %13 = vector.load %arg5[%c0_12, %c0_13] : memref<1x256xf32, #tpu.memory_space<vmem>>, vector<1x256xf32>
      %14 = vector.broadcast %13 : vector<1x256xf32> to vector<16x256xf32>
      %15 = arith.addf %12, %14 : vector<16x256xf32>
      %cst_14 = arith.constant 0.000000e+00 : f32
      %16 = vector.broadcast %cst_14 : f32 to vector<16x256xf32>
      %17 = arith.maximumf %15, %16 : vector<16x256xf32>
      %18 = arith.truncf %17 : vector<16x256xf32> to vector<16x256xbf16>
      %c0_15 = arith.constant 0 : index
      %c0_16 = arith.constant 0 : index
      %19 = vector.load %arg6[%c0_15, %c0_16] : memref<16x256xbf16, #tpu.memory_space<vmem>>, vector<16x256xbf16>
      tpu.vector_store %arg6[%c0_15, %c0_16], %18 {strides = array<i32>} : memref<16x256xbf16, #tpu.memory_space<vmem>>, vector<16x256xbf16>,
    } else {
    }
    return
  }
  func.func @transform_0(%arg0: i32, %arg1: i32, %arg2: i32) -> (i32, i32) {
    %c0_i32 = arith.constant 0 : i32
    return %arg0, %arg2 : i32, i32
  }
  func.func @transform_1(%arg0: i32, %arg1: i32, %arg2: i32) -> (i32, i32) {
    %c0_i32 = arith.constant 0 : i32
    return %arg2, %arg1 : i32, i32
  }
  func.func @transform_2(%arg0: i32, %arg1: i32, %arg2: i32) -> (i32, i32) {
    %c0_i32 = arith.constant 0 : i32
    %c0_i32_0 = arith.constant 0 : i32
    return %c0_i32, %arg1 : i32, i32
  }
  func.func @transform_3(%arg0: i32, %arg1: i32, %arg2: i32) -> (i32, i32) {
    %c0_i32 = arith.constant 0 : i32
    return %arg0, %arg1 : i32, i32
  }
}

module attributes {stable_mosaic.version = 11 : i64} {
  func.func @_mm_bn_kernel(%arg0: i32, %arg1: i32, %arg2: i32, %arg3: memref<16x384xbf16, #tpu.memory_space<vmem>>, %arg4: memref<384x256xbf16, #tpu.memory_space<vmem>>, %arg5: memref<1x256xf32, #tpu.memory_space<vmem>>, %arg6: memref<16x256xbf16, #tpu.memory_space<vmem>>, %arg7: memref<16x256xf32, #tpu.memory_space<vmem>>) attributes {dimension_semantics = [#tpu.dimension_semantics<parallel>, #tpu.dimension_semantics<parallel>, #tpu.dimension_semantics<arbitrary>], iteration_bounds = array<i64: 1, 1, 6>, scalar_prefetch = 0 : i64, scratch_operands = 1 : i64, tpu.core_type = #tpu.core_type<tc>, window_params = [{transform_indices = @transform_0, window_bounds = array<i64: 16, 384>}, {transform_indices = @transform_1, window_bounds = array<i64: 384, 256>}, {transform_indices = @transform_2, window_bounds = array<i64: 1, 256>}, {transform_indices = @transform_3, window_bounds = array<i64: 16, 256>}]} {
    %c0_i32 = arith.constant 0 : i32
    %0 = arith.cmpi eq, %arg2, %c0_i32 : i32
    %1 = arith.extui %0 : i1 to i32
    %c0_i32_0 = arith.constant 0 : i32
    %2 = arith.cmpi ne, %1, %c0_i32_0 : i32
    scf.if %2 {
      %cst_9 = arith.constant 0.000000e+00 : f32
      %12 = vector.broadcast %cst_9 : f32 to vector<16x256xf32>
      %c0_10 = arith.constant 0 : index
      %c0_11 = arith.constant 0 : index
      %13 = vector.load %arg7[%c0_10, %c0_11] : memref<16x256xf32, #tpu.memory_space<vmem>>, vector<16x256xf32>
      tpu.vector_store %arg7[%c0_10, %c0_11], %12 {strides = array<i32>} : memref<16x256xf32, #tpu.memory_space<vmem>>, vector<16x256xf32>,
    } else {
    }
    %c0 = arith.constant 0 : index
    %c0_1 = arith.constant 0 : index
    %3 = vector.load %arg7[%c0, %c0_1] : memref<16x256xf32, #tpu.memory_space<vmem>>, vector<16x256xf32>
    %c0_2 = arith.constant 0 : index
    %c0_3 = arith.constant 0 : index
    %4 = vector.load %arg3[%c0_2, %c0_3] : memref<16x384xbf16, #tpu.memory_space<vmem>>, vector<16x384xbf16>
    %c0_4 = arith.constant 0 : index
    %c0_5 = arith.constant 0 : index
    %5 = vector.load %arg4[%c0_4, %c0_5] : memref<384x256xbf16, #tpu.memory_space<vmem>>, vector<384x256xbf16>
    %cst = arith.constant dense<0.000000e+00> : vector<16x256xf32>
    %6 = tpu.matmul %4, %5, %cst {dimension_numbers = #tpu.dot_dimension_numbers<[1], [0], [0], [1], [0, 0, 1, 1], [], []>} : vector<16x384xbf16>, vector<384x256xbf16>, vector<16x256xf32> -> vector<16x256xf32>
    %7 = arith.addf %3, %6 : vector<16x256xf32>
    %c0_6 = arith.constant 0 : index
    %c0_7 = arith.constant 0 : index
    %8 = vector.load %arg7[%c0_6, %c0_7] : memref<16x256xf32, #tpu.memory_space<vmem>>, vector<16x256xf32>
    tpu.vector_store %arg7[%c0_6, %c0_7], %7 {strides = array<i32>} : memref<16x256xf32, #tpu.memory_space<vmem>>, vector<16x256xf32>,
    %c5_i32 = arith.constant 5 : i32
    %9 = arith.cmpi eq, %arg2, %c5_i32 : i32
    %10 = arith.extui %9 : i1 to i32
    %c0_i32_8 = arith.constant 0 : i32
    %11 = arith.cmpi ne, %10, %c0_i32_8 : i32
    scf.if %11 {
      %c0_9 = arith.constant 0 : index
      %c0_10 = arith.constant 0 : index
      %12 = vector.load %arg7[%c0_9, %c0_10] : memref<16x256xf32, #tpu.memory_space<vmem>>, vector<16x256xf32>
      %c0_11 = arith.constant 0 : index
      %c0_12 = arith.constant 0 : index
      %13 = vector.load %arg5[%c0_11, %c0_12] : memref<1x256xf32, #tpu.memory_space<vmem>>, vector<1x256xf32>
      %14 = vector.broadcast %13 : vector<1x256xf32> to vector<16x256xf32>
      %15 = arith.addf %12, %14 : vector<16x256xf32>
      %cst_13 = arith.constant 0.000000e+00 : f32
      %16 = vector.broadcast %cst_13 : f32 to vector<16x256xf32>
      %17 = arith.maximumf %15, %16 : vector<16x256xf32>
      %18 = arith.truncf %17 : vector<16x256xf32> to vector<16x256xbf16>
      %c0_14 = arith.constant 0 : index
      %c0_15 = arith.constant 0 : index
      %19 = vector.load %arg6[%c0_14, %c0_15] : memref<16x256xbf16, #tpu.memory_space<vmem>>, vector<16x256xbf16>
      tpu.vector_store %arg6[%c0_14, %c0_15], %18 {strides = array<i32>} : memref<16x256xbf16, #tpu.memory_space<vmem>>, vector<16x256xbf16>,
    } else {
    }
    return
  }
  func.func @transform_0(%arg0: i32, %arg1: i32, %arg2: i32) -> (i32, i32) {
    %c0_i32 = arith.constant 0 : i32
    return %arg0, %arg2 : i32, i32
  }
  func.func @transform_1(%arg0: i32, %arg1: i32, %arg2: i32) -> (i32, i32) {
    %c0_i32 = arith.constant 0 : i32
    return %arg2, %arg1 : i32, i32
  }
  func.func @transform_2(%arg0: i32, %arg1: i32, %arg2: i32) -> (i32, i32) {
    %c0_i32 = arith.constant 0 : i32
    %c0_i32_0 = arith.constant 0 : i32
    return %c0_i32, %arg1 : i32, i32
  }
  func.func @transform_3(%arg0: i32, %arg1: i32, %arg2: i32) -> (i32, i32) {
    %c0_i32 = arith.constant 0 : i32
    return %arg0, %arg1 : i32, i32
  }
}

module attributes {stable_mosaic.version = 11 : i64} {
  func.func @_mm_bn_kernel(%arg0: i32, %arg1: i32, %arg2: i32, %arg3: memref<16x512xbf16, #tpu.memory_space<vmem>>, %arg4: memref<512x256xbf16, #tpu.memory_space<vmem>>, %arg5: memref<1x256xf32, #tpu.memory_space<vmem>>, %arg6: memref<16x256xbf16, #tpu.memory_space<vmem>>, %arg7: memref<16x256xf32, #tpu.memory_space<vmem>>) attributes {dimension_semantics = [#tpu.dimension_semantics<parallel>, #tpu.dimension_semantics<parallel>, #tpu.dimension_semantics<arbitrary>], iteration_bounds = array<i64: 1, 4, 1>, scalar_prefetch = 0 : i64, scratch_operands = 1 : i64, tpu.core_type = #tpu.core_type<tc>, window_params = [{transform_indices = @transform_0, window_bounds = array<i64: 16, 512>}, {transform_indices = @transform_1, window_bounds = array<i64: 512, 256>}, {transform_indices = @transform_2, window_bounds = array<i64: 1, 256>}, {transform_indices = @transform_3, window_bounds = array<i64: 16, 256>}]} {
    %c0_i32 = arith.constant 0 : i32
    %0 = arith.cmpi eq, %arg2, %c0_i32 : i32
    %1 = arith.extui %0 : i1 to i32
    %c0_i32_0 = arith.constant 0 : i32
    %2 = arith.cmpi ne, %1, %c0_i32_0 : i32
    scf.if %2 {
      %cst_10 = arith.constant 0.000000e+00 : f32
      %12 = vector.broadcast %cst_10 : f32 to vector<16x256xf32>
      %c0_11 = arith.constant 0 : index
      %c0_12 = arith.constant 0 : index
      %13 = vector.load %arg7[%c0_11, %c0_12] : memref<16x256xf32, #tpu.memory_space<vmem>>, vector<16x256xf32>
      tpu.vector_store %arg7[%c0_11, %c0_12], %12 {strides = array<i32>} : memref<16x256xf32, #tpu.memory_space<vmem>>, vector<16x256xf32>,
    } else {
    }
    %c0 = arith.constant 0 : index
    %c0_1 = arith.constant 0 : index
    %3 = vector.load %arg7[%c0, %c0_1] : memref<16x256xf32, #tpu.memory_space<vmem>>, vector<16x256xf32>
    %c0_2 = arith.constant 0 : index
    %c0_3 = arith.constant 0 : index
    %4 = vector.load %arg3[%c0_2, %c0_3] : memref<16x512xbf16, #tpu.memory_space<vmem>>, vector<16x512xbf16>
    %c0_4 = arith.constant 0 : index
    %c0_5 = arith.constant 0 : index
    %5 = vector.load %arg4[%c0_4, %c0_5] : memref<512x256xbf16, #tpu.memory_space<vmem>>, vector<512x256xbf16>
    %cst = arith.constant dense<0.000000e+00> : vector<16x256xf32>
    %6 = tpu.matmul %4, %5, %cst {dimension_numbers = #tpu.dot_dimension_numbers<[1], [0], [0], [1], [0, 0, 1, 1], [], []>} : vector<16x512xbf16>, vector<512x256xbf16>, vector<16x256xf32> -> vector<16x256xf32>
    %7 = arith.addf %3, %6 : vector<16x256xf32>
    %c0_6 = arith.constant 0 : index
    %c0_7 = arith.constant 0 : index
    %8 = vector.load %arg7[%c0_6, %c0_7] : memref<16x256xf32, #tpu.memory_space<vmem>>, vector<16x256xf32>
    tpu.vector_store %arg7[%c0_6, %c0_7], %7 {strides = array<i32>} : memref<16x256xf32, #tpu.memory_space<vmem>>, vector<16x256xf32>,
    %c0_i32_8 = arith.constant 0 : i32
    %9 = arith.cmpi eq, %arg2, %c0_i32_8 : i32
    %10 = arith.extui %9 : i1 to i32
    %c0_i32_9 = arith.constant 0 : i32
    %11 = arith.cmpi ne, %10, %c0_i32_9 : i32
    scf.if %11 {
      %c0_10 = arith.constant 0 : index
      %c0_11 = arith.constant 0 : index
      %12 = vector.load %arg7[%c0_10, %c0_11] : memref<16x256xf32, #tpu.memory_space<vmem>>, vector<16x256xf32>
      %c0_12 = arith.constant 0 : index
      %c0_13 = arith.constant 0 : index
      %13 = vector.load %arg5[%c0_12, %c0_13] : memref<1x256xf32, #tpu.memory_space<vmem>>, vector<1x256xf32>
      %14 = vector.broadcast %13 : vector<1x256xf32> to vector<16x256xf32>
      %15 = arith.addf %12, %14 : vector<16x256xf32>
      %16 = arith.truncf %15 : vector<16x256xf32> to vector<16x256xbf16>
      %c0_14 = arith.constant 0 : index
      %c0_15 = arith.constant 0 : index
      %17 = vector.load %arg6[%c0_14, %c0_15] : memref<16x256xbf16, #tpu.memory_space<vmem>>, vector<16x256xbf16>
      tpu.vector_store %arg6[%c0_14, %c0_15], %16 {strides = array<i32>} : memref<16x256xbf16, #tpu.memory_space<vmem>>, vector<16x256xbf16>,
    } else {
    }
    return
  }
  func.func @transform_0(%arg0: i32, %arg1: i32, %arg2: i32) -> (i32, i32) {
    %c0_i32 = arith.constant 0 : i32
    return %arg0, %arg2 : i32, i32
  }
  func.func @transform_1(%arg0: i32, %arg1: i32, %arg2: i32) -> (i32, i32) {
    %c0_i32 = arith.constant 0 : i32
    return %arg2, %arg1 : i32, i32
  }
  func.func @transform_2(%arg0: i32, %arg1: i32, %arg2: i32) -> (i32, i32) {
    %c0_i32 = arith.constant 0 : i32
    %c0_i32_0 = arith.constant 0 : i32
    return %c0_i32, %arg1 : i32, i32
  }
  func.func @transform_3(%arg0: i32, %arg1: i32, %arg2: i32) -> (i32, i32) {
    %c0_i32 = arith.constant 0 : i32
    return %arg0, %arg1 : i32, i32
  }
}

module attributes {stable_mosaic.version = 11 : i64} {
  func.func @_mm_bn_res_kernel(%arg0: i32, %arg1: i32, %arg2: i32, %arg3: memref<16x256xbf16, #tpu.memory_space<vmem>>, %arg4: memref<256x256xbf16, #tpu.memory_space<vmem>>, %arg5: memref<1x256xf32, #tpu.memory_space<vmem>>, %arg6: memref<16x256xbf16, #tpu.memory_space<vmem>>, %arg7: memref<16x256xbf16, #tpu.memory_space<vmem>>, %arg8: memref<16x256xf32, #tpu.memory_space<vmem>>) attributes {dimension_semantics = [#tpu.dimension_semantics<parallel>, #tpu.dimension_semantics<parallel>, #tpu.dimension_semantics<arbitrary>], iteration_bounds = array<i64: 1, 4, 1>, scalar_prefetch = 0 : i64, scratch_operands = 1 : i64, tpu.core_type = #tpu.core_type<tc>, window_params = [{transform_indices = @transform_0, window_bounds = array<i64: 16, 256>}, {transform_indices = @transform_1, window_bounds = array<i64: 256, 256>}, {transform_indices = @transform_2, window_bounds = array<i64: 1, 256>}, {transform_indices = @transform_3, window_bounds = array<i64: 16, 256>}, {transform_indices = @transform_4, window_bounds = array<i64: 16, 256>}]} {
    %c0_i32 = arith.constant 0 : i32
    %0 = arith.cmpi eq, %arg2, %c0_i32 : i32
    %1 = arith.extui %0 : i1 to i32
    %c0_i32_0 = arith.constant 0 : i32
    %2 = arith.cmpi ne, %1, %c0_i32_0 : i32
    scf.if %2 {
      %cst_10 = arith.constant 0.000000e+00 : f32
      %12 = vector.broadcast %cst_10 : f32 to vector<16x256xf32>
      %c0_11 = arith.constant 0 : index
      %c0_12 = arith.constant 0 : index
      %13 = vector.load %arg8[%c0_11, %c0_12] : memref<16x256xf32, #tpu.memory_space<vmem>>, vector<16x256xf32>
      tpu.vector_store %arg8[%c0_11, %c0_12], %12 {strides = array<i32>} : memref<16x256xf32, #tpu.memory_space<vmem>>, vector<16x256xf32>,
    } else {
    }
    %c0 = arith.constant 0 : index
    %c0_1 = arith.constant 0 : index
    %3 = vector.load %arg8[%c0, %c0_1] : memref<16x256xf32, #tpu.memory_space<vmem>>, vector<16x256xf32>
    %c0_2 = arith.constant 0 : index
    %c0_3 = arith.constant 0 : index
    %4 = vector.load %arg3[%c0_2, %c0_3] : memref<16x256xbf16, #tpu.memory_space<vmem>>, vector<16x256xbf16>
    %c0_4 = arith.constant 0 : index
    %c0_5 = arith.constant 0 : index
    %5 = vector.load %arg4[%c0_4, %c0_5] : memref<256x256xbf16, #tpu.memory_space<vmem>>, vector<256x256xbf16>
    %cst = arith.constant dense<0.000000e+00> : vector<16x256xf32>
    %6 = tpu.matmul %4, %5, %cst {dimension_numbers = #tpu.dot_dimension_numbers<[1], [0], [0], [1], [0, 0, 1, 1], [], []>} : vector<16x256xbf16>, vector<256x256xbf16>, vector<16x256xf32> -> vector<16x256xf32>
    %7 = arith.addf %3, %6 : vector<16x256xf32>
    %c0_6 = arith.constant 0 : index
    %c0_7 = arith.constant 0 : index
    %8 = vector.load %arg8[%c0_6, %c0_7] : memref<16x256xf32, #tpu.memory_space<vmem>>, vector<16x256xf32>
    tpu.vector_store %arg8[%c0_6, %c0_7], %7 {strides = array<i32>} : memref<16x256xf32, #tpu.memory_space<vmem>>, vector<16x256xf32>,
    %c0_i32_8 = arith.constant 0 : i32
    %9 = arith.cmpi eq, %arg2, %c0_i32_8 : i32
    %10 = arith.extui %9 : i1 to i32
    %c0_i32_9 = arith.constant 0 : i32
    %11 = arith.cmpi ne, %10, %c0_i32_9 : i32
    scf.if %11 {
      %c0_10 = arith.constant 0 : index
      %c0_11 = arith.constant 0 : index
      %12 = vector.load %arg8[%c0_10, %c0_11] : memref<16x256xf32, #tpu.memory_space<vmem>>, vector<16x256xf32>
      %c0_12 = arith.constant 0 : index
      %c0_13 = arith.constant 0 : index
      %13 = vector.load %arg5[%c0_12, %c0_13] : memref<1x256xf32, #tpu.memory_space<vmem>>, vector<1x256xf32>
      %14 = vector.broadcast %13 : vector<1x256xf32> to vector<16x256xf32>
      %15 = arith.addf %12, %14 : vector<16x256xf32>
      %c0_14 = arith.constant 0 : index
      %c0_15 = arith.constant 0 : index
      %16 = vector.load %arg6[%c0_14, %c0_15] : memref<16x256xbf16, #tpu.memory_space<vmem>>, vector<16x256xbf16>
      %17 = arith.extf %16 : vector<16x256xbf16> to vector<16x256xf32>
      %18 = arith.addf %15, %17 : vector<16x256xf32>
      %cst_16 = arith.constant 0.000000e+00 : f32
      %19 = vector.broadcast %cst_16 : f32 to vector<16x256xf32>
      %20 = arith.maximumf %18, %19 : vector<16x256xf32>
      %21 = arith.truncf %20 : vector<16x256xf32> to vector<16x256xbf16>
      %c0_17 = arith.constant 0 : index
      %c0_18 = arith.constant 0 : index
      %22 = vector.load %arg7[%c0_17, %c0_18] : memref<16x256xbf16, #tpu.memory_space<vmem>>, vector<16x256xbf16>
      tpu.vector_store %arg7[%c0_17, %c0_18], %21 {strides = array<i32>} : memref<16x256xbf16, #tpu.memory_space<vmem>>, vector<16x256xbf16>,
    } else {
    }
    return
  }
  func.func @transform_0(%arg0: i32, %arg1: i32, %arg2: i32) -> (i32, i32) {
    %c0_i32 = arith.constant 0 : i32
    return %arg0, %arg2 : i32, i32
  }
  func.func @transform_1(%arg0: i32, %arg1: i32, %arg2: i32) -> (i32, i32) {
    %c0_i32 = arith.constant 0 : i32
    return %arg2, %arg1 : i32, i32
  }
  func.func @transform_2(%arg0: i32, %arg1: i32, %arg2: i32) -> (i32, i32) {
    %c0_i32 = arith.constant 0 : i32
    %c0_i32_0 = arith.constant 0 : i32
    return %c0_i32, %arg1 : i32, i32
  }
  func.func @transform_3(%arg0: i32, %arg1: i32, %arg2: i32) -> (i32, i32) {
    %c0_i32 = arith.constant 0 : i32
    return %arg0, %arg1 : i32, i32
  }
  func.func @transform_4(%arg0: i32, %arg1: i32, %arg2: i32) -> (i32, i32) {
    %c0_i32 = arith.constant 0 : i32
    return %arg0, %arg1 : i32, i32
  }
}

module attributes {stable_mosaic.version = 11 : i64} {
  func.func @_mm_bn_kernel(%arg0: i32, %arg1: i32, %arg2: i32, %arg3: memref<16x512xbf16, #tpu.memory_space<vmem>>, %arg4: memref<512x256xbf16, #tpu.memory_space<vmem>>, %arg5: memref<1x256xf32, #tpu.memory_space<vmem>>, %arg6: memref<16x256xbf16, #tpu.memory_space<vmem>>, %arg7: memref<16x256xf32, #tpu.memory_space<vmem>>) attributes {dimension_semantics = [#tpu.dimension_semantics<parallel>, #tpu.dimension_semantics<parallel>, #tpu.dimension_semantics<arbitrary>], iteration_bounds = array<i64: 1, 1, 2>, scalar_prefetch = 0 : i64, scratch_operands = 1 : i64, tpu.core_type = #tpu.core_type<tc>, window_params = [{transform_indices = @transform_0, window_bounds = array<i64: 16, 512>}, {transform_indices = @transform_1, window_bounds = array<i64: 512, 256>}, {transform_indices = @transform_2, window_bounds = array<i64: 1, 256>}, {transform_indices = @transform_3, window_bounds = array<i64: 16, 256>}]} {
    %c0_i32 = arith.constant 0 : i32
    %0 = arith.cmpi eq, %arg2, %c0_i32 : i32
    %1 = arith.extui %0 : i1 to i32
    %c0_i32_0 = arith.constant 0 : i32
    %2 = arith.cmpi ne, %1, %c0_i32_0 : i32
    scf.if %2 {
      %cst_9 = arith.constant 0.000000e+00 : f32
      %12 = vector.broadcast %cst_9 : f32 to vector<16x256xf32>
      %c0_10 = arith.constant 0 : index
      %c0_11 = arith.constant 0 : index
      %13 = vector.load %arg7[%c0_10, %c0_11] : memref<16x256xf32, #tpu.memory_space<vmem>>, vector<16x256xf32>
      tpu.vector_store %arg7[%c0_10, %c0_11], %12 {strides = array<i32>} : memref<16x256xf32, #tpu.memory_space<vmem>>, vector<16x256xf32>,
    } else {
    }
    %c0 = arith.constant 0 : index
    %c0_1 = arith.constant 0 : index
    %3 = vector.load %arg7[%c0, %c0_1] : memref<16x256xf32, #tpu.memory_space<vmem>>, vector<16x256xf32>
    %c0_2 = arith.constant 0 : index
    %c0_3 = arith.constant 0 : index
    %4 = vector.load %arg3[%c0_2, %c0_3] : memref<16x512xbf16, #tpu.memory_space<vmem>>, vector<16x512xbf16>
    %c0_4 = arith.constant 0 : index
    %c0_5 = arith.constant 0 : index
    %5 = vector.load %arg4[%c0_4, %c0_5] : memref<512x256xbf16, #tpu.memory_space<vmem>>, vector<512x256xbf16>
    %cst = arith.constant dense<0.000000e+00> : vector<16x256xf32>
    %6 = tpu.matmul %4, %5, %cst {dimension_numbers = #tpu.dot_dimension_numbers<[1], [0], [0], [1], [0, 0, 1, 1], [], []>} : vector<16x512xbf16>, vector<512x256xbf16>, vector<16x256xf32> -> vector<16x256xf32>
    %7 = arith.addf %3, %6 : vector<16x256xf32>
    %c0_6 = arith.constant 0 : index
    %c0_7 = arith.constant 0 : index
    %8 = vector.load %arg7[%c0_6, %c0_7] : memref<16x256xf32, #tpu.memory_space<vmem>>, vector<16x256xf32>
    tpu.vector_store %arg7[%c0_6, %c0_7], %7 {strides = array<i32>} : memref<16x256xf32, #tpu.memory_space<vmem>>, vector<16x256xf32>,
    %c1_i32 = arith.constant 1 : i32
    %9 = arith.cmpi eq, %arg2, %c1_i32 : i32
    %10 = arith.extui %9 : i1 to i32
    %c0_i32_8 = arith.constant 0 : i32
    %11 = arith.cmpi ne, %10, %c0_i32_8 : i32
    scf.if %11 {
      %c0_9 = arith.constant 0 : index
      %c0_10 = arith.constant 0 : index
      %12 = vector.load %arg7[%c0_9, %c0_10] : memref<16x256xf32, #tpu.memory_space<vmem>>, vector<16x256xf32>
      %c0_11 = arith.constant 0 : index
      %c0_12 = arith.constant 0 : index
      %13 = vector.load %arg5[%c0_11, %c0_12] : memref<1x256xf32, #tpu.memory_space<vmem>>, vector<1x256xf32>
      %14 = vector.broadcast %13 : vector<1x256xf32> to vector<16x256xf32>
      %15 = arith.addf %12, %14 : vector<16x256xf32>
      %cst_13 = arith.constant 0.000000e+00 : f32
      %16 = vector.broadcast %cst_13 : f32 to vector<16x256xf32>
      %17 = arith.maximumf %15, %16 : vector<16x256xf32>
      %18 = arith.truncf %17 : vector<16x256xf32> to vector<16x256xbf16>
      %c0_14 = arith.constant 0 : index
      %c0_15 = arith.constant 0 : index
      %19 = vector.load %arg6[%c0_14, %c0_15] : memref<16x256xbf16, #tpu.memory_space<vmem>>, vector<16x256xbf16>
      tpu.vector_store %arg6[%c0_14, %c0_15], %18 {strides = array<i32>} : memref<16x256xbf16, #tpu.memory_space<vmem>>, vector<16x256xbf16>,
    } else {
    }
    return
  }
  func.func @transform_0(%arg0: i32, %arg1: i32, %arg2: i32) -> (i32, i32) {
    %c0_i32 = arith.constant 0 : i32
    return %arg0, %arg2 : i32, i32
  }
  func.func @transform_1(%arg0: i32, %arg1: i32, %arg2: i32) -> (i32, i32) {
    %c0_i32 = arith.constant 0 : i32
    return %arg2, %arg1 : i32, i32
  }
  func.func @transform_2(%arg0: i32, %arg1: i32, %arg2: i32) -> (i32, i32) {
    %c0_i32 = arith.constant 0 : i32
    %c0_i32_0 = arith.constant 0 : i32
    return %c0_i32, %arg1 : i32, i32
  }
  func.func @transform_3(%arg0: i32, %arg1: i32, %arg2: i32) -> (i32, i32) {
    %c0_i32 = arith.constant 0 : i32
    return %arg0, %arg1 : i32, i32
  }
}

module attributes {stable_mosaic.version = 11 : i64} {
  func.func @_mm_bn_kernel(%arg0: i32, %arg1: i32, %arg2: i32, %arg3: memref<16x512xbf16, #tpu.memory_space<vmem>>, %arg4: memref<512x256xbf16, #tpu.memory_space<vmem>>, %arg5: memref<1x256xf32, #tpu.memory_space<vmem>>, %arg6: memref<16x256xbf16, #tpu.memory_space<vmem>>, %arg7: memref<16x256xf32, #tpu.memory_space<vmem>>) attributes {dimension_semantics = [#tpu.dimension_semantics<parallel>, #tpu.dimension_semantics<parallel>, #tpu.dimension_semantics<arbitrary>], iteration_bounds = array<i64: 1, 2, 2>, scalar_prefetch = 0 : i64, scratch_operands = 1 : i64, tpu.core_type = #tpu.core_type<tc>, window_params = [{transform_indices = @transform_0, window_bounds = array<i64: 16, 512>}, {transform_indices = @transform_1, window_bounds = array<i64: 512, 256>}, {transform_indices = @transform_2, window_bounds = array<i64: 1, 256>}, {transform_indices = @transform_3, window_bounds = array<i64: 16, 256>}]} {
    %c0_i32 = arith.constant 0 : i32
    %0 = arith.cmpi eq, %arg2, %c0_i32 : i32
    %1 = arith.extui %0 : i1 to i32
    %c0_i32_0 = arith.constant 0 : i32
    %2 = arith.cmpi ne, %1, %c0_i32_0 : i32
    scf.if %2 {
      %cst_9 = arith.constant 0.000000e+00 : f32
      %12 = vector.broadcast %cst_9 : f32 to vector<16x256xf32>
      %c0_10 = arith.constant 0 : index
      %c0_11 = arith.constant 0 : index
      %13 = vector.load %arg7[%c0_10, %c0_11] : memref<16x256xf32, #tpu.memory_space<vmem>>, vector<16x256xf32>
      tpu.vector_store %arg7[%c0_10, %c0_11], %12 {strides = array<i32>} : memref<16x256xf32, #tpu.memory_space<vmem>>, vector<16x256xf32>,
    } else {
    }
    %c0 = arith.constant 0 : index
    %c0_1 = arith.constant 0 : index
    %3 = vector.load %arg7[%c0, %c0_1] : memref<16x256xf32, #tpu.memory_space<vmem>>, vector<16x256xf32>
    %c0_2 = arith.constant 0 : index
    %c0_3 = arith.constant 0 : index
    %4 = vector.load %arg3[%c0_2, %c0_3] : memref<16x512xbf16, #tpu.memory_space<vmem>>, vector<16x512xbf16>
    %c0_4 = arith.constant 0 : index
    %c0_5 = arith.constant 0 : index
    %5 = vector.load %arg4[%c0_4, %c0_5] : memref<512x256xbf16, #tpu.memory_space<vmem>>, vector<512x256xbf16>
    %cst = arith.constant dense<0.000000e+00> : vector<16x256xf32>
    %6 = tpu.matmul %4, %5, %cst {dimension_numbers = #tpu.dot_dimension_numbers<[1], [0], [0], [1], [0, 0, 1, 1], [], []>} : vector<16x512xbf16>, vector<512x256xbf16>, vector<16x256xf32> -> vector<16x256xf32>
    %7 = arith.addf %3, %6 : vector<16x256xf32>
    %c0_6 = arith.constant 0 : index
    %c0_7 = arith.constant 0 : index
    %8 = vector.load %arg7[%c0_6, %c0_7] : memref<16x256xf32, #tpu.memory_space<vmem>>, vector<16x256xf32>
    tpu.vector_store %arg7[%c0_6, %c0_7], %7 {strides = array<i32>} : memref<16x256xf32, #tpu.memory_space<vmem>>, vector<16x256xf32>,
    %c1_i32 = arith.constant 1 : i32
    %9 = arith.cmpi eq, %arg2, %c1_i32 : i32
    %10 = arith.extui %9 : i1 to i32
    %c0_i32_8 = arith.constant 0 : i32
    %11 = arith.cmpi ne, %10, %c0_i32_8 : i32
    scf.if %11 {
      %c0_9 = arith.constant 0 : index
      %c0_10 = arith.constant 0 : index
      %12 = vector.load %arg7[%c0_9, %c0_10] : memref<16x256xf32, #tpu.memory_space<vmem>>, vector<16x256xf32>
      %c0_11 = arith.constant 0 : index
      %c0_12 = arith.constant 0 : index
      %13 = vector.load %arg5[%c0_11, %c0_12] : memref<1x256xf32, #tpu.memory_space<vmem>>, vector<1x256xf32>
      %14 = vector.broadcast %13 : vector<1x256xf32> to vector<16x256xf32>
      %15 = arith.addf %12, %14 : vector<16x256xf32>
      %cst_13 = arith.constant 0.000000e+00 : f32
      %16 = vector.broadcast %cst_13 : f32 to vector<16x256xf32>
      %17 = arith.maximumf %15, %16 : vector<16x256xf32>
      %18 = arith.truncf %17 : vector<16x256xf32> to vector<16x256xbf16>
      %c0_14 = arith.constant 0 : index
      %c0_15 = arith.constant 0 : index
      %19 = vector.load %arg6[%c0_14, %c0_15] : memref<16x256xbf16, #tpu.memory_space<vmem>>, vector<16x256xbf16>
      tpu.vector_store %arg6[%c0_14, %c0_15], %18 {strides = array<i32>} : memref<16x256xbf16, #tpu.memory_space<vmem>>, vector<16x256xbf16>,
    } else {
    }
    return
  }
  func.func @transform_0(%arg0: i32, %arg1: i32, %arg2: i32) -> (i32, i32) {
    %c0_i32 = arith.constant 0 : i32
    return %arg0, %arg2 : i32, i32
  }
  func.func @transform_1(%arg0: i32, %arg1: i32, %arg2: i32) -> (i32, i32) {
    %c0_i32 = arith.constant 0 : i32
    return %arg2, %arg1 : i32, i32
  }
  func.func @transform_2(%arg0: i32, %arg1: i32, %arg2: i32) -> (i32, i32) {
    %c0_i32 = arith.constant 0 : i32
    %c0_i32_0 = arith.constant 0 : i32
    return %c0_i32, %arg1 : i32, i32
  }
  func.func @transform_3(%arg0: i32, %arg1: i32, %arg2: i32) -> (i32, i32) {
    %c0_i32 = arith.constant 0 : i32
    return %arg0, %arg1 : i32, i32
  }
}

module attributes {stable_mosaic.version = 11 : i64} {
  func.func @_mm_bn_kernel(%arg0: i32, %arg1: i32, %arg2: i32, %arg3: memref<16x512xbf16, #tpu.memory_space<vmem>>, %arg4: memref<512x256xbf16, #tpu.memory_space<vmem>>, %arg5: memref<1x256xf32, #tpu.memory_space<vmem>>, %arg6: memref<16x256xbf16, #tpu.memory_space<vmem>>, %arg7: memref<16x256xf32, #tpu.memory_space<vmem>>) attributes {dimension_semantics = [#tpu.dimension_semantics<parallel>, #tpu.dimension_semantics<parallel>, #tpu.dimension_semantics<arbitrary>], iteration_bounds = array<i64: 1, 2, 9>, scalar_prefetch = 0 : i64, scratch_operands = 1 : i64, tpu.core_type = #tpu.core_type<tc>, window_params = [{transform_indices = @transform_0, window_bounds = array<i64: 16, 512>}, {transform_indices = @transform_1, window_bounds = array<i64: 512, 256>}, {transform_indices = @transform_2, window_bounds = array<i64: 1, 256>}, {transform_indices = @transform_3, window_bounds = array<i64: 16, 256>}]} {
    %c0_i32 = arith.constant 0 : i32
    %0 = arith.cmpi eq, %arg2, %c0_i32 : i32
    %1 = arith.extui %0 : i1 to i32
    %c0_i32_0 = arith.constant 0 : i32
    %2 = arith.cmpi ne, %1, %c0_i32_0 : i32
    scf.if %2 {
      %cst_9 = arith.constant 0.000000e+00 : f32
      %12 = vector.broadcast %cst_9 : f32 to vector<16x256xf32>
      %c0_10 = arith.constant 0 : index
      %c0_11 = arith.constant 0 : index
      %13 = vector.load %arg7[%c0_10, %c0_11] : memref<16x256xf32, #tpu.memory_space<vmem>>, vector<16x256xf32>
      tpu.vector_store %arg7[%c0_10, %c0_11], %12 {strides = array<i32>} : memref<16x256xf32, #tpu.memory_space<vmem>>, vector<16x256xf32>,
    } else {
    }
    %c0 = arith.constant 0 : index
    %c0_1 = arith.constant 0 : index
    %3 = vector.load %arg7[%c0, %c0_1] : memref<16x256xf32, #tpu.memory_space<vmem>>, vector<16x256xf32>
    %c0_2 = arith.constant 0 : index
    %c0_3 = arith.constant 0 : index
    %4 = vector.load %arg3[%c0_2, %c0_3] : memref<16x512xbf16, #tpu.memory_space<vmem>>, vector<16x512xbf16>
    %c0_4 = arith.constant 0 : index
    %c0_5 = arith.constant 0 : index
    %5 = vector.load %arg4[%c0_4, %c0_5] : memref<512x256xbf16, #tpu.memory_space<vmem>>, vector<512x256xbf16>
    %cst = arith.constant dense<0.000000e+00> : vector<16x256xf32>
    %6 = tpu.matmul %4, %5, %cst {dimension_numbers = #tpu.dot_dimension_numbers<[1], [0], [0], [1], [0, 0, 1, 1], [], []>} : vector<16x512xbf16>, vector<512x256xbf16>, vector<16x256xf32> -> vector<16x256xf32>
    %7 = arith.addf %3, %6 : vector<16x256xf32>
    %c0_6 = arith.constant 0 : index
    %c0_7 = arith.constant 0 : index
    %8 = vector.load %arg7[%c0_6, %c0_7] : memref<16x256xf32, #tpu.memory_space<vmem>>, vector<16x256xf32>
    tpu.vector_store %arg7[%c0_6, %c0_7], %7 {strides = array<i32>} : memref<16x256xf32, #tpu.memory_space<vmem>>, vector<16x256xf32>,
    %c8_i32 = arith.constant 8 : i32
    %9 = arith.cmpi eq, %arg2, %c8_i32 : i32
    %10 = arith.extui %9 : i1 to i32
    %c0_i32_8 = arith.constant 0 : i32
    %11 = arith.cmpi ne, %10, %c0_i32_8 : i32
    scf.if %11 {
      %c0_9 = arith.constant 0 : index
      %c0_10 = arith.constant 0 : index
      %12 = vector.load %arg7[%c0_9, %c0_10] : memref<16x256xf32, #tpu.memory_space<vmem>>, vector<16x256xf32>
      %c0_11 = arith.constant 0 : index
      %c0_12 = arith.constant 0 : index
      %13 = vector.load %arg5[%c0_11, %c0_12] : memref<1x256xf32, #tpu.memory_space<vmem>>, vector<1x256xf32>
      %14 = vector.broadcast %13 : vector<1x256xf32> to vector<16x256xf32>
      %15 = arith.addf %12, %14 : vector<16x256xf32>
      %cst_13 = arith.constant 0.000000e+00 : f32
      %16 = vector.broadcast %cst_13 : f32 to vector<16x256xf32>
      %17 = arith.maximumf %15, %16 : vector<16x256xf32>
      %18 = arith.truncf %17 : vector<16x256xf32> to vector<16x256xbf16>
      %c0_14 = arith.constant 0 : index
      %c0_15 = arith.constant 0 : index
      %19 = vector.load %arg6[%c0_14, %c0_15] : memref<16x256xbf16, #tpu.memory_space<vmem>>, vector<16x256xbf16>
      tpu.vector_store %arg6[%c0_14, %c0_15], %18 {strides = array<i32>} : memref<16x256xbf16, #tpu.memory_space<vmem>>, vector<16x256xbf16>,
    } else {
    }
    return
  }
  func.func @transform_0(%arg0: i32, %arg1: i32, %arg2: i32) -> (i32, i32) {
    %c0_i32 = arith.constant 0 : i32
    return %arg0, %arg2 : i32, i32
  }
  func.func @transform_1(%arg0: i32, %arg1: i32, %arg2: i32) -> (i32, i32) {
    %c0_i32 = arith.constant 0 : i32
    return %arg2, %arg1 : i32, i32
  }
  func.func @transform_2(%arg0: i32, %arg1: i32, %arg2: i32) -> (i32, i32) {
    %c0_i32 = arith.constant 0 : i32
    %c0_i32_0 = arith.constant 0 : i32
    return %c0_i32, %arg1 : i32, i32
  }
  func.func @transform_3(%arg0: i32, %arg1: i32, %arg2: i32) -> (i32, i32) {
    %c0_i32 = arith.constant 0 : i32
    return %arg0, %arg1 : i32, i32
  }
}

module attributes {stable_mosaic.version = 11 : i64} {
  func.func @_mm_bn_kernel(%arg0: i32, %arg1: i32, %arg2: i32, %arg3: memref<16x512xbf16, #tpu.memory_space<vmem>>, %arg4: memref<512x256xbf16, #tpu.memory_space<vmem>>, %arg5: memref<1x256xf32, #tpu.memory_space<vmem>>, %arg6: memref<16x256xbf16, #tpu.memory_space<vmem>>, %arg7: memref<16x256xf32, #tpu.memory_space<vmem>>) attributes {dimension_semantics = [#tpu.dimension_semantics<parallel>, #tpu.dimension_semantics<parallel>, #tpu.dimension_semantics<arbitrary>], iteration_bounds = array<i64: 1, 8, 2>, scalar_prefetch = 0 : i64, scratch_operands = 1 : i64, tpu.core_type = #tpu.core_type<tc>, window_params = [{transform_indices = @transform_0, window_bounds = array<i64: 16, 512>}, {transform_indices = @transform_1, window_bounds = array<i64: 512, 256>}, {transform_indices = @transform_2, window_bounds = array<i64: 1, 256>}, {transform_indices = @transform_3, window_bounds = array<i64: 16, 256>}]} {
    %c0_i32 = arith.constant 0 : i32
    %0 = arith.cmpi eq, %arg2, %c0_i32 : i32
    %1 = arith.extui %0 : i1 to i32
    %c0_i32_0 = arith.constant 0 : i32
    %2 = arith.cmpi ne, %1, %c0_i32_0 : i32
    scf.if %2 {
      %cst_9 = arith.constant 0.000000e+00 : f32
      %12 = vector.broadcast %cst_9 : f32 to vector<16x256xf32>
      %c0_10 = arith.constant 0 : index
      %c0_11 = arith.constant 0 : index
      %13 = vector.load %arg7[%c0_10, %c0_11] : memref<16x256xf32, #tpu.memory_space<vmem>>, vector<16x256xf32>
      tpu.vector_store %arg7[%c0_10, %c0_11], %12 {strides = array<i32>} : memref<16x256xf32, #tpu.memory_space<vmem>>, vector<16x256xf32>,
    } else {
    }
    %c0 = arith.constant 0 : index
    %c0_1 = arith.constant 0 : index
    %3 = vector.load %arg7[%c0, %c0_1] : memref<16x256xf32, #tpu.memory_space<vmem>>, vector<16x256xf32>
    %c0_2 = arith.constant 0 : index
    %c0_3 = arith.constant 0 : index
    %4 = vector.load %arg3[%c0_2, %c0_3] : memref<16x512xbf16, #tpu.memory_space<vmem>>, vector<16x512xbf16>
    %c0_4 = arith.constant 0 : index
    %c0_5 = arith.constant 0 : index
    %5 = vector.load %arg4[%c0_4, %c0_5] : memref<512x256xbf16, #tpu.memory_space<vmem>>, vector<512x256xbf16>
    %cst = arith.constant dense<0.000000e+00> : vector<16x256xf32>
    %6 = tpu.matmul %4, %5, %cst {dimension_numbers = #tpu.dot_dimension_numbers<[1], [0], [0], [1], [0, 0, 1, 1], [], []>} : vector<16x512xbf16>, vector<512x256xbf16>, vector<16x256xf32> -> vector<16x256xf32>
    %7 = arith.addf %3, %6 : vector<16x256xf32>
    %c0_6 = arith.constant 0 : index
    %c0_7 = arith.constant 0 : index
    %8 = vector.load %arg7[%c0_6, %c0_7] : memref<16x256xf32, #tpu.memory_space<vmem>>, vector<16x256xf32>
    tpu.vector_store %arg7[%c0_6, %c0_7], %7 {strides = array<i32>} : memref<16x256xf32, #tpu.memory_space<vmem>>, vector<16x256xf32>,
    %c1_i32 = arith.constant 1 : i32
    %9 = arith.cmpi eq, %arg2, %c1_i32 : i32
    %10 = arith.extui %9 : i1 to i32
    %c0_i32_8 = arith.constant 0 : i32
    %11 = arith.cmpi ne, %10, %c0_i32_8 : i32
    scf.if %11 {
      %c0_9 = arith.constant 0 : index
      %c0_10 = arith.constant 0 : index
      %12 = vector.load %arg7[%c0_9, %c0_10] : memref<16x256xf32, #tpu.memory_space<vmem>>, vector<16x256xf32>
      %c0_11 = arith.constant 0 : index
      %c0_12 = arith.constant 0 : index
      %13 = vector.load %arg5[%c0_11, %c0_12] : memref<1x256xf32, #tpu.memory_space<vmem>>, vector<1x256xf32>
      %14 = vector.broadcast %13 : vector<1x256xf32> to vector<16x256xf32>
      %15 = arith.addf %12, %14 : vector<16x256xf32>
      %16 = arith.truncf %15 : vector<16x256xf32> to vector<16x256xbf16>
      %c0_13 = arith.constant 0 : index
      %c0_14 = arith.constant 0 : index
      %17 = vector.load %arg6[%c0_13, %c0_14] : memref<16x256xbf16, #tpu.memory_space<vmem>>, vector<16x256xbf16>
      tpu.vector_store %arg6[%c0_13, %c0_14], %16 {strides = array<i32>} : memref<16x256xbf16, #tpu.memory_space<vmem>>, vector<16x256xbf16>,
    } else {
    }
    return
  }
  func.func @transform_0(%arg0: i32, %arg1: i32, %arg2: i32) -> (i32, i32) {
    %c0_i32 = arith.constant 0 : i32
    return %arg0, %arg2 : i32, i32
  }
  func.func @transform_1(%arg0: i32, %arg1: i32, %arg2: i32) -> (i32, i32) {
    %c0_i32 = arith.constant 0 : i32
    return %arg2, %arg1 : i32, i32
  }
  func.func @transform_2(%arg0: i32, %arg1: i32, %arg2: i32) -> (i32, i32) {
    %c0_i32 = arith.constant 0 : i32
    %c0_i32_0 = arith.constant 0 : i32
    return %c0_i32, %arg1 : i32, i32
  }
  func.func @transform_3(%arg0: i32, %arg1: i32, %arg2: i32) -> (i32, i32) {
    %c0_i32 = arith.constant 0 : i32
    return %arg0, %arg1 : i32, i32
  }
}

module attributes {stable_mosaic.version = 11 : i64} {
  func.func @_mm_bn_res_kernel(%arg0: i32, %arg1: i32, %arg2: i32, %arg3: memref<16x512xbf16, #tpu.memory_space<vmem>>, %arg4: memref<512x256xbf16, #tpu.memory_space<vmem>>, %arg5: memref<1x256xf32, #tpu.memory_space<vmem>>, %arg6: memref<16x256xbf16, #tpu.memory_space<vmem>>, %arg7: memref<16x256xbf16, #tpu.memory_space<vmem>>, %arg8: memref<16x256xf32, #tpu.memory_space<vmem>>) attributes {dimension_semantics = [#tpu.dimension_semantics<parallel>, #tpu.dimension_semantics<parallel>, #tpu.dimension_semantics<arbitrary>], iteration_bounds = array<i64: 1, 8, 1>, scalar_prefetch = 0 : i64, scratch_operands = 1 : i64, tpu.core_type = #tpu.core_type<tc>, window_params = [{transform_indices = @transform_0, window_bounds = array<i64: 16, 512>}, {transform_indices = @transform_1, window_bounds = array<i64: 512, 256>}, {transform_indices = @transform_2, window_bounds = array<i64: 1, 256>}, {transform_indices = @transform_3, window_bounds = array<i64: 16, 256>}, {transform_indices = @transform_4, window_bounds = array<i64: 16, 256>}]} {
    %c0_i32 = arith.constant 0 : i32
    %0 = arith.cmpi eq, %arg2, %c0_i32 : i32
    %1 = arith.extui %0 : i1 to i32
    %c0_i32_0 = arith.constant 0 : i32
    %2 = arith.cmpi ne, %1, %c0_i32_0 : i32
    scf.if %2 {
      %cst_10 = arith.constant 0.000000e+00 : f32
      %12 = vector.broadcast %cst_10 : f32 to vector<16x256xf32>
      %c0_11 = arith.constant 0 : index
      %c0_12 = arith.constant 0 : index
      %13 = vector.load %arg8[%c0_11, %c0_12] : memref<16x256xf32, #tpu.memory_space<vmem>>, vector<16x256xf32>
      tpu.vector_store %arg8[%c0_11, %c0_12], %12 {strides = array<i32>} : memref<16x256xf32, #tpu.memory_space<vmem>>, vector<16x256xf32>,
    } else {
    }
    %c0 = arith.constant 0 : index
    %c0_1 = arith.constant 0 : index
    %3 = vector.load %arg8[%c0, %c0_1] : memref<16x256xf32, #tpu.memory_space<vmem>>, vector<16x256xf32>
    %c0_2 = arith.constant 0 : index
    %c0_3 = arith.constant 0 : index
    %4 = vector.load %arg3[%c0_2, %c0_3] : memref<16x512xbf16, #tpu.memory_space<vmem>>, vector<16x512xbf16>
    %c0_4 = arith.constant 0 : index
    %c0_5 = arith.constant 0 : index
    %5 = vector.load %arg4[%c0_4, %c0_5] : memref<512x256xbf16, #tpu.memory_space<vmem>>, vector<512x256xbf16>
    %cst = arith.constant dense<0.000000e+00> : vector<16x256xf32>
    %6 = tpu.matmul %4, %5, %cst {dimension_numbers = #tpu.dot_dimension_numbers<[1], [0], [0], [1], [0, 0, 1, 1], [], []>} : vector<16x512xbf16>, vector<512x256xbf16>, vector<16x256xf32> -> vector<16x256xf32>
    %7 = arith.addf %3, %6 : vector<16x256xf32>
    %c0_6 = arith.constant 0 : index
    %c0_7 = arith.constant 0 : index
    %8 = vector.load %arg8[%c0_6, %c0_7] : memref<16x256xf32, #tpu.memory_space<vmem>>, vector<16x256xf32>
    tpu.vector_store %arg8[%c0_6, %c0_7], %7 {strides = array<i32>} : memref<16x256xf32, #tpu.memory_space<vmem>>, vector<16x256xf32>,
    %c0_i32_8 = arith.constant 0 : i32
    %9 = arith.cmpi eq, %arg2, %c0_i32_8 : i32
    %10 = arith.extui %9 : i1 to i32
    %c0_i32_9 = arith.constant 0 : i32
    %11 = arith.cmpi ne, %10, %c0_i32_9 : i32
    scf.if %11 {
      %c0_10 = arith.constant 0 : index
      %c0_11 = arith.constant 0 : index
      %12 = vector.load %arg8[%c0_10, %c0_11] : memref<16x256xf32, #tpu.memory_space<vmem>>, vector<16x256xf32>
      %c0_12 = arith.constant 0 : index
      %c0_13 = arith.constant 0 : index
      %13 = vector.load %arg5[%c0_12, %c0_13] : memref<1x256xf32, #tpu.memory_space<vmem>>, vector<1x256xf32>
      %14 = vector.broadcast %13 : vector<1x256xf32> to vector<16x256xf32>
      %15 = arith.addf %12, %14 : vector<16x256xf32>
      %c0_14 = arith.constant 0 : index
      %c0_15 = arith.constant 0 : index
      %16 = vector.load %arg6[%c0_14, %c0_15] : memref<16x256xbf16, #tpu.memory_space<vmem>>, vector<16x256xbf16>
      %17 = arith.extf %16 : vector<16x256xbf16> to vector<16x256xf32>
      %18 = arith.addf %15, %17 : vector<16x256xf32>
      %cst_16 = arith.constant 0.000000e+00 : f32
      %19 = vector.broadcast %cst_16 : f32 to vector<16x256xf32>
      %20 = arith.maximumf %18, %19 : vector<16x256xf32>
      %21 = arith.truncf %20 : vector<16x256xf32> to vector<16x256xbf16>
      %c0_17 = arith.constant 0 : index
      %c0_18 = arith.constant 0 : index
      %22 = vector.load %arg7[%c0_17, %c0_18] : memref<16x256xbf16, #tpu.memory_space<vmem>>, vector<16x256xbf16>
      tpu.vector_store %arg7[%c0_17, %c0_18], %21 {strides = array<i32>} : memref<16x256xbf16, #tpu.memory_space<vmem>>, vector<16x256xbf16>,
    } else {
    }
    return
  }
  func.func @transform_0(%arg0: i32, %arg1: i32, %arg2: i32) -> (i32, i32) {
    %c0_i32 = arith.constant 0 : i32
    return %arg0, %arg2 : i32, i32
  }
  func.func @transform_1(%arg0: i32, %arg1: i32, %arg2: i32) -> (i32, i32) {
    %c0_i32 = arith.constant 0 : i32
    return %arg2, %arg1 : i32, i32
  }
  func.func @transform_2(%arg0: i32, %arg1: i32, %arg2: i32) -> (i32, i32) {
    %c0_i32 = arith.constant 0 : i32
    %c0_i32_0 = arith.constant 0 : i32
    return %c0_i32, %arg1 : i32, i32
  }
  func.func @transform_3(%arg0: i32, %arg1: i32, %arg2: i32) -> (i32, i32) {
    %c0_i32 = arith.constant 0 : i32
    return %arg0, %arg1 : i32, i32
  }
  func.func @transform_4(%arg0: i32, %arg1: i32, %arg2: i32) -> (i32, i32) {
    %c0_i32 = arith.constant 0 : i32
    return %arg0, %arg1 : i32, i32
  }
}

module attributes {stable_mosaic.version = 11 : i64} {
  func.func @_mm_bn_kernel(%arg0: i32, %arg1: i32, %arg2: i32, %arg3: memref<16x512xbf16, #tpu.memory_space<vmem>>, %arg4: memref<512x256xbf16, #tpu.memory_space<vmem>>, %arg5: memref<1x256xf32, #tpu.memory_space<vmem>>, %arg6: memref<16x256xbf16, #tpu.memory_space<vmem>>, %arg7: memref<16x256xf32, #tpu.memory_space<vmem>>) attributes {dimension_semantics = [#tpu.dimension_semantics<parallel>, #tpu.dimension_semantics<parallel>, #tpu.dimension_semantics<arbitrary>], iteration_bounds = array<i64: 1, 2, 4>, scalar_prefetch = 0 : i64, scratch_operands = 1 : i64, tpu.core_type = #tpu.core_type<tc>, window_params = [{transform_indices = @transform_0, window_bounds = array<i64: 16, 512>}, {transform_indices = @transform_1, window_bounds = array<i64: 512, 256>}, {transform_indices = @transform_2, window_bounds = array<i64: 1, 256>}, {transform_indices = @transform_3, window_bounds = array<i64: 16, 256>}]} {
    %c0_i32 = arith.constant 0 : i32
    %0 = arith.cmpi eq, %arg2, %c0_i32 : i32
    %1 = arith.extui %0 : i1 to i32
    %c0_i32_0 = arith.constant 0 : i32
    %2 = arith.cmpi ne, %1, %c0_i32_0 : i32
    scf.if %2 {
      %cst_9 = arith.constant 0.000000e+00 : f32
      %12 = vector.broadcast %cst_9 : f32 to vector<16x256xf32>
      %c0_10 = arith.constant 0 : index
      %c0_11 = arith.constant 0 : index
      %13 = vector.load %arg7[%c0_10, %c0_11] : memref<16x256xf32, #tpu.memory_space<vmem>>, vector<16x256xf32>
      tpu.vector_store %arg7[%c0_10, %c0_11], %12 {strides = array<i32>} : memref<16x256xf32, #tpu.memory_space<vmem>>, vector<16x256xf32>,
    } else {
    }
    %c0 = arith.constant 0 : index
    %c0_1 = arith.constant 0 : index
    %3 = vector.load %arg7[%c0, %c0_1] : memref<16x256xf32, #tpu.memory_space<vmem>>, vector<16x256xf32>
    %c0_2 = arith.constant 0 : index
    %c0_3 = arith.constant 0 : index
    %4 = vector.load %arg3[%c0_2, %c0_3] : memref<16x512xbf16, #tpu.memory_space<vmem>>, vector<16x512xbf16>
    %c0_4 = arith.constant 0 : index
    %c0_5 = arith.constant 0 : index
    %5 = vector.load %arg4[%c0_4, %c0_5] : memref<512x256xbf16, #tpu.memory_space<vmem>>, vector<512x256xbf16>
    %cst = arith.constant dense<0.000000e+00> : vector<16x256xf32>
    %6 = tpu.matmul %4, %5, %cst {dimension_numbers = #tpu.dot_dimension_numbers<[1], [0], [0], [1], [0, 0, 1, 1], [], []>} : vector<16x512xbf16>, vector<512x256xbf16>, vector<16x256xf32> -> vector<16x256xf32>
    %7 = arith.addf %3, %6 : vector<16x256xf32>
    %c0_6 = arith.constant 0 : index
    %c0_7 = arith.constant 0 : index
    %8 = vector.load %arg7[%c0_6, %c0_7] : memref<16x256xf32, #tpu.memory_space<vmem>>, vector<16x256xf32>
    tpu.vector_store %arg7[%c0_6, %c0_7], %7 {strides = array<i32>} : memref<16x256xf32, #tpu.memory_space<vmem>>, vector<16x256xf32>,
    %c3_i32 = arith.constant 3 : i32
    %9 = arith.cmpi eq, %arg2, %c3_i32 : i32
    %10 = arith.extui %9 : i1 to i32
    %c0_i32_8 = arith.constant 0 : i32
    %11 = arith.cmpi ne, %10, %c0_i32_8 : i32
    scf.if %11 {
      %c0_9 = arith.constant 0 : index
      %c0_10 = arith.constant 0 : index
      %12 = vector.load %arg7[%c0_9, %c0_10] : memref<16x256xf32, #tpu.memory_space<vmem>>, vector<16x256xf32>
      %c0_11 = arith.constant 0 : index
      %c0_12 = arith.constant 0 : index
      %13 = vector.load %arg5[%c0_11, %c0_12] : memref<1x256xf32, #tpu.memory_space<vmem>>, vector<1x256xf32>
      %14 = vector.broadcast %13 : vector<1x256xf32> to vector<16x256xf32>
      %15 = arith.addf %12, %14 : vector<16x256xf32>
      %cst_13 = arith.constant 0.000000e+00 : f32
      %16 = vector.broadcast %cst_13 : f32 to vector<16x256xf32>
      %17 = arith.maximumf %15, %16 : vector<16x256xf32>
      %18 = arith.truncf %17 : vector<16x256xf32> to vector<16x256xbf16>
      %c0_14 = arith.constant 0 : index
      %c0_15 = arith.constant 0 : index
      %19 = vector.load %arg6[%c0_14, %c0_15] : memref<16x256xbf16, #tpu.memory_space<vmem>>, vector<16x256xbf16>
      tpu.vector_store %arg6[%c0_14, %c0_15], %18 {strides = array<i32>} : memref<16x256xbf16, #tpu.memory_space<vmem>>, vector<16x256xbf16>,
    } else {
    }
    return
  }
  func.func @transform_0(%arg0: i32, %arg1: i32, %arg2: i32) -> (i32, i32) {
    %c0_i32 = arith.constant 0 : i32
    return %arg0, %arg2 : i32, i32
  }
  func.func @transform_1(%arg0: i32, %arg1: i32, %arg2: i32) -> (i32, i32) {
    %c0_i32 = arith.constant 0 : i32
    return %arg2, %arg1 : i32, i32
  }
  func.func @transform_2(%arg0: i32, %arg1: i32, %arg2: i32) -> (i32, i32) {
    %c0_i32 = arith.constant 0 : i32
    %c0_i32_0 = arith.constant 0 : i32
    return %c0_i32, %arg1 : i32, i32
  }
  func.func @transform_3(%arg0: i32, %arg1: i32, %arg2: i32) -> (i32, i32) {
    %c0_i32 = arith.constant 0 : i32
    return %arg0, %arg1 : i32, i32
  }
}

</mosaic_0001>

<bundles_post_ra>
// kernel: resnet50_forward.55
= control target key start
LH: loop header
LB: loop body
LE: loop exit
PB: predicated region body
PF: predicated region fallthrough
CT: control target
= control target key end

     0   :  { %vm45_vm0 = vcmask 1043456   ;;  %s368_s0 = inlined_call_operand.vmem [shape: bf16[9,32,128], index: 0, kind: input, shape index: {}]   ;;  %s369_s1 = inlined_call_operand.vmem [shape: bf16[32,128], index: 1, kind: output, shape index: {}]  }
   0x1   :  { %v9_v0 = vld [vmem:[%s368_s0] sm:$0xf]  ;;  %v13_v1 = vld [vmem:[%s368_s0 + $0x10] sm:$0xf]  ;;  %v10_v3 = vld [vmem:[%s368_s0 + $0x4] sm:$0xf] }
   0x2   :  { %v17_v2 = vld [vmem:[%s368_s0 + $0x20] sm:$0xf]  ;;  %v14_v4 = vld [vmem:[%s368_s0 + $0x14] sm:$0xf]  ;;  %v18_v5 = vld [vmem:[%s368_s0 + $0x24] sm:$0xf] }
   0x3   :  { %v21_v6 = vld [vmem:[%s368_s0 + $0x30] sm:$0xf]  ;;  %v48_v7 = vsel %vm45_vm0, %v9_v0, 4286644096  ;;  %v51_v8 = vsel %vm45_vm0, %v13_v1, 4286644096 }
   0x4   :  { %v55_v9 = vsel %vm45_vm0, %v17_v2, 4286644096  ;;  %v25_v10 = vld [vmem:[%s368_s0 + $0x40] sm:$0xf]  ;;  %v53_v11 = vmax.bf16 %v51_v8, %v48_v7  ;;  %v22_v12 = vld [vmem:[%s368_s0 + $0x34] sm:$0xf] }
   0x5   :  { %v29_v13 = vld [vmem:[%s368_s0 + $0x50] sm:$0xf]  ;;  %v59_v14 = vsel %vm45_vm0, %v21_v6, 4286644096  ;;  %v83_v16 = vsel %vm45_vm0, %v10_v3, 4286644096 }
   0x6   :  { %v57_v15 = vmax.bf16 %v55_v9, %v53_v11  ;;  %v86_v17 = vsel %vm45_vm0, %v14_v4, 4286644096  ;;  %v90_v18 = vsel %vm45_vm0, %v18_v5, 4286644096  ;;  %v26_v19 = vld [vmem:[%s368_s0 + $0x44] sm:$0xf] }
   0x7   :  { %v63_v20 = vsel %vm45_vm0, %v25_v10, 4286644096  ;;  %v88_v21 = vmax.bf16 %v86_v17, %v83_v16  ;;  %v30_v22 = vld [vmem:[%s368_s0 + $0x54] sm:$0xf]  ;;  %v33_v23 = vld [vmem:[%s368_s0 + $0x60] sm:$0xf] }
   0x8   :  { %v61_v24 = vmax.bf16 %v59_v14, %v57_v15  ;;  %v94_v25 = vsel %vm45_vm0, %v22_v12, 4286644096  ;;  %v34_v26 = vld [vmem:[%s368_s0 + $0x64] sm:$0xf]  ;;  %v67_v27 = vsel %vm45_vm0, %v29_v13, 4286644096 }
   0x9   :  { %v92_v28 = vmax.bf16 %v90_v18, %v88_v21  ;;  %v37_v29 = vld [vmem:[%s368_s0 + $0x70] sm:$0xf]  ;;  %v41_v30 = vld [vmem:[%s368_s0 + $0x80] sm:$0xf]  ;;  %v98_v32 = vsel %vm45_vm0, %v26_v19, 4286644096 }
   0xa   :  { %v65_v31 = vmax.bf16 %v63_v20, %v61_v24  ;;  %v38_v33 = vld [vmem:[%s368_s0 + $0x74] sm:$0xf]  ;;  %v71_v34 = vsel %vm45_vm0, %v33_v23, 4286644096  ;;  %v102_v36 = vsel %vm45_vm0, %v30_v22, 4286644096 }
   0xb   :  { %v96_v35 = vmax.bf16 %v94_v25, %v92_v28  ;;  %v42_v37 = vld [vmem:[%s368_s0 + $0x84] sm:$0xf]  ;;  %v11_v39 = vld [vmem:[%s368_s0 + $0x8] sm:$0xf]  ;;  %v15_v40 = vld [vmem:[%s368_s0 + $0x18] sm:$0xf] }
   0xc   :  { %v69_v38 = vmax.bf16 %v67_v27, %v65_v31  ;;  %v19_v41 = vld [vmem:[%s368_s0 + $0x28] sm:$0xf]  ;;  %v75_v42 = vsel %vm45_vm0, %v37_v29, 4286644096  ;;  %v79_v43 = vsel %vm45_vm0, %v41_v30, 4286644096 }
   0xd   :  { %v100_v44 = vmax.bf16 %v98_v32, %v96_v35  ;;  %v106_v45 = vsel %vm45_vm0, %v34_v26, 4286644096  ;;  %v12_v47 = vld [vmem:[%s368_s0 + $0xc] sm:$0xf]  ;;  %v23_v48 = vld [vmem:[%s368_s0 + $0x38] sm:$0xf] }
   0xe   :  { %v73_v46 = vmax.bf16 %v71_v34, %v69_v38  ;;  %v27_v49 = vld [vmem:[%s368_s0 + $0x48] sm:$0xf]  ;;  %v118_v51 = vsel %vm45_vm0, %v11_v39, 4286644096  ;;  %v121_v52 = vsel %vm45_vm0, %v15_v40, 4286644096 }
   0xf   :  { %v104_v50 = vmax.bf16 %v102_v36, %v100_v44  ;;  %v125_v53 = vsel %vm45_vm0, %v19_v41, 4286644096  ;;  %v110_v55 = vsel %vm45_vm0, %v38_v33, 4286644096  ;;  %v16_v56 = vld [vmem:[%s368_s0 + $0x1c] sm:$0xf]  ;;  %v123_v58 = vmax.bf16 %v121_v52, %v118_v51 }
  0x10   :  { %v77_v54 = vmax.bf16 %v75_v42, %v73_v46  ;;  %v20_v57 = vld [vmem:[%s368_s0 + $0x2c] sm:$0xf]  ;;  %v114_v60 = vsel %vm45_vm0, %v42_v37, 4286644096  ;;  %v24_v61 = vld [vmem:[%s368_s0 + $0x3c] sm:$0xf] }
  0x11   :  { %v108_v59 = vmax.bf16 %v106_v45, %v104_v50  ;;  %v129_v62 = vsel %vm45_vm0, %v23_v48, 4286644096  ;;  %v31_v63 = vld [vmem:[%s368_s0 + $0x58] sm:$0xf]  ;;  %v127_v0 = vmax.bf16 %v125_v53, %v123_v58  ;;  %v133_v1 = vsel %vm45_vm0, %v27_v49, 4286644096 }
  0x12   :  { %v153_v2 = vsel %vm45_vm0, %v12_v47, 4286644096  ;;  %v81_v3 = vmax.bf16 %v79_v43, %v77_v54  ;;  %v156_v5 = vsel %vm45_vm0, %v16_v56, 4286644096  ;;  %v160_v6 = vsel %vm45_vm0, %v20_v57, 4286644096 }
  0x13   :  { %v112_v4 = vmax.bf16 %v110_v55, %v108_v59  ;;  %v28_v7 = vld [vmem:[%s368_s0 + $0x4c] sm:$0xf]  ;;  %v35_v8 = vld [vmem:[%s368_s0 + $0x68] sm:$0xf]  ;;  %v131_v9 = vmax.bf16 %v129_v62, %v127_v0  ;;  %v158_v10 = vmax.bf16 %v156_v5, %v153_v2  ;;  %v137_v12 = vsel %vm45_vm0, %v31_v63, 4286644096 }
  0x14   :  { %v164_v13 = vsel %vm45_vm0, %v24_v61, 4286644096  ;;  %v32_v14 = vld [vmem:[%s368_s0 + $0x5c] sm:$0xf]  ;;  %v39_v15 = vld [vmem:[%s368_s0 + $0x78] sm:$0xf] }
  0x15   :  { %v116_v11 = vmax.bf16 %v114_v60, %v112_v4  ;;  %v135_v16 = vmax.bf16 %v133_v1, %v131_v9  ;;  %v162_v17 = vmax.bf16 %v160_v6, %v158_v10  ;;  %v141_v19 = vsel %vm45_vm0, %v35_v8, 4286644096  ;;  %v36_v21 = vld [vmem:[%s368_s0 + $0x6c] sm:$0xf]  ;;  %v40_v26 = vld [vmem:[%s368_s0 + $0x7c] sm:$0xf] }
  0x16   :  { %v168_v20 = vsel %vm45_vm0, %v28_v7, 4286644096  ;;  %v145_v24 = vsel %vm45_vm0, %v39_v15, 4286644096  ;;  %v172_v25 = vsel %vm45_vm0, %v32_v14, 4286644096 }
  0x17   :  { %v205_v18 = vcombine.low %v81_v3, %v116_v11  ;;  %v139_v22 = vmax.bf16 %v137_v12, %v135_v16  ;;  %v166_v23 = vmax.bf16 %v164_v13, %v162_v17  ;;  %v43_v27 = vld [vmem:[%s368_s0 + $0x88] sm:$0xf]  ;;  %v176_v30 = vsel %vm45_vm0, %v36_v21, 4286644096  ;;  %v44_v31 = vld [vmem:[%s368_s0 + $0x8c] sm:$0xf] }
  0x18   :  { %v149_v34 = vsel %vm45_vm0, %v43_v27, 4286644096  ;;  %v180_v35 = vsel %vm45_vm0, %v40_v26, 4286644096  ;;  %v184_v37 = vsel %vm45_vm0, %v44_v31, 4286644096 }
  0x19   :  { %199 = vst [vmem:[%s369_s1] sm:$0xff] %v205_v18   ;;  %v143_v28 = vmax.bf16 %v141_v19, %v139_v22  ;;  %v170_v29 = vmax.bf16 %v168_v20, %v166_v23 }
  0x1b   :  { %v147_v32 = vmax.bf16 %v145_v24, %v143_v28  ;;  %v174_v33 = vmax.bf16 %v172_v25, %v170_v29 }
  0x1d   :  { %v178_v36 = vmax.bf16 %v176_v30, %v174_v33  ;;  %v151_v38 = vmax.bf16 %v149_v34, %v147_v32 }
  0x1f   :  { %v182_v39 = vmax.bf16 %v180_v35, %v178_v36 }
  0x21   :  { %v186_v40 = vmax.bf16 %v184_v37, %v182_v39 }
  0x23   :  { %v206_v41 = vcombine.low %v151_v38, %v186_v40 }
  0x25   :  { %207 = vst [vmem:[%s369_s1 + $0x8] sm:$0xff] %v206_v41  }

// kernel: resnet50_forward.54
= control target key start
LH: loop header
LB: loop body
LE: loop exit
PB: predicated region body
PF: predicated region fallthrough
CT: control target
= control target key end

     0   :  { %s939_s1 = inlined_call_operand.vmem [shape: bf16[256,128], index: 1, kind: input, shape index: {}]   ;;  %s940_s0 = inlined_call_operand.vmem [shape: bf16[128,256], index: 0, kind: input, shape index: {}]   ;;  %s941_s2 = inlined_call_operand.vmem [shape: f32[1,128], index: 2, kind: input, shape index: {}]   ;;  %s942_s3 = inlined_call_operand.vmem [shape: bf16[128,128], index: 3, kind: output, shape index: {}]  }
   0x1   :  { %v738_v0 = vld [vmem:[%s939_s1 + $0x40] sm:$0xff]   ;;  %v740_v2 = vld [vmem:[%s939_s1 + $0x48] sm:$0xff]   ;;  %v742_v4 = vld [vmem:[%s939_s1 + $0x50] sm:$0xff]  }
   0x2   :  { %v739_v1 = vld [vmem:[%s939_s1] sm:$0xff]   ;;  %658 = vmatprep.subr.bf16.mxu0 %v738_v0  ;;  %722 = vmatprep.subr.bf16.mxu1 %v738_v0  ;;  %v741_v3 = vld [vmem:[%s939_s1 + $0x8] sm:$0xff]   ;;  %v743_v5 = vld [vmem:[%s939_s1 + $0x10] sm:$0xff]  }
   0x3   :  { %659 = vmatpush3.bf16.msra.mxu0 %v739_v1  ;;  %730 = vmatpush3.bf16.msra.mxu1 %v739_v1  ;;  %v744_v6 = vld [vmem:[%s939_s1 + $0x58] sm:$0xff]   ;;  %v746_v8 = vld [vmem:[%s939_s1 + $0x60] sm:$0xff]   ;;  %v748_v10 = vld [vmem:[%s939_s1 + $0x68] sm:$0xff]  }
   0x4   :  { %660 = vmatprep.subr.bf16.mxu0 %v740_v2  ;;  %723 = vmatprep.subr.bf16.mxu1 %v740_v2  ;;  %v745_v7 = vld [vmem:[%s939_s1 + $0x18] sm:$0xff]   ;;  %v747_v9 = vld [vmem:[%s939_s1 + $0x20] sm:$0xff]   ;;  %v749_v13 = vld [vmem:[%s939_s1 + $0x28] sm:$0xff]  }
   0x5   :  { %v756_v11 = vld [vmem:[%s940_s0 + $0x4] ss:$8 sps:$4 sm:$0xff]   ;;  %v750_v14 = vld [vmem:[%s939_s1 + $0x70] sm:$0xff]   ;;  %v752_v16 = vld [vmem:[%s939_s1 + $0x78] sm:$0xff]  }
   0x6   :  { %v759_v12 = vld [vmem:[%s940_s0 + $0x44] ss:$8 sps:$4 sm:$0xff]   ;;  %307 = vmatprep.mubr.bf16.mxu0 %v756_v11  ;;  %v751_v15 = vld [vmem:[%s939_s1 + $0x30] sm:$0xff]   ;;  %v753_v17 = vld [vmem:[%s939_s1 + $0x38] sm:$0xff]  }
   0x7   :  { %661 = vmatpush3.bf16.msra.mxu0 %v741_v3  ;;  %731 = vmatpush3.bf16.msra.mxu1 %v741_v3  ;;  %v754_v18 = vld [vmem:[%s940_s0] ss:$8 sps:$4 sm:$0xff]   ;;  %v760_v20 = vld [vmem:[%s940_s0 + $0x14] ss:$8 sps:$4 sm:$0xff]   ;;  %v764_v22 = vld [vmem:[%s940_s0 + $0x10] ss:$8 sps:$4 sm:$0xff]  }
   0x8   :  { %662 = vmatprep.subr.bf16.mxu0 %v742_v4  ;;  %724 = vmatprep.subr.bf16.mxu1 %v742_v4  ;;  %v757_v19 = vld [vmem:[%s940_s0 + $0x40] ss:$8 sps:$4 sm:$0xff]   ;;  %v762_v21 = vld [vmem:[%s940_s0 + $0x54] ss:$8 sps:$4 sm:$0xff]   ;;  %v765_v23 = vld [vmem:[%s940_s0 + $0x50] ss:$8 sps:$4 sm:$0xff]  }
   0x9   :  { %339 = vmatprep.mubr.bf16.mxu1 %v759_v12  ;;  %v766_v24 = vld [vmem:[%s940_s0 + $0x24] ss:$8 sps:$4 sm:$0xff]   ;;  %v770_v26 = vld [vmem:[%s940_s0 + $0x20] ss:$8 sps:$4 sm:$0xff]   ;;  %v772_v28 = vld [vmem:[%s940_s0 + $0x34] ss:$8 sps:$4 sm:$0xff]  }
   0xa   :  { %v768_v25 = vld [vmem:[%s940_s0 + $0x64] ss:$8 sps:$4 sm:$0xff]   ;;  %v771_v27 = vld [vmem:[%s940_s0 + $0x60] ss:$8 sps:$4 sm:$0xff]   ;;  %v774_v29 = vld [vmem:[%s940_s0 + $0x74] ss:$8 sps:$4 sm:$0xff]  }
   0xb   :  { %663 = vmatpush3.bf16.msra.mxu0 %v743_v5  ;;  %732 = vmatpush3.bf16.msra.mxu1 %v743_v5  ;;  %v776_v30 = vld [vmem:[%s940_s0 + $0x30] ss:$8 sps:$4 sm:$0xff]   ;;  %v897_v35 = vld [vmem:[%s941_s2] ss:$0 sm:$0xff] }
   0xc   :  { %664 = vmatprep.subr.bf16.mxu0 %v744_v6  ;;  %725 = vmatprep.subr.bf16.mxu1 %v744_v6  ;;  %v777_v31 = vld [vmem:[%s940_s0 + $0x70] ss:$8 sps:$4 sm:$0xff]  }
   0xf   :  { %665 = vmatpush3.bf16.msra.mxu0 %v745_v7  ;;  %733 = vmatpush3.bf16.msra.mxu1 %v745_v7 }
  0x10   :  { %666 = vmatprep.subr.bf16.mxu0 %v746_v8  ;;  %726 = vmatprep.subr.bf16.mxu1 %v746_v8 }
  0x13   :  { %667 = vmatpush3.bf16.msra.mxu0 %v747_v9  ;;  %734 = vmatpush3.bf16.msra.mxu1 %v747_v9 }
  0x14   :  { %668 = vmatprep.subr.bf16.mxu0 %v748_v10  ;;  %727 = vmatprep.subr.bf16.mxu1 %v748_v10 }
  0x17   :  { %669 = vmatpush3.bf16.msra.mxu0 %v749_v13  ;;  %735 = vmatpush3.bf16.msra.mxu1 %v749_v13 }
  0x18   :  { %670 = vmatprep.subr.bf16.mxu0 %v750_v14  ;;  %728 = vmatprep.subr.bf16.mxu1 %v750_v14 }
  0x1b   :  { %671 = vmatpush3.bf16.msra.mxu0 %v751_v15  ;;  %736 = vmatpush3.bf16.msra.mxu1 %v751_v15 }
  0x1c   :  { %672 = vmatprep.subr.bf16.mxu0 %v752_v16  ;;  %729 = vmatprep.subr.bf16.mxu1 %v752_v16 }
  0x1f   :  { %673 = vmatpush3.bf16.msra.mxu0 %v753_v17  ;;  %737 = vmatpush3.bf16.msra.mxu1 %v753_v17 }
  0x22   :  { %308 = vmatmul.mubr.bf16.vlgmr.msra.gmra.mrb[0].mxu0 %v754_v18  ;;  %340 = vmatmul.mubr.bf16.vlgmr.msra.gmra.mrb[0].mxu1 %v757_v19 }
  0x23   :  { %315 = vmatprep.mubr.bf16.mxu0 %v760_v20  ;;  %347 = vmatprep.mubr.bf16.mxu1 %v762_v21 }
  0x2a   :  { %316 = vmatmul.mubr.bf16.gmra.mrb[4].mxu0 %v764_v22  ;;  %348 = vmatmul.mubr.bf16.gmra.mrb[4].mxu1 %v765_v23 }
  0x2b   :  { %323 = vmatprep.mubr.bf16.mxu0 %v766_v24  ;;  %355 = vmatprep.mubr.bf16.mxu1 %v768_v25 }
  0x32   :  { %324 = vmatmul.mubr.bf16.gmra.mrb[8].mxu0 %v770_v26  ;;  %356 = vmatmul.mubr.bf16.gmra.mrb[8].mxu1 %v771_v27 }
  0x33   :  { %331 = vmatprep.mubr.bf16.mxu0 %v772_v28  ;;  %363 = vmatprep.mubr.bf16.mxu1 %v774_v29 }
  0x3a   :  { %332 = vmatmul.mubr.bf16.gmra.mrb[12].mxu0 %v776_v30  ;;  %364 = vmatmul.mubr.bf16.gmra.mrb[12].mxu1 %v777_v31 }
  0xf5   :  { %v674_v32 = vpop.f32.mrb[0].mxu0  ;;  %v698_v33 = vpop.f32.mrb[0].mxu1 }
  0xf6   :  { %v675_v34 = vpop.f32.mrb[1].mxu0  ;;  %v699_v36 = vpop.f32.mrb[1].mxu1 }
  0xf7   :  { %v676_v37 = vadd.f32 %v675_v34, %v674_v32  ;;  %v700_v38 = vadd.f32 %v699_v36, %v698_v33  ;;  %v677_v39 = vpop.f32.mrb[2].mxu0  ;;  %v701_v40 = vpop.f32.mrb[2].mxu1 }
  0xf8   :  { %v678_v41 = vpop.f32.mrb[3].mxu0  ;;  %v702_v42 = vpop.f32.mrb[3].mxu1 }
  0xf9   :  { %v430_v43 = vadd.f32 %v676_v37, %v897_v35  ;;  %v438_v44 = vadd.f32 %v700_v38, %v897_v35  ;;  %v679_v45 = vadd.f32 %v678_v41, %v677_v39  ;;  %v703_v46 = vadd.f32 %v702_v42, %v701_v40 }
  0xfb   :  { %v431_v47 = vadd.f32 %v679_v45, %v897_v35  ;;  %v439_v48 = vadd.f32 %v703_v46, %v897_v35  ;;  %v446_v49 = vmax.f32 %v430_v43, 0.0  ;;  %v454_v50 = vmax.f32 %v438_v44, 0.0 }
  0xfd   :  { %v447_v51 = vmax.f32 %v431_v47, 0.0  ;;  %v455_v52 = vmax.f32 %v439_v48, 0.0  ;;  %v680_v53 = vpop.f32.mrb[4].mxu0  ;;  %v704_v54 = vpop.f32.mrb[4].mxu1 }
  0xfe   :  { %v681_v55 = vpop.f32.mrb[5].mxu0  ;;  %v705_v56 = vpop.f32.mrb[5].mxu1 }
  0xff   :  { %v614_v57 = vpack.c.bf16 %v447_v51, %v446_v49  ;;  %v634_v58 = vpack.c.bf16 %v455_v52, %v454_v50  ;;  %v682_v59 = vadd.f32 %v681_v55, %v680_v53  ;;  %v706_v60 = vadd.f32 %v705_v56, %v704_v54  ;;  %v683_v61 = vpop.f32.mrb[6].mxu0  ;;  %v707_v62 = vpop.f32.mrb[6].mxu1 }
 0x100   :  { %v684_v63 = vpop.f32.mrb[7].mxu0  ;;  %v708_v0 = vpop.f32.mrb[7].mxu1 }
 0x101   :  { %615 = vst [vmem:[%s942_s3] sm:$0xff] %v614_v57   ;;  %654 = vst [vmem:[%s942_s3 + $0x20] sm:$0xff] %v634_v58   ;;  %v432_v1 = vadd.f32 %v682_v59, %v897_v35  ;;  %v440_v2 = vadd.f32 %v706_v60, %v897_v35  ;;  %v685_v3 = vadd.f32 %v684_v63, %v683_v61 }
 0x102   :  { %v709_v4 = vadd.f32 %v708_v0, %v707_v62 }
 0x103   :  { %v433_v5 = vadd.f32 %v685_v3, %v897_v35  ;;  %v448_v7 = vmax.f32 %v432_v1, 0.0  ;;  %v456_v8 = vmax.f32 %v440_v2, 0.0 }
 0x104   :  { %v441_v6 = vadd.f32 %v709_v4, %v897_v35 }
 0x105   :  { %v449_v9 = vmax.f32 %v433_v5, 0.0  ;;  %v686_v11 = vpop.f32.mrb[8].mxu0  ;;  %v710_v12 = vpop.f32.mrb[8].mxu1 }
 0x106   :  { %v457_v10 = vmax.f32 %v441_v6, 0.0  ;;  %v687_v13 = vpop.f32.mrb[9].mxu0  ;;  %v711_v14 = vpop.f32.mrb[9].mxu1 }
 0x107   :  { %v619_v15 = vpack.c.bf16 %v449_v9, %v448_v7  ;;  %v688_v17 = vadd.f32 %v687_v13, %v686_v11  ;;  %v712_v18 = vadd.f32 %v711_v14, %v710_v12  ;;  %v689_v19 = vpop.f32.mrb[10].mxu0  ;;  %v713_v20 = vpop.f32.mrb[10].mxu1 }
 0x108   :  { %v639_v16 = vpack.c.bf16 %v457_v10, %v456_v8  ;;  %v690_v21 = vpop.f32.mrb[11].mxu0  ;;  %v714_v22 = vpop.f32.mrb[11].mxu1 }
 0x109   :  { %651 = vst [vmem:[%s942_s3 + $0x8] sm:$0xff] %v619_v15   ;;  %v434_v23 = vadd.f32 %v688_v17, %v897_v35  ;;  %v442_v24 = vadd.f32 %v712_v18, %v897_v35  ;;  %v691_v25 = vadd.f32 %v690_v21, %v689_v19  ;;  %v715_v26 = vadd.f32 %v714_v22, %v713_v20 }
 0x10a   :  { %655 = vst [vmem:[%s942_s3 + $0x28] sm:$0xff] %v639_v16  }
 0x10b   :  { %v435_v27 = vadd.f32 %v691_v25, %v897_v35  ;;  %v443_v28 = vadd.f32 %v715_v26, %v897_v35  ;;  %v450_v29 = vmax.f32 %v434_v23, 0.0  ;;  %v458_v30 = vmax.f32 %v442_v24, 0.0 }
 0x10d   :  { %v451_v31 = vmax.f32 %v435_v27, 0.0  ;;  %v459_v32 = vmax.f32 %v443_v28, 0.0  ;;  %v692_v33 = vpop.f32.mrb[12].mxu0  ;;  %v716_v34 = vpop.f32.mrb[12].mxu1 }
 0x10e   :  { %v693_v36 = vpop.f32.mrb[13].mxu0  ;;  %v717_v37 = vpop.f32.mrb[13].mxu1 }
 0x10f   :  { %v624_v38 = vpack.c.bf16 %v451_v31, %v450_v29  ;;  %v644_v39 = vpack.c.bf16 %v459_v32, %v458_v30  ;;  %v694_v40 = vadd.f32 %v693_v36, %v692_v33  ;;  %v718_v41 = vadd.f32 %v717_v37, %v716_v34  ;;  %v695_v42 = vpop.f32.mrb[14].mxu0  ;;  %v719_v43 = vpop.f32.mrb[14].mxu1 }
 0x110   :  { %v696_v44 = vpop.f32.mrb[15].mxu0  ;;  %v720_v45 = vpop.f32.mrb[15].mxu1 }
 0x111   :  { %652 = vst [vmem:[%s942_s3 + $0x10] sm:$0xff] %v624_v38   ;;  %656 = vst [vmem:[%s942_s3 + $0x30] sm:$0xff] %v644_v39   ;;  %v436_v46 = vadd.f32 %v694_v40, %v897_v35  ;;  %v444_v47 = vadd.f32 %v718_v41, %v897_v35  ;;  %v697_v48 = vadd.f32 %v696_v44, %v695_v42 }
 0x112   :  { %v721_v49 = vadd.f32 %v720_v45, %v719_v43 }
 0x113   :  { %v437_v50 = vadd.f32 %v697_v48, %v897_v35  ;;  %v452_v52 = vmax.f32 %v436_v46, 0.0  ;;  %v460_v53 = vmax.f32 %v444_v47, 0.0 }
 0x114   :  { %v445_v51 = vadd.f32 %v721_v49, %v897_v35 }
 0x115   :  { %v453_v54 = vmax.f32 %v437_v50, 0.0 }
 0x116   :  { %v461_v55 = vmax.f32 %v445_v51, 0.0 }
 0x117   :  { %v629_v56 = vpack.c.bf16 %v453_v54, %v452_v52 }
 0x118   :  { %v649_v57 = vpack.c.bf16 %v461_v55, %v460_v53 }
 0x119   :  { %653 = vst [vmem:[%s942_s3 + $0x18] sm:$0xff] %v629_v56  }
 0x11a   :  { %657 = vst [vmem:[%s942_s3 + $0x38] sm:$0xff] %v649_v57  }

// kernel: resnet50_forward.56
= control target key start
LH: loop header
LB: loop body
LE: loop exit
PB: predicated region body
PF: predicated region fallthrough
CT: control target
= control target key end

     0   :  { %s339_s1 = inlined_call_operand.vmem [shape: bf16[128,128], index: 1, kind: input, shape index: {}]   ;;  %s340_s0 = inlined_call_operand.vmem [shape: bf16[32,128], index: 0, kind: input, shape index: {}]   ;;  %s341_s2 = inlined_call_operand.vmem [shape: f32[1,128], index: 2, kind: input, shape index: {}]   ;;  %s342_s3 = inlined_call_operand.vmem [shape: bf16[32,128], index: 3, kind: output, shape index: {}]  }
   0x1   :  { %v270_v0 = vld [vmem:[%s339_s1] sm:$0xff]   ;;  %v271_v1 = vld [vmem:[%s339_s1 + $0x8] sm:$0xff]   ;;  %v272_v2 = vld [vmem:[%s339_s1 + $0x10] sm:$0xff]  }
   0x2   :  { %250 = vmatprep.subr.bf16.mxu0 %v270_v0  ;;  %v273_v3 = vld [vmem:[%s339_s1 + $0x18] sm:$0xff]   ;;  %v278_v4 = vld [vmem:[%s340_s0] sm:$0xff]   ;;  %v275_v6 = vld [vmem:[%s339_s1 + $0x28] sm:$0xff]  }
   0x3   :  { %251 = vmatpush3.bf16.msra.mxu0 %v270_v0  ;;  %266 = vmatprep.mubr.bf16.mxu0 %v278_v4  ;;  %v274_v5 = vld [vmem:[%s339_s1 + $0x20] sm:$0xff]   ;;  %v276_v7 = vld [vmem:[%s339_s1 + $0x30] sm:$0xff]   ;;  %v277_v8 = vld [vmem:[%s339_s1 + $0x38] sm:$0xff]  }
   0x4   :  { %252 = vmatprep.subr.bf16.mxu0 %v271_v1  ;;  %v279_v9 = vld [vmem:[%s340_s0 + $0x8] sm:$0xff]   ;;  %v220_v10 = vld [vmem:[%s341_s2] ss:$0 sm:$0xff] }
   0x7   :  { %253 = vmatpush3.bf16.msra.mxu0 %v271_v1 }
   0x8   :  { %254 = vmatprep.subr.bf16.mxu0 %v272_v2 }
   0xb   :  { %255 = vmatpush3.bf16.msra.mxu0 %v272_v2 }
   0xc   :  { %256 = vmatprep.subr.bf16.mxu0 %v273_v3 }
   0xf   :  { %257 = vmatpush3.bf16.msra.mxu0 %v273_v3 }
  0x10   :  { %258 = vmatprep.subr.bf16.mxu0 %v274_v5 }
  0x13   :  { %259 = vmatpush3.bf16.msra.mxu0 %v274_v5 }
  0x14   :  { %260 = vmatprep.subr.bf16.mxu0 %v275_v6 }
  0x17   :  { %261 = vmatpush3.bf16.msra.mxu0 %v275_v6 }
  0x18   :  { %262 = vmatprep.subr.bf16.mxu0 %v276_v7 }
  0x1b   :  { %263 = vmatpush3.bf16.msra.mxu0 %v276_v7 }
  0x1c   :  { %264 = vmatprep.subr.bf16.mxu0 %v277_v8 }
  0x1f   :  { %265 = vmatpush3.bf16.msra.mxu0 %v277_v8 }
  0x22   :  { %267 = vmatmul.mubr.bf16.vlgmr.msra.gmra.mrb[0].mxu0 %v279_v9 }
  0xf5   :  { %v268_v11 = vpop.f32.mrb[0].mxu0 }
  0xf6   :  { %v180_v12 = vadd.f32 %v268_v11, %v220_v10  ;;  %v141_v13 = vpop.f32.mrb[1].mxu0 }
  0xf7   :  { %v178_v14 = vadd.f32 %v220_v10, %v141_v13  ;;  %v269_v15 = vpop.f32.mrb[2].mxu0 }
  0xf8   :  { %v181_v16 = vadd.f32 %v269_v15, %v220_v10  ;;  %v144_v17 = vpop.f32.mrb[3].mxu0  ;;  %v184_v19 = vmax.f32 %v180_v12, 0.0 }
  0xf9   :  { %v179_v18 = vadd.f32 %v220_v10, %v144_v17  ;;  %v182_v21 = vmax.f32 %v178_v14, 0.0 }
  0xfa   :  { %v185_v20 = vmax.f32 %v181_v16, 0.0 }
  0xfb   :  { %v183_v22 = vmax.f32 %v179_v18, 0.0 }
  0xfc   :  { %v237_v23 = vpack.c.bf16 %v185_v20, %v184_v19 }
  0xfd   :  { %v232_v24 = vpack.c.bf16 %v183_v22, %v182_v21 }
  0xfe   :  { %239 = vst [vmem:[%s342_s3 + $0x8] sm:$0xff] %v237_v23  }
  0xff   :  { %233 = vst [vmem:[%s342_s3] sm:$0xff] %v232_v24  }

// kernel: resnet50_forward.57
= control target key start
LH: loop header
LB: loop body
LE: loop exit
PB: predicated region body
PF: predicated region fallthrough
CT: control target
= control target key end

     0   :  { %s796_s12 = smov 0   ;;  %s798_s13 = smov 0   ;;  %s889_s0 = inlined_call_operand.vmem [shape: bf16[32,640], index: 0, kind: input, shape index: {}]   ;;  %s890_s1 = inlined_call_operand.vmem [shape: bf16[640,128], index: 1, kind: input, shape index: {}]   ;;  %s891_s2 = inlined_call_operand.vmem [shape: f32[1,128], index: 2, kind: input, shape index: {}]   ;;  %s892_s3 = inlined_call_operand.vmem [shape: bf16[32,128], index: 3, kind: output, shape index: {}]  }
   0x1   :  { %s800_s14 = smov 0   ;;  %s802_s15 = smov 0  }
   0x2   :  { %s804_s16 = smov 0  }
   0x3 LB: > { %s25_s17 = sadd.s32 1, %s769_s15  ;;  %p48_p1 = scmp.ne.s32.totalorder %s761_s13, %s757_s12  ;;  %s773_s16 = sphi %s804_s16, %s13_s16   ;;  %s769_s15 = sphi %s802_s15, %s896_s15   ;;  %s765_s14 = sphi %s800_s14, %s895_s14   ;;  %s761_s13 = sphi %s798_s13, %s894_s13   ;;  %s757_s12 = sphi %s796_s12, %s893_s12  }
   0x4   : > { %p26_p0 = scmp.ge.s32.totalorder %s25_s17, 5  ;;  %p49_p2 = scmp.eq.s32.totalorder %s773_s16, 0 }
   0x5   : > { %s41_s19 = sadd.s32 1, %s761_s13  ;;  %p611_p5 = scmp.ge.s32.totalorder %s773_s16, 5 }
   0x6   : > { %s898_s17 = smov (%p26_p0, %s25_s17), 0  ;;  %p50_p3 = por %p49_p2, %p48_p1 }
   0x7   : > { %s37_s18 = ssub.s32 %s769_s15, %s898_s17  ;;  %162 = sbr.rel (%p611_p5) target bundleno = 21 (0x15), region = 20 }
   0x8   : > { %p39_p4 = scmp.eq.s32.totalorder %s37_s18, 0 }
   0xa   : > { %s831_s20 = scalar_select %p39_p4, %s761_s13, %s41_s19  }
   0xe   : > { %165 = sbr.rel (!%p50_p3) target bundleno = 21 (0x15), region = 24  ;;  %s167_s21 = sand.u32 (%p50_p3), 1, %s761_s13  }
   0xf   : > { %s613_s22 = sshll.u32 (%p50_p3), %s769_s15, 2  ;;  %s612_s23 = sshll.u32 (%p50_p3), %s167_s21, 4 }
  0x10   : > { %s174_s26 = scalar_lea.vmem (%p50_p3), %s889_s0, %s613_s22  ;;  %s169_s27 = scalar_lea.vmem (%p50_p3), [#allocation3], %s612_s23 }
  0x11   : > { %v190_v0 = vld [vmem:[%s174_s26] sm:$0xf] (%p50_p3)  ;;  %v192_v1 = vld [vmem:[%s174_s26 + $0x14] sm:$0xf] (%p50_p3)  ;;  %v194_v2 = vld [vmem:[%s174_s26 + $0x28] sm:$0xf] (%p50_p3) }
  0x12   : > { %191 = vst [vmem:[%s169_s27] sm:$0xf] (%p50_p3), %v190_v0  ;;  %193 = vst [vmem:[%s169_s27 + $0x4] sm:$0xf] (%p50_p3), %v192_v1  ;;  %v196_v3 = vld [vmem:[%s174_s26 + $0x3c] sm:$0xf] (%p50_p3) }
  0x13   : > { %195 = vst [vmem:[%s169_s27 + $0x8] sm:$0xf] (%p50_p3), %v194_v2  ;;  %197 = vst [vmem:[%s169_s27 + $0xc] sm:$0xf] (%p50_p3), %v196_v3 }
  0x15 PF: > { %p614_p6 = scmp.ge.s32.totalorder %s773_s16, 1  ;;  %p239_p7 = scmp.lt.s32.totalorder %s773_s16, 6 }
  0x17   : > { %p240_p8 = pnand %p614_p6, %p239_p7 }
  0x18   : > { %s246_s28 = sand.u32 (!%p240_p8), 1, %s757_s12   ;;  %s616_s29 = sshll.u32 (!%p240_p8), %s765_s14, 4 }
  0x19   : > { %243 = sbr.rel (%p240_p8) target bundleno = 304 (0x130), region = 69  ;;  %s843_s30 = sshll.u32 (!%p240_p8), %s246_s28, 4 }
  0x1a   : > { %p285_p9 = scmp.lt.s32.totalorder (!%p240_p8), %s616_s29, 79  ;;  %s248_s8 = scalar_lea.vmem (!%p240_p8), [#allocation3], %s843_s30 }
  0x1b   : > { %p618_p10 = scmp.ne.s32.totalorder (!%p240_p8), %s765_s14, 0 }
  0x20   : > { %s900_s29 = smov (!%p285_p9, %s616_s29), 79  ;;  %309 = sbr.rel (%p618_p10) target bundleno = 39 (0x27), region = 77 }
  0x21   : > { %s617_s4 = sshll.u32 %s900_s29, 2  ;;  %v775_v4 = vmov (!%p618_p10), 0.0  }
  0x22   : > { %s848_s7 = scalar_lea.vmem %s890_s1, %s617_s4  ;;  %310 = vst [vmem:[#allocation2] sm:$0xff] (!%p618_p10), %v775_v4  ;;  %311 = vst [vmem:[#allocation2 + $0x8] sm:$0xff] (!%p618_p10), %v775_v4 }
  0x23   : > { %312 = vst [vmem:[#allocation2 + $0x10] sm:$0xff] (!%p618_p10), %v775_v4  ;;  %313 = vst [vmem:[#allocation2 + $0x18] sm:$0xff] (!%p618_p10), %v775_v4 }
  0x27 PF: > { %v725_v5 = vld [vmem:[%s848_s7] sm:$0xff]   ;;  %v726_v6 = vld [vmem:[%s848_s7 + $0x8] sm:$0xff]   ;;  %v727_v7 = vld [vmem:[%s848_s7 + $0x10] sm:$0xff]   ;;  %p629_p11 = scmp.ne.s32.totalorder %s765_s14, 4 }
  0x28   : > { %664 = vmatprep.subr.bf16.mxu0 %v725_v5  ;;  %v728_v8 = vld [vmem:[%s848_s7 + $0x18] sm:$0xff]   ;;  %v733_v9 = vld [vmem:[%s248_s8] sm:$0xff]   ;;  %v730_v11 = vld [vmem:[%s848_s7 + $0x28] sm:$0xff]  }
  0x29   : > { %665 = vmatpush3.bf16.msra.mxu0 %v725_v5  ;;  %680 = vmatprep.mubr.bf16.mxu0 %v733_v9  ;;  %v729_v10 = vld [vmem:[%s848_s7 + $0x20] sm:$0xff]   ;;  %v731_v12 = vld [vmem:[%s848_s7 + $0x30] sm:$0xff]   ;;  %v732_v13 = vld [vmem:[%s848_s7 + $0x38] sm:$0xff]  }
  0x2a   : > { %666 = vmatprep.subr.bf16.mxu0 %v726_v6  ;;  %v734_v14 = vld [vmem:[%s248_s8 + $0x8] sm:$0xff]   ;;  %v316_v15 = vld [vmem:[#allocation2 + $0x10] sm:$0xff]  ;;  %v314_v16 = vld [vmem:[#allocation2] sm:$0xff] }
  0x2b   : > { %v317_v18 = vld [vmem:[#allocation2 + $0x18] sm:$0xff]  ;;  %v315_v21 = vld [vmem:[#allocation2 + $0x8] sm:$0xff]  ;;  %v630_v29 = vld [vmem:[%s891_s2] ss:$0 sm:$0xff] (!%p629_p11) }
  0x2d   : > { %667 = vmatpush3.bf16.msra.mxu0 %v726_v6 }
  0x2e   : > { %668 = vmatprep.subr.bf16.mxu0 %v727_v7 }
  0x31   : > { %669 = vmatpush3.bf16.msra.mxu0 %v727_v7 }
  0x32   : > { %670 = vmatprep.subr.bf16.mxu0 %v728_v8 }
  0x35   : > { %671 = vmatpush3.bf16.msra.mxu0 %v728_v8 }
  0x36   : > { %672 = vmatprep.subr.bf16.mxu0 %v729_v10 }
  0x39   : > { %673 = vmatpush3.bf16.msra.mxu0 %v729_v10 }
  0x3a   : > { %674 = vmatprep.subr.bf16.mxu0 %v730_v11 }
  0x3d   : > { %675 = vmatpush3.bf16.msra.mxu0 %v730_v11 }
  0x3e   : > { %676 = vmatprep.subr.bf16.mxu0 %v731_v12 }
  0x41   : > { %677 = vmatpush3.bf16.msra.mxu0 %v731_v12 }
  0x42   : > { %678 = vmatprep.subr.bf16.mxu0 %v732_v13 }
  0x45   : > { %679 = vmatpush3.bf16.msra.mxu0 %v732_v13 }
  0x48   : > { %681 = vmatmul.mubr.bf16.vlgmr.msra.gmra.mrb[0].mxu0 %v734_v14 }
 0x11b   : > { %v682_v17 = vpop.f32.mrb[0].mxu0  ;;  %458 = sbr.rel (%p629_p11) target bundleno = 304 (0x130), region = 81 }
 0x11c   : > { %v449_v19 = vadd.f32 %v682_v17, %v316_v15  ;;  %v432_v20 = vpop.f32.mrb[1].mxu0 }
 0x11d   : > { %v447_v22 = vadd.f32 %v432_v20, %v314_v16  ;;  %v683_v23 = vpop.f32.mrb[2].mxu0 }
 0x11e   : > { %453 = vst [vmem:[#allocation2 + $0x10] sm:$0xff] %v449_v19  ;;  %v450_v24 = vadd.f32 %v683_v23, %v317_v18  ;;  %v435_v25 = vpop.f32.mrb[3].mxu0 }
 0x11f   : > { %451 = vst [vmem:[#allocation2] sm:$0xff] %v447_v22  ;;  %v448_v26 = vadd.f32 %v435_v25, %v315_v21 }
 0x120   : > { %454 = vst [vmem:[#allocation2 + $0x18] sm:$0xff] %v450_v24 }
 0x121   : > { %452 = vst [vmem:[#allocation2 + $0x8] sm:$0xff] %v448_v26 }
 0x125   : > { %v461_v32 = vld [vmem:[#allocation2 + $0x10] sm:$0xff] }
 0x126   : > { %v459_v27 = vld [vmem:[#allocation2] sm:$0xff]  ;;  %v472_v34 = vadd.f32 %v630_v29, %v461_v32 }
 0x127   : > { %v470_v30 = vadd.f32 %v630_v29, %v459_v27  ;;  %v462_v33 = vld [vmem:[#allocation2 + $0x18] sm:$0xff] }
 0x128   : > { %v460_v28 = vld [vmem:[#allocation2 + $0x8] sm:$0xff]  ;;  %v473_v35 = vadd.f32 %v630_v29, %v462_v33  ;;  %v476_v38 = vmax.f32 %v472_v34, 0.0 }
 0x129   : > { %v471_v31 = vadd.f32 %v630_v29, %v460_v28  ;;  %v474_v36 = vmax.f32 %v470_v30, 0.0 }
 0x12a   : > { %v477_v39 = vmax.f32 %v473_v35, 0.0 }
 0x12b   : > { %v475_v37 = vmax.f32 %v471_v31, 0.0 }
 0x12c   : > { %v651_v41 = vpack.c.bf16 %v477_v39, %v476_v38 }
 0x12d   : > { %v646_v40 = vpack.c.bf16 %v475_v37, %v474_v36 }
 0x12e   : > { %653 = vst [vmem:[%s892_s3 + $0x8] sm:$0xff] %v651_v41  }
 0x12f   : > { %647 = vst [vmem:[%s892_s3] sm:$0xff] %v646_v40  }
 0x130 PF: > { %s13_s16 = sadd.s32 1, %s773_s16   ;;  %s893_s12 = smov %s761_s13 }
 0x131   : > { %p10_p12 = scmp.ge.s32.totalorder %s13_s16, 7   ;;  %s894_s13 = smov %s831_s20 }
 0x132   : > { %s895_s14 = smov %s769_s15  ;;  %s896_s15 = smov %s898_s17 }
 0x133   :  { %12 = sbr.rel (!%p10_p12) target bundleno = 3 (0x3), region = 122 }

// kernel: resnet50_forward.58
= control target key start
LH: loop header
LB: loop body
LE: loop exit
PB: predicated region body
PF: predicated region fallthrough
CT: control target
= control target key end

     0   :  { %v348_v1 = vmov 0   ;;  %v229_v19 = vlaneseq  ;;  %s438_s1 = inlined_call_operand.vmem [shape: bf16[128,256], index: 1, kind: input, shape index: {}]   ;;  %s439_s0 = inlined_call_operand.vmem [shape: bf16[32,128], index: 0, kind: input, shape index: {}]   ;;  %s440_s2 = inlined_call_operand.vmem [shape: f32[1,256], index: 2, kind: input, shape index: {}]   ;;  %s441_s3 = inlined_call_operand.vmem [shape: bf16[32,256], index: 3, kind: output, shape index: {}]  }
   0x1   :  { %v322_v0 = vld [vmem:[%s438_s1 + $0x4] ss:$8 sps:$4 sm:$0xff]   ;;  %179 = vmatprep.mubr.bf16.mxu0 %v348_v1  ;;  %189 = vmatprep.mubr.bf16.mxu1 %v348_v1  ;;  %v324_v2 = vld [vmem:[%s438_s1] ss:$8 sps:$4 sm:$0xff]   ;;  %v325_v3 = vld [vmem:[%s438_s1 + $0x14] ss:$8 sps:$4 sm:$0xff]  }
   0x2   :  { %147 = vmatprep.subr.bf16.mxu0 %v322_v0  ;;  %305 = vmatprep.subr.bf16.mxu1 %v322_v0  ;;  %v327_v4 = vld [vmem:[%s438_s1 + $0x10] ss:$8 sps:$4 sm:$0xff]   ;;  %v328_v5 = vld [vmem:[%s438_s1 + $0x24] ss:$8 sps:$4 sm:$0xff]   ;;  %v330_v6 = vld [vmem:[%s438_s1 + $0x20] ss:$8 sps:$4 sm:$0xff]  }
   0x3   :  { %148 = vmatpush1.bf16.msra.mxu0 %v324_v2  ;;  %313 = vmatpush1.bf16.msra.mxu1 %v324_v2  ;;  %v331_v7 = vld [vmem:[%s438_s1 + $0x34] ss:$8 sps:$4 sm:$0xff]   ;;  %v333_v8 = vld [vmem:[%s438_s1 + $0x30] ss:$8 sps:$4 sm:$0xff]   ;;  %v334_v9 = vld [vmem:[%s438_s1 + $0x44] ss:$8 sps:$4 sm:$0xff]  }
   0x4   :  { %149 = vmatprep.subr.bf16.mxu0 %v325_v3  ;;  %306 = vmatprep.subr.bf16.mxu1 %v325_v3  ;;  %v336_v10 = vld [vmem:[%s438_s1 + $0x40] ss:$8 sps:$4 sm:$0xff]   ;;  %v337_v11 = vld [vmem:[%s438_s1 + $0x54] ss:$8 sps:$4 sm:$0xff]   ;;  %v339_v12 = vld [vmem:[%s438_s1 + $0x50] ss:$8 sps:$4 sm:$0xff]  }
   0x5   :  { %v340_v13 = vld [vmem:[%s438_s1 + $0x64] ss:$8 sps:$4 sm:$0xff]   ;;  %v342_v14 = vld [vmem:[%s438_s1 + $0x60] ss:$8 sps:$4 sm:$0xff]   ;;  %v343_v15 = vld [vmem:[%s438_s1 + $0x74] ss:$8 sps:$4 sm:$0xff]  }
   0x6   :  { %v345_v16 = vld [vmem:[%s438_s1 + $0x70] ss:$8 sps:$4 sm:$0xff]   ;;  %v346_v17 = vld [vmem:[%s439_s0] sm:$0xff]   ;;  %v347_v18 = vld [vmem:[%s439_s0 + $0x8] sm:$0xff]   ;;  %v230_v20 = vshrl.u32 %v229_v19, 7 }
   0x7   :  { %150 = vmatpush1.bf16.msra.mxu0 %v327_v4  ;;  %314 = vmatpush1.bf16.msra.mxu1 %v327_v4  ;;  %v227_v22 = vld [vmem:[%s440_s2] sm:$0x3] }
   0x8   :  { %151 = vmatprep.subr.bf16.mxu0 %v328_v5  ;;  %307 = vmatprep.subr.bf16.mxu1 %v328_v5  ;;  %v231_v21 = vsub.s32 0, %v230_v20  ;;  %v235_v23 = vsub.s32 1, %v230_v20 }
   0xa   :  { %v232_v24 = vrot.slane %v227_v22, %v231_v21  ;;  %v236_v25 = vrot.slane %v227_v22, %v235_v23 }
   0xb   :  { %152 = vmatpush1.bf16.msra.mxu0 %v330_v6  ;;  %315 = vmatpush1.bf16.msra.mxu1 %v330_v6 }
   0xc   :  { %153 = vmatprep.subr.bf16.mxu0 %v331_v7  ;;  %308 = vmatprep.subr.bf16.mxu1 %v331_v7 }
   0xf   :  { %154 = vmatpush1.bf16.msra.mxu0 %v333_v8  ;;  %316 = vmatpush1.bf16.msra.mxu1 %v333_v8 }
  0x10   :  { %155 = vmatprep.subr.bf16.mxu0 %v334_v9  ;;  %309 = vmatprep.subr.bf16.mxu1 %v334_v9 }
  0x13   :  { %156 = vmatpush1.bf16.msra.mxu0 %v336_v10  ;;  %317 = vmatpush1.bf16.msra.mxu1 %v336_v10 }
  0x14   :  { %157 = vmatprep.subr.bf16.mxu0 %v337_v11  ;;  %310 = vmatprep.subr.bf16.mxu1 %v337_v11 }
  0x17   :  { %158 = vmatpush1.bf16.msra.mxu0 %v339_v12  ;;  %318 = vmatpush1.bf16.msra.mxu1 %v339_v12 }
  0x18   :  { %159 = vmatprep.subr.bf16.mxu0 %v340_v13  ;;  %311 = vmatprep.subr.bf16.mxu1 %v340_v13 }
  0x1b   :  { %160 = vmatpush1.bf16.msra.mxu0 %v342_v14  ;;  %319 = vmatpush1.bf16.msra.mxu1 %v342_v14 }
  0x1c   :  { %161 = vmatprep.subr.bf16.mxu0 %v343_v15  ;;  %312 = vmatprep.subr.bf16.mxu1 %v343_v15 }
  0x1f   :  { %162 = vmatpush1.bf16.msra.mxu0 %v345_v16  ;;  %320 = vmatpush1.bf16.msra.mxu1 %v345_v16 }
  0x22   :  { %180 = vmatmul.mubr.bf16.vlgmr.msra.gmra.mrb[0].mxu0 %v346_v17  ;;  %190 = vmatmul.mubr.bf16.vlgmr.msra.gmra.mrb[0].mxu1 %v347_v18 }
  0xf5   :  { %v181_v26 = vpop.f32.mrb[0].mxu0  ;;  %v191_v27 = vpop.f32.mrb[0].mxu1 }
  0xf6   :  { %v239_v28 = vadd.f32 %v232_v24, %v181_v26  ;;  %v243_v29 = vadd.f32 %v232_v24, %v191_v27  ;;  %v183_v30 = vpop.f32.mrb[1].mxu0  ;;  %v193_v31 = vpop.f32.mrb[1].mxu1 }
  0xf7   :  { %v240_v32 = vadd.f32 %v236_v25, %v183_v30  ;;  %v244_v33 = vadd.f32 %v236_v25, %v193_v31  ;;  %v185_v34 = vpop.f32.mrb[2].mxu0  ;;  %v195_v35 = vpop.f32.mrb[2].mxu1 }
  0xf8   :  { %v241_v36 = vadd.f32 %v232_v24, %v185_v34  ;;  %v245_v37 = vadd.f32 %v232_v24, %v195_v35  ;;  %v187_v38 = vpop.f32.mrb[3].mxu0  ;;  %v197_v39 = vpop.f32.mrb[3].mxu1 }
  0xf9   :  { %v301_v40 = vpack.c.bf16 %v240_v32, %v239_v28  ;;  %v303_v41 = vpack.c.bf16 %v244_v33, %v243_v29  ;;  %v242_v42 = vadd.f32 %v236_v25, %v187_v38  ;;  %v246_v43 = vadd.f32 %v236_v25, %v197_v39 }
  0xfb   :  { %271 = vst [vmem:[%s441_s3] sm:$0xff] %v301_v40  ;;  %273 = vst [vmem:[%s441_s3 + $0x10] sm:$0xff] %v303_v41  ;;  %v302_v44 = vpack.c.bf16 %v242_v42, %v241_v36  ;;  %v304_v45 = vpack.c.bf16 %v246_v43, %v245_v37 }
  0xfd   :  { %272 = vst [vmem:[%s441_s3 + $0x8] sm:$0xff] %v302_v44  ;;  %274 = vst [vmem:[%s441_s3 + $0x18] sm:$0xff] %v304_v45 }

// kernel: resnet50_forward.60
= control target key start
LH: loop header
LB: loop body
LE: loop exit
PB: predicated region body
PF: predicated region fallthrough
CT: control target
= control target key end

     0   :  { %s477_s1 = inlined_call_operand.vmem [shape: bf16[256,128], index: 1, kind: input, shape index: {}]   ;;  %s478_s0 = inlined_call_operand.vmem [shape: bf16[32,256], index: 0, kind: input, shape index: {}]   ;;  %s479_s2 = inlined_call_operand.vmem [shape: f32[1,128], index: 2, kind: input, shape index: {}]   ;;  %s480_s3 = inlined_call_operand.vmem [shape: bf16[32,128], index: 3, kind: output, shape index: {}]  }
   0x1   :  { %v366_v0 = vld [vmem:[%s477_s1 + $0x40] sm:$0xff]   ;;  %v368_v2 = vld [vmem:[%s477_s1 + $0x48] sm:$0xff]   ;;  %v370_v4 = vld [vmem:[%s477_s1 + $0x50] sm:$0xff]  }
   0x2   :  { %v367_v1 = vld [vmem:[%s477_s1] sm:$0xff]   ;;  %322 = vmatprep.subr.bf16.mxu0 %v366_v0  ;;  %350 = vmatprep.subr.bf16.mxu1 %v366_v0  ;;  %v369_v3 = vld [vmem:[%s477_s1 + $0x8] sm:$0xff]   ;;  %v371_v5 = vld [vmem:[%s477_s1 + $0x10] sm:$0xff]  }
   0x3   :  { %323 = vmatpush3.bf16.msra.mxu0 %v367_v1  ;;  %358 = vmatpush3.bf16.msra.mxu1 %v367_v1  ;;  %v372_v6 = vld [vmem:[%s477_s1 + $0x58] sm:$0xff]   ;;  %v374_v8 = vld [vmem:[%s477_s1 + $0x60] sm:$0xff]   ;;  %v376_v10 = vld [vmem:[%s477_s1 + $0x68] sm:$0xff]  }
   0x4   :  { %324 = vmatprep.subr.bf16.mxu0 %v368_v2  ;;  %351 = vmatprep.subr.bf16.mxu1 %v368_v2  ;;  %v373_v7 = vld [vmem:[%s477_s1 + $0x18] sm:$0xff]   ;;  %v375_v9 = vld [vmem:[%s477_s1 + $0x20] sm:$0xff]   ;;  %v377_v13 = vld [vmem:[%s477_s1 + $0x28] sm:$0xff]  }
   0x5   :  { %v384_v11 = vld [vmem:[%s478_s0 + $0x4] ss:$8 sps:$4 sm:$0xff]   ;;  %v387_v12 = vld [vmem:[%s478_s0 + $0x14] ss:$8 sps:$4 sm:$0xff]   ;;  %v382_v18 = vld [vmem:[%s478_s0] ss:$8 sps:$4 sm:$0xff]  }
   0x6   :  { %v378_v14 = vld [vmem:[%s477_s1 + $0x70] sm:$0xff]   ;;  %211 = vmatprep.mubr.bf16.mxu0 %v384_v11  ;;  %219 = vmatprep.mubr.bf16.mxu1 %v387_v12  ;;  %v380_v16 = vld [vmem:[%s477_s1 + $0x78] sm:$0xff]   ;;  %v302_v23 = vld [vmem:[%s479_s2] ss:$0 sm:$0xff] }
   0x7   :  { %325 = vmatpush3.bf16.msra.mxu0 %v369_v3  ;;  %359 = vmatpush3.bf16.msra.mxu1 %v369_v3  ;;  %v379_v15 = vld [vmem:[%s477_s1 + $0x30] sm:$0xff]   ;;  %v381_v17 = vld [vmem:[%s477_s1 + $0x38] sm:$0xff]  }
   0x8   :  { %326 = vmatprep.subr.bf16.mxu0 %v370_v4  ;;  %352 = vmatprep.subr.bf16.mxu1 %v370_v4  ;;  %v385_v19 = vld [vmem:[%s478_s0 + $0x10] ss:$8 sps:$4 sm:$0xff]  }
   0xb   :  { %327 = vmatpush3.bf16.msra.mxu0 %v371_v5  ;;  %360 = vmatpush3.bf16.msra.mxu1 %v371_v5 }
   0xc   :  { %328 = vmatprep.subr.bf16.mxu0 %v372_v6  ;;  %353 = vmatprep.subr.bf16.mxu1 %v372_v6 }
   0xf   :  { %329 = vmatpush3.bf16.msra.mxu0 %v373_v7  ;;  %361 = vmatpush3.bf16.msra.mxu1 %v373_v7 }
  0x10   :  { %330 = vmatprep.subr.bf16.mxu0 %v374_v8  ;;  %354 = vmatprep.subr.bf16.mxu1 %v374_v8 }
  0x13   :  { %331 = vmatpush3.bf16.msra.mxu0 %v375_v9  ;;  %362 = vmatpush3.bf16.msra.mxu1 %v375_v9 }
  0x14   :  { %332 = vmatprep.subr.bf16.mxu0 %v376_v10  ;;  %355 = vmatprep.subr.bf16.mxu1 %v376_v10 }
  0x17   :  { %333 = vmatpush3.bf16.msra.mxu0 %v377_v13  ;;  %363 = vmatpush3.bf16.msra.mxu1 %v377_v13 }
  0x18   :  { %334 = vmatprep.subr.bf16.mxu0 %v378_v14  ;;  %356 = vmatprep.subr.bf16.mxu1 %v378_v14 }
  0x1b   :  { %335 = vmatpush3.bf16.msra.mxu0 %v379_v15  ;;  %364 = vmatpush3.bf16.msra.mxu1 %v379_v15 }
  0x1c   :  { %336 = vmatprep.subr.bf16.mxu0 %v380_v16  ;;  %357 = vmatprep.subr.bf16.mxu1 %v380_v16 }
  0x1f   :  { %337 = vmatpush3.bf16.msra.mxu0 %v381_v17  ;;  %365 = vmatpush3.bf16.msra.mxu1 %v381_v17 }
  0x22   :  { %212 = vmatmul.mubr.bf16.vlgmr.msra.gmra.mrb[0].mxu0 %v382_v18  ;;  %220 = vmatmul.mubr.bf16.vlgmr.msra.gmra.mrb[0].mxu1 %v385_v19 }
  0xf5   :  { %v338_v20 = vpop.f32.mrb[0].mxu0  ;;  %v344_v21 = vpop.f32.mrb[0].mxu1 }
  0xf6   :  { %v339_v22 = vpop.f32.mrb[1].mxu0  ;;  %v345_v24 = vpop.f32.mrb[1].mxu1 }
  0xf7   :  { %v340_v25 = vadd.f32 %v339_v22, %v338_v20  ;;  %v346_v26 = vadd.f32 %v345_v24, %v344_v21  ;;  %v341_v27 = vpop.f32.mrb[2].mxu0  ;;  %v347_v28 = vpop.f32.mrb[2].mxu1 }
  0xf8   :  { %v342_v29 = vpop.f32.mrb[3].mxu0  ;;  %v348_v30 = vpop.f32.mrb[3].mxu1 }
  0xf9   :  { %v250_v31 = vadd.f32 %v340_v25, %v302_v23  ;;  %v252_v32 = vadd.f32 %v346_v26, %v302_v23  ;;  %v343_v33 = vadd.f32 %v342_v29, %v341_v27  ;;  %v349_v34 = vadd.f32 %v348_v30, %v347_v28 }
  0xfb   :  { %v251_v35 = vadd.f32 %v343_v33, %v302_v23  ;;  %v253_v36 = vadd.f32 %v349_v34, %v302_v23  ;;  %v254_v37 = vmax.f32 %v250_v31, 0.0  ;;  %v256_v38 = vmax.f32 %v252_v32, 0.0 }
  0xfd   :  { %v255_v39 = vmax.f32 %v251_v35, 0.0  ;;  %v257_v40 = vmax.f32 %v253_v36, 0.0 }
  0xff   :  { %v314_v41 = vpack.c.bf16 %v255_v39, %v254_v37  ;;  %v319_v42 = vpack.c.bf16 %v257_v40, %v256_v38 }
 0x101   :  { %315 = vst [vmem:[%s480_s3] sm:$0xff] %v314_v41   ;;  %321 = vst [vmem:[%s480_s3 + $0x8] sm:$0xff] %v319_v42  }

// kernel: resnet50_forward.59
= control target key start
LH: loop header
LB: loop body
LE: loop exit
PB: predicated region body
PF: predicated region fallthrough
CT: control target
= control target key end

     0   :  { %v379_v1 = vmov 0   ;;  %v232_v19 = vlaneseq  ;;  %s486_s1 = inlined_call_operand.vmem [shape: bf16[128,256], index: 1, kind: input, shape index: {}]   ;;  %s487_s0 = inlined_call_operand.vmem [shape: bf16[32,128], index: 0, kind: input, shape index: {}]   ;;  %s488_s2 = inlined_call_operand.vmem [shape: f32[1,256], index: 2, kind: input, shape index: {}]   ;;  %s489_s3 = inlined_call_operand.vmem [shape: bf16[32,256], index: 3, kind: input, shape index: {}]   ;;  %s490_s4 = inlined_call_operand.vmem [shape: bf16[32,256], index: 4, kind: output, shape index: {}]  }
   0x1   :  { %v353_v0 = vld [vmem:[%s486_s1 + $0x4] ss:$8 sps:$4 sm:$0xff]   ;;  %182 = vmatprep.mubr.bf16.mxu0 %v379_v1  ;;  %192 = vmatprep.mubr.bf16.mxu1 %v379_v1  ;;  %v355_v2 = vld [vmem:[%s486_s1] ss:$8 sps:$4 sm:$0xff]   ;;  %v356_v3 = vld [vmem:[%s486_s1 + $0x14] ss:$8 sps:$4 sm:$0xff]  }
   0x2   :  { %150 = vmatprep.subr.bf16.mxu0 %v353_v0  ;;  %336 = vmatprep.subr.bf16.mxu1 %v353_v0  ;;  %v358_v4 = vld [vmem:[%s486_s1 + $0x10] ss:$8 sps:$4 sm:$0xff]   ;;  %v359_v5 = vld [vmem:[%s486_s1 + $0x24] ss:$8 sps:$4 sm:$0xff]   ;;  %v361_v6 = vld [vmem:[%s486_s1 + $0x20] ss:$8 sps:$4 sm:$0xff]  }
   0x3   :  { %151 = vmatpush1.bf16.msra.mxu0 %v355_v2  ;;  %344 = vmatpush1.bf16.msra.mxu1 %v355_v2  ;;  %v362_v7 = vld [vmem:[%s486_s1 + $0x34] ss:$8 sps:$4 sm:$0xff]   ;;  %v364_v8 = vld [vmem:[%s486_s1 + $0x30] ss:$8 sps:$4 sm:$0xff]   ;;  %v365_v9 = vld [vmem:[%s486_s1 + $0x44] ss:$8 sps:$4 sm:$0xff]  }
   0x4   :  { %152 = vmatprep.subr.bf16.mxu0 %v356_v3  ;;  %337 = vmatprep.subr.bf16.mxu1 %v356_v3  ;;  %v367_v10 = vld [vmem:[%s486_s1 + $0x40] ss:$8 sps:$4 sm:$0xff]   ;;  %v368_v11 = vld [vmem:[%s486_s1 + $0x54] ss:$8 sps:$4 sm:$0xff]   ;;  %v370_v12 = vld [vmem:[%s486_s1 + $0x50] ss:$8 sps:$4 sm:$0xff]  }
   0x5   :  { %v371_v13 = vld [vmem:[%s486_s1 + $0x64] ss:$8 sps:$4 sm:$0xff]   ;;  %v373_v14 = vld [vmem:[%s486_s1 + $0x60] ss:$8 sps:$4 sm:$0xff]   ;;  %v374_v15 = vld [vmem:[%s486_s1 + $0x74] ss:$8 sps:$4 sm:$0xff]  }
   0x6   :  { %v376_v16 = vld [vmem:[%s486_s1 + $0x70] ss:$8 sps:$4 sm:$0xff]   ;;  %v377_v17 = vld [vmem:[%s487_s0] sm:$0xff]   ;;  %v378_v18 = vld [vmem:[%s487_s0 + $0x8] sm:$0xff]   ;;  %v233_v20 = vshrl.u32 %v232_v19, 7 }
   0x7   :  { %153 = vmatpush1.bf16.msra.mxu0 %v358_v4  ;;  %345 = vmatpush1.bf16.msra.mxu1 %v358_v4  ;;  %v230_v22 = vld [vmem:[%s488_s2] sm:$0x3]  ;;  %v252_v25 = vld [vmem:[%s489_s3 + $0x10] sm:$0xff]  ;;  %v251_v28 = vld [vmem:[%s489_s3 + $0x8] sm:$0xff] }
   0x8   :  { %154 = vmatprep.subr.bf16.mxu0 %v359_v5  ;;  %338 = vmatprep.subr.bf16.mxu1 %v359_v5  ;;  %v234_v21 = vsub.s32 0, %v233_v20  ;;  %v238_v23 = vsub.s32 1, %v233_v20  ;;  %v250_v24 = vld [vmem:[%s489_s3] sm:$0xff]  ;;  %v253_v29 = vld [vmem:[%s489_s3 + $0x18] sm:$0xff]  ;;  %v258_v31 = vunpack.c.l.bf16 %v252_v25  ;;  %v259_v35 = vunpack.c.h.bf16 %v252_v25 }
   0x9   :  { %v254_v30 = vunpack.c.l.bf16 %v250_v24  ;;  %v255_v34 = vunpack.c.h.bf16 %v250_v24  ;;  %v256_v40 = vunpack.c.l.bf16 %v251_v28  ;;  %v260_v41 = vunpack.c.l.bf16 %v253_v29 }
   0xa   :  { %v235_v26 = vrot.slane %v230_v22, %v234_v21  ;;  %v239_v27 = vrot.slane %v230_v22, %v238_v23  ;;  %v257_v46 = vunpack.c.h.bf16 %v251_v28  ;;  %v261_v47 = vunpack.c.h.bf16 %v253_v29 }
   0xb   :  { %155 = vmatpush1.bf16.msra.mxu0 %v361_v6  ;;  %346 = vmatpush1.bf16.msra.mxu1 %v361_v6 }
   0xc   :  { %156 = vmatprep.subr.bf16.mxu0 %v362_v7  ;;  %339 = vmatprep.subr.bf16.mxu1 %v362_v7 }
   0xf   :  { %157 = vmatpush1.bf16.msra.mxu0 %v364_v8  ;;  %347 = vmatpush1.bf16.msra.mxu1 %v364_v8 }
  0x10   :  { %158 = vmatprep.subr.bf16.mxu0 %v365_v9  ;;  %340 = vmatprep.subr.bf16.mxu1 %v365_v9 }
  0x13   :  { %159 = vmatpush1.bf16.msra.mxu0 %v367_v10  ;;  %348 = vmatpush1.bf16.msra.mxu1 %v367_v10 }
  0x14   :  { %160 = vmatprep.subr.bf16.mxu0 %v368_v11  ;;  %341 = vmatprep.subr.bf16.mxu1 %v368_v11 }
  0x17   :  { %161 = vmatpush1.bf16.msra.mxu0 %v370_v12  ;;  %349 = vmatpush1.bf16.msra.mxu1 %v370_v12 }
  0x18   :  { %162 = vmatprep.subr.bf16.mxu0 %v371_v13  ;;  %342 = vmatprep.subr.bf16.mxu1 %v371_v13 }
  0x1b   :  { %163 = vmatpush1.bf16.msra.mxu0 %v373_v14  ;;  %350 = vmatpush1.bf16.msra.mxu1 %v373_v14 }
  0x1c   :  { %164 = vmatprep.subr.bf16.mxu0 %v374_v15  ;;  %343 = vmatprep.subr.bf16.mxu1 %v374_v15 }
  0x1f   :  { %165 = vmatpush1.bf16.msra.mxu0 %v376_v16  ;;  %351 = vmatpush1.bf16.msra.mxu1 %v376_v16 }
  0x22   :  { %183 = vmatmul.mubr.bf16.vlgmr.msra.gmra.mrb[0].mxu0 %v377_v17  ;;  %193 = vmatmul.mubr.bf16.vlgmr.msra.gmra.mrb[0].mxu1 %v378_v18 }
  0xf5   :  { %v184_v32 = vpop.f32.mrb[0].mxu0  ;;  %v194_v33 = vpop.f32.mrb[0].mxu1 }
  0xf6   :  { %v242_v36 = vadd.f32 %v235_v26, %v184_v32  ;;  %v246_v37 = vadd.f32 %v235_v26, %v194_v33  ;;  %v186_v38 = vpop.f32.mrb[1].mxu0  ;;  %v196_v39 = vpop.f32.mrb[1].mxu1 }
  0xf7   :  { %v243_v42 = vadd.f32 %v239_v27, %v186_v38  ;;  %v247_v43 = vadd.f32 %v239_v27, %v196_v39  ;;  %v188_v44 = vpop.f32.mrb[2].mxu0  ;;  %v198_v45 = vpop.f32.mrb[2].mxu1 }
  0xf8   :  { %v262_v48 = vadd.f32 %v254_v30, %v242_v36  ;;  %v266_v49 = vadd.f32 %v258_v31, %v246_v37  ;;  %v244_v50 = vadd.f32 %v235_v26, %v188_v44  ;;  %v248_v51 = vadd.f32 %v235_v26, %v198_v45  ;;  %v190_v52 = vpop.f32.mrb[3].mxu0  ;;  %v200_v53 = vpop.f32.mrb[3].mxu1 }
  0xf9   :  { %v263_v54 = vadd.f32 %v255_v34, %v243_v42  ;;  %v267_v55 = vadd.f32 %v259_v35, %v247_v43  ;;  %v245_v56 = vadd.f32 %v239_v27, %v190_v52  ;;  %v249_v57 = vadd.f32 %v239_v27, %v200_v53 }
  0xfa   :  { %v270_v58 = vmax.f32 %v262_v48, 0.0  ;;  %v274_v59 = vmax.f32 %v266_v49, 0.0  ;;  %v264_v60 = vadd.f32 %v256_v40, %v244_v50  ;;  %v268_v61 = vadd.f32 %v260_v41, %v248_v51 }
  0xfb   :  { %v271_v62 = vmax.f32 %v263_v54, 0.0  ;;  %v275_v63 = vmax.f32 %v267_v55, 0.0  ;;  %v265_v0 = vadd.f32 %v257_v46, %v245_v56  ;;  %v269_v1 = vadd.f32 %v261_v47, %v249_v57 }
  0xfc   :  { %v272_v2 = vmax.f32 %v264_v60, 0.0  ;;  %v276_v3 = vmax.f32 %v268_v61, 0.0 }
  0xfd   :  { %v332_v4 = vpack.c.bf16 %v271_v62, %v270_v58  ;;  %v334_v5 = vpack.c.bf16 %v275_v63, %v274_v59  ;;  %v273_v6 = vmax.f32 %v265_v0, 0.0  ;;  %v277_v7 = vmax.f32 %v269_v1, 0.0 }
  0xff   :  { %302 = vst [vmem:[%s490_s4] sm:$0xff] %v332_v4  ;;  %304 = vst [vmem:[%s490_s4 + $0x10] sm:$0xff] %v334_v5  ;;  %v333_v8 = vpack.c.bf16 %v273_v6, %v272_v2  ;;  %v335_v9 = vpack.c.bf16 %v277_v7, %v276_v3 }
 0x101   :  { %303 = vst [vmem:[%s490_s4 + $0x8] sm:$0xff] %v333_v8  ;;  %305 = vst [vmem:[%s490_s4 + $0x18] sm:$0xff] %v335_v9 }

// kernel: resnet50_forward.67
= control target key start
LH: loop header
LB: loop body
LE: loop exit
PB: predicated region body
PF: predicated region fallthrough
CT: control target
= control target key end

     0   :  { %s979_s12 = smov 0   ;;  %s981_s13 = smov 0   ;;  %s1083_s0 = inlined_call_operand.vmem [shape: bf16[16,1152], index: 0, kind: input, shape index: {}]   ;;  %s1084_s1 = inlined_call_operand.vmem [shape: bf16[1152,128], index: 1, kind: input, shape index: {}]   ;;  %s1085_s2 = inlined_call_operand.vmem [shape: f32[1,128], index: 2, kind: input, shape index: {}]   ;;  %s1086_s3 = inlined_call_operand.vmem [shape: bf16[16,128], index: 3, kind: output, shape index: {}]  }
   0x1   :  { %s983_s14 = smov 0   ;;  %s985_s15 = smov 0  }
   0x2   :  { %s987_s16 = smov 0  }
   0x3 LB: > { %s25_s17 = sadd.s32 1, %s950_s15  ;;  %p48_p1 = scmp.ne.s32.totalorder %s942_s13, %s938_s12  ;;  %s954_s16 = sphi %s987_s16, %s13_s16   ;;  %s950_s15 = sphi %s985_s15, %s1090_s15   ;;  %s946_s14 = sphi %s983_s14, %s1089_s14   ;;  %s942_s13 = sphi %s981_s13, %s1088_s13   ;;  %s938_s12 = sphi %s979_s12, %s1087_s12  }
   0x4   : > { %p26_p0 = scmp.ge.s32.totalorder %s25_s17, 3  ;;  %p49_p2 = scmp.eq.s32.totalorder %s954_s16, 0 }
   0x5   : > { %s41_s19 = sadd.s32 1, %s942_s13  ;;  %p740_p5 = scmp.ge.s32.totalorder %s954_s16, 3 }
   0x6   : > { %s1092_s17 = smov (%p26_p0, %s25_s17), 0  ;;  %p50_p3 = por %p49_p2, %p48_p1 }
   0x7   : > { %s37_s18 = ssub.s32 %s950_s15, %s1092_s17  ;;  %162 = sbr.rel (%p740_p5) target bundleno = 21 (0x15), region = 20 }
   0x8   : > { %p39_p4 = scmp.eq.s32.totalorder %s37_s18, 0 }
   0xa   : > { %s1014_s20 = scalar_select %p39_p4, %s942_s13, %s41_s19  }
   0xe   : > { %165 = sbr.rel (!%p50_p3) target bundleno = 21 (0x15), region = 24  ;;  %s167_s21 = sand.u32 (%p50_p3), 1, %s942_s13  }
   0xf   : > { %s784_s22 = smul.u32 (%p50_p3), 12, %s950_s15 }
  0x10   : > { %s843_s23 = smul.u32 (%p50_p3), 24, %s167_s21 }
  0x11   : > { %s175_s26 = scalar_lea.vmem (%p50_p3), %s1083_s0, %s784_s22 }
  0x12   : > { %v190_v0 = vld [vmem:[%s175_s26] sm:$0xff] (%p50_p3)  ;;  %v742_v2 = vld [vmem:[%s175_s26 + $0x8] sm:$0xf] (%p50_p3)  ;;  %s169_s27 = scalar_lea.vmem (%p50_p3), [#allocation3], %s843_s23  ;;  %v744_v3 = vld [vmem:[%s175_s26 + $0x2c] sm:$0xf] (%p50_p3) }
  0x13   : > { %v192_v1 = vld [vmem:[%s175_s26 + $0x24] sm:$0xff] (%p50_p3)  ;;  %191 = vst [vmem:[%s169_s27] sm:$0xff] (%p50_p3), %v190_v0  ;;  %743 = vst [vmem:[%s169_s27 + $0x8] sm:$0xf] (%p50_p3), %v742_v2 }
  0x14   : > { %193 = vst [vmem:[%s169_s27 + $0xc] sm:$0xff] (%p50_p3), %v192_v1  ;;  %745 = vst [vmem:[%s169_s27 + $0x14] sm:$0xf] (%p50_p3), %v744_v3 }
  0x15 PF: > { %p746_p6 = scmp.ge.s32.totalorder %s954_s16, 1  ;;  %p221_p7 = scmp.lt.s32.totalorder %s954_s16, 4 }
  0x17   : > { %p222_p8 = pnand %p746_p6, %p221_p7 }
  0x18   : > { %s228_s28 = sand.u32 (!%p222_p8), 1, %s938_s12   ;;  %s267_s29 = smul.u32 (!%p222_p8), 48, %s946_s14 }
  0x19   : > { %225 = sbr.rel (%p222_p8) target bundleno = 308 (0x134), region = 54  ;;  %p748_p10 = scmp.ne.s32.totalorder (!%p222_p8), %s946_s14, 0 }
  0x1a   : > { %s844_s30 = smul.u32 (!%p222_p8), 24, %s228_s28  ;;  %p268_p9 = scmp.lt.s32.totalorder (!%p222_p8), %s267_s29, 143 }
  0x1c   : > { %s1031_s8 = scalar_lea.vmem (!%p222_p8), [#allocation3], %s844_s30 }
  0x20   : > { %s1094_s29 = smov (!%p268_p9, %s267_s29), 143  ;;  %292 = sbr.rel (%p748_p10) target bundleno = 39 (0x27), region = 62 }
  0x21   : > { %s747_s4 = sshll.u32 %s1094_s29, 2  ;;  %v956_v4 = vmov (!%p748_p10), 0.0  }
  0x22   : > { %s1029_s7 = scalar_lea.vmem %s1084_s1, %s747_s4  ;;  %293 = vst [vmem:[#allocation2] sm:$0xff] (!%p748_p10), %v956_v4  ;;  %294 = vst [vmem:[#allocation2 + $0x8] sm:$0xff] (!%p748_p10), %v956_v4 }
  0x27 PF: > { %v888_v5 = vld [vmem:[%s1029_s7 + $0x40] sm:$0xff]   ;;  %v957_v6 = vmov 0.0   ;;  %vm958_vm0 = vmmov 0   ;;  %v891_v9 = vld [vmem:[%s1029_s7 + $0x48] sm:$0xff]   ;;  %v894_v12 = vld [vmem:[%s1029_s7 + $0x50] sm:$0xff]   ;;  %p776_p11 = scmp.ne.s32.totalorder %s946_s14, 2 }
  0x28   : > { %823 = vmatprep.subr.bf16.mxu1 %v957_v6  ;;  %v889_v7 = vld [vmem:[%s1029_s7] sm:$0xff]   ;;  %792 = vmatprep.subr.bf16.mxu0 %v888_v5  ;;  %v892_v10 = vld [vmem:[%s1029_s7 + $0x8] sm:$0xff]   ;;  %v895_v13 = vld [vmem:[%s1029_s7 + $0x10] sm:$0xff]  }
  0x29   : > { %v890_v8 = vld [vmem:[%s1029_s7 + $0x80] sm:$0xff]   ;;  %839 = vmatprep.mubr.msk.bf16.mxu1 %vm958_vm0, %v957_v6  ;;  %793 = vmatpush3.bf16.msra.mxu0 %v889_v7  ;;  %v893_v11 = vld [vmem:[%s1029_s7 + $0x88] sm:$0xff]   ;;  %v896_v14 = vld [vmem:[%s1029_s7 + $0x90] sm:$0xff]  }
  0x2a   : > { %824 = vmatpush3.bf16.msra.mxu1 %v890_v8  ;;  %794 = vmatprep.subr.bf16.mxu0 %v891_v9  ;;  %v897_v15 = vld [vmem:[%s1029_s7 + $0x58] sm:$0xff]   ;;  %v900_v18 = vld [vmem:[%s1029_s7 + $0x60] sm:$0xff]   ;;  %v903_v21 = vld [vmem:[%s1029_s7 + $0x68] sm:$0xff]  }
  0x2b   : > { %825 = vmatprep.subr.bf16.mxu1 %v957_v6  ;;  %v898_v16 = vld [vmem:[%s1029_s7 + $0x18] sm:$0xff]   ;;  %v901_v19 = vld [vmem:[%s1029_s7 + $0x20] sm:$0xff]   ;;  %v904_v22 = vld [vmem:[%s1029_s7 + $0x28] sm:$0xff]  }
  0x2c   : > { %v899_v17 = vld [vmem:[%s1029_s7 + $0x98] sm:$0xff]   ;;  %v902_v20 = vld [vmem:[%s1029_s7 + $0xa0] sm:$0xff]   ;;  %v905_v23 = vld [vmem:[%s1029_s7 + $0xa8] sm:$0xff]  }
  0x2d   : > { %795 = vmatpush3.bf16.msra.mxu0 %v892_v10  ;;  %v906_v24 = vld [vmem:[%s1029_s7 + $0x70] sm:$0xff]   ;;  %v909_v27 = vld [vmem:[%s1029_s7 + $0x78] sm:$0xff]   ;;  %v295_v39 = vld [vmem:[#allocation2] sm:$0xff] }
  0x2e   : > { %826 = vmatpush3.bf16.msra.mxu1 %v893_v11  ;;  %796 = vmatprep.subr.bf16.mxu0 %v894_v12  ;;  %v907_v25 = vld [vmem:[%s1029_s7 + $0x30] sm:$0xff]   ;;  %v910_v29 = vld [vmem:[%s1029_s7 + $0x38] sm:$0xff]   ;;  %v296_v45 = vld [vmem:[#allocation2 + $0x8] sm:$0xff] }
  0x2f   : > { %827 = vmatprep.subr.bf16.mxu1 %v957_v6  ;;  %v908_v26 = vld [vmem:[%s1029_s7 + $0xb0] sm:$0xff]   ;;  %v911_v30 = vld [vmem:[%s1029_s7 + $0xb8] sm:$0xff]   ;;  %v777_v51 = vld [vmem:[%s1085_s2] ss:$0 sm:$0xff] (!%p776_p11) }
  0x30   : > { %v914_v28 = vld [vmem:[%s1031_s8 + $0x4] ss:$12 sps:$4 sm:$0xff]   ;;  %v912_v31 = vld [vmem:[%s1031_s8] ss:$12 sps:$4 sm:$0xff]   ;;  %v915_v32 = vld [vmem:[%s1031_s8 + $0x8] ss:$12 sps:$4 sm:$0xff]  }
  0x31   : > { %797 = vmatpush3.bf16.msra.mxu0 %v895_v13  ;;  %541 = vmatprep.mubr.bf16.mxu0 %v914_v28 }
  0x32   : > { %828 = vmatpush3.bf16.msra.mxu1 %v896_v14  ;;  %798 = vmatprep.subr.bf16.mxu0 %v897_v15 }
  0x33   : > { %829 = vmatprep.subr.bf16.mxu1 %v957_v6 }
  0x35   : > { %799 = vmatpush3.bf16.msra.mxu0 %v898_v16 }
  0x36   : > { %830 = vmatpush3.bf16.msra.mxu1 %v899_v17  ;;  %800 = vmatprep.subr.bf16.mxu0 %v900_v18 }
  0x37   : > { %831 = vmatprep.subr.bf16.mxu1 %v957_v6 }
  0x39   : > { %801 = vmatpush3.bf16.msra.mxu0 %v901_v19 }
  0x3a   : > { %832 = vmatpush3.bf16.msra.mxu1 %v902_v20  ;;  %802 = vmatprep.subr.bf16.mxu0 %v903_v21 }
  0x3b   : > { %833 = vmatprep.subr.bf16.mxu1 %v957_v6 }
  0x3d   : > { %803 = vmatpush3.bf16.msra.mxu0 %v904_v22 }
  0x3e   : > { %834 = vmatpush3.bf16.msra.mxu1 %v905_v23  ;;  %804 = vmatprep.subr.bf16.mxu0 %v906_v24 }
  0x3f   : > { %835 = vmatprep.subr.bf16.mxu1 %v957_v6 }
  0x41   : > { %805 = vmatpush3.bf16.msra.mxu0 %v907_v25 }
  0x42   : > { %836 = vmatpush3.bf16.msra.mxu1 %v908_v26  ;;  %806 = vmatprep.subr.bf16.mxu0 %v909_v27 }
  0x43   : > { %837 = vmatprep.subr.bf16.mxu1 %v957_v6 }
  0x45   : > { %807 = vmatpush3.bf16.msra.mxu0 %v910_v29 }
  0x46   : > { %838 = vmatpush3.bf16.msra.mxu1 %v911_v30 }
  0x48   : > { %542 = vmatmul.mubr.bf16.vlgmr.msra.gmra.mrb[0].mxu0 %v912_v31 }
  0x49   : > { %840 = vmatmul.mubr.bf16.vlgmr.msra.gmra.mrb[0].mxu1 %v915_v32 }
 0x11b   : > { %v808_v33 = vpop.f32.mrb[0].mxu0 }
 0x11c   : > { %v584_v34 = vpop.f32.mrb[0].mxu1  ;;  %v809_v35 = vpop.f32.mrb[1].mxu0 }
 0x11d   : > { %v810_v36 = vadd.f32 %v809_v35, %v808_v33  ;;  %v841_v37 = vpop.f32.mrb[1].mxu1  ;;  %v811_v38 = vpop.f32.mrb[2].mxu0 }
 0x11e   : > { %v587_v40 = vpop.f32.mrb[2].mxu1  ;;  %v812_v41 = vpop.f32.mrb[3].mxu0 }
 0x11f   : > { %v585_v42 = vadd.f32 %v810_v36, %v584_v34  ;;  %v813_v43 = vadd.f32 %v812_v41, %v811_v38  ;;  %v842_v44 = vpop.f32.mrb[3].mxu1  ;;  %598 = sbr.rel (%p776_p11) target bundleno = 308 (0x134), region = 66 }
 0x121   : > { %v591_v46 = vadd.f32 %v585_v42, %v295_v39  ;;  %v588_v47 = vadd.f32 %v813_v43, %v587_v40 }
 0x123   : > { %593 = vst [vmem:[#allocation2] sm:$0xff] %v591_v46  ;;  %v592_v48 = vadd.f32 %v588_v47, %v296_v45 }
 0x125   : > { %594 = vst [vmem:[#allocation2 + $0x8] sm:$0xff] %v592_v48 }
 0x12a   : > { %v599_v49 = vld [vmem:[#allocation2] sm:$0xff] }
 0x12b   : > { %v608_v52 = vadd.f32 %v777_v51, %v599_v49 }
 0x12c   : > { %v600_v50 = vld [vmem:[#allocation2 + $0x8] sm:$0xff] }
 0x12d   : > { %v609_v53 = vadd.f32 %v777_v51, %v600_v50  ;;  %v610_v54 = vmax.f32 %v608_v52, 0.0 }
 0x12f   : > { %v611_v55 = vmax.f32 %v609_v53, 0.0 }
 0x131   : > { %v790_v56 = vpack.c.bf16 %v611_v55, %v610_v54 }
 0x133   : > { %791 = vst [vmem:[%s1086_s3] sm:$0xff] %v790_v56  }
 0x134 PF: > { %s13_s16 = sadd.s32 1, %s954_s16   ;;  %s1087_s12 = smov %s942_s13 }
 0x135   : > { %p10_p12 = scmp.ge.s32.totalorder %s13_s16, 5   ;;  %s1088_s13 = smov %s1014_s20 }
 0x136   : > { %s1089_s14 = smov %s950_s15  ;;  %s1090_s15 = smov %s1092_s17 }
 0x137   :  { %12 = sbr.rel (!%p10_p12) target bundleno = 3 (0x3), region = 113 }

// kernel: resnet50_forward.68
= control target key start
LH: loop header
LB: loop body
LE: loop exit
PB: predicated region body
PF: predicated region fallthrough
CT: control target
= control target key end

     0   :  { %s1079_s12 = smov 0   ;;  %s1081_s13 = smov 0   ;;  %s1267_s0 = inlined_call_operand.vmem [shape: bf16[16,256], index: 0, kind: input, shape index: {}]   ;;  %s1268_s1 = inlined_call_operand.vmem [shape: bf16[256,512], index: 1, kind: input, shape index: {}]   ;;  %s1269_s2 = inlined_call_operand.vmem [shape: f32[1,512], index: 2, kind: input, shape index: {}]   ;;  %s1270_s3 = inlined_call_operand.vmem [shape: bf16[16,512], index: 3, kind: output, shape index: {}]  }
   0x1   :  { %s1083_s14 = smov 0   ;;  %s1085_s15 = smov 0  }
   0x2   :  { %s1087_s16 = smov 0  }
   0x3 LB: > { %s28_s17 = sadd.s32 1, %s1053_s15  ;;  %s871_s18 = sadd.s32 4294967295, %s1057_s16   ;;  %s1057_s16 = sphi %s1087_s16, %s13_s16   ;;  %s1053_s15 = sphi %s1085_s15, %s1275_s15   ;;  %s1049_s14 = sphi %s1083_s14, %s1274_s14   ;;  %s1045_s13 = sphi %s1081_s13, %s1273_s13   ;;  %s1041_s12 = sphi %s1079_s12, %s1272_s12  }
   0x4   : > { %p30_p0 = scmp.ge.s32.totalorder %s28_s17, 2  ;;  %p76_p1 = scmp.ne.s32.totalorder %s1045_s13, %s1041_s12 }
   0x5   : > { %p77_p2 = scmp.eq.s32.totalorder %s1057_s16, 0  ;;  %p134_p4 = scmp.eq.s32.totalorder %s871_s18, 1 }
   0x6   : > { %s1277_s17 = smov (%p30_p0, %s28_s17), 0  ;;  %s69_s20 = sadd.s32 1, %s1045_s13 }
   0x7   : > { %p78_p3 = por %p77_p2, %p76_p1  ;;  %s65_s19 = ssub.s32 %s1053_s15, %s1277_s17 }
   0x8   : > { %p67_p5 = scmp.eq.s32.totalorder %s65_s19, 0  ;;  %p1114_p6 = por %p134_p4, %p76_p1 }
   0x9   : > { %p875_p7 = scmp.ge.s32.totalorder %s1057_s16, 2 }
   0xa   : > { %s1119_s22 = scalar_select %p67_p5, %s1045_s13, %s69_s20  }
   0xb   : > { %171 = sbr.rel (%p875_p7) target bundleno = 38 (0x26), region = 20 }
  0x12   : > { %174 = sbr.rel (!%p78_p3) target bundleno = 38 (0x26), region = 24  ;;  %s176_s23 = sand.u32 (%p78_p3), 1, %s1045_s13  }
  0x13   : > { %s924_s24 = sshll.u32 (%p78_p3), %s1053_s15, 3  ;;  %s876_s25 = sshll.u32 (%p78_p3), %s176_s23, 8 }
  0x14   : > { %s1127_s28 = scalar_lea.vmem (%p78_p3), %s1268_s1, %s924_s24  ;;  %s1132_s29 = scalar_lea.vmem (%p78_p3), [#allocation3], %s876_s25 }
  0x15   : > { %v274_v0 = vld [vmem:[%s1127_s28] sm:$0xff] (%p78_p3)  ;;  %v276_v1 = vld [vmem:[%s1127_s28 + $0x10] sm:$0xff] (%p78_p3) }
  0x16   : > { %v278_v2 = vld [vmem:[%s1127_s28 + $0x20] sm:$0xff] (%p78_p3)  ;;  %275 = vst [vmem:[%s1132_s29] sm:$0xff] (%p78_p3), %v274_v0  ;;  %277 = vst [vmem:[%s1132_s29 + $0x8] sm:$0xff] (%p78_p3), %v276_v1  ;;  %v280_v3 = vld [vmem:[%s1127_s28 + $0x30] sm:$0xff] (%p78_p3) }
  0x17   : > { %279 = vst [vmem:[%s1132_s29 + $0x10] sm:$0xff] (%p78_p3), %v278_v2  ;;  %v282_v4 = vld [vmem:[%s1127_s28 + $0x40] sm:$0xff] (%p78_p3)  ;;  %v284_v5 = vld [vmem:[%s1127_s28 + $0x50] sm:$0xff] (%p78_p3)  ;;  %281 = vst [vmem:[%s1132_s29 + $0x18] sm:$0xff] (%p78_p3), %v280_v3 }
  0x18   : > { %283 = vst [vmem:[%s1132_s29 + $0x20] sm:$0xff] (%p78_p3), %v282_v4  ;;  %285 = vst [vmem:[%s1132_s29 + $0x28] sm:$0xff] (%p78_p3), %v284_v5  ;;  %v286_v6 = vld [vmem:[%s1127_s28 + $0x60] sm:$0xff] (%p78_p3)  ;;  %v288_v7 = vld [vmem:[%s1127_s28 + $0x70] sm:$0xff] (%p78_p3) }
  0x19   : > { %v290_v8 = vld [vmem:[%s1127_s28 + $0x80] sm:$0xff]  ;;  %287 = vst [vmem:[%s1132_s29 + $0x30] sm:$0xff] %v286_v6  ;;  %289 = vst [vmem:[%s1132_s29 + $0x38] sm:$0xff] %v288_v7  ;;  %v292_v9 = vld [vmem:[%s1127_s28 + $0x90] sm:$0xff] }
  0x1a   : > { %291 = vst [vmem:[%s1132_s29 + $0x40] sm:$0xff] %v290_v8  ;;  %v294_v10 = vld [vmem:[%s1127_s28 + $0xa0] sm:$0xff]  ;;  %v296_v11 = vld [vmem:[%s1127_s28 + $0xb0] sm:$0xff]  ;;  %293 = vst [vmem:[%s1132_s29 + $0x48] sm:$0xff] %v292_v9 }
  0x1b   : > { %295 = vst [vmem:[%s1132_s29 + $0x50] sm:$0xff] %v294_v10  ;;  %297 = vst [vmem:[%s1132_s29 + $0x58] sm:$0xff] %v296_v11  ;;  %v298_v12 = vld [vmem:[%s1127_s28 + $0xc0] sm:$0xff]  ;;  %v300_v13 = vld [vmem:[%s1127_s28 + $0xd0] sm:$0xff] }
  0x1c   : > { %v302_v14 = vld [vmem:[%s1127_s28 + $0xe0] sm:$0xff]  ;;  %299 = vst [vmem:[%s1132_s29 + $0x60] sm:$0xff] %v298_v12  ;;  %301 = vst [vmem:[%s1132_s29 + $0x68] sm:$0xff] %v300_v13  ;;  %v304_v15 = vld [vmem:[%s1127_s28 + $0xf0] sm:$0xff] }
  0x1d   : > { %303 = vst [vmem:[%s1132_s29 + $0x70] sm:$0xff] %v302_v14  ;;  %v306_v16 = vld [vmem:[%s1127_s28 + $0x100] sm:$0xff]  ;;  %v308_v17 = vld [vmem:[%s1127_s28 + $0x110] sm:$0xff]  ;;  %305 = vst [vmem:[%s1132_s29 + $0x78] sm:$0xff] %v304_v15 }
  0x1e   : > { %307 = vst [vmem:[%s1132_s29 + $0x80] sm:$0xff] %v306_v16  ;;  %309 = vst [vmem:[%s1132_s29 + $0x88] sm:$0xff] %v308_v17  ;;  %v310_v18 = vld [vmem:[%s1127_s28 + $0x120] sm:$0xff]  ;;  %v312_v19 = vld [vmem:[%s1127_s28 + $0x130] sm:$0xff] }
  0x1f   : > { %v314_v20 = vld [vmem:[%s1127_s28 + $0x140] sm:$0xff]  ;;  %311 = vst [vmem:[%s1132_s29 + $0x90] sm:$0xff] %v310_v18  ;;  %313 = vst [vmem:[%s1132_s29 + $0x98] sm:$0xff] %v312_v19  ;;  %v316_v21 = vld [vmem:[%s1127_s28 + $0x150] sm:$0xff] }
  0x20   : > { %315 = vst [vmem:[%s1132_s29 + $0xa0] sm:$0xff] %v314_v20  ;;  %v318_v22 = vld [vmem:[%s1127_s28 + $0x160] sm:$0xff]  ;;  %v320_v23 = vld [vmem:[%s1127_s28 + $0x170] sm:$0xff]  ;;  %317 = vst [vmem:[%s1132_s29 + $0xa8] sm:$0xff] %v316_v21 }
  0x21   : > { %319 = vst [vmem:[%s1132_s29 + $0xb0] sm:$0xff] %v318_v22  ;;  %321 = vst [vmem:[%s1132_s29 + $0xb8] sm:$0xff] %v320_v23  ;;  %v322_v24 = vld [vmem:[%s1127_s28 + $0x180] sm:$0xff]  ;;  %v324_v25 = vld [vmem:[%s1127_s28 + $0x190] sm:$0xff] }
  0x22   : > { %v326_v26 = vld [vmem:[%s1127_s28 + $0x1a0] sm:$0xff]  ;;  %323 = vst [vmem:[%s1132_s29 + $0xc0] sm:$0xff] %v322_v24  ;;  %325 = vst [vmem:[%s1132_s29 + $0xc8] sm:$0xff] %v324_v25  ;;  %v328_v27 = vld [vmem:[%s1127_s28 + $0x1b0] sm:$0xff] }
  0x23   : > { %327 = vst [vmem:[%s1132_s29 + $0xd0] sm:$0xff] %v326_v26  ;;  %v330_v28 = vld [vmem:[%s1127_s28 + $0x1c0] sm:$0xff]  ;;  %v332_v29 = vld [vmem:[%s1127_s28 + $0x1d0] sm:$0xff]  ;;  %329 = vst [vmem:[%s1132_s29 + $0xd8] sm:$0xff] %v328_v27 }
  0x24   : > { %331 = vst [vmem:[%s1132_s29 + $0xe0] sm:$0xff] %v330_v28  ;;  %333 = vst [vmem:[%s1132_s29 + $0xe8] sm:$0xff] %v332_v29  ;;  %v334_v30 = vld [vmem:[%s1127_s28 + $0x1e0] sm:$0xff]  ;;  %v336_v31 = vld [vmem:[%s1127_s28 + $0x1f0] sm:$0xff] }
  0x25   : > { %335 = vst [vmem:[%s1132_s29 + $0xf0] sm:$0xff] %v334_v30  ;;  %337 = vst [vmem:[%s1132_s29 + $0xf8] sm:$0xff] %v336_v31 }
  0x26 PF: > { %p879_p8 = scmp.ge.s32.totalorder %s1057_s16, 1  ;;  %p350_p9 = scmp.lt.s32.totalorder %s1057_s16, 3 }
  0x28   : > { %p351_p10 = pnand %p879_p8, %p350_p9 }
  0x29   : > { %s357_s30 = sand.u32 (!%p351_p10), 1, %s1041_s12   ;;  %v1018_v32 = vld [vmem:[%s1267_s0 + $0x4] ss:$8 sps:$4 sm:$0xff] (!%p351_p10)   ;;  %v1016_v1 = vld [vmem:[%s1267_s0] ss:$8 sps:$4 sm:$0xff] (!%p351_p10)   ;;  %s882_s10 = sshll.u32 (!%p351_p10), %s1049_s14, 1  ;;  %v690_v2 = vlaneseq (!%p351_p10) }
  0x2a   : > { %354 = sbr.rel (%p351_p10) target bundleno = 337 (0x151), region = 66  ;;  %s880_s4 = sshll.u32 (!%p351_p10), %s357_s30, 8  ;;  %662 = vmatprep.mubr.bf16.mxu0 (!%p351_p10), %v1018_v32 }
  0x2b   : > { %s1203_s7 = scalar_lea.vmem (!%p351_p10), [#allocation3], %s880_s4  ;;  %p408_p11 = scmp.lt.s32.totalorder (!%p351_p10), %s882_s10, 3  ;;  %v691_v3 = vshrl.u32 (!%p351_p10), %v690_v2, 7 }
  0x2c   : > { %v968_v33 = vld [vmem:[%s1203_s7 + $0x4] ss:$8 sps:$4 sm:$0xff] (!%p351_p10)   ;;  %v970_v34 = vld [vmem:[%s1203_s7] ss:$8 sps:$4 sm:$0xff] (!%p351_p10)   ;;  %v971_v35 = vld [vmem:[%s1203_s7 + $0x14] ss:$8 sps:$4 sm:$0xff] (!%p351_p10)  }
  0x2d   : > { %630 = vmatprep.subr.bf16.mxu0 (!%p351_p10), %v968_v33  ;;  %v973_v36 = vld [vmem:[%s1203_s7 + $0x10] ss:$8 sps:$4 sm:$0xff] (!%p351_p10)   ;;  %v974_v37 = vld [vmem:[%s1203_s7 + $0x24] ss:$8 sps:$4 sm:$0xff] (!%p351_p10)   ;;  %v976_v38 = vld [vmem:[%s1203_s7 + $0x20] ss:$8 sps:$4 sm:$0xff] (!%p351_p10)  }
  0x2e   : > { %631 = vmatpush1.bf16.msra.mxu0 (!%p351_p10), %v970_v34  ;;  %v977_v39 = vld [vmem:[%s1203_s7 + $0x34] ss:$8 sps:$4 sm:$0xff] (!%p351_p10)   ;;  %v979_v40 = vld [vmem:[%s1203_s7 + $0x30] ss:$8 sps:$4 sm:$0xff] (!%p351_p10)   ;;  %v980_v41 = vld [vmem:[%s1203_s7 + $0x44] ss:$8 sps:$4 sm:$0xff] (!%p351_p10)  }
  0x2f   : > { %632 = vmatprep.subr.bf16.mxu0 (!%p351_p10), %v971_v35  ;;  %v982_v42 = vld [vmem:[%s1203_s7 + $0x40] ss:$8 sps:$4 sm:$0xff] (!%p351_p10)   ;;  %v983_v43 = vld [vmem:[%s1203_s7 + $0x54] ss:$8 sps:$4 sm:$0xff] (!%p351_p10)   ;;  %v985_v44 = vld [vmem:[%s1203_s7 + $0x50] ss:$8 sps:$4 sm:$0xff] (!%p351_p10)  }
  0x30   : > { %v986_v45 = vld [vmem:[%s1203_s7 + $0x64] ss:$8 sps:$4 sm:$0xff] (!%p351_p10)   ;;  %v988_v46 = vld [vmem:[%s1203_s7 + $0x60] ss:$8 sps:$4 sm:$0xff] (!%p351_p10)   ;;  %v989_v47 = vld [vmem:[%s1203_s7 + $0x74] ss:$8 sps:$4 sm:$0xff] (!%p351_p10)  }
  0x31   : > { %v991_v48 = vld [vmem:[%s1203_s7 + $0x70] ss:$8 sps:$4 sm:$0xff]   ;;  %v992_v49 = vld [vmem:[%s1203_s7 + $0x84] ss:$8 sps:$4 sm:$0xff]   ;;  %v994_v50 = vld [vmem:[%s1203_s7 + $0x80] ss:$8 sps:$4 sm:$0xff]  }
  0x32   : > { %633 = vmatpush1.bf16.msra.mxu0 %v973_v36  ;;  %v995_v51 = vld [vmem:[%s1203_s7 + $0x94] ss:$8 sps:$4 sm:$0xff]   ;;  %v997_v52 = vld [vmem:[%s1203_s7 + $0x90] ss:$8 sps:$4 sm:$0xff]   ;;  %v998_v53 = vld [vmem:[%s1203_s7 + $0xa4] ss:$8 sps:$4 sm:$0xff]  }
  0x33   : > { %634 = vmatprep.subr.bf16.mxu0 %v974_v37  ;;  %v1000_v54 = vld [vmem:[%s1203_s7 + $0xa0] ss:$8 sps:$4 sm:$0xff]   ;;  %v1001_v55 = vld [vmem:[%s1203_s7 + $0xb4] ss:$8 sps:$4 sm:$0xff]   ;;  %v1003_v56 = vld [vmem:[%s1203_s7 + $0xb0] ss:$8 sps:$4 sm:$0xff]  }
  0x34   : > { %v1004_v57 = vld [vmem:[%s1203_s7 + $0xc4] ss:$8 sps:$4 sm:$0xff]   ;;  %v1006_v58 = vld [vmem:[%s1203_s7 + $0xc0] ss:$8 sps:$4 sm:$0xff]   ;;  %v1007_v59 = vld [vmem:[%s1203_s7 + $0xd4] ss:$8 sps:$4 sm:$0xff]  }
  0x35   : > { %v1009_v60 = vld [vmem:[%s1203_s7 + $0xd0] ss:$8 sps:$4 sm:$0xff]   ;;  %v1010_v61 = vld [vmem:[%s1203_s7 + $0xe4] ss:$8 sps:$4 sm:$0xff]   ;;  %v1012_v62 = vld [vmem:[%s1203_s7 + $0xe0] ss:$8 sps:$4 sm:$0xff]  }
  0x36   : > { %635 = vmatpush1.bf16.msra.mxu0 %v976_v38  ;;  %v1013_v63 = vld [vmem:[%s1203_s7 + $0xf4] ss:$8 sps:$4 sm:$0xff]   ;;  %v1015_v0 = vld [vmem:[%s1203_s7 + $0xf0] ss:$8 sps:$4 sm:$0xff]   ;;  %s1279_s10 = smov (!%p408_p11, %s882_s10), 3  ;;  %v692_v4 = vsub.s32 0, %v691_v3 }
  0x37   : > { %636 = vmatprep.subr.bf16.mxu0 %v977_v39  ;;  %s410_s19 = scalar_lea.vmem %s1269_s2, %s1279_s10  ;;  %v696_v6 = vsub.s32 1, %v691_v3  ;;  %s881_s20 = sshll.u32 %s357_s30, 4 }
  0x38   : > { %v688_v5 = vld [vmem:[%s410_s19] sm:$0x3]  ;;  %s392_s23 = scalar_lea.vmem [#allocation4], %s881_s20  ;;  %s927_s24 = sshll.u32 (%p1114_p6), %s1049_s14, 3 }
  0x39   : > { %v693_v7 = vrot.slane %v688_v5, %v692_v4  ;;  %v697_v8 = vrot.slane %v688_v5, %v696_v6  ;;  %s730_s26 = scalar_lea.vmem (%p1114_p6), %s1270_s3, %s927_s24 }
  0x3a   : > { %637 = vmatpush1.bf16.msra.mxu0 %v979_v40 }
  0x3b   : > { %638 = vmatprep.subr.bf16.mxu0 %v980_v41 }
  0x3e   : > { %639 = vmatpush1.bf16.msra.mxu0 %v982_v42 }
  0x3f   : > { %640 = vmatprep.subr.bf16.mxu0 %v983_v43 }
  0x42   : > { %641 = vmatpush1.bf16.msra.mxu0 %v985_v44 }
  0x43   : > { %642 = vmatprep.subr.bf16.mxu0 %v986_v45 }
  0x46   : > { %643 = vmatpush1.bf16.msra.mxu0 %v988_v46 }
  0x47   : > { %644 = vmatprep.subr.bf16.mxu0 %v989_v47 }
  0x4a   : > { %645 = vmatpush1.bf16.msra.mxu0 %v991_v48 }
  0x4b   : > { %646 = vmatprep.subr.bf16.mxu0 %v992_v49 }
  0x4e   : > { %647 = vmatpush1.bf16.msra.mxu0 %v994_v50 }
  0x4f   : > { %648 = vmatprep.subr.bf16.mxu0 %v995_v51 }
  0x52   : > { %649 = vmatpush1.bf16.msra.mxu0 %v997_v52 }
  0x53   : > { %650 = vmatprep.subr.bf16.mxu0 %v998_v53 }
  0x56   : > { %651 = vmatpush1.bf16.msra.mxu0 %v1000_v54 }
  0x57   : > { %652 = vmatprep.subr.bf16.mxu0 %v1001_v55 }
  0x5a   : > { %653 = vmatpush1.bf16.msra.mxu0 %v1003_v56 }
  0x5b   : > { %654 = vmatprep.subr.bf16.mxu0 %v1004_v57 }
  0x5e   : > { %655 = vmatpush1.bf16.msra.mxu0 %v1006_v58 }
  0x5f   : > { %656 = vmatprep.subr.bf16.mxu0 %v1007_v59 }
  0x62   : > { %657 = vmatpush1.bf16.msra.mxu0 %v1009_v60 }
  0x63   : > { %658 = vmatprep.subr.bf16.mxu0 %v1010_v61 }
  0x66   : > { %659 = vmatpush1.bf16.msra.mxu0 %v1012_v62 }
  0x67   : > { %660 = vmatprep.subr.bf16.mxu0 %v1013_v63 }
  0x6a   : > { %661 = vmatpush1.bf16.msra.mxu0 %v1015_v0 }
  0x6d   : > { %663 = vmatmul.mubr.bf16.vlgmr.msra.gmra.mrb[0].mxu0 %v1016_v1 }
 0x140   : > { %v664_v9 = vpop.f32.mrb[0].mxu0 }
 0x141   : > { %v700_v10 = vadd.f32 %v693_v7, %v664_v9  ;;  %v666_v11 = vpop.f32.mrb[1].mxu0 }
 0x142   : > { %v701_v12 = vadd.f32 %v697_v8, %v666_v11  ;;  %v668_v13 = vpop.f32.mrb[2].mxu0  ;;  %724 = sbr.rel (!%p1114_p6) target bundleno = 337 (0x151), region = 82 }
 0x143   : > { %v702_v14 = vadd.f32 %v693_v7, %v668_v13  ;;  %v670_v15 = vpop.f32.mrb[3].mxu0 }
 0x144   : > { %v925_v16 = vpack.c.bf16 %v701_v12, %v700_v10  ;;  %v703_v17 = vadd.f32 %v697_v8, %v670_v15 }
 0x146   : > { %716 = vst [vmem:[%s392_s23] sm:$0xff] %v925_v16  ;;  %v926_v18 = vpack.c.bf16 %v703_v17, %v702_v14 }
 0x148   : > { %717 = vst [vmem:[%s392_s23 + $0x8] sm:$0xff] %v926_v18 }
 0x14d   : > { %v760_v19 = vld [vmem:[%s392_s23] sm:$0xff] }
 0x14e   : > { %761 = vst [vmem:[%s730_s26] sm:$0xff] %v760_v19 }
 0x14f   : > { %v762_v20 = vld [vmem:[%s392_s23 + $0x8] sm:$0xff] }
 0x150   : > { %763 = vst [vmem:[%s730_s26 + $0x10] sm:$0xff] %v762_v20 }
 0x151 PF: > { %s13_s16 = sadd.s32 1, %s1057_s16   ;;  %s1272_s12 = smov %s1045_s13 }
 0x152   : > { %p10_p12 = scmp.ge.s32.totalorder %s13_s16, 4   ;;  %s1273_s13 = smov %s1119_s22 }
 0x153   : > { %s1274_s14 = smov %s1053_s15  ;;  %s1275_s15 = smov %s1277_s17 }
 0x154   :  { %12 = sbr.rel (!%p10_p12) target bundleno = 3 (0x3), region = 157 }

// kernel: resnet50_forward.69
= control target key start
LH: loop header
LB: loop body
LE: loop exit
PB: predicated region body
PF: predicated region fallthrough
CT: control target
= control target key end

     0   :  { %s1002_s15 = smov 0   ;;  %s1004_s16 = smov 0   ;;  %s1120_s0 = inlined_call_operand.vmem [shape: bf16[16,128], index: 0, kind: input, shape index: {}]   ;;  %s1121_s1 = inlined_call_operand.vmem [shape: bf16[128,512], index: 1, kind: input, shape index: {}]   ;;  %s1122_s2 = inlined_call_operand.vmem [shape: f32[1,512], index: 2, kind: input, shape index: {}]   ;;  %s1123_s3 = inlined_call_operand.vmem [shape: bf16[16,512], index: 3, kind: input, shape index: {}]   ;;  %s1124_s4 = inlined_call_operand.vmem [shape: bf16[16,512], index: 4, kind: output, shape index: {}]  }
   0x1   :  { %s1006_s17 = smov 0   ;;  %s1008_s18 = smov 0  }
   0x2   :  { %s1010_s19 = smov 0  }
   0x3 LB: > { %s29_s20 = sadd.s32 1, %s970_s18  ;;  %s825_s21 = sadd.s32 4294967295, %s974_s19   ;;  %s974_s19 = sphi %s1010_s19, %s14_s19   ;;  %s970_s18 = sphi %s1008_s18, %s1130_s18   ;;  %s966_s17 = sphi %s1006_s17, %s1129_s17   ;;  %s962_s16 = sphi %s1004_s16, %s1128_s16   ;;  %s958_s15 = sphi %s1002_s15, %s1127_s15  }
   0x4   : > { %p31_p0 = scmp.ge.s32.totalorder %s29_s20, 2  ;;  %p77_p1 = scmp.ne.s32.totalorder %s962_s16, %s958_s15 }
   0x5   : > { %p78_p2 = scmp.eq.s32.totalorder %s974_s19, 0  ;;  %p163_p4 = scmp.eq.s32.totalorder %s825_s21, 1 }
   0x6   : > { %s1132_s20 = smov (%p31_p0, %s29_s20), 0  ;;  %s70_s24 = sadd.s32 1, %s962_s16 }
   0x7   : > { %p1034_p3 = por %p78_p2, %p77_p1  ;;  %s66_s23 = ssub.s32 %s970_s18, %s1132_s20 }
   0x8   : > { %p68_p5 = scmp.eq.s32.totalorder %s66_s23, 0  ;;  %p1041_p6 = por %p163_p4, %p77_p1 }
   0x9   : > { %p829_p7 = scmp.ge.s32.totalorder %s974_s19, 2 }
   0xa   : > { %s1046_s26 = scalar_select %p68_p5, %s962_s16, %s70_s24  }
   0xb   : > { %197 = sbr.rel (%p829_p7) target bundleno = 37 (0x25), region = 20 }
  0x12   : > { %200 = sbr.rel (!%p1034_p3) target bundleno = 30 (0x1e), region = 24  ;;  %s202_s27 = sand.u32 (%p1034_p3), 1, %s962_s16  }
  0x13   : > { %s865_s28 = sshll.u32 (%p1034_p3), %s970_s18, 3  ;;  %s830_s29 = sshll.u32 (%p1034_p3), %s202_s27, 7 }
  0x14   : > { %s1056_s6 = scalar_lea.vmem (%p1034_p3), %s1121_s1, %s865_s28  ;;  %s204_s7 = scalar_lea.vmem (%p1034_p3), [#allocation3], %s830_s29 }
  0x15   : > { %v268_v0 = vld [vmem:[%s1056_s6] sm:$0xff] (%p1034_p3)  ;;  %v270_v1 = vld [vmem:[%s1056_s6 + $0x10] sm:$0xff] (%p1034_p3) }
  0x16   : > { %v272_v2 = vld [vmem:[%s1056_s6 + $0x20] sm:$0xff] (%p1034_p3)  ;;  %269 = vst [vmem:[%s204_s7] sm:$0xff] (%p1034_p3), %v268_v0  ;;  %271 = vst [vmem:[%s204_s7 + $0x8] sm:$0xff] (%p1034_p3), %v270_v1  ;;  %v274_v3 = vld [vmem:[%s1056_s6 + $0x30] sm:$0xff] (%p1034_p3) }
  0x17   : > { %273 = vst [vmem:[%s204_s7 + $0x10] sm:$0xff] (%p1034_p3), %v272_v2  ;;  %v276_v4 = vld [vmem:[%s1056_s6 + $0x40] sm:$0xff] (%p1034_p3)  ;;  %v278_v5 = vld [vmem:[%s1056_s6 + $0x50] sm:$0xff] (%p1034_p3)  ;;  %275 = vst [vmem:[%s204_s7 + $0x18] sm:$0xff] (%p1034_p3), %v274_v3 }
  0x18   : > { %277 = vst [vmem:[%s204_s7 + $0x20] sm:$0xff] (%p1034_p3), %v276_v4  ;;  %279 = vst [vmem:[%s204_s7 + $0x28] sm:$0xff] (%p1034_p3), %v278_v5  ;;  %v280_v6 = vld [vmem:[%s1056_s6 + $0x60] sm:$0xff] (%p1034_p3)  ;;  %v282_v7 = vld [vmem:[%s1056_s6 + $0x70] sm:$0xff] (%p1034_p3) }
  0x19   : > { %v284_v8 = vld [vmem:[%s1056_s6 + $0x80] sm:$0xff]  ;;  %281 = vst [vmem:[%s204_s7 + $0x30] sm:$0xff] %v280_v6  ;;  %283 = vst [vmem:[%s204_s7 + $0x38] sm:$0xff] %v282_v7  ;;  %v286_v9 = vld [vmem:[%s1056_s6 + $0x90] sm:$0xff] }
  0x1a   : > { %285 = vst [vmem:[%s204_s7 + $0x40] sm:$0xff] %v284_v8  ;;  %v288_v10 = vld [vmem:[%s1056_s6 + $0xa0] sm:$0xff]  ;;  %v290_v11 = vld [vmem:[%s1056_s6 + $0xb0] sm:$0xff]  ;;  %287 = vst [vmem:[%s204_s7 + $0x48] sm:$0xff] %v286_v9 }
  0x1b   : > { %289 = vst [vmem:[%s204_s7 + $0x50] sm:$0xff] %v288_v10  ;;  %291 = vst [vmem:[%s204_s7 + $0x58] sm:$0xff] %v290_v11  ;;  %v292_v12 = vld [vmem:[%s1056_s6 + $0xc0] sm:$0xff]  ;;  %v294_v13 = vld [vmem:[%s1056_s6 + $0xd0] sm:$0xff] }
  0x1c   : > { %v296_v14 = vld [vmem:[%s1056_s6 + $0xe0] sm:$0xff]  ;;  %293 = vst [vmem:[%s204_s7 + $0x60] sm:$0xff] %v292_v12  ;;  %295 = vst [vmem:[%s204_s7 + $0x68] sm:$0xff] %v294_v13  ;;  %v298_v15 = vld [vmem:[%s1056_s6 + $0xf0] sm:$0xff] }
  0x1d   : > { %297 = vst [vmem:[%s204_s7 + $0x70] sm:$0xff] %v296_v14  ;;  %299 = vst [vmem:[%s204_s7 + $0x78] sm:$0xff] %v298_v15 }
  0x1e PF: > { %313 = sbr.rel (!%p1034_p3) target bundleno = 37 (0x25), region = 66  ;;  %s315_s8 = sand.u32 (%p1034_p3), 1, %s962_s16  }
  0x1f   : > { %s866_s9 = sshll.u32 (%p1034_p3), %s970_s18, 3  ;;  %s833_s10 = sshll.u32 (%p1034_p3), %s315_s8, 4 }
  0x20   : > { %s323_s13 = scalar_lea.vmem (%p1034_p3), %s1123_s3, %s866_s9  ;;  %s317_s14 = scalar_lea.vmem (%p1034_p3), [#allocation4], %s833_s10 }
  0x21   : > { %v353_v16 = vld [vmem:[%s323_s13] sm:$0xff] (%p1034_p3)  ;;  %v355_v17 = vld [vmem:[%s323_s13 + $0x10] sm:$0xff] (%p1034_p3) }
  0x22   : > { %354 = vst [vmem:[%s317_s14] sm:$0xff] (%p1034_p3), %v353_v16  ;;  %356 = vst [vmem:[%s317_s14 + $0x8] sm:$0xff] (%p1034_p3), %v355_v17 }
  0x25 PF: > { %p836_p8 = scmp.ge.s32.totalorder %s974_s19, 1  ;;  %p361_p9 = scmp.lt.s32.totalorder %s974_s19, 3 }
  0x27   : > { %p362_p10 = pnand %p836_p8, %p361_p9 }
  0x28   : > { %s368_s21 = sand.u32 (!%p362_p10), 1, %s958_s15   ;;  %v976_v18 = vmov (!%p362_p10), 0   ;;  %v935_v35 = vld [vmem:[%s1120_s0] sm:$0xff] (!%p362_p10)   ;;  %s840_s28 = sshll.u32 (!%p362_p10), %s966_s17, 1  ;;  %v612_v36 = vlaneseq (!%p362_p10) }
  0x29   : > { %365 = sbr.rel (%p362_p10) target bundleno = 308 (0x134), region = 104  ;;  %s837_s22 = sshll.u32 (!%p362_p10), %s368_s21, 7  ;;  %584 = vmatprep.mubr.bf16.mxu0 (!%p362_p10), %v976_v18 }
  0x2a   : > { %s370_s23 = scalar_lea.vmem (!%p362_p10), [#allocation3], %s837_s22  ;;  %p427_p11 = scmp.lt.s32.totalorder (!%p362_p10), %s840_s28, 3  ;;  %v613_v37 = vshrl.u32 (!%p362_p10), %v612_v36, 7 }
  0x2b   : > { %v911_v19 = vld [vmem:[%s370_s23 + $0x4] ss:$8 sps:$4 sm:$0xff] (!%p362_p10)   ;;  %v913_v20 = vld [vmem:[%s370_s23] ss:$8 sps:$4 sm:$0xff] (!%p362_p10)   ;;  %v914_v21 = vld [vmem:[%s370_s23 + $0x14] ss:$8 sps:$4 sm:$0xff] (!%p362_p10)  }
  0x2c   : > { %552 = vmatprep.subr.bf16.mxu0 (!%p362_p10), %v911_v19  ;;  %v916_v22 = vld [vmem:[%s370_s23 + $0x10] ss:$8 sps:$4 sm:$0xff] (!%p362_p10)   ;;  %v917_v23 = vld [vmem:[%s370_s23 + $0x24] ss:$8 sps:$4 sm:$0xff] (!%p362_p10)   ;;  %v919_v24 = vld [vmem:[%s370_s23 + $0x20] ss:$8 sps:$4 sm:$0xff] (!%p362_p10)  }
  0x2d   : > { %553 = vmatpush1.bf16.msra.mxu0 (!%p362_p10), %v913_v20  ;;  %v920_v25 = vld [vmem:[%s370_s23 + $0x34] ss:$8 sps:$4 sm:$0xff] (!%p362_p10)   ;;  %v922_v26 = vld [vmem:[%s370_s23 + $0x30] ss:$8 sps:$4 sm:$0xff] (!%p362_p10)   ;;  %v923_v27 = vld [vmem:[%s370_s23 + $0x44] ss:$8 sps:$4 sm:$0xff] (!%p362_p10)  }
  0x2e   : > { %554 = vmatprep.subr.bf16.mxu0 (!%p362_p10), %v914_v21  ;;  %v925_v28 = vld [vmem:[%s370_s23 + $0x40] ss:$8 sps:$4 sm:$0xff] (!%p362_p10)   ;;  %v926_v29 = vld [vmem:[%s370_s23 + $0x54] ss:$8 sps:$4 sm:$0xff] (!%p362_p10)   ;;  %v928_v30 = vld [vmem:[%s370_s23 + $0x50] ss:$8 sps:$4 sm:$0xff] (!%p362_p10)  }
  0x2f   : > { %v929_v31 = vld [vmem:[%s370_s23 + $0x64] ss:$8 sps:$4 sm:$0xff] (!%p362_p10)   ;;  %v931_v32 = vld [vmem:[%s370_s23 + $0x60] ss:$8 sps:$4 sm:$0xff] (!%p362_p10)   ;;  %v932_v33 = vld [vmem:[%s370_s23 + $0x74] ss:$8 sps:$4 sm:$0xff] (!%p362_p10)  }
  0x30   : > { %v934_v34 = vld [vmem:[%s370_s23 + $0x70] ss:$8 sps:$4 sm:$0xff]   ;;  %s1134_s28 = smov (!%p427_p11, %s840_s28), 3  ;;  %s1092_s29 = sshll.u32 %s368_s21, 4  ;;  %v614_v38 = vsub.s32 0, %v613_v37  ;;  %v618_v40 = vsub.s32 1, %v613_v37 }
  0x31   : > { %555 = vmatpush1.bf16.msra.mxu0 %v916_v22  ;;  %s429_s6 = scalar_lea.vmem %s1122_s2, %s1134_s28  ;;  %s377_s7 = scalar_lea.vmem [#allocation4], %s1092_s29 }
  0x32   : > { %556 = vmatprep.subr.bf16.mxu0 %v917_v23  ;;  %v610_v39 = vld [vmem:[%s429_s6] sm:$0x3]  ;;  %v627_v44 = vld [vmem:[%s377_s7 + $0x8] sm:$0xff]  ;;  %s414_s15 = scalar_lea.vmem [#allocation5], %s1092_s29  ;;  %s869_s8 = sshll.u32 (%p1041_p6), %s966_s17, 3 }
  0x33   : > { %v626_v41 = vld [vmem:[%s377_s7] sm:$0xff]  ;;  %v615_v42 = vrot.slane %v610_v39, %v614_v38  ;;  %v619_v43 = vrot.slane %v610_v39, %v618_v40  ;;  %v630_v50 = vunpack.c.l.bf16 %v627_v44  ;;  %v631_v53 = vunpack.c.h.bf16 %v627_v44  ;;  %s666_s11 = scalar_lea.vmem (%p1041_p6), %s1124_s4, %s869_s8 }
  0x34   : > { %v628_v45 = vunpack.c.l.bf16 %v626_v41  ;;  %v629_v47 = vunpack.c.h.bf16 %v626_v41 }
  0x35   : > { %557 = vmatpush1.bf16.msra.mxu0 %v919_v24 }
  0x36   : > { %558 = vmatprep.subr.bf16.mxu0 %v920_v25 }
  0x39   : > { %559 = vmatpush1.bf16.msra.mxu0 %v922_v26 }
  0x3a   : > { %560 = vmatprep.subr.bf16.mxu0 %v923_v27 }
  0x3d   : > { %561 = vmatpush1.bf16.msra.mxu0 %v925_v28 }
  0x3e   : > { %562 = vmatprep.subr.bf16.mxu0 %v926_v29 }
  0x41   : > { %563 = vmatpush1.bf16.msra.mxu0 %v928_v30 }
  0x42   : > { %564 = vmatprep.subr.bf16.mxu0 %v929_v31 }
  0x45   : > { %565 = vmatpush1.bf16.msra.mxu0 %v931_v32 }
  0x46   : > { %566 = vmatprep.subr.bf16.mxu0 %v932_v33 }
  0x49   : > { %567 = vmatpush1.bf16.msra.mxu0 %v934_v34 }
  0x4c   : > { %585 = vmatmul.mubr.bf16.vlgmr.msra.gmra.mrb[0].mxu0 %v935_v35 }
 0x11f   : > { %v586_v46 = vpop.f32.mrb[0].mxu0 }
 0x120   : > { %v622_v48 = vadd.f32 %v615_v42, %v586_v46  ;;  %v588_v49 = vpop.f32.mrb[1].mxu0 }
 0x121   : > { %v623_v51 = vadd.f32 %v619_v43, %v588_v49  ;;  %v590_v52 = vpop.f32.mrb[2].mxu0 }
 0x122   : > { %v632_v54 = vadd.f32 %v628_v45, %v622_v48  ;;  %v624_v55 = vadd.f32 %v615_v42, %v590_v52  ;;  %v592_v56 = vpop.f32.mrb[3].mxu0 }
 0x123   : > { %v633_v57 = vadd.f32 %v629_v47, %v623_v51  ;;  %v625_v58 = vadd.f32 %v619_v43, %v592_v56 }
 0x124   : > { %v636_v59 = vmax.f32 %v632_v54, 0.0  ;;  %v634_v60 = vadd.f32 %v630_v50, %v624_v55 }
 0x125   : > { %v637_v61 = vmax.f32 %v633_v57, 0.0  ;;  %v635_v62 = vadd.f32 %v631_v53, %v625_v58  ;;  %660 = sbr.rel (!%p1041_p6) target bundleno = 308 (0x134), region = 124 }
 0x126   : > { %v638_v63 = vmax.f32 %v634_v60, 0.0 }
 0x127   : > { %v867_v0 = vpack.c.bf16 %v637_v61, %v636_v59  ;;  %v639_v1 = vmax.f32 %v635_v62, 0.0 }
 0x129   : > { %652 = vst [vmem:[%s414_s15] sm:$0xff] %v867_v0  ;;  %v868_v2 = vpack.c.bf16 %v639_v1, %v638_v63 }
 0x12b   : > { %653 = vst [vmem:[%s414_s15 + $0x8] sm:$0xff] %v868_v2 }
 0x130   : > { %v696_v3 = vld [vmem:[%s414_s15] sm:$0xff] }
 0x131   : > { %697 = vst [vmem:[%s666_s11] sm:$0xff] %v696_v3 }
 0x132   : > { %v698_v4 = vld [vmem:[%s414_s15 + $0x8] sm:$0xff] }
 0x133   : > { %699 = vst [vmem:[%s666_s11 + $0x10] sm:$0xff] %v698_v4 }
 0x134 PF: > { %s14_s19 = sadd.s32 1, %s974_s19   ;;  %s1127_s15 = smov %s962_s16 }
 0x135   : > { %p11_p12 = scmp.ge.s32.totalorder %s14_s19, 4   ;;  %s1128_s16 = smov %s1046_s26 }
 0x136   : > { %s1129_s17 = smov %s970_s18  ;;  %s1130_s18 = smov %s1132_s20 }
 0x137   :  { %13 = sbr.rel (!%p11_p12) target bundleno = 3 (0x3), region = 207 }

// kernel: resnet50_forward.70
= control target key start
LH: loop header
LB: loop body
LE: loop exit
PB: predicated region body
PF: predicated region fallthrough
CT: control target
= control target key end

     0   :  { %s681_s1 = inlined_call_operand.vmem [shape: bf16[512,128], index: 1, kind: input, shape index: {}]   ;;  %s682_s0 = inlined_call_operand.vmem [shape: bf16[16,512], index: 0, kind: input, shape index: {}]   ;;  %s683_s2 = inlined_call_operand.vmem [shape: f32[1,128], index: 2, kind: input, shape index: {}]   ;;  %s684_s3 = inlined_call_operand.vmem [shape: bf16[16,128], index: 3, kind: output, shape index: {}]  }
   0x1   :  { %v509_v0 = vld [vmem:[%s681_s1 + $0x40] sm:$0xff]   ;;  %v513_v4 = vld [vmem:[%s681_s1 + $0x48] sm:$0xff]   ;;  %v517_v8 = vld [vmem:[%s681_s1 + $0x50] sm:$0xff]  }
   0x2   :  { %v510_v1 = vld [vmem:[%s681_s1 + $0xc0] sm:$0xff]   ;;  %465 = vmatprep.subr.bf16.mxu0 %v509_v0  ;;  %v514_v5 = vld [vmem:[%s681_s1 + $0xc8] sm:$0xff]   ;;  %v518_v9 = vld [vmem:[%s681_s1 + $0xd0] sm:$0xff]  }
   0x3   :  { %v511_v2 = vld [vmem:[%s681_s1] sm:$0xff]   ;;  %487 = vmatprep.subr.bf16.mxu1 %v510_v1  ;;  %v515_v6 = vld [vmem:[%s681_s1 + $0x8] sm:$0xff]   ;;  %v519_v10 = vld [vmem:[%s681_s1 + $0x10] sm:$0xff]  }
   0x4   :  { %v512_v3 = vld [vmem:[%s681_s1 + $0x80] sm:$0xff]   ;;  %466 = vmatpush3.bf16.msra.mxu0 %v511_v2  ;;  %v516_v7 = vld [vmem:[%s681_s1 + $0x88] sm:$0xff]   ;;  %v520_v11 = vld [vmem:[%s681_s1 + $0x90] sm:$0xff]  }
   0x5   :  { %488 = vmatpush3.bf16.msra.mxu1 %v512_v3  ;;  %467 = vmatprep.subr.bf16.mxu0 %v513_v4  ;;  %v521_v12 = vld [vmem:[%s681_s1 + $0x58] sm:$0xff]   ;;  %v525_v16 = vld [vmem:[%s681_s1 + $0x60] sm:$0xff]   ;;  %v529_v20 = vld [vmem:[%s681_s1 + $0x68] sm:$0xff]  }
   0x6   :  { %489 = vmatprep.subr.bf16.mxu1 %v514_v5  ;;  %v522_v13 = vld [vmem:[%s681_s1 + $0xd8] sm:$0xff]   ;;  %v526_v17 = vld [vmem:[%s681_s1 + $0xe0] sm:$0xff]   ;;  %v530_v21 = vld [vmem:[%s681_s1 + $0xe8] sm:$0xff]  }
   0x7   :  { %v523_v14 = vld [vmem:[%s681_s1 + $0x18] sm:$0xff]   ;;  %v527_v18 = vld [vmem:[%s681_s1 + $0x20] sm:$0xff]   ;;  %v531_v22 = vld [vmem:[%s681_s1 + $0x28] sm:$0xff]  }
   0x8   :  { %468 = vmatpush3.bf16.msra.mxu0 %v515_v6  ;;  %v524_v15 = vld [vmem:[%s681_s1 + $0x98] sm:$0xff]   ;;  %v528_v19 = vld [vmem:[%s681_s1 + $0xa0] sm:$0xff]   ;;  %v532_v23 = vld [vmem:[%s681_s1 + $0xa8] sm:$0xff]  }
   0x9   :  { %490 = vmatpush3.bf16.msra.mxu1 %v516_v7  ;;  %469 = vmatprep.subr.bf16.mxu0 %v517_v8  ;;  %v533_v24 = vld [vmem:[%s681_s1 + $0x70] sm:$0xff]   ;;  %v537_v28 = vld [vmem:[%s681_s1 + $0x78] sm:$0xff]   ;;  %v455_v45 = vld [vmem:[%s683_s2] ss:$0 sm:$0xff] }
   0xa   :  { %491 = vmatprep.subr.bf16.mxu1 %v518_v9  ;;  %v534_v25 = vld [vmem:[%s681_s1 + $0xf0] sm:$0xff]   ;;  %v538_v29 = vld [vmem:[%s681_s1 + $0xf8] sm:$0xff]  }
   0xb   :  { %v535_v26 = vld [vmem:[%s681_s1 + $0x30] sm:$0xff]   ;;  %v539_v30 = vld [vmem:[%s681_s1 + $0x38] sm:$0xff]  }
   0xc   :  { %470 = vmatpush3.bf16.msra.mxu0 %v519_v10  ;;  %v536_v27 = vld [vmem:[%s681_s1 + $0xb0] sm:$0xff]   ;;  %v540_v31 = vld [vmem:[%s681_s1 + $0xb8] sm:$0xff]  }
   0xd   :  { %492 = vmatpush3.bf16.msra.mxu1 %v520_v11  ;;  %471 = vmatprep.subr.bf16.mxu0 %v521_v12  ;;  %v541_v32 = vld [vmem:[%s682_s0] ss:$16 sps:$4 sm:$0xff]   ;;  %v543_v33 = vld [vmem:[%s682_s0 + $0x4] ss:$16 sps:$4 sm:$0xff]   ;;  %v544_v34 = vld [vmem:[%s682_s0 + $0x8] ss:$16 sps:$4 sm:$0xff]  }
   0xe   :  { %493 = vmatprep.subr.bf16.mxu1 %v522_v13  ;;  %v546_v35 = vld [vmem:[%s682_s0 + $0xc] ss:$16 sps:$4 sm:$0xff]   ;;  %335 = vmatprep.mubr.bf16.mxu0 %v543_v33 }
   0xf   :  { %376 = vmatprep.mubr.bf16.mxu1 %v546_v35 }
  0x10   :  { %472 = vmatpush3.bf16.msra.mxu0 %v523_v14 }
  0x11   :  { %494 = vmatpush3.bf16.msra.mxu1 %v524_v15  ;;  %473 = vmatprep.subr.bf16.mxu0 %v525_v16 }
  0x12   :  { %495 = vmatprep.subr.bf16.mxu1 %v526_v17 }
  0x14   :  { %474 = vmatpush3.bf16.msra.mxu0 %v527_v18 }
  0x15   :  { %496 = vmatpush3.bf16.msra.mxu1 %v528_v19  ;;  %475 = vmatprep.subr.bf16.mxu0 %v529_v20 }
  0x16   :  { %497 = vmatprep.subr.bf16.mxu1 %v530_v21 }
  0x18   :  { %476 = vmatpush3.bf16.msra.mxu0 %v531_v22 }
  0x19   :  { %498 = vmatpush3.bf16.msra.mxu1 %v532_v23  ;;  %477 = vmatprep.subr.bf16.mxu0 %v533_v24 }
  0x1a   :  { %499 = vmatprep.subr.bf16.mxu1 %v534_v25 }
  0x1c   :  { %478 = vmatpush3.bf16.msra.mxu0 %v535_v26 }
  0x1d   :  { %500 = vmatpush3.bf16.msra.mxu1 %v536_v27  ;;  %479 = vmatprep.subr.bf16.mxu0 %v537_v28 }
  0x1e   :  { %501 = vmatprep.subr.bf16.mxu1 %v538_v29 }
  0x20   :  { %480 = vmatpush3.bf16.msra.mxu0 %v539_v30 }
  0x21   :  { %502 = vmatpush3.bf16.msra.mxu1 %v540_v31 }
  0x23   :  { %336 = vmatmul.mubr.bf16.vlgmr.msra.gmra.mrb[0].mxu0 %v541_v32 }
  0x24   :  { %377 = vmatmul.mubr.bf16.vlgmr.msra.gmra.mrb[0].mxu1 %v544_v34 }
  0xf6   :  { %v481_v36 = vpop.f32.mrb[0].mxu0 }
  0xf7   :  { %v503_v37 = vpop.f32.mrb[0].mxu1  ;;  %v482_v38 = vpop.f32.mrb[1].mxu0 }
  0xf8   :  { %v483_v39 = vadd.f32 %v482_v38, %v481_v36  ;;  %v504_v40 = vpop.f32.mrb[1].mxu1  ;;  %v484_v41 = vpop.f32.mrb[2].mxu0 }
  0xf9   :  { %v505_v42 = vadd.f32 %v504_v40, %v503_v37  ;;  %v506_v43 = vpop.f32.mrb[2].mxu1  ;;  %v485_v44 = vpop.f32.mrb[3].mxu0 }
  0xfa   :  { %v486_v46 = vadd.f32 %v485_v44, %v484_v41  ;;  %v507_v47 = vpop.f32.mrb[3].mxu1 }
  0xfb   :  { %v379_v48 = vadd.f32 %v505_v42, %v483_v39  ;;  %v508_v49 = vadd.f32 %v507_v47, %v506_v43 }
  0xfd   :  { %v401_v50 = vadd.f32 %v455_v45, %v379_v48  ;;  %v382_v51 = vadd.f32 %v508_v49, %v486_v46 }
  0xff   :  { %v402_v52 = vadd.f32 %v455_v45, %v382_v51  ;;  %v403_v53 = vmax.f32 %v401_v50, 0.0 }
 0x101   :  { %v404_v54 = vmax.f32 %v402_v52, 0.0 }
 0x103   :  { %v463_v55 = vpack.c.bf16 %v404_v54, %v403_v53 }
 0x105   :  { %464 = vst [vmem:[%s684_s3] sm:$0xff] %v463_v55  }

// kernel: resnet50_forward.79
= control target key start
LH: loop header
LB: loop body
LE: loop exit
PB: predicated region body
PF: predicated region fallthrough
CT: control target
= control target key end

     0   :  { %s984_s1 = inlined_call_operand.vmem [shape: bf16[512,256], index: 1, kind: input, shape index: {}]   ;;  %s985_s0 = inlined_call_operand.vmem [shape: bf16[16,512], index: 0, kind: input, shape index: {}]   ;;  %s986_s2 = inlined_call_operand.vmem [shape: f32[1,256], index: 2, kind: input, shape index: {}]   ;;  %s987_s3 = inlined_call_operand.vmem [shape: bf16[16,256], index: 3, kind: output, shape index: {}]  }
   0x1   :  { %v649_v0 = vld [vmem:[%s984_s1 + $0x4] ss:$8 sps:$4 sm:$0xff]   ;;  %v653_v2 = vld [vmem:[%s984_s1] ss:$8 sps:$4 sm:$0xff]   ;;  %v655_v4 = vld [vmem:[%s984_s1 + $0x14] ss:$8 sps:$4 sm:$0xff]  }
   0x2   :  { %v651_v1 = vld [vmem:[%s984_s1 + $0x104] ss:$8 sps:$4 sm:$0xff]   ;;  %434 = vmatprep.subr.bf16.mxu1 %v649_v0  ;;  %v654_v3 = vld [vmem:[%s984_s1 + $0x100] ss:$8 sps:$4 sm:$0xff]   ;;  %v657_v5 = vld [vmem:[%s984_s1 + $0x114] ss:$8 sps:$4 sm:$0xff]  }
   0x3   :  { %477 = vmatprep.subr.bf16.mxu0 %v651_v1  ;;  %435 = vmatpush1.bf16.msra.mxu1 %v653_v2  ;;  %v659_v6 = vld [vmem:[%s984_s1 + $0x10] ss:$8 sps:$4 sm:$0xff]   ;;  %v661_v8 = vld [vmem:[%s984_s1 + $0x24] ss:$8 sps:$4 sm:$0xff]   ;;  %v665_v10 = vld [vmem:[%s984_s1 + $0x20] ss:$8 sps:$4 sm:$0xff]  }
   0x4   :  { %478 = vmatpush1.bf16.msra.mxu0 %v654_v3  ;;  %436 = vmatprep.subr.bf16.mxu1 %v655_v4  ;;  %v660_v7 = vld [vmem:[%s984_s1 + $0x110] ss:$8 sps:$4 sm:$0xff]   ;;  %v663_v9 = vld [vmem:[%s984_s1 + $0x124] ss:$8 sps:$4 sm:$0xff]   ;;  %v666_v11 = vld [vmem:[%s984_s1 + $0x120] ss:$8 sps:$4 sm:$0xff]   ;;  %v537_v4 = vlaneseq }
   0x5   :  { %479 = vmatprep.subr.bf16.mxu0 %v657_v5  ;;  %v667_v12 = vld [vmem:[%s984_s1 + $0x34] ss:$8 sps:$4 sm:$0xff]   ;;  %v671_v14 = vld [vmem:[%s984_s1 + $0x30] ss:$8 sps:$4 sm:$0xff]   ;;  %v673_v16 = vld [vmem:[%s984_s1 + $0x44] ss:$8 sps:$4 sm:$0xff]  }
   0x6   :  { %v669_v13 = vld [vmem:[%s984_s1 + $0x134] ss:$8 sps:$4 sm:$0xff]   ;;  %v672_v15 = vld [vmem:[%s984_s1 + $0x130] ss:$8 sps:$4 sm:$0xff]   ;;  %v675_v17 = vld [vmem:[%s984_s1 + $0x144] ss:$8 sps:$4 sm:$0xff]  }
   0x7   :  { %437 = vmatpush1.bf16.msra.mxu1 %v659_v6  ;;  %v677_v18 = vld [vmem:[%s984_s1 + $0x40] ss:$8 sps:$4 sm:$0xff]   ;;  %v679_v20 = vld [vmem:[%s984_s1 + $0x54] ss:$8 sps:$4 sm:$0xff]   ;;  %v683_v22 = vld [vmem:[%s984_s1 + $0x50] ss:$8 sps:$4 sm:$0xff]  }
   0x8   :  { %480 = vmatpush1.bf16.msra.mxu0 %v660_v7  ;;  %438 = vmatprep.subr.bf16.mxu1 %v661_v8  ;;  %v678_v19 = vld [vmem:[%s984_s1 + $0x140] ss:$8 sps:$4 sm:$0xff]   ;;  %v681_v21 = vld [vmem:[%s984_s1 + $0x154] ss:$8 sps:$4 sm:$0xff]   ;;  %v684_v23 = vld [vmem:[%s984_s1 + $0x150] ss:$8 sps:$4 sm:$0xff]  }
   0x9   :  { %481 = vmatprep.subr.bf16.mxu0 %v663_v9  ;;  %v685_v24 = vld [vmem:[%s984_s1 + $0x64] ss:$8 sps:$4 sm:$0xff]   ;;  %v689_v26 = vld [vmem:[%s984_s1 + $0x60] ss:$8 sps:$4 sm:$0xff]   ;;  %v691_v28 = vld [vmem:[%s984_s1 + $0x74] ss:$8 sps:$4 sm:$0xff]  }
   0xa   :  { %v687_v25 = vld [vmem:[%s984_s1 + $0x164] ss:$8 sps:$4 sm:$0xff]   ;;  %v690_v27 = vld [vmem:[%s984_s1 + $0x160] ss:$8 sps:$4 sm:$0xff]   ;;  %v693_v29 = vld [vmem:[%s984_s1 + $0x174] ss:$8 sps:$4 sm:$0xff]  }
   0xb   :  { %439 = vmatpush1.bf16.msra.mxu1 %v665_v10  ;;  %v695_v30 = vld [vmem:[%s984_s1 + $0x70] ss:$8 sps:$4 sm:$0xff]   ;;  %v697_v32 = vld [vmem:[%s984_s1 + $0x84] ss:$8 sps:$4 sm:$0xff]   ;;  %v701_v34 = vld [vmem:[%s984_s1 + $0x80] ss:$8 sps:$4 sm:$0xff]  }
   0xc   :  { %482 = vmatpush1.bf16.msra.mxu0 %v666_v11  ;;  %440 = vmatprep.subr.bf16.mxu1 %v667_v12  ;;  %v696_v31 = vld [vmem:[%s984_s1 + $0x170] ss:$8 sps:$4 sm:$0xff]   ;;  %v699_v33 = vld [vmem:[%s984_s1 + $0x184] ss:$8 sps:$4 sm:$0xff]   ;;  %v702_v35 = vld [vmem:[%s984_s1 + $0x180] ss:$8 sps:$4 sm:$0xff]  }
   0xd   :  { %483 = vmatprep.subr.bf16.mxu0 %v669_v13  ;;  %v703_v36 = vld [vmem:[%s984_s1 + $0x94] ss:$8 sps:$4 sm:$0xff]   ;;  %v707_v38 = vld [vmem:[%s984_s1 + $0x90] ss:$8 sps:$4 sm:$0xff]   ;;  %v709_v40 = vld [vmem:[%s984_s1 + $0xa4] ss:$8 sps:$4 sm:$0xff]  }
   0xe   :  { %v705_v37 = vld [vmem:[%s984_s1 + $0x194] ss:$8 sps:$4 sm:$0xff]   ;;  %v708_v39 = vld [vmem:[%s984_s1 + $0x190] ss:$8 sps:$4 sm:$0xff]   ;;  %v711_v41 = vld [vmem:[%s984_s1 + $0x1a4] ss:$8 sps:$4 sm:$0xff]  }
   0xf   :  { %441 = vmatpush1.bf16.msra.mxu1 %v671_v14  ;;  %v713_v42 = vld [vmem:[%s984_s1 + $0xa0] ss:$8 sps:$4 sm:$0xff]   ;;  %v715_v44 = vld [vmem:[%s984_s1 + $0xb4] ss:$8 sps:$4 sm:$0xff]   ;;  %v719_v46 = vld [vmem:[%s984_s1 + $0xb0] ss:$8 sps:$4 sm:$0xff]  }
  0x10   :  { %484 = vmatpush1.bf16.msra.mxu0 %v672_v15  ;;  %442 = vmatprep.subr.bf16.mxu1 %v673_v16  ;;  %v714_v43 = vld [vmem:[%s984_s1 + $0x1a0] ss:$8 sps:$4 sm:$0xff]   ;;  %v717_v45 = vld [vmem:[%s984_s1 + $0x1b4] ss:$8 sps:$4 sm:$0xff]   ;;  %v720_v48 = vld [vmem:[%s984_s1 + $0x1b0] ss:$8 sps:$4 sm:$0xff]  }
  0x11   :  { %485 = vmatprep.subr.bf16.mxu0 %v675_v17  ;;  %v747_v47 = vld [vmem:[%s985_s0 + $0x4] ss:$16 sps:$4 sm:$0xff]   ;;  %v750_v51 = vld [vmem:[%s985_s0 + $0xc] ss:$16 sps:$4 sm:$0xff]   ;;  %v725_v52 = vld [vmem:[%s984_s1 + $0xc0] ss:$8 sps:$4 sm:$0xff]  }
  0x12   :  { %v721_v49 = vld [vmem:[%s984_s1 + $0xc4] ss:$8 sps:$4 sm:$0xff]   ;;  %466 = vmatprep.mubr.bf16.mxu1 %v747_v47  ;;  %509 = vmatprep.mubr.bf16.mxu0 %v750_v51  ;;  %v726_v53 = vld [vmem:[%s984_s1 + $0x1c0] ss:$8 sps:$4 sm:$0xff]   ;;  %v727_v54 = vld [vmem:[%s984_s1 + $0xd4] ss:$8 sps:$4 sm:$0xff]  }
  0x13   :  { %443 = vmatpush1.bf16.msra.mxu1 %v677_v18  ;;  %v723_v50 = vld [vmem:[%s984_s1 + $0x1c4] ss:$8 sps:$4 sm:$0xff]   ;;  %v729_v55 = vld [vmem:[%s984_s1 + $0x1d4] ss:$8 sps:$4 sm:$0xff]   ;;  %v731_v56 = vld [vmem:[%s984_s1 + $0xd0] ss:$8 sps:$4 sm:$0xff]  }
  0x14   :  { %486 = vmatpush1.bf16.msra.mxu0 %v678_v19  ;;  %444 = vmatprep.subr.bf16.mxu1 %v679_v20  ;;  %v732_v57 = vld [vmem:[%s984_s1 + $0x1d0] ss:$8 sps:$4 sm:$0xff]   ;;  %v733_v58 = vld [vmem:[%s984_s1 + $0xe4] ss:$8 sps:$4 sm:$0xff]   ;;  %v737_v60 = vld [vmem:[%s984_s1 + $0xe0] ss:$8 sps:$4 sm:$0xff]  }
  0x15   :  { %487 = vmatprep.subr.bf16.mxu0 %v681_v21  ;;  %v735_v59 = vld [vmem:[%s984_s1 + $0x1e4] ss:$8 sps:$4 sm:$0xff]   ;;  %v738_v61 = vld [vmem:[%s984_s1 + $0x1e0] ss:$8 sps:$4 sm:$0xff]   ;;  %v739_v62 = vld [vmem:[%s984_s1 + $0xf4] ss:$8 sps:$4 sm:$0xff]  }
  0x16   :  { %v741_v63 = vld [vmem:[%s984_s1 + $0x1f4] ss:$8 sps:$4 sm:$0xff]   ;;  %v743_v0 = vld [vmem:[%s984_s1 + $0xf0] ss:$8 sps:$4 sm:$0xff]   ;;  %v538_v5 = vshrl.u32 %v537_v4, 7 }
  0x17   :  { %445 = vmatpush1.bf16.msra.mxu1 %v683_v22  ;;  %v744_v1 = vld [vmem:[%s984_s1 + $0x1f0] ss:$8 sps:$4 sm:$0xff]   ;;  %v535_v7 = vld [vmem:[%s986_s2] sm:$0x3] }
  0x18   :  { %488 = vmatpush1.bf16.msra.mxu0 %v684_v23  ;;  %446 = vmatprep.subr.bf16.mxu1 %v685_v24  ;;  %v745_v2 = vld [vmem:[%s985_s0] ss:$16 sps:$4 sm:$0xff]   ;;  %v748_v3 = vld [vmem:[%s985_s0 + $0x8] ss:$16 sps:$4 sm:$0xff]   ;;  %v539_v6 = vsub.s32 0, %v538_v5  ;;  %v543_v8 = vsub.s32 1, %v538_v5 }
  0x19   :  { %489 = vmatprep.subr.bf16.mxu0 %v687_v25 }
  0x1a   :  { %v540_v9 = vrot.slane %v535_v7, %v539_v6  ;;  %v544_v12 = vrot.slane %v535_v7, %v543_v8 }
  0x1b   :  { %447 = vmatpush1.bf16.msra.mxu1 %v689_v26 }
  0x1c   :  { %490 = vmatpush1.bf16.msra.mxu0 %v690_v27  ;;  %448 = vmatprep.subr.bf16.mxu1 %v691_v28 }
  0x1d   :  { %491 = vmatprep.subr.bf16.mxu0 %v693_v29 }
  0x1f   :  { %449 = vmatpush1.bf16.msra.mxu1 %v695_v30 }
  0x20   :  { %492 = vmatpush1.bf16.msra.mxu0 %v696_v31  ;;  %450 = vmatprep.subr.bf16.mxu1 %v697_v32 }
  0x21   :  { %493 = vmatprep.subr.bf16.mxu0 %v699_v33 }
  0x23   :  { %451 = vmatpush1.bf16.msra.mxu1 %v701_v34 }
  0x24   :  { %494 = vmatpush1.bf16.msra.mxu0 %v702_v35  ;;  %452 = vmatprep.subr.bf16.mxu1 %v703_v36 }
  0x25   :  { %495 = vmatprep.subr.bf16.mxu0 %v705_v37 }
  0x27   :  { %453 = vmatpush1.bf16.msra.mxu1 %v707_v38 }
  0x28   :  { %496 = vmatpush1.bf16.msra.mxu0 %v708_v39  ;;  %454 = vmatprep.subr.bf16.mxu1 %v709_v40 }
  0x29   :  { %497 = vmatprep.subr.bf16.mxu0 %v711_v41 }
  0x2b   :  { %455 = vmatpush1.bf16.msra.mxu1 %v713_v42 }
  0x2c   :  { %498 = vmatpush1.bf16.msra.mxu0 %v714_v43  ;;  %456 = vmatprep.subr.bf16.mxu1 %v715_v44 }
  0x2d   :  { %499 = vmatprep.subr.bf16.mxu0 %v717_v45 }
  0x2f   :  { %457 = vmatpush1.bf16.msra.mxu1 %v719_v46 }
  0x30   :  { %500 = vmatpush1.bf16.msra.mxu0 %v720_v48  ;;  %458 = vmatprep.subr.bf16.mxu1 %v721_v49 }
  0x31   :  { %501 = vmatprep.subr.bf16.mxu0 %v723_v50 }
  0x33   :  { %459 = vmatpush1.bf16.msra.mxu1 %v725_v52 }
  0x34   :  { %502 = vmatpush1.bf16.msra.mxu0 %v726_v53  ;;  %460 = vmatprep.subr.bf16.mxu1 %v727_v54 }
  0x35   :  { %503 = vmatprep.subr.bf16.mxu0 %v729_v55 }
  0x37   :  { %461 = vmatpush1.bf16.msra.mxu1 %v731_v56 }
  0x38   :  { %504 = vmatpush1.bf16.msra.mxu0 %v732_v57  ;;  %462 = vmatprep.subr.bf16.mxu1 %v733_v58 }
  0x39   :  { %505 = vmatprep.subr.bf16.mxu0 %v735_v59 }
  0x3b   :  { %463 = vmatpush1.bf16.msra.mxu1 %v737_v60 }
  0x3c   :  { %506 = vmatpush1.bf16.msra.mxu0 %v738_v61  ;;  %464 = vmatprep.subr.bf16.mxu1 %v739_v62 }
  0x3d   :  { %507 = vmatprep.subr.bf16.mxu0 %v741_v63 }
  0x3f   :  { %465 = vmatpush1.bf16.msra.mxu1 %v743_v0 }
  0x40   :  { %508 = vmatpush1.bf16.msra.mxu0 %v744_v1 }
  0x42   :  { %467 = vmatmul.mubr.bf16.vlgmr.msra.gmra.mrb[0].mxu1 %v745_v2 }
  0x43   :  { %510 = vmatmul.mubr.bf16.vlgmr.msra.gmra.mrb[0].mxu0 %v748_v3 }
 0x115   :  { %v468_v10 = vpop.f32.mrb[0].mxu1 }
 0x116   :  { %v511_v11 = vpop.f32.mrb[0].mxu0  ;;  %v470_v14 = vpop.f32.mrb[1].mxu1 }
 0x117   :  { %v512_v13 = vadd.f32 %v511_v11, %v468_v10  ;;  %v513_v15 = vpop.f32.mrb[1].mxu0  ;;  %v472_v17 = vpop.f32.mrb[2].mxu1 }
 0x118   :  { %v514_v16 = vadd.f32 %v513_v15, %v470_v14  ;;  %v515_v18 = vpop.f32.mrb[2].mxu0  ;;  %v474_v21 = vpop.f32.mrb[3].mxu1 }
 0x119   :  { %v547_v19 = vadd.f32 %v540_v9, %v512_v13  ;;  %v516_v20 = vadd.f32 %v515_v18, %v472_v17  ;;  %v517_v22 = vpop.f32.mrb[3].mxu0 }
 0x11a   :  { %v548_v23 = vadd.f32 %v544_v12, %v514_v16  ;;  %v518_v24 = vadd.f32 %v517_v22, %v474_v21 }
 0x11b   :  { %v551_v25 = vmax.f32 %v547_v19, 0.0  ;;  %v549_v26 = vadd.f32 %v540_v9, %v516_v20 }
 0x11c   :  { %v552_v27 = vmax.f32 %v548_v23, 0.0  ;;  %v550_v28 = vadd.f32 %v544_v12, %v518_v24 }
 0x11d   :  { %v553_v29 = vmax.f32 %v549_v26, 0.0 }
 0x11e   :  { %v643_v30 = vpack.c.bf16 %v552_v27, %v551_v25  ;;  %v554_v31 = vmax.f32 %v550_v28, 0.0 }
 0x120   :  { %567 = vst [vmem:[%s987_s3] sm:$0xff] %v643_v30  ;;  %v644_v32 = vpack.c.bf16 %v554_v31, %v553_v29 }
 0x122   :  { %568 = vst [vmem:[%s987_s3 + $0x8] sm:$0xff] %v644_v32 }

// kernel: resnet50_forward.80
= control target key start
LH: loop header
LB: loop body
LE: loop exit
PB: predicated region body
PF: predicated region fallthrough
CT: control target
= control target key end

     0   :  { %s1151_s12 = smov 0   ;;  %s1153_s13 = smov 0   ;;  %s1282_s0 = inlined_call_operand.vmem [shape: bf16[16,2304], index: 0, kind: input, shape index: {}]   ;;  %s1283_s1 = inlined_call_operand.vmem [shape: bf16[2304,256], index: 1, kind: input, shape index: {}]   ;;  %s1284_s2 = inlined_call_operand.vmem [shape: f32[1,256], index: 2, kind: input, shape index: {}]   ;;  %s1285_s3 = inlined_call_operand.vmem [shape: bf16[16,256], index: 3, kind: output, shape index: {}]  }
   0x1   :  { %s1155_s14 = smov 0   ;;  %s1157_s15 = smov 0  }
   0x2   :  { %s1159_s16 = smov 0  }
   0x3 LB: > { %s25_s17 = sadd.s32 1, %s1123_s15  ;;  %p48_p1 = scmp.ne.s32.totalorder %s1115_s13, %s1111_s12  ;;  %s1127_s16 = sphi %s1159_s16, %s13_s16   ;;  %s1123_s15 = sphi %s1157_s15, %s1289_s15   ;;  %s1119_s14 = sphi %s1155_s14, %s1288_s14   ;;  %s1115_s13 = sphi %s1153_s13, %s1287_s13   ;;  %s1111_s12 = sphi %s1151_s12, %s1286_s12  }
   0x4   : > { %p26_p0 = scmp.ge.s32.totalorder %s25_s17, 6  ;;  %p49_p2 = scmp.eq.s32.totalorder %s1127_s16, 0 }
   0x5   : > { %s41_s19 = sadd.s32 1, %s1115_s13  ;;  %p893_p5 = scmp.ge.s32.totalorder %s1127_s16, 6 }
   0x6   : > { %s1291_s17 = smov (%p26_p0, %s25_s17), 0  ;;  %p50_p3 = por %p49_p2, %p48_p1 }
   0x7   : > { %s37_s18 = ssub.s32 %s1123_s15, %s1291_s17  ;;  %164 = sbr.rel (%p893_p5) target bundleno = 21 (0x15), region = 20 }
   0x8   : > { %p39_p4 = scmp.eq.s32.totalorder %s37_s18, 0 }
   0xa   : > { %s1186_s20 = scalar_select %p39_p4, %s1115_s13, %s41_s19  }
   0xe   : > { %167 = sbr.rel (!%p50_p3) target bundleno = 21 (0x15), region = 24  ;;  %s169_s21 = sand.u32 (%p50_p3), 1, %s1115_s13  }
   0xf   : > { %s961_s22 = smul.u32 (%p50_p3), 12, %s1123_s15 }
  0x10   : > { %s969_s23 = smul.u32 (%p50_p3), 24, %s169_s21 }
  0x11   : > { %s177_s26 = scalar_lea.vmem (%p50_p3), %s1282_s0, %s961_s22 }
  0x12   : > { %v192_v0 = vld [vmem:[%s177_s26] sm:$0xff] (%p50_p3)  ;;  %v194_v1 = vld [vmem:[%s177_s26 + $0x48] sm:$0xff] (%p50_p3)  ;;  %s171_s27 = scalar_lea.vmem (%p50_p3), [#allocation3], %s969_s23  ;;  %v897_v3 = vld [vmem:[%s177_s26 + $0x50] sm:$0xf] (%p50_p3) }
  0x13   : > { %v895_v2 = vld [vmem:[%s177_s26 + $0x8] sm:$0xf] (%p50_p3)  ;;  %193 = vst [vmem:[%s171_s27] sm:$0xff] (%p50_p3), %v192_v0  ;;  %195 = vst [vmem:[%s171_s27 + $0xc] sm:$0xff] (%p50_p3), %v194_v1 }
  0x14   : > { %896 = vst [vmem:[%s171_s27 + $0x8] sm:$0xf] (%p50_p3), %v895_v2  ;;  %898 = vst [vmem:[%s171_s27 + $0x14] sm:$0xf] (%p50_p3), %v897_v3 }
  0x15 PF: > { %p899_p6 = scmp.ge.s32.totalorder %s1127_s16, 1  ;;  %p226_p7 = scmp.lt.s32.totalorder %s1127_s16, 7 }
  0x17   : > { %p227_p8 = pnand %p899_p6, %p226_p7 }
  0x18   : > { %s233_s28 = sand.u32 (!%p227_p8), 1, %s1111_s12   ;;  %s277_s29 = smul.u32 (!%p227_p8), 48, %s1119_s14 }
  0x19   : > { %230 = sbr.rel (%p227_p8) target bundleno = 338 (0x152), region = 54  ;;  %p902_p10 = scmp.ne.s32.totalorder (!%p227_p8), %s1119_s14, 0 }
  0x1a   : > { %s970_s30 = smul.u32 (!%p227_p8), 24, %s233_s28  ;;  %p279_p9 = scmp.lt.s32.totalorder (!%p227_p8), %s277_s29, 287 }
  0x1c   : > { %s1203_s8 = scalar_lea.vmem (!%p227_p8), [#allocation3], %s970_s30 }
  0x20   : > { %s1293_s29 = smov (!%p279_p9, %s277_s29), 287  ;;  %310 = sbr.rel (%p902_p10) target bundleno = 39 (0x27), region = 62 }
  0x21   : > { %s962_s4 = sshll.u32 %s1293_s29, 3  ;;  %v1129_v4 = vmov (!%p902_p10), 0.0  }
  0x22   : > { %s1201_s7 = scalar_lea.vmem %s1283_s1, %s962_s4  ;;  %311 = vst [vmem:[#allocation2] sm:$0xff] (!%p902_p10), %v1129_v4  ;;  %312 = vst [vmem:[#allocation2 + $0x8] sm:$0xff] (!%p902_p10), %v1129_v4 }
  0x23   : > { %313 = vst [vmem:[#allocation2 + $0x10] sm:$0xff] (!%p902_p10), %v1129_v4  ;;  %314 = vst [vmem:[#allocation2 + $0x18] sm:$0xff] (!%p902_p10), %v1129_v4 }
  0x27 PF: > { %v1013_v5 = vld [vmem:[%s1201_s7 + $0x4] ss:$8 sps:$4 sm:$0xff]   ;;  %v1015_v6 = vld [vmem:[%s1201_s7] ss:$8 sps:$4 sm:$0xff]   ;;  %v1130_v7 = vmov 0   ;;  %p954_p11 = scmp.ne.s32.totalorder %s1119_s14, 5 }
  0x28   : > { %702 = vmatprep.mubr.bf16.mxu0 %v1130_v7  ;;  %627 = vmatprep.subr.bf16.mxu1 %v1013_v5  ;;  %v1016_v8 = vld [vmem:[%s1201_s7 + $0x14] ss:$8 sps:$4 sm:$0xff]   ;;  %v1018_v9 = vld [vmem:[%s1201_s7 + $0x10] ss:$8 sps:$4 sm:$0xff]   ;;  %v1019_v10 = vld [vmem:[%s1201_s7 + $0x24] ss:$8 sps:$4 sm:$0xff]  }
  0x29   : > { %628 = vmatpush1.bf16.msra.mxu1 %v1015_v6  ;;  %v1021_v11 = vld [vmem:[%s1201_s7 + $0x20] ss:$8 sps:$4 sm:$0xff]   ;;  %v1022_v12 = vld [vmem:[%s1201_s7 + $0x34] ss:$8 sps:$4 sm:$0xff]   ;;  %v1024_v13 = vld [vmem:[%s1201_s7 + $0x30] ss:$8 sps:$4 sm:$0xff]  }
  0x2a   : > { %629 = vmatprep.subr.bf16.mxu1 %v1016_v8  ;;  %v1037_v14 = vld [vmem:[%s1201_s7 + $0x104] ss:$8 sps:$4 sm:$0xff]   ;;  %v1039_v15 = vld [vmem:[%s1201_s7 + $0x100] ss:$8 sps:$4 sm:$0xff]   ;;  %v1043_v17 = vld [vmem:[%s1201_s7 + $0x114] ss:$8 sps:$4 sm:$0xff]  }
  0x2b   : > { %v1025_v16 = vld [vmem:[%s1201_s7 + $0x44] ss:$8 sps:$4 sm:$0xff]   ;;  %670 = vmatprep.subr.bf16.mxu0 %v1037_v14  ;;  %v1045_v18 = vld [vmem:[%s1201_s7 + $0x110] ss:$8 sps:$4 sm:$0xff]   ;;  %v1027_v19 = vld [vmem:[%s1201_s7 + $0x40] ss:$8 sps:$4 sm:$0xff]  }
  0x2c   : > { %671 = vmatpush1.bf16.msra.mxu0 %v1039_v15  ;;  %v1028_v20 = vld [vmem:[%s1201_s7 + $0x54] ss:$8 sps:$4 sm:$0xff]   ;;  %v1049_v21 = vld [vmem:[%s1201_s7 + $0x124] ss:$8 sps:$4 sm:$0xff]   ;;  %v1051_v22 = vld [vmem:[%s1201_s7 + $0x120] ss:$8 sps:$4 sm:$0xff]  }
  0x2d   : > { %630 = vmatpush1.bf16.msra.mxu1 %v1018_v9  ;;  %672 = vmatprep.subr.bf16.mxu0 %v1043_v17  ;;  %v1030_v23 = vld [vmem:[%s1201_s7 + $0x50] ss:$8 sps:$4 sm:$0xff]   ;;  %v1055_v24 = vld [vmem:[%s1201_s7 + $0x134] ss:$8 sps:$4 sm:$0xff]   ;;  %v1031_v25 = vld [vmem:[%s1201_s7 + $0x64] ss:$8 sps:$4 sm:$0xff]  }
  0x2e   : > { %631 = vmatprep.subr.bf16.mxu1 %v1019_v10  ;;  %v1057_v26 = vld [vmem:[%s1201_s7 + $0x130] ss:$8 sps:$4 sm:$0xff]   ;;  %v1033_v27 = vld [vmem:[%s1201_s7 + $0x60] ss:$8 sps:$4 sm:$0xff]   ;;  %v1061_v28 = vld [vmem:[%s1201_s7 + $0x144] ss:$8 sps:$4 sm:$0xff]  }
  0x2f   : > { %v1034_v29 = vld [vmem:[%s1201_s7 + $0x74] ss:$8 sps:$4 sm:$0xff]   ;;  %v1063_v30 = vld [vmem:[%s1201_s7 + $0x140] ss:$8 sps:$4 sm:$0xff]   ;;  %v1036_v31 = vld [vmem:[%s1201_s7 + $0x70] ss:$8 sps:$4 sm:$0xff]  }
  0x30   : > { %673 = vmatpush1.bf16.msra.mxu0 %v1045_v18  ;;  %v1067_v32 = vld [vmem:[%s1201_s7 + $0x154] ss:$8 sps:$4 sm:$0xff]   ;;  %v1040_v33 = vld [vmem:[%s1201_s7 + $0x84] ss:$8 sps:$4 sm:$0xff]   ;;  %v1069_v34 = vld [vmem:[%s1201_s7 + $0x150] ss:$8 sps:$4 sm:$0xff]  }
  0x31   : > { %632 = vmatpush1.bf16.msra.mxu1 %v1021_v11  ;;  %674 = vmatprep.subr.bf16.mxu0 %v1049_v21  ;;  %v1042_v35 = vld [vmem:[%s1201_s7 + $0x80] ss:$8 sps:$4 sm:$0xff]   ;;  %v1073_v36 = vld [vmem:[%s1201_s7 + $0x164] ss:$8 sps:$4 sm:$0xff]   ;;  %v1046_v37 = vld [vmem:[%s1201_s7 + $0x94] ss:$8 sps:$4 sm:$0xff]  }
  0x32   : > { %633 = vmatprep.subr.bf16.mxu1 %v1022_v12  ;;  %v1075_v38 = vld [vmem:[%s1201_s7 + $0x160] ss:$8 sps:$4 sm:$0xff]   ;;  %v1048_v40 = vld [vmem:[%s1201_s7 + $0x90] ss:$8 sps:$4 sm:$0xff]   ;;  %v1079_v41 = vld [vmem:[%s1201_s7 + $0x174] ss:$8 sps:$4 sm:$0xff]  }
  0x33   : > { %v1088_v39 = vld [vmem:[%s1203_s8 + $0x4] ss:$12 sps:$4 sm:$0xff]   ;;  %v1085_v46 = vld [vmem:[%s1203_s8 + $0x8] ss:$12 sps:$4 sm:$0xff]   ;;  %v1086_v56 = vld [vmem:[%s1203_s8] ss:$12 sps:$4 sm:$0xff]  }
  0x34   : > { %675 = vmatpush1.bf16.msra.mxu0 %v1051_v22  ;;  %v1052_v42 = vld [vmem:[%s1201_s7 + $0xa4] ss:$8 sps:$4 sm:$0xff]   ;;  %659 = vmatprep.mubr.bf16.mxu1 %v1088_v39  ;;  %v1081_v43 = vld [vmem:[%s1201_s7 + $0x170] ss:$8 sps:$4 sm:$0xff]   ;;  %v1054_v44 = vld [vmem:[%s1201_s7 + $0xa0] ss:$8 sps:$4 sm:$0xff]  }
  0x35   : > { %634 = vmatpush1.bf16.msra.mxu1 %v1024_v13  ;;  %676 = vmatprep.subr.bf16.mxu0 %v1055_v24  ;;  %v1058_v45 = vld [vmem:[%s1201_s7 + $0xb4] ss:$8 sps:$4 sm:$0xff]   ;;  %v1060_v47 = vld [vmem:[%s1201_s7 + $0xb0] ss:$8 sps:$4 sm:$0xff]   ;;  %v1064_v48 = vld [vmem:[%s1201_s7 + $0xc4] ss:$8 sps:$4 sm:$0xff]   ;;  %v731_v13 = vlaneseq (!%p954_p11) }
  0x36   : > { %635 = vmatprep.subr.bf16.mxu1 %v1025_v16  ;;  %v1066_v49 = vld [vmem:[%s1201_s7 + $0xc0] ss:$8 sps:$4 sm:$0xff]   ;;  %v1070_v50 = vld [vmem:[%s1201_s7 + $0xd4] ss:$8 sps:$4 sm:$0xff]   ;;  %v1072_v51 = vld [vmem:[%s1201_s7 + $0xd0] ss:$8 sps:$4 sm:$0xff]  }
  0x37   : > { %v1076_v52 = vld [vmem:[%s1201_s7 + $0xe4] ss:$8 sps:$4 sm:$0xff]   ;;  %v1078_v53 = vld [vmem:[%s1201_s7 + $0xe0] ss:$8 sps:$4 sm:$0xff]   ;;  %v1082_v54 = vld [vmem:[%s1201_s7 + $0xf4] ss:$8 sps:$4 sm:$0xff]  }
  0x38   : > { %677 = vmatpush1.bf16.msra.mxu0 %v1057_v26  ;;  %v1084_v55 = vld [vmem:[%s1201_s7 + $0xf0] ss:$8 sps:$4 sm:$0xff]   ;;  %v315_v61 = vld [vmem:[#allocation2] sm:$0xff]  ;;  %v316_v0 = vld [vmem:[#allocation2 + $0x8] sm:$0xff]  ;;  %v732_v14 = vshrl.u32 (!%p954_p11), %v731_v13, 7 }
  0x39   : > { %636 = vmatpush1.bf16.msra.mxu1 %v1027_v19  ;;  %678 = vmatprep.subr.bf16.mxu0 %v1061_v28  ;;  %v317_v3 = vld [vmem:[#allocation2 + $0x10] sm:$0xff]  ;;  %v318_v7 = vld [vmem:[#allocation2 + $0x18] sm:$0xff]  ;;  %v729_v15 = vld [vmem:[%s1284_s2] sm:$0x3] (!%p954_p11) }
  0x3a   : > { %637 = vmatprep.subr.bf16.mxu1 %v1028_v20  ;;  %v733_v17 = vsub.s32 (!%p954_p11), 0, %v732_v14  ;;  %v737_v18 = vsub.s32 (!%p954_p11), 1, %v732_v14 }
  0x3c   : > { %679 = vmatpush1.bf16.msra.mxu0 %v1063_v30  ;;  %v734_v22 = vrot.slane (!%p954_p11), %v729_v15, %v733_v17 }
  0x3d   : > { %638 = vmatpush1.bf16.msra.mxu1 %v1030_v23  ;;  %680 = vmatprep.subr.bf16.mxu0 %v1067_v32  ;;  %v738_v23 = vrot.slane (!%p954_p11), %v729_v15, %v737_v18 }
  0x3e   : > { %639 = vmatprep.subr.bf16.mxu1 %v1031_v25 }
  0x40   : > { %681 = vmatpush1.bf16.msra.mxu0 %v1069_v34 }
  0x41   : > { %640 = vmatpush1.bf16.msra.mxu1 %v1033_v27  ;;  %682 = vmatprep.subr.bf16.mxu0 %v1073_v36 }
  0x42   : > { %641 = vmatprep.subr.bf16.mxu1 %v1034_v29 }
  0x44   : > { %683 = vmatpush1.bf16.msra.mxu0 %v1075_v38 }
  0x45   : > { %642 = vmatpush1.bf16.msra.mxu1 %v1036_v31  ;;  %684 = vmatprep.subr.bf16.mxu0 %v1079_v41 }
  0x46   : > { %643 = vmatprep.subr.bf16.mxu1 %v1040_v33 }
  0x48   : > { %685 = vmatpush1.bf16.msra.mxu0 %v1081_v43 }
  0x49   : > { %644 = vmatpush1.bf16.msra.mxu1 %v1042_v35 }
  0x4a   : > { %645 = vmatprep.subr.bf16.mxu1 %v1046_v37 }
  0x4b   : > { %703 = vmatmul.mubr.bf16.vlgmr.msra.gmra.mrb[0].mxu0 %v1085_v46 }
  0x4d   : > { %646 = vmatpush1.bf16.msra.mxu1 %v1048_v40 }
  0x4e   : > { %647 = vmatprep.subr.bf16.mxu1 %v1052_v42 }
  0x51   : > { %648 = vmatpush1.bf16.msra.mxu1 %v1054_v44 }
  0x52   : > { %649 = vmatprep.subr.bf16.mxu1 %v1058_v45 }
  0x55   : > { %650 = vmatpush1.bf16.msra.mxu1 %v1060_v47 }
  0x56   : > { %651 = vmatprep.subr.bf16.mxu1 %v1064_v48 }
  0x59   : > { %652 = vmatpush1.bf16.msra.mxu1 %v1066_v49 }
  0x5a   : > { %653 = vmatprep.subr.bf16.mxu1 %v1070_v50 }
  0x5d   : > { %654 = vmatpush1.bf16.msra.mxu1 %v1072_v51 }
  0x5e   : > { %655 = vmatprep.subr.bf16.mxu1 %v1076_v52 }
  0x61   : > { %656 = vmatpush1.bf16.msra.mxu1 %v1078_v53 }
  0x62   : > { %657 = vmatprep.subr.bf16.mxu1 %v1082_v54 }
  0x65   : > { %658 = vmatpush1.bf16.msra.mxu1 %v1084_v55 }
  0x68   : > { %660 = vmatmul.mubr.bf16.vlgmr.msra.gmra.mrb[0].mxu1 %v1086_v56 }
 0x11e   : > { %v704_v57 = vpop.f32.mrb[0].mxu0 }
 0x11f   : > { %v706_v58 = vpop.f32.mrb[1].mxu0 }
 0x120   : > { %v708_v59 = vpop.f32.mrb[2].mxu0 }
 0x121   : > { %v710_v60 = vpop.f32.mrb[3].mxu0 }
 0x13b   : > { %v661_v62 = vpop.f32.mrb[0].mxu1 }
 0x13c   : > { %v705_v63 = vadd.f32 %v704_v57, %v661_v62  ;;  %v663_v1 = vpop.f32.mrb[1].mxu1 }
 0x13d   : > { %v707_v2 = vadd.f32 %v706_v58, %v663_v1  ;;  %v665_v4 = vpop.f32.mrb[2].mxu1  ;;  %724 = sbr.rel (%p954_p11) target bundleno = 338 (0x152), region = 66 }
 0x13e   : > { %v713_v5 = vadd.f32 %v705_v63, %v315_v61  ;;  %v709_v6 = vadd.f32 %v708_v59, %v665_v4  ;;  %v667_v8 = vpop.f32.mrb[3].mxu1 }
 0x13f   : > { %v714_v9 = vadd.f32 %v707_v2, %v316_v0  ;;  %v711_v10 = vadd.f32 %v710_v60, %v667_v8 }
 0x140   : > { %717 = vst [vmem:[#allocation2] sm:$0xff] %v713_v5  ;;  %v715_v11 = vadd.f32 %v709_v6, %v317_v3 }
 0x141   : > { %718 = vst [vmem:[#allocation2 + $0x8] sm:$0xff] %v714_v9  ;;  %v716_v12 = vadd.f32 %v711_v10, %v318_v7 }
 0x142   : > { %719 = vst [vmem:[#allocation2 + $0x10] sm:$0xff] %v715_v11 }
 0x143   : > { %720 = vst [vmem:[#allocation2 + $0x18] sm:$0xff] %v716_v12 }
 0x147   : > { %v725_v16 = vld [vmem:[#allocation2] sm:$0xff] }
 0x148   : > { %v726_v19 = vld [vmem:[#allocation2 + $0x8] sm:$0xff]  ;;  %v741_v24 = vadd.f32 %v734_v22, %v725_v16 }
 0x149   : > { %v727_v20 = vld [vmem:[#allocation2 + $0x10] sm:$0xff]  ;;  %v742_v25 = vadd.f32 %v738_v23, %v726_v19 }
 0x14a   : > { %v728_v21 = vld [vmem:[#allocation2 + $0x18] sm:$0xff]  ;;  %v743_v26 = vadd.f32 %v734_v22, %v727_v20  ;;  %v745_v28 = vmax.f32 %v741_v24, 0.0 }
 0x14b   : > { %v744_v27 = vadd.f32 %v738_v23, %v728_v21  ;;  %v746_v29 = vmax.f32 %v742_v25, 0.0 }
 0x14c   : > { %v747_v30 = vmax.f32 %v743_v26, 0.0 }
 0x14d   : > { %v748_v31 = vmax.f32 %v744_v27, 0.0  ;;  %v963_v32 = vpack.c.bf16 %v746_v29, %v745_v28 }
 0x14f   : > { %v964_v33 = vpack.c.bf16 %v748_v31, %v747_v30  ;;  %761 = vst [vmem:[%s1285_s3] sm:$0xff] %v963_v32 }
 0x151   : > { %762 = vst [vmem:[%s1285_s3 + $0x8] sm:$0xff] %v964_v33 }
 0x152 PF: > { %s13_s16 = sadd.s32 1, %s1127_s16   ;;  %s1286_s12 = smov %s1115_s13 }
 0x153   : > { %p10_p12 = scmp.ge.s32.totalorder %s13_s16, 8   ;;  %s1287_s13 = smov %s1186_s20 }
 0x154   : > { %s1288_s14 = smov %s1123_s15  ;;  %s1289_s15 = smov %s1291_s17 }
 0x155   :  { %12 = sbr.rel (!%p10_p12) target bundleno = 3 (0x3), region = 113 }

// kernel: resnet50_forward.81
= control target key start
LH: loop header
LB: loop body
LE: loop exit
PB: predicated region body
PF: predicated region fallthrough
CT: control target
= control target key end

     0   :  { %s1543_s12 = smov 0   ;;  %s1545_s13 = smov 0   ;;  %s1833_s0 = inlined_call_operand.vmem [shape: bf16[16,512], index: 0, kind: input, shape index: {}]   ;;  %s1834_s1 = inlined_call_operand.vmem [shape: bf16[512,1024], index: 1, kind: input, shape index: {}]   ;;  %s1835_s2 = inlined_call_operand.vmem [shape: f32[1,1024], index: 2, kind: input, shape index: {}]   ;;  %s1836_s3 = inlined_call_operand.vmem [shape: bf16[16,1024], index: 3, kind: output, shape index: {}]  }
   0x1   :  { %s1547_s14 = smov 0   ;;  %s1549_s15 = smov 0  }
   0x2   :  { %s1551_s16 = smov 0  }
   0x3 LB: > { %s28_s17 = sadd.s32 1, %s1517_s15  ;;  %s1246_s18 = sadd.s32 4294967295, %s1521_s16   ;;  %s1521_s16 = sphi %s1551_s16, %s13_s16   ;;  %s1517_s15 = sphi %s1549_s15, %s1841_s15   ;;  %s1513_s14 = sphi %s1547_s14, %s1840_s14   ;;  %s1509_s13 = sphi %s1545_s13, %s1839_s13   ;;  %s1505_s12 = sphi %s1543_s12, %s1838_s12  }
   0x4   : > { %p30_p0 = scmp.ge.s32.totalorder %s28_s17, 4  ;;  %p76_p1 = scmp.ne.s32.totalorder %s1509_s13, %s1505_s12 }
   0x5   : > { %p77_p2 = scmp.eq.s32.totalorder %s1521_s16, 0  ;;  %p134_p4 = scmp.eq.s32.totalorder %s1246_s18, 3 }
   0x6   : > { %s1843_s17 = smov (%p30_p0, %s28_s17), 0  ;;  %s69_s20 = sadd.s32 1, %s1509_s13 }
   0x7   : > { %p78_p3 = por %p77_p2, %p76_p1  ;;  %s65_s19 = ssub.s32 %s1517_s15, %s1843_s17 }
   0x8   : > { %p67_p5 = scmp.eq.s32.totalorder %s65_s19, 0  ;;  %p1578_p6 = por %p134_p4, %p76_p1 }
   0x9   : > { %p1250_p7 = scmp.ge.s32.totalorder %s1521_s16, 4 }
   0xa   : > { %s1583_s22 = scalar_select %p67_p5, %s1509_s13, %s69_s20  }
   0xb   : > { %171 = sbr.rel (%p1250_p7) target bundleno = 86 (0x56), region = 20 }
  0x12   : > { %174 = sbr.rel (!%p78_p3) target bundleno = 86 (0x56), region = 24  ;;  %s176_s23 = sand.u32 (%p78_p3), 1, %s1509_s13  }
  0x13   : > { %s1333_s24 = sshll.u32 (%p78_p3), %s1517_s15, 3  ;;  %s1251_s25 = sshll.u32 (%p78_p3), %s176_s23, 9 }
  0x14   : > { %s1591_s28 = scalar_lea.vmem (%p78_p3), %s1834_s1, %s1333_s24  ;;  %s1596_s29 = scalar_lea.vmem (%p78_p3), [#allocation3], %s1251_s25 }
  0x15   : > { %v338_v0 = vld [vmem:[%s1591_s28] sm:$0xff] (%p78_p3) }
  0x16   : > { %v340_v1 = vld [vmem:[%s1591_s28 + $0x20] sm:$0xff] (%p78_p3)  ;;  %339 = vst [vmem:[%s1596_s29] sm:$0xff] (%p78_p3), %v338_v0 }
  0x17   : > { %v342_v2 = vld [vmem:[%s1591_s28 + $0x40] sm:$0xff] (%p78_p3)  ;;  %341 = vst [vmem:[%s1596_s29 + $0x8] sm:$0xff] (%p78_p3), %v340_v1 }
  0x18   : > { %343 = vst [vmem:[%s1596_s29 + $0x10] sm:$0xff] (%p78_p3), %v342_v2  ;;  %v344_v3 = vld [vmem:[%s1591_s28 + $0x60] sm:$0xff] (%p78_p3) }
  0x19   : > { %v346_v4 = vld [vmem:[%s1591_s28 + $0x80] sm:$0xff]  ;;  %345 = vst [vmem:[%s1596_s29 + $0x18] sm:$0xff] %v344_v3 }
  0x1a   : > { %v348_v5 = vld [vmem:[%s1591_s28 + $0xa0] sm:$0xff]  ;;  %347 = vst [vmem:[%s1596_s29 + $0x20] sm:$0xff] %v346_v4 }
  0x1b   : > { %349 = vst [vmem:[%s1596_s29 + $0x28] sm:$0xff] %v348_v5  ;;  %v350_v6 = vld [vmem:[%s1591_s28 + $0xc0] sm:$0xff] }
  0x1c   : > { %v352_v7 = vld [vmem:[%s1591_s28 + $0xe0] sm:$0xff]  ;;  %351 = vst [vmem:[%s1596_s29 + $0x30] sm:$0xff] %v350_v6 }
  0x1d   : > { %v354_v8 = vld [vmem:[%s1591_s28 + $0x100] sm:$0xff]  ;;  %353 = vst [vmem:[%s1596_s29 + $0x38] sm:$0xff] %v352_v7 }
  0x1e   : > { %355 = vst [vmem:[%s1596_s29 + $0x40] sm:$0xff] %v354_v8  ;;  %v356_v9 = vld [vmem:[%s1591_s28 + $0x120] sm:$0xff] }
  0x1f   : > { %v358_v10 = vld [vmem:[%s1591_s28 + $0x140] sm:$0xff]  ;;  %357 = vst [vmem:[%s1596_s29 + $0x48] sm:$0xff] %v356_v9 }
  0x20   : > { %v360_v11 = vld [vmem:[%s1591_s28 + $0x160] sm:$0xff]  ;;  %359 = vst [vmem:[%s1596_s29 + $0x50] sm:$0xff] %v358_v10 }
  0x21   : > { %361 = vst [vmem:[%s1596_s29 + $0x58] sm:$0xff] %v360_v11  ;;  %v362_v12 = vld [vmem:[%s1591_s28 + $0x180] sm:$0xff] }
  0x22   : > { %v364_v13 = vld [vmem:[%s1591_s28 + $0x1a0] sm:$0xff]  ;;  %363 = vst [vmem:[%s1596_s29 + $0x60] sm:$0xff] %v362_v12 }
  0x23   : > { %v366_v14 = vld [vmem:[%s1591_s28 + $0x1c0] sm:$0xff]  ;;  %365 = vst [vmem:[%s1596_s29 + $0x68] sm:$0xff] %v364_v13 }
  0x24   : > { %367 = vst [vmem:[%s1596_s29 + $0x70] sm:$0xff] %v366_v14  ;;  %v368_v15 = vld [vmem:[%s1591_s28 + $0x1e0] sm:$0xff] }
  0x25   : > { %v370_v16 = vld [vmem:[%s1591_s28 + $0x200] sm:$0xff]  ;;  %369 = vst [vmem:[%s1596_s29 + $0x78] sm:$0xff] %v368_v15 }
  0x26   : > { %v372_v17 = vld [vmem:[%s1591_s28 + $0x220] sm:$0xff]  ;;  %371 = vst [vmem:[%s1596_s29 + $0x80] sm:$0xff] %v370_v16 }
  0x27   : > { %373 = vst [vmem:[%s1596_s29 + $0x88] sm:$0xff] %v372_v17  ;;  %v374_v18 = vld [vmem:[%s1591_s28 + $0x240] sm:$0xff] }
  0x28   : > { %v376_v19 = vld [vmem:[%s1591_s28 + $0x260] sm:$0xff]  ;;  %375 = vst [vmem:[%s1596_s29 + $0x90] sm:$0xff] %v374_v18 }
  0x29   : > { %v378_v20 = vld [vmem:[%s1591_s28 + $0x280] sm:$0xff]  ;;  %377 = vst [vmem:[%s1596_s29 + $0x98] sm:$0xff] %v376_v19 }
  0x2a   : > { %379 = vst [vmem:[%s1596_s29 + $0xa0] sm:$0xff] %v378_v20  ;;  %v380_v21 = vld [vmem:[%s1591_s28 + $0x2a0] sm:$0xff] }
  0x2b   : > { %v382_v22 = vld [vmem:[%s1591_s28 + $0x2c0] sm:$0xff]  ;;  %381 = vst [vmem:[%s1596_s29 + $0xa8] sm:$0xff] %v380_v21 }
  0x2c   : > { %v384_v23 = vld [vmem:[%s1591_s28 + $0x2e0] sm:$0xff]  ;;  %383 = vst [vmem:[%s1596_s29 + $0xb0] sm:$0xff] %v382_v22 }
  0x2d   : > { %385 = vst [vmem:[%s1596_s29 + $0xb8] sm:$0xff] %v384_v23  ;;  %v386_v24 = vld [vmem:[%s1591_s28 + $0x300] sm:$0xff] }
  0x2e   : > { %v388_v25 = vld [vmem:[%s1591_s28 + $0x320] sm:$0xff]  ;;  %387 = vst [vmem:[%s1596_s29 + $0xc0] sm:$0xff] %v386_v24 }
  0x2f   : > { %v390_v26 = vld [vmem:[%s1591_s28 + $0x340] sm:$0xff]  ;;  %389 = vst [vmem:[%s1596_s29 + $0xc8] sm:$0xff] %v388_v25 }
  0x30   : > { %391 = vst [vmem:[%s1596_s29 + $0xd0] sm:$0xff] %v390_v26  ;;  %v392_v27 = vld [vmem:[%s1591_s28 + $0x360] sm:$0xff] }
  0x31   : > { %v394_v28 = vld [vmem:[%s1591_s28 + $0x380] sm:$0xff]  ;;  %393 = vst [vmem:[%s1596_s29 + $0xd8] sm:$0xff] %v392_v27 }
  0x32   : > { %v396_v29 = vld [vmem:[%s1591_s28 + $0x3a0] sm:$0xff]  ;;  %395 = vst [vmem:[%s1596_s29 + $0xe0] sm:$0xff] %v394_v28 }
  0x33   : > { %397 = vst [vmem:[%s1596_s29 + $0xe8] sm:$0xff] %v396_v29  ;;  %v398_v30 = vld [vmem:[%s1591_s28 + $0x3c0] sm:$0xff] }
  0x34   : > { %v400_v31 = vld [vmem:[%s1591_s28 + $0x3e0] sm:$0xff]  ;;  %399 = vst [vmem:[%s1596_s29 + $0xf0] sm:$0xff] %v398_v30 }
  0x35   : > { %v402_v32 = vld [vmem:[%s1591_s28 + $0x400] sm:$0xff]  ;;  %401 = vst [vmem:[%s1596_s29 + $0xf8] sm:$0xff] %v400_v31 }
  0x36   : > { %403 = vst [vmem:[%s1596_s29 + $0x100] sm:$0xff] %v402_v32  ;;  %v404_v33 = vld [vmem:[%s1591_s28 + $0x420] sm:$0xff] }
  0x37   : > { %v406_v34 = vld [vmem:[%s1591_s28 + $0x440] sm:$0xff]  ;;  %405 = vst [vmem:[%s1596_s29 + $0x108] sm:$0xff] %v404_v33 }
  0x38   : > { %v408_v35 = vld [vmem:[%s1591_s28 + $0x460] sm:$0xff]  ;;  %407 = vst [vmem:[%s1596_s29 + $0x110] sm:$0xff] %v406_v34 }
  0x39   : > { %409 = vst [vmem:[%s1596_s29 + $0x118] sm:$0xff] %v408_v35  ;;  %v410_v36 = vld [vmem:[%s1591_s28 + $0x480] sm:$0xff] }
  0x3a   : > { %v412_v37 = vld [vmem:[%s1591_s28 + $0x4a0] sm:$0xff]  ;;  %411 = vst [vmem:[%s1596_s29 + $0x120] sm:$0xff] %v410_v36 }
  0x3b   : > { %v414_v38 = vld [vmem:[%s1591_s28 + $0x4c0] sm:$0xff]  ;;  %413 = vst [vmem:[%s1596_s29 + $0x128] sm:$0xff] %v412_v37 }
  0x3c   : > { %415 = vst [vmem:[%s1596_s29 + $0x130] sm:$0xff] %v414_v38  ;;  %v416_v39 = vld [vmem:[%s1591_s28 + $0x4e0] sm:$0xff] }
  0x3d   : > { %v418_v40 = vld [vmem:[%s1591_s28 + $0x500] sm:$0xff]  ;;  %417 = vst [vmem:[%s1596_s29 + $0x138] sm:$0xff] %v416_v39 }
  0x3e   : > { %v420_v41 = vld [vmem:[%s1591_s28 + $0x520] sm:$0xff]  ;;  %419 = vst [vmem:[%s1596_s29 + $0x140] sm:$0xff] %v418_v40 }
  0x3f   : > { %421 = vst [vmem:[%s1596_s29 + $0x148] sm:$0xff] %v420_v41  ;;  %v422_v42 = vld [vmem:[%s1591_s28 + $0x540] sm:$0xff] }
  0x40   : > { %v424_v43 = vld [vmem:[%s1591_s28 + $0x560] sm:$0xff]  ;;  %423 = vst [vmem:[%s1596_s29 + $0x150] sm:$0xff] %v422_v42 }
  0x41   : > { %v426_v44 = vld [vmem:[%s1591_s28 + $0x580] sm:$0xff]  ;;  %425 = vst [vmem:[%s1596_s29 + $0x158] sm:$0xff] %v424_v43 }
  0x42   : > { %427 = vst [vmem:[%s1596_s29 + $0x160] sm:$0xff] %v426_v44  ;;  %v428_v45 = vld [vmem:[%s1591_s28 + $0x5a0] sm:$0xff] }
  0x43   : > { %v430_v46 = vld [vmem:[%s1591_s28 + $0x5c0] sm:$0xff]  ;;  %429 = vst [vmem:[%s1596_s29 + $0x168] sm:$0xff] %v428_v45 }
  0x44   : > { %v432_v47 = vld [vmem:[%s1591_s28 + $0x5e0] sm:$0xff]  ;;  %431 = vst [vmem:[%s1596_s29 + $0x170] sm:$0xff] %v430_v46 }
  0x45   : > { %433 = vst [vmem:[%s1596_s29 + $0x178] sm:$0xff] %v432_v47  ;;  %v434_v48 = vld [vmem:[%s1591_s28 + $0x600] sm:$0xff] }
  0x46   : > { %v436_v49 = vld [vmem:[%s1591_s28 + $0x620] sm:$0xff]  ;;  %435 = vst [vmem:[%s1596_s29 + $0x180] sm:$0xff] %v434_v48 }
  0x47   : > { %v438_v50 = vld [vmem:[%s1591_s28 + $0x640] sm:$0xff]  ;;  %437 = vst [vmem:[%s1596_s29 + $0x188] sm:$0xff] %v436_v49 }
  0x48   : > { %439 = vst [vmem:[%s1596_s29 + $0x190] sm:$0xff] %v438_v50  ;;  %v440_v51 = vld [vmem:[%s1591_s28 + $0x660] sm:$0xff] }
  0x49   : > { %v442_v52 = vld [vmem:[%s1591_s28 + $0x680] sm:$0xff]  ;;  %441 = vst [vmem:[%s1596_s29 + $0x198] sm:$0xff] %v440_v51 }
  0x4a   : > { %v444_v53 = vld [vmem:[%s1591_s28 + $0x6a0] sm:$0xff]  ;;  %443 = vst [vmem:[%s1596_s29 + $0x1a0] sm:$0xff] %v442_v52 }
  0x4b   : > { %445 = vst [vmem:[%s1596_s29 + $0x1a8] sm:$0xff] %v444_v53  ;;  %v446_v54 = vld [vmem:[%s1591_s28 + $0x6c0] sm:$0xff] }
  0x4c   : > { %v448_v55 = vld [vmem:[%s1591_s28 + $0x6e0] sm:$0xff]  ;;  %447 = vst [vmem:[%s1596_s29 + $0x1b0] sm:$0xff] %v446_v54 }
  0x4d   : > { %v450_v56 = vld [vmem:[%s1591_s28 + $0x700] sm:$0xff]  ;;  %449 = vst [vmem:[%s1596_s29 + $0x1b8] sm:$0xff] %v448_v55 }
  0x4e   : > { %451 = vst [vmem:[%s1596_s29 + $0x1c0] sm:$0xff] %v450_v56  ;;  %v452_v57 = vld [vmem:[%s1591_s28 + $0x720] sm:$0xff] }
  0x4f   : > { %v454_v58 = vld [vmem:[%s1591_s28 + $0x740] sm:$0xff]  ;;  %453 = vst [vmem:[%s1596_s29 + $0x1c8] sm:$0xff] %v452_v57 }
  0x50   : > { %v456_v59 = vld [vmem:[%s1591_s28 + $0x760] sm:$0xff]  ;;  %455 = vst [vmem:[%s1596_s29 + $0x1d0] sm:$0xff] %v454_v58 }
  0x51   : > { %457 = vst [vmem:[%s1596_s29 + $0x1d8] sm:$0xff] %v456_v59  ;;  %v458_v60 = vld [vmem:[%s1591_s28 + $0x780] sm:$0xff] }
  0x52   : > { %v460_v61 = vld [vmem:[%s1591_s28 + $0x7a0] sm:$0xff]  ;;  %459 = vst [vmem:[%s1596_s29 + $0x1e0] sm:$0xff] %v458_v60 }
  0x53   : > { %v462_v62 = vld [vmem:[%s1591_s28 + $0x7c0] sm:$0xff]  ;;  %461 = vst [vmem:[%s1596_s29 + $0x1e8] sm:$0xff] %v460_v61 }
  0x54   : > { %463 = vst [vmem:[%s1596_s29 + $0x1f0] sm:$0xff] %v462_v62  ;;  %v464_v63 = vld [vmem:[%s1591_s28 + $0x7e0] sm:$0xff] }
  0x55   : > { %465 = vst [vmem:[%s1596_s29 + $0x1f8] sm:$0xff] %v464_v63 }
  0x56 PF: > { %p1254_p8 = scmp.ge.s32.totalorder %s1521_s16, 1  ;;  %p478_p9 = scmp.lt.s32.totalorder %s1521_s16, 5 }
  0x58   : > { %p479_p10 = pnand %p1254_p8, %p478_p9 }
  0x59   : > { %s485_s30 = sand.u32 (!%p479_p10), 1, %s1505_s12   ;;  %v1479_v0 = vld [vmem:[%s1833_s0 + $0x4] ss:$16 sps:$4 sm:$0xff] (!%p479_p10)   ;;  %v1482_v1 = vld [vmem:[%s1833_s0 + $0xc] ss:$16 sps:$4 sm:$0xff] (!%p479_p10)   ;;  %s1257_s20 = sshll.u32 (!%p479_p10), %s1513_s14, 1 }
  0x5a   : > { %482 = sbr.rel (%p479_p10) target bundleno = 388 (0x184), region = 66  ;;  %s1255_s4 = sshll.u32 (!%p479_p10), %s485_s30, 9  ;;  %994 = vmatprep.mubr.bf16.mxu1 (!%p479_p10), %v1479_v0  ;;  %1037 = vmatprep.mubr.bf16.mxu0 (!%p479_p10), %v1482_v1 }
  0x5b   : > { %s1734_s9 = scalar_lea.vmem (!%p479_p10), [#allocation3], %s1255_s4  ;;  %p536_p11 = scmp.lt.s32.totalorder (!%p479_p10), %s1257_s20, 7 }
  0x5c   : > { %v1381_v2 = vld [vmem:[%s1734_s9 + $0x4] ss:$8 sps:$4 sm:$0xff] (!%p479_p10)   ;;  %v1385_v4 = vld [vmem:[%s1734_s9] ss:$8 sps:$4 sm:$0xff] (!%p479_p10)   ;;  %v1387_v6 = vld [vmem:[%s1734_s9 + $0x14] ss:$8 sps:$4 sm:$0xff] (!%p479_p10)  }
  0x5d   : > { %v1383_v3 = vld [vmem:[%s1734_s9 + $0x104] ss:$8 sps:$4 sm:$0xff] (!%p479_p10)   ;;  %962 = vmatprep.subr.bf16.mxu1 (!%p479_p10), %v1381_v2  ;;  %v1386_v5 = vld [vmem:[%s1734_s9 + $0x100] ss:$8 sps:$4 sm:$0xff] (!%p479_p10)   ;;  %v1389_v7 = vld [vmem:[%s1734_s9 + $0x114] ss:$8 sps:$4 sm:$0xff] (!%p479_p10)  }
  0x5e   : > { %1005 = vmatprep.subr.bf16.mxu0 (!%p479_p10), %v1383_v3  ;;  %963 = vmatpush1.bf16.msra.mxu1 (!%p479_p10), %v1385_v4  ;;  %v1391_v8 = vld [vmem:[%s1734_s9 + $0x10] ss:$8 sps:$4 sm:$0xff] (!%p479_p10)   ;;  %v1393_v10 = vld [vmem:[%s1734_s9 + $0x24] ss:$8 sps:$4 sm:$0xff] (!%p479_p10)   ;;  %v1397_v12 = vld [vmem:[%s1734_s9 + $0x20] ss:$8 sps:$4 sm:$0xff] (!%p479_p10)   ;;  %v1065_v4 = vlaneseq (!%p479_p10) }
  0x5f   : > { %1006 = vmatpush1.bf16.msra.mxu0 (!%p479_p10), %v1386_v5  ;;  %964 = vmatprep.subr.bf16.mxu1 (!%p479_p10), %v1387_v6  ;;  %v1392_v9 = vld [vmem:[%s1734_s9 + $0x110] ss:$8 sps:$4 sm:$0xff] (!%p479_p10)   ;;  %v1395_v11 = vld [vmem:[%s1734_s9 + $0x124] ss:$8 sps:$4 sm:$0xff] (!%p479_p10)   ;;  %v1398_v13 = vld [vmem:[%s1734_s9 + $0x120] ss:$8 sps:$4 sm:$0xff] (!%p479_p10)  }
  0x60   : > { %1007 = vmatprep.subr.bf16.mxu0 (!%p479_p10), %v1389_v7  ;;  %v1399_v14 = vld [vmem:[%s1734_s9 + $0x34] ss:$8 sps:$4 sm:$0xff] (!%p479_p10)   ;;  %v1403_v16 = vld [vmem:[%s1734_s9 + $0x30] ss:$8 sps:$4 sm:$0xff] (!%p479_p10)   ;;  %v1405_v18 = vld [vmem:[%s1734_s9 + $0x44] ss:$8 sps:$4 sm:$0xff] (!%p479_p10)  }
  0x61   : > { %v1401_v15 = vld [vmem:[%s1734_s9 + $0x134] ss:$8 sps:$4 sm:$0xff]   ;;  %v1404_v17 = vld [vmem:[%s1734_s9 + $0x130] ss:$8 sps:$4 sm:$0xff]   ;;  %v1407_v19 = vld [vmem:[%s1734_s9 + $0x144] ss:$8 sps:$4 sm:$0xff]  }
  0x62   : > { %965 = vmatpush1.bf16.msra.mxu1 %v1391_v8  ;;  %v1409_v20 = vld [vmem:[%s1734_s9 + $0x40] ss:$8 sps:$4 sm:$0xff]   ;;  %v1411_v22 = vld [vmem:[%s1734_s9 + $0x54] ss:$8 sps:$4 sm:$0xff]   ;;  %v1415_v24 = vld [vmem:[%s1734_s9 + $0x50] ss:$8 sps:$4 sm:$0xff]  }
  0x63   : > { %1008 = vmatpush1.bf16.msra.mxu0 %v1392_v9  ;;  %966 = vmatprep.subr.bf16.mxu1 %v1393_v10  ;;  %v1410_v21 = vld [vmem:[%s1734_s9 + $0x140] ss:$8 sps:$4 sm:$0xff]   ;;  %v1413_v23 = vld [vmem:[%s1734_s9 + $0x154] ss:$8 sps:$4 sm:$0xff]   ;;  %v1416_v25 = vld [vmem:[%s1734_s9 + $0x150] ss:$8 sps:$4 sm:$0xff]  }
  0x64   : > { %1009 = vmatprep.subr.bf16.mxu0 %v1395_v11  ;;  %v1417_v26 = vld [vmem:[%s1734_s9 + $0x64] ss:$8 sps:$4 sm:$0xff]   ;;  %v1421_v28 = vld [vmem:[%s1734_s9 + $0x60] ss:$8 sps:$4 sm:$0xff]   ;;  %v1423_v30 = vld [vmem:[%s1734_s9 + $0x74] ss:$8 sps:$4 sm:$0xff]  }
  0x65   : > { %v1419_v27 = vld [vmem:[%s1734_s9 + $0x164] ss:$8 sps:$4 sm:$0xff]   ;;  %v1422_v29 = vld [vmem:[%s1734_s9 + $0x160] ss:$8 sps:$4 sm:$0xff]   ;;  %v1425_v31 = vld [vmem:[%s1734_s9 + $0x174] ss:$8 sps:$4 sm:$0xff]  }
  0x66   : > { %967 = vmatpush1.bf16.msra.mxu1 %v1397_v12  ;;  %v1427_v32 = vld [vmem:[%s1734_s9 + $0x70] ss:$8 sps:$4 sm:$0xff]   ;;  %v1429_v34 = vld [vmem:[%s1734_s9 + $0x84] ss:$8 sps:$4 sm:$0xff]   ;;  %v1433_v36 = vld [vmem:[%s1734_s9 + $0x80] ss:$8 sps:$4 sm:$0xff]  }
  0x67   : > { %1010 = vmatpush1.bf16.msra.mxu0 %v1398_v13  ;;  %968 = vmatprep.subr.bf16.mxu1 %v1399_v14  ;;  %v1428_v33 = vld [vmem:[%s1734_s9 + $0x170] ss:$8 sps:$4 sm:$0xff]   ;;  %v1431_v35 = vld [vmem:[%s1734_s9 + $0x184] ss:$8 sps:$4 sm:$0xff]   ;;  %v1434_v37 = vld [vmem:[%s1734_s9 + $0x180] ss:$8 sps:$4 sm:$0xff]  }
  0x68   : > { %1011 = vmatprep.subr.bf16.mxu0 %v1401_v15  ;;  %v1435_v38 = vld [vmem:[%s1734_s9 + $0x94] ss:$8 sps:$4 sm:$0xff]   ;;  %v1439_v40 = vld [vmem:[%s1734_s9 + $0x90] ss:$8 sps:$4 sm:$0xff]   ;;  %v1441_v42 = vld [vmem:[%s1734_s9 + $0xa4] ss:$8 sps:$4 sm:$0xff]  }
  0x69   : > { %v1437_v39 = vld [vmem:[%s1734_s9 + $0x194] ss:$8 sps:$4 sm:$0xff]   ;;  %v1440_v41 = vld [vmem:[%s1734_s9 + $0x190] ss:$8 sps:$4 sm:$0xff]   ;;  %v1443_v43 = vld [vmem:[%s1734_s9 + $0x1a4] ss:$8 sps:$4 sm:$0xff]  }
  0x6a   : > { %969 = vmatpush1.bf16.msra.mxu1 %v1403_v16  ;;  %v1445_v44 = vld [vmem:[%s1734_s9 + $0xa0] ss:$8 sps:$4 sm:$0xff]   ;;  %v1447_v46 = vld [vmem:[%s1734_s9 + $0xb4] ss:$8 sps:$4 sm:$0xff]   ;;  %v1451_v48 = vld [vmem:[%s1734_s9 + $0xb0] ss:$8 sps:$4 sm:$0xff]  }
  0x6b   : > { %1012 = vmatpush1.bf16.msra.mxu0 %v1404_v17  ;;  %970 = vmatprep.subr.bf16.mxu1 %v1405_v18  ;;  %v1446_v45 = vld [vmem:[%s1734_s9 + $0x1a0] ss:$8 sps:$4 sm:$0xff]   ;;  %v1449_v47 = vld [vmem:[%s1734_s9 + $0x1b4] ss:$8 sps:$4 sm:$0xff]   ;;  %v1452_v49 = vld [vmem:[%s1734_s9 + $0x1b0] ss:$8 sps:$4 sm:$0xff]  }
  0x6c   : > { %1013 = vmatprep.subr.bf16.mxu0 %v1407_v19  ;;  %v1453_v50 = vld [vmem:[%s1734_s9 + $0xc4] ss:$8 sps:$4 sm:$0xff]   ;;  %v1457_v52 = vld [vmem:[%s1734_s9 + $0xc0] ss:$8 sps:$4 sm:$0xff]   ;;  %v1459_v54 = vld [vmem:[%s1734_s9 + $0xd4] ss:$8 sps:$4 sm:$0xff]  }
  0x6d   : > { %v1455_v51 = vld [vmem:[%s1734_s9 + $0x1c4] ss:$8 sps:$4 sm:$0xff]   ;;  %v1458_v53 = vld [vmem:[%s1734_s9 + $0x1c0] ss:$8 sps:$4 sm:$0xff]   ;;  %v1461_v55 = vld [vmem:[%s1734_s9 + $0x1d4] ss:$8 sps:$4 sm:$0xff]  }
  0x6e   : > { %971 = vmatpush1.bf16.msra.mxu1 %v1409_v20  ;;  %v1463_v56 = vld [vmem:[%s1734_s9 + $0xd0] ss:$8 sps:$4 sm:$0xff]   ;;  %v1465_v58 = vld [vmem:[%s1734_s9 + $0xe4] ss:$8 sps:$4 sm:$0xff]   ;;  %v1469_v60 = vld [vmem:[%s1734_s9 + $0xe0] ss:$8 sps:$4 sm:$0xff]  }
  0x6f   : > { %1014 = vmatpush1.bf16.msra.mxu0 %v1410_v21  ;;  %972 = vmatprep.subr.bf16.mxu1 %v1411_v22  ;;  %v1464_v57 = vld [vmem:[%s1734_s9 + $0x1d0] ss:$8 sps:$4 sm:$0xff]   ;;  %v1467_v59 = vld [vmem:[%s1734_s9 + $0x1e4] ss:$8 sps:$4 sm:$0xff]   ;;  %v1470_v61 = vld [vmem:[%s1734_s9 + $0x1e0] ss:$8 sps:$4 sm:$0xff]  }
  0x70   : > { %1015 = vmatprep.subr.bf16.mxu0 %v1413_v23  ;;  %v1471_v62 = vld [vmem:[%s1734_s9 + $0xf4] ss:$8 sps:$4 sm:$0xff]   ;;  %v1475_v0 = vld [vmem:[%s1734_s9 + $0xf0] ss:$8 sps:$4 sm:$0xff]   ;;  %s1845_s20 = smov (!%p536_p11, %s1257_s20), 7  ;;  %v1066_v5 = vshrl.u32 %v1065_v4, 7 }
  0x71   : > { %v1473_v63 = vld [vmem:[%s1734_s9 + $0x1f4] ss:$8 sps:$4 sm:$0xff]   ;;  %v1476_v1 = vld [vmem:[%s1734_s9 + $0x1f0] ss:$8 sps:$4 sm:$0xff]   ;;  %s538_s25 = scalar_lea.vmem %s1835_s2, %s1845_s20  ;;  %s1256_s26 = sshll.u32 %s485_s30, 4 }
  0x72   : > { %973 = vmatpush1.bf16.msra.mxu1 %v1415_v24  ;;  %v1477_v2 = vld [vmem:[%s1833_s0] ss:$16 sps:$4 sm:$0xff]   ;;  %v1480_v3 = vld [vmem:[%s1833_s0 + $0x8] ss:$16 sps:$4 sm:$0xff]   ;;  %v1067_v6 = vsub.s32 0, %v1066_v5  ;;  %v1071_v8 = vsub.s32 1, %v1066_v5 }
  0x73   : > { %1016 = vmatpush1.bf16.msra.mxu0 %v1416_v25  ;;  %974 = vmatprep.subr.bf16.mxu1 %v1417_v26  ;;  %v1063_v7 = vld [vmem:[%s538_s25] sm:$0x3]  ;;  %s520_s27 = scalar_lea.vmem [#allocation4], %s1256_s26  ;;  %s1336_s12 = sshll.u32 (%p1578_p6), %s1513_s14, 3 }
  0x74   : > { %1017 = vmatprep.subr.bf16.mxu0 %v1419_v27  ;;  %v1068_v9 = vrot.slane %v1063_v7, %v1067_v6  ;;  %v1072_v12 = vrot.slane %v1063_v7, %v1071_v8  ;;  %s1105_s30 = scalar_lea.vmem (%p1578_p6), %s1836_s3, %s1336_s12 }
  0x76   : > { %975 = vmatpush1.bf16.msra.mxu1 %v1421_v28 }
  0x77   : > { %1018 = vmatpush1.bf16.msra.mxu0 %v1422_v29  ;;  %976 = vmatprep.subr.bf16.mxu1 %v1423_v30 }
  0x78   : > { %1019 = vmatprep.subr.bf16.mxu0 %v1425_v31 }
  0x7a   : > { %977 = vmatpush1.bf16.msra.mxu1 %v1427_v32 }
  0x7b   : > { %1020 = vmatpush1.bf16.msra.mxu0 %v1428_v33  ;;  %978 = vmatprep.subr.bf16.mxu1 %v1429_v34 }
  0x7c   : > { %1021 = vmatprep.subr.bf16.mxu0 %v1431_v35 }
  0x7e   : > { %979 = vmatpush1.bf16.msra.mxu1 %v1433_v36 }
  0x7f   : > { %1022 = vmatpush1.bf16.msra.mxu0 %v1434_v37  ;;  %980 = vmatprep.subr.bf16.mxu1 %v1435_v38 }
  0x80   : > { %1023 = vmatprep.subr.bf16.mxu0 %v1437_v39 }
  0x82   : > { %981 = vmatpush1.bf16.msra.mxu1 %v1439_v40 }
  0x83   : > { %1024 = vmatpush1.bf16.msra.mxu0 %v1440_v41  ;;  %982 = vmatprep.subr.bf16.mxu1 %v1441_v42 }
  0x84   : > { %1025 = vmatprep.subr.bf16.mxu0 %v1443_v43 }
  0x86   : > { %983 = vmatpush1.bf16.msra.mxu1 %v1445_v44 }
  0x87   : > { %1026 = vmatpush1.bf16.msra.mxu0 %v1446_v45  ;;  %984 = vmatprep.subr.bf16.mxu1 %v1447_v46 }
  0x88   : > { %1027 = vmatprep.subr.bf16.mxu0 %v1449_v47 }
  0x8a   : > { %985 = vmatpush1.bf16.msra.mxu1 %v1451_v48 }
  0x8b   : > { %1028 = vmatpush1.bf16.msra.mxu0 %v1452_v49  ;;  %986 = vmatprep.subr.bf16.mxu1 %v1453_v50 }
  0x8c   : > { %1029 = vmatprep.subr.bf16.mxu0 %v1455_v51 }
  0x8e   : > { %987 = vmatpush1.bf16.msra.mxu1 %v1457_v52 }
  0x8f   : > { %1030 = vmatpush1.bf16.msra.mxu0 %v1458_v53  ;;  %988 = vmatprep.subr.bf16.mxu1 %v1459_v54 }
  0x90   : > { %1031 = vmatprep.subr.bf16.mxu0 %v1461_v55 }
  0x92   : > { %989 = vmatpush1.bf16.msra.mxu1 %v1463_v56 }
  0x93   : > { %1032 = vmatpush1.bf16.msra.mxu0 %v1464_v57  ;;  %990 = vmatprep.subr.bf16.mxu1 %v1465_v58 }
  0x94   : > { %1033 = vmatprep.subr.bf16.mxu0 %v1467_v59 }
  0x96   : > { %991 = vmatpush1.bf16.msra.mxu1 %v1469_v60 }
  0x97   : > { %1034 = vmatpush1.bf16.msra.mxu0 %v1470_v61  ;;  %992 = vmatprep.subr.bf16.mxu1 %v1471_v62 }
  0x98   : > { %1035 = vmatprep.subr.bf16.mxu0 %v1473_v63 }
  0x9a   : > { %993 = vmatpush1.bf16.msra.mxu1 %v1475_v0 }
  0x9b   : > { %1036 = vmatpush1.bf16.msra.mxu0 %v1476_v1 }
  0x9d   : > { %995 = vmatmul.mubr.bf16.vlgmr.msra.gmra.mrb[0].mxu1 %v1477_v2 }
  0x9e   : > { %1038 = vmatmul.mubr.bf16.vlgmr.msra.gmra.mrb[0].mxu0 %v1480_v3 }
 0x170   : > { %v996_v10 = vpop.f32.mrb[0].mxu1 }
 0x171   : > { %v1039_v11 = vpop.f32.mrb[0].mxu0  ;;  %v998_v14 = vpop.f32.mrb[1].mxu1 }
 0x172   : > { %v1040_v13 = vadd.f32 %v1039_v11, %v996_v10  ;;  %v1041_v15 = vpop.f32.mrb[1].mxu0  ;;  %v1000_v17 = vpop.f32.mrb[2].mxu1 }
 0x173   : > { %v1042_v16 = vadd.f32 %v1041_v15, %v998_v14  ;;  %v1043_v18 = vpop.f32.mrb[2].mxu0  ;;  %v1002_v21 = vpop.f32.mrb[3].mxu1 }
 0x174   : > { %v1075_v19 = vadd.f32 %v1068_v9, %v1040_v13  ;;  %v1044_v20 = vadd.f32 %v1043_v18, %v1000_v17  ;;  %v1045_v22 = vpop.f32.mrb[3].mxu0 }
 0x175   : > { %v1076_v23 = vadd.f32 %v1072_v12, %v1042_v16  ;;  %v1046_v24 = vadd.f32 %v1045_v22, %v1002_v21  ;;  %1099 = sbr.rel (!%p1578_p6) target bundleno = 388 (0x184), region = 82 }
 0x176   : > { %v1077_v25 = vadd.f32 %v1068_v9, %v1044_v20 }
 0x177   : > { %v1334_v26 = vpack.c.bf16 %v1076_v23, %v1075_v19  ;;  %v1078_v27 = vadd.f32 %v1072_v12, %v1046_v24 }
 0x179   : > { %1091 = vst [vmem:[%s520_s27] sm:$0xff] %v1334_v26  ;;  %v1335_v28 = vpack.c.bf16 %v1078_v27, %v1077_v25 }
 0x17b   : > { %1092 = vst [vmem:[%s520_s27 + $0x8] sm:$0xff] %v1335_v28 }
 0x180   : > { %v1135_v29 = vld [vmem:[%s520_s27] sm:$0xff] }
 0x181   : > { %1136 = vst [vmem:[%s1105_s30] sm:$0xff] %v1135_v29 }
 0x182   : > { %v1137_v30 = vld [vmem:[%s520_s27 + $0x8] sm:$0xff] }
 0x183   : > { %1138 = vst [vmem:[%s1105_s30 + $0x20] sm:$0xff] %v1137_v30 }
 0x184 PF: > { %s13_s16 = sadd.s32 1, %s1521_s16   ;;  %s1838_s12 = smov %s1509_s13 }
 0x185   : > { %p10_p12 = scmp.ge.s32.totalorder %s13_s16, 6   ;;  %s1839_s13 = smov %s1583_s22 }
 0x186   : > { %s1840_s14 = smov %s1517_s15  ;;  %s1841_s15 = smov %s1843_s17 }
 0x187   :  { %12 = sbr.rel (!%p10_p12) target bundleno = 3 (0x3), region = 157 }

// kernel: resnet50_forward.82
= control target key start
LH: loop header
LB: loop body
LE: loop exit
PB: predicated region body
PF: predicated region fallthrough
CT: control target
= control target key end

     0   :  { %s1217_s15 = smov 0   ;;  %s1219_s16 = smov 0   ;;  %s1422_s0 = inlined_call_operand.vmem [shape: bf16[16,256], index: 0, kind: input, shape index: {}]   ;;  %s1423_s1 = inlined_call_operand.vmem [shape: bf16[256,1024], index: 1, kind: input, shape index: {}]   ;;  %s1424_s2 = inlined_call_operand.vmem [shape: f32[1,1024], index: 2, kind: input, shape index: {}]   ;;  %s1425_s3 = inlined_call_operand.vmem [shape: bf16[16,1024], index: 3, kind: input, shape index: {}]   ;;  %s1426_s4 = inlined_call_operand.vmem [shape: bf16[16,1024], index: 4, kind: output, shape index: {}]  }
   0x1   :  { %s1221_s17 = smov 0   ;;  %s1223_s18 = smov 0  }
   0x2   :  { %s1225_s19 = smov 0  }
   0x3 LB: > { %s29_s20 = sadd.s32 1, %s1186_s18  ;;  %s999_s21 = sadd.s32 4294967295, %s1190_s19   ;;  %s1190_s19 = sphi %s1225_s19, %s14_s19   ;;  %s1186_s18 = sphi %s1223_s18, %s1432_s18   ;;  %s1182_s17 = sphi %s1221_s17, %s1431_s17   ;;  %s1178_s16 = sphi %s1219_s16, %s1430_s16   ;;  %s1174_s15 = sphi %s1217_s15, %s1429_s15  }
   0x4   : > { %p31_p0 = scmp.ge.s32.totalorder %s29_s20, 4  ;;  %p77_p1 = scmp.ne.s32.totalorder %s1178_s16, %s1174_s15 }
   0x5   : > { %p78_p2 = scmp.eq.s32.totalorder %s1190_s19, 0  ;;  %p163_p4 = scmp.eq.s32.totalorder %s999_s21, 3 }
   0x6   : > { %s1434_s20 = smov (%p31_p0, %s29_s20), 0  ;;  %s70_s24 = sadd.s32 1, %s1178_s16 }
   0x7   : > { %p1249_p3 = por %p78_p2, %p77_p1  ;;  %s66_s23 = ssub.s32 %s1186_s18, %s1434_s20 }
   0x8   : > { %p68_p5 = scmp.eq.s32.totalorder %s66_s23, 0  ;;  %p1256_p6 = por %p163_p4, %p77_p1 }
   0x9   : > { %p1003_p7 = scmp.ge.s32.totalorder %s1190_s19, 4 }
   0xa   : > { %s1261_s26 = scalar_select %p68_p5, %s1178_s16, %s70_s24  }
   0xb   : > { %200 = sbr.rel (%p1003_p7) target bundleno = 61 (0x3d), region = 20 }
  0x12   : > { %203 = sbr.rel (!%p1249_p3) target bundleno = 54 (0x36), region = 24  ;;  %s205_s27 = sand.u32 (%p1249_p3), 1, %s1178_s16  }
  0x13   : > { %s1056_s28 = sshll.u32 (%p1249_p3), %s1186_s18, 3  ;;  %s1004_s29 = sshll.u32 (%p1249_p3), %s205_s27, 8 }
  0x14   : > { %s1271_s6 = scalar_lea.vmem (%p1249_p3), %s1423_s1, %s1056_s28  ;;  %s1276_s7 = scalar_lea.vmem (%p1249_p3), [#allocation3], %s1004_s29 }
  0x15   : > { %v303_v0 = vld [vmem:[%s1271_s6] sm:$0xff] (%p1249_p3) }
  0x16   : > { %v305_v1 = vld [vmem:[%s1271_s6 + $0x20] sm:$0xff] (%p1249_p3)  ;;  %304 = vst [vmem:[%s1276_s7] sm:$0xff] (%p1249_p3), %v303_v0 }
  0x17   : > { %v307_v2 = vld [vmem:[%s1271_s6 + $0x40] sm:$0xff] (%p1249_p3)  ;;  %306 = vst [vmem:[%s1276_s7 + $0x8] sm:$0xff] (%p1249_p3), %v305_v1 }
  0x18   : > { %308 = vst [vmem:[%s1276_s7 + $0x10] sm:$0xff] (%p1249_p3), %v307_v2  ;;  %v309_v3 = vld [vmem:[%s1271_s6 + $0x60] sm:$0xff] (%p1249_p3) }
  0x19   : > { %v311_v4 = vld [vmem:[%s1271_s6 + $0x80] sm:$0xff]  ;;  %310 = vst [vmem:[%s1276_s7 + $0x18] sm:$0xff] %v309_v3 }
  0x1a   : > { %v313_v5 = vld [vmem:[%s1271_s6 + $0xa0] sm:$0xff]  ;;  %312 = vst [vmem:[%s1276_s7 + $0x20] sm:$0xff] %v311_v4 }
  0x1b   : > { %314 = vst [vmem:[%s1276_s7 + $0x28] sm:$0xff] %v313_v5  ;;  %v315_v6 = vld [vmem:[%s1271_s6 + $0xc0] sm:$0xff] }
  0x1c   : > { %v317_v7 = vld [vmem:[%s1271_s6 + $0xe0] sm:$0xff]  ;;  %316 = vst [vmem:[%s1276_s7 + $0x30] sm:$0xff] %v315_v6 }
  0x1d   : > { %v319_v8 = vld [vmem:[%s1271_s6 + $0x100] sm:$0xff]  ;;  %318 = vst [vmem:[%s1276_s7 + $0x38] sm:$0xff] %v317_v7 }
  0x1e   : > { %320 = vst [vmem:[%s1276_s7 + $0x40] sm:$0xff] %v319_v8  ;;  %v321_v9 = vld [vmem:[%s1271_s6 + $0x120] sm:$0xff] }
  0x1f   : > { %v323_v10 = vld [vmem:[%s1271_s6 + $0x140] sm:$0xff]  ;;  %322 = vst [vmem:[%s1276_s7 + $0x48] sm:$0xff] %v321_v9 }
  0x20   : > { %v325_v11 = vld [vmem:[%s1271_s6 + $0x160] sm:$0xff]  ;;  %324 = vst [vmem:[%s1276_s7 + $0x50] sm:$0xff] %v323_v10 }
  0x21   : > { %326 = vst [vmem:[%s1276_s7 + $0x58] sm:$0xff] %v325_v11  ;;  %v327_v12 = vld [vmem:[%s1271_s6 + $0x180] sm:$0xff] }
  0x22   : > { %v329_v13 = vld [vmem:[%s1271_s6 + $0x1a0] sm:$0xff]  ;;  %328 = vst [vmem:[%s1276_s7 + $0x60] sm:$0xff] %v327_v12 }
  0x23   : > { %v331_v14 = vld [vmem:[%s1271_s6 + $0x1c0] sm:$0xff]  ;;  %330 = vst [vmem:[%s1276_s7 + $0x68] sm:$0xff] %v329_v13 }
  0x24   : > { %332 = vst [vmem:[%s1276_s7 + $0x70] sm:$0xff] %v331_v14  ;;  %v333_v15 = vld [vmem:[%s1271_s6 + $0x1e0] sm:$0xff] }
  0x25   : > { %v335_v16 = vld [vmem:[%s1271_s6 + $0x200] sm:$0xff]  ;;  %334 = vst [vmem:[%s1276_s7 + $0x78] sm:$0xff] %v333_v15 }
  0x26   : > { %v337_v17 = vld [vmem:[%s1271_s6 + $0x220] sm:$0xff]  ;;  %336 = vst [vmem:[%s1276_s7 + $0x80] sm:$0xff] %v335_v16 }
  0x27   : > { %338 = vst [vmem:[%s1276_s7 + $0x88] sm:$0xff] %v337_v17  ;;  %v339_v18 = vld [vmem:[%s1271_s6 + $0x240] sm:$0xff] }
  0x28   : > { %v341_v19 = vld [vmem:[%s1271_s6 + $0x260] sm:$0xff]  ;;  %340 = vst [vmem:[%s1276_s7 + $0x90] sm:$0xff] %v339_v18 }
  0x29   : > { %v343_v20 = vld [vmem:[%s1271_s6 + $0x280] sm:$0xff]  ;;  %342 = vst [vmem:[%s1276_s7 + $0x98] sm:$0xff] %v341_v19 }
  0x2a   : > { %344 = vst [vmem:[%s1276_s7 + $0xa0] sm:$0xff] %v343_v20  ;;  %v345_v21 = vld [vmem:[%s1271_s6 + $0x2a0] sm:$0xff] }
  0x2b   : > { %v347_v22 = vld [vmem:[%s1271_s6 + $0x2c0] sm:$0xff]  ;;  %346 = vst [vmem:[%s1276_s7 + $0xa8] sm:$0xff] %v345_v21 }
  0x2c   : > { %v349_v23 = vld [vmem:[%s1271_s6 + $0x2e0] sm:$0xff]  ;;  %348 = vst [vmem:[%s1276_s7 + $0xb0] sm:$0xff] %v347_v22 }
  0x2d   : > { %350 = vst [vmem:[%s1276_s7 + $0xb8] sm:$0xff] %v349_v23  ;;  %v351_v24 = vld [vmem:[%s1271_s6 + $0x300] sm:$0xff] }
  0x2e   : > { %v353_v25 = vld [vmem:[%s1271_s6 + $0x320] sm:$0xff]  ;;  %352 = vst [vmem:[%s1276_s7 + $0xc0] sm:$0xff] %v351_v24 }
  0x2f   : > { %v355_v26 = vld [vmem:[%s1271_s6 + $0x340] sm:$0xff]  ;;  %354 = vst [vmem:[%s1276_s7 + $0xc8] sm:$0xff] %v353_v25 }
  0x30   : > { %356 = vst [vmem:[%s1276_s7 + $0xd0] sm:$0xff] %v355_v26  ;;  %v357_v27 = vld [vmem:[%s1271_s6 + $0x360] sm:$0xff] }
  0x31   : > { %v359_v28 = vld [vmem:[%s1271_s6 + $0x380] sm:$0xff]  ;;  %358 = vst [vmem:[%s1276_s7 + $0xd8] sm:$0xff] %v357_v27 }
  0x32   : > { %v361_v29 = vld [vmem:[%s1271_s6 + $0x3a0] sm:$0xff]  ;;  %360 = vst [vmem:[%s1276_s7 + $0xe0] sm:$0xff] %v359_v28 }
  0x33   : > { %362 = vst [vmem:[%s1276_s7 + $0xe8] sm:$0xff] %v361_v29  ;;  %v363_v30 = vld [vmem:[%s1271_s6 + $0x3c0] sm:$0xff] }
  0x34   : > { %v365_v31 = vld [vmem:[%s1271_s6 + $0x3e0] sm:$0xff]  ;;  %364 = vst [vmem:[%s1276_s7 + $0xf0] sm:$0xff] %v363_v30 }
  0x35   : > { %366 = vst [vmem:[%s1276_s7 + $0xf8] sm:$0xff] %v365_v31 }
  0x36 PF: > { %380 = sbr.rel (!%p1249_p3) target bundleno = 61 (0x3d), region = 66  ;;  %s382_s8 = sand.u32 (%p1249_p3), 1, %s1178_s16  }
  0x37   : > { %s1057_s9 = sshll.u32 (%p1249_p3), %s1186_s18, 3  ;;  %s1007_s10 = sshll.u32 (%p1249_p3), %s382_s8, 4 }
  0x38   : > { %s390_s13 = scalar_lea.vmem (%p1249_p3), %s1425_s3, %s1057_s9  ;;  %s384_s14 = scalar_lea.vmem (%p1249_p3), [#allocation4], %s1007_s10 }
  0x39   : > { %v420_v32 = vld [vmem:[%s390_s13] sm:$0xff] (%p1249_p3) }
  0x3a   : > { %v422_v33 = vld [vmem:[%s390_s13 + $0x20] sm:$0xff] (%p1249_p3)  ;;  %421 = vst [vmem:[%s384_s14] sm:$0xff] (%p1249_p3), %v420_v32 }
  0x3b   : > { %423 = vst [vmem:[%s384_s14 + $0x8] sm:$0xff] (%p1249_p3), %v422_v33 }
  0x3d PF: > { %p1010_p8 = scmp.ge.s32.totalorder %s1190_s19, 1  ;;  %p428_p9 = scmp.lt.s32.totalorder %s1190_s19, 5 }
  0x3f   : > { %p429_p10 = pnand %p1010_p8, %p428_p9 }
  0x40   : > { %s435_s21 = sand.u32 (!%p429_p10), 1, %s1174_s15   ;;  %v1151_v34 = vld [vmem:[%s1422_s0 + $0x4] ss:$8 sps:$4 sm:$0xff] (!%p429_p10)   ;;  %v1149_v3 = vld [vmem:[%s1422_s0] ss:$8 sps:$4 sm:$0xff] (!%p429_p10)   ;;  %s1014_s30 = sshll.u32 (!%p429_p10), %s1182_s17, 1  ;;  %v783_v4 = vlaneseq (!%p429_p10) }
  0x41   : > { %432 = sbr.rel (%p429_p10) target bundleno = 364 (0x16c), region = 104  ;;  %s1011_s22 = sshll.u32 (!%p429_p10), %s435_s21, 8  ;;  %755 = vmatprep.mubr.bf16.mxu0 (!%p429_p10), %v1151_v34 }
  0x42   : > { %s1354_s27 = scalar_lea.vmem (!%p429_p10), [#allocation3], %s1011_s22  ;;  %p499_p11 = scmp.lt.s32.totalorder (!%p429_p10), %s1014_s30, 7  ;;  %v784_v5 = vshrl.u32 (!%p429_p10), %v783_v4, 7 }
  0x43   : > { %v1101_v35 = vld [vmem:[%s1354_s27 + $0x4] ss:$8 sps:$4 sm:$0xff] (!%p429_p10)   ;;  %v1103_v36 = vld [vmem:[%s1354_s27] ss:$8 sps:$4 sm:$0xff] (!%p429_p10)   ;;  %v1104_v37 = vld [vmem:[%s1354_s27 + $0x14] ss:$8 sps:$4 sm:$0xff] (!%p429_p10)  }
  0x44   : > { %723 = vmatprep.subr.bf16.mxu0 (!%p429_p10), %v1101_v35  ;;  %v1106_v38 = vld [vmem:[%s1354_s27 + $0x10] ss:$8 sps:$4 sm:$0xff] (!%p429_p10)   ;;  %v1107_v39 = vld [vmem:[%s1354_s27 + $0x24] ss:$8 sps:$4 sm:$0xff] (!%p429_p10)   ;;  %v1109_v40 = vld [vmem:[%s1354_s27 + $0x20] ss:$8 sps:$4 sm:$0xff] (!%p429_p10)  }
  0x45   : > { %724 = vmatpush1.bf16.msra.mxu0 (!%p429_p10), %v1103_v36  ;;  %v1110_v41 = vld [vmem:[%s1354_s27 + $0x34] ss:$8 sps:$4 sm:$0xff] (!%p429_p10)   ;;  %v1112_v42 = vld [vmem:[%s1354_s27 + $0x30] ss:$8 sps:$4 sm:$0xff] (!%p429_p10)   ;;  %v1113_v43 = vld [vmem:[%s1354_s27 + $0x44] ss:$8 sps:$4 sm:$0xff] (!%p429_p10)  }
  0x46   : > { %725 = vmatprep.subr.bf16.mxu0 (!%p429_p10), %v1104_v37  ;;  %v1115_v44 = vld [vmem:[%s1354_s27 + $0x40] ss:$8 sps:$4 sm:$0xff] (!%p429_p10)   ;;  %v1116_v45 = vld [vmem:[%s1354_s27 + $0x54] ss:$8 sps:$4 sm:$0xff] (!%p429_p10)   ;;  %v1118_v46 = vld [vmem:[%s1354_s27 + $0x50] ss:$8 sps:$4 sm:$0xff] (!%p429_p10)  }
  0x47   : > { %v1119_v47 = vld [vmem:[%s1354_s27 + $0x64] ss:$8 sps:$4 sm:$0xff] (!%p429_p10)   ;;  %v1121_v48 = vld [vmem:[%s1354_s27 + $0x60] ss:$8 sps:$4 sm:$0xff] (!%p429_p10)   ;;  %v1122_v49 = vld [vmem:[%s1354_s27 + $0x74] ss:$8 sps:$4 sm:$0xff] (!%p429_p10)  }
  0x48   : > { %v1124_v50 = vld [vmem:[%s1354_s27 + $0x70] ss:$8 sps:$4 sm:$0xff]   ;;  %v1125_v51 = vld [vmem:[%s1354_s27 + $0x84] ss:$8 sps:$4 sm:$0xff]   ;;  %v1127_v52 = vld [vmem:[%s1354_s27 + $0x80] ss:$8 sps:$4 sm:$0xff]  }
  0x49   : > { %726 = vmatpush1.bf16.msra.mxu0 %v1106_v38  ;;  %v1128_v53 = vld [vmem:[%s1354_s27 + $0x94] ss:$8 sps:$4 sm:$0xff]   ;;  %v1130_v54 = vld [vmem:[%s1354_s27 + $0x90] ss:$8 sps:$4 sm:$0xff]   ;;  %v1131_v55 = vld [vmem:[%s1354_s27 + $0xa4] ss:$8 sps:$4 sm:$0xff]  }
  0x4a   : > { %727 = vmatprep.subr.bf16.mxu0 %v1107_v39  ;;  %v1133_v56 = vld [vmem:[%s1354_s27 + $0xa0] ss:$8 sps:$4 sm:$0xff]   ;;  %v1134_v57 = vld [vmem:[%s1354_s27 + $0xb4] ss:$8 sps:$4 sm:$0xff]   ;;  %v1136_v58 = vld [vmem:[%s1354_s27 + $0xb0] ss:$8 sps:$4 sm:$0xff]  }
  0x4b   : > { %v1137_v59 = vld [vmem:[%s1354_s27 + $0xc4] ss:$8 sps:$4 sm:$0xff]   ;;  %v1139_v60 = vld [vmem:[%s1354_s27 + $0xc0] ss:$8 sps:$4 sm:$0xff]   ;;  %v1140_v61 = vld [vmem:[%s1354_s27 + $0xd4] ss:$8 sps:$4 sm:$0xff]  }
  0x4c   : > { %v1142_v62 = vld [vmem:[%s1354_s27 + $0xd0] ss:$8 sps:$4 sm:$0xff]   ;;  %v1143_v63 = vld [vmem:[%s1354_s27 + $0xe4] ss:$8 sps:$4 sm:$0xff]   ;;  %v1145_v0 = vld [vmem:[%s1354_s27 + $0xe0] ss:$8 sps:$4 sm:$0xff]  }
  0x4d   : > { %728 = vmatpush1.bf16.msra.mxu0 %v1109_v40  ;;  %v1146_v1 = vld [vmem:[%s1354_s27 + $0xf4] ss:$8 sps:$4 sm:$0xff]   ;;  %v1148_v2 = vld [vmem:[%s1354_s27 + $0xf0] ss:$8 sps:$4 sm:$0xff]   ;;  %s1436_s30 = smov (!%p499_p11, %s1014_s30), 7  ;;  %s1394_s5 = sshll.u32 %s435_s21, 4 }
  0x4e   : > { %729 = vmatprep.subr.bf16.mxu0 %v1110_v41  ;;  %s501_s8 = scalar_lea.vmem %s1424_s2, %s1436_s30  ;;  %v785_v6 = vsub.s32 0, %v784_v5  ;;  %v789_v8 = vsub.s32 1, %v784_v5  ;;  %s444_s9 = scalar_lea.vmem [#allocation4], %s1394_s5 }
  0x4f   : > { %v781_v7 = vld [vmem:[%s501_s8] sm:$0x3]  ;;  %v798_v12 = vld [vmem:[%s444_s9 + $0x8] sm:$0xff]  ;;  %s483_s15 = scalar_lea.vmem [#allocation5], %s1394_s5  ;;  %s1060_s10 = sshll.u32 (%p1256_p6), %s1182_s17, 3 }
  0x50   : > { %v797_v9 = vld [vmem:[%s444_s9] sm:$0xff]  ;;  %v786_v10 = vrot.slane %v781_v7, %v785_v6  ;;  %v790_v11 = vrot.slane %v781_v7, %v789_v8  ;;  %v801_v18 = vunpack.c.l.bf16 %v798_v12  ;;  %v802_v21 = vunpack.c.h.bf16 %v798_v12  ;;  %s837_s13 = scalar_lea.vmem (%p1256_p6), %s1426_s4, %s1060_s10 }
  0x51   : > { %730 = vmatpush1.bf16.msra.mxu0 %v1112_v42  ;;  %v799_v13 = vunpack.c.l.bf16 %v797_v9  ;;  %v800_v15 = vunpack.c.h.bf16 %v797_v9 }
  0x52   : > { %731 = vmatprep.subr.bf16.mxu0 %v1113_v43 }
  0x55   : > { %732 = vmatpush1.bf16.msra.mxu0 %v1115_v44 }
  0x56   : > { %733 = vmatprep.subr.bf16.mxu0 %v1116_v45 }
  0x59   : > { %734 = vmatpush1.bf16.msra.mxu0 %v1118_v46 }
  0x5a   : > { %735 = vmatprep.subr.bf16.mxu0 %v1119_v47 }
  0x5d   : > { %736 = vmatpush1.bf16.msra.mxu0 %v1121_v48 }
  0x5e   : > { %737 = vmatprep.subr.bf16.mxu0 %v1122_v49 }
  0x61   : > { %738 = vmatpush1.bf16.msra.mxu0 %v1124_v50 }
  0x62   : > { %739 = vmatprep.subr.bf16.mxu0 %v1125_v51 }
  0x65   : > { %740 = vmatpush1.bf16.msra.mxu0 %v1127_v52 }
  0x66   : > { %741 = vmatprep.subr.bf16.mxu0 %v1128_v53 }
  0x69   : > { %742 = vmatpush1.bf16.msra.mxu0 %v1130_v54 }
  0x6a   : > { %743 = vmatprep.subr.bf16.mxu0 %v1131_v55 }
  0x6d   : > { %744 = vmatpush1.bf16.msra.mxu0 %v1133_v56 }
  0x6e   : > { %745 = vmatprep.subr.bf16.mxu0 %v1134_v57 }
  0x71   : > { %746 = vmatpush1.bf16.msra.mxu0 %v1136_v58 }
  0x72   : > { %747 = vmatprep.subr.bf16.mxu0 %v1137_v59 }
  0x75   : > { %748 = vmatpush1.bf16.msra.mxu0 %v1139_v60 }
  0x76   : > { %749 = vmatprep.subr.bf16.mxu0 %v1140_v61 }
  0x79   : > { %750 = vmatpush1.bf16.msra.mxu0 %v1142_v62 }
  0x7a   : > { %751 = vmatprep.subr.bf16.mxu0 %v1143_v63 }
  0x7d   : > { %752 = vmatpush1.bf16.msra.mxu0 %v1145_v0 }
  0x7e   : > { %753 = vmatprep.subr.bf16.mxu0 %v1146_v1 }
  0x81   : > { %754 = vmatpush1.bf16.msra.mxu0 %v1148_v2 }
  0x84   : > { %756 = vmatmul.mubr.bf16.vlgmr.msra.gmra.mrb[0].mxu0 %v1149_v3 }
 0x157   : > { %v757_v14 = vpop.f32.mrb[0].mxu0 }
 0x158   : > { %v793_v16 = vadd.f32 %v786_v10, %v757_v14  ;;  %v759_v17 = vpop.f32.mrb[1].mxu0 }
 0x159   : > { %v794_v19 = vadd.f32 %v790_v11, %v759_v17  ;;  %v761_v20 = vpop.f32.mrb[2].mxu0 }
 0x15a   : > { %v803_v22 = vadd.f32 %v799_v13, %v793_v16  ;;  %v795_v23 = vadd.f32 %v786_v10, %v761_v20  ;;  %v763_v24 = vpop.f32.mrb[3].mxu0 }
 0x15b   : > { %v804_v25 = vadd.f32 %v800_v15, %v794_v19  ;;  %v796_v26 = vadd.f32 %v790_v11, %v763_v24 }
 0x15c   : > { %v807_v27 = vmax.f32 %v803_v22, 0.0  ;;  %v805_v28 = vadd.f32 %v801_v18, %v795_v23 }
 0x15d   : > { %v808_v29 = vmax.f32 %v804_v25, 0.0  ;;  %v806_v30 = vadd.f32 %v802_v21, %v796_v26  ;;  %831 = sbr.rel (!%p1256_p6) target bundleno = 364 (0x16c), region = 124 }
 0x15e   : > { %v809_v31 = vmax.f32 %v805_v28, 0.0 }
 0x15f   : > { %v1058_v32 = vpack.c.bf16 %v808_v29, %v807_v27  ;;  %v810_v33 = vmax.f32 %v806_v30, 0.0 }
 0x161   : > { %823 = vst [vmem:[%s483_s15] sm:$0xff] %v1058_v32  ;;  %v1059_v34 = vpack.c.bf16 %v810_v33, %v809_v31 }
 0x163   : > { %824 = vst [vmem:[%s483_s15 + $0x8] sm:$0xff] %v1059_v34 }
 0x168   : > { %v867_v35 = vld [vmem:[%s483_s15] sm:$0xff] }
 0x169   : > { %868 = vst [vmem:[%s837_s13] sm:$0xff] %v867_v35 }
 0x16a   : > { %v869_v36 = vld [vmem:[%s483_s15 + $0x8] sm:$0xff] }
 0x16b   : > { %870 = vst [vmem:[%s837_s13 + $0x20] sm:$0xff] %v869_v36 }
 0x16c PF: > { %s14_s19 = sadd.s32 1, %s1190_s19   ;;  %s1429_s15 = smov %s1178_s16 }
 0x16d   : > { %p11_p12 = scmp.ge.s32.totalorder %s14_s19, 6   ;;  %s1430_s16 = smov %s1261_s26 }
 0x16e   : > { %s1431_s17 = smov %s1186_s18  ;;  %s1432_s18 = smov %s1434_s20 }
 0x16f   :  { %13 = sbr.rel (!%p11_p12) target bundleno = 3 (0x3), region = 207 }

// kernel: resnet50_forward.83
= control target key start
LH: loop header
LB: loop body
LE: loop exit
PB: predicated region body
PF: predicated region fallthrough
CT: control target
= control target key end

     0   :  { %s1276_s12 = smov 0   ;;  %s1278_s13 = smov 0   ;;  %s1424_s0 = inlined_call_operand.vmem [shape: bf16[16,1024], index: 0, kind: input, shape index: {}]   ;;  %s1425_s1 = inlined_call_operand.vmem [shape: bf16[1024,256], index: 1, kind: input, shape index: {}]   ;;  %s1426_s2 = inlined_call_operand.vmem [shape: f32[1,256], index: 2, kind: input, shape index: {}]   ;;  %s1427_s3 = inlined_call_operand.vmem [shape: bf16[16,256], index: 3, kind: output, shape index: {}]  }
   0x1   :  { %s1280_s14 = smov 0   ;;  %s1282_s15 = smov 0  }
   0x2   :  { %s1284_s16 = smov 0  }
   0x3 LB: > { %s25_s17 = sadd.s32 1, %s1249_s15  ;;  %p48_p1 = scmp.ne.s32.totalorder %s1241_s13, %s1237_s12  ;;  %s1253_s16 = sphi %s1284_s16, %s13_s16   ;;  %s1249_s15 = sphi %s1282_s15, %s1431_s15   ;;  %s1245_s14 = sphi %s1280_s14, %s1430_s14   ;;  %s1241_s13 = sphi %s1278_s13, %s1429_s13   ;;  %s1237_s12 = sphi %s1276_s12, %s1428_s12  }
   0x4   : > { %p26_p0 = scmp.ge.s32.totalorder %s25_s17, 2  ;;  %p49_p2 = scmp.eq.s32.totalorder %s1253_s16, 0 }
   0x5   : > { %s41_s19 = sadd.s32 1, %s1241_s13  ;;  %p979_p5 = scmp.ge.s32.totalorder %s1253_s16, 2 }
   0x6   : > { %s1433_s17 = smov (%p26_p0, %s25_s17), 0  ;;  %p50_p3 = por %p49_p2, %p48_p1 }
   0x7   : > { %s37_s18 = ssub.s32 %s1249_s15, %s1433_s17  ;;  %164 = sbr.rel (%p979_p5) target bundleno = 21 (0x15), region = 20 }
   0x8   : > { %p39_p4 = scmp.eq.s32.totalorder %s37_s18, 0 }
   0xa   : > { %s1311_s20 = scalar_select %p39_p4, %s1241_s13, %s41_s19  }
   0xe   : > { %167 = sbr.rel (!%p50_p3) target bundleno = 21 (0x15), region = 24  ;;  %s169_s21 = sand.u32 (%p50_p3), 1, %s1241_s13  }
   0xf   : > { %s1064_s22 = sshll.u32 (%p50_p3), %s1249_s15, 4  ;;  %s980_s23 = sshll.u32 (%p50_p3), %s169_s21, 5 }
  0x10   : > { %s177_s26 = scalar_lea.vmem (%p50_p3), %s1424_s0, %s1064_s22  ;;  %s171_s27 = scalar_lea.vmem (%p50_p3), [#allocation3], %s980_s23 }
  0x11   : > { %v190_v0 = vld [vmem:[%s177_s26] sm:$0xff] (%p50_p3)  ;;  %v192_v1 = vld [vmem:[%s177_s26 + $0x8] sm:$0xff] (%p50_p3) }
  0x12   : > { %v194_v2 = vld [vmem:[%s177_s26 + $0x20] sm:$0xff] (%p50_p3)  ;;  %191 = vst [vmem:[%s171_s27] sm:$0xff] (%p50_p3), %v190_v0  ;;  %193 = vst [vmem:[%s171_s27 + $0x8] sm:$0xff] (%p50_p3), %v192_v1  ;;  %v196_v3 = vld [vmem:[%s177_s26 + $0x28] sm:$0xff] (%p50_p3) }
  0x13   : > { %195 = vst [vmem:[%s171_s27 + $0x10] sm:$0xff] (%p50_p3), %v194_v2  ;;  %197 = vst [vmem:[%s171_s27 + $0x18] sm:$0xff] (%p50_p3), %v196_v3 }
  0x15 PF: > { %p983_p6 = scmp.ge.s32.totalorder %s1253_s16, 1  ;;  %p217_p7 = scmp.lt.s32.totalorder %s1253_s16, 3 }
  0x17   : > { %p218_p8 = pnand %p983_p6, %p217_p7 }
  0x18   : > { %s224_s28 = sand.u32 (!%p218_p8), 1, %s1237_s12   ;;  %s985_s29 = sshll.u32 (!%p218_p8), %s1245_s14, 6 }
  0x19   : > { %221 = sbr.rel (%p218_p8) target bundleno = 339 (0x153), region = 51  ;;  %s984_s30 = sshll.u32 (!%p218_p8), %s224_s28, 5 }
  0x1a   : > { %p270_p9 = scmp.lt.s32.totalorder (!%p218_p8), %s985_s29, 127  ;;  %s1328_s8 = scalar_lea.vmem (!%p218_p8), [#allocation3], %s984_s30 }
  0x1b   : > { %p988_p10 = scmp.ne.s32.totalorder (!%p218_p8), %s1245_s14, 0 }
  0x20   : > { %s1435_s29 = smov (!%p270_p9, %s985_s29), 127  ;;  %300 = sbr.rel (%p988_p10) target bundleno = 39 (0x27), region = 59 }
  0x21   : > { %s1065_s4 = sshll.u32 %s1435_s29, 3  ;;  %v1255_v4 = vmov (!%p988_p10), 0.0  }
  0x22   : > { %s1326_s7 = scalar_lea.vmem %s1425_s1, %s1065_s4  ;;  %301 = vst [vmem:[#allocation2] sm:$0xff] (!%p988_p10), %v1255_v4  ;;  %302 = vst [vmem:[#allocation2 + $0x8] sm:$0xff] (!%p988_p10), %v1255_v4 }
  0x23   : > { %303 = vst [vmem:[#allocation2 + $0x10] sm:$0xff] (!%p988_p10), %v1255_v4  ;;  %304 = vst [vmem:[#allocation2 + $0x18] sm:$0xff] (!%p988_p10), %v1255_v4 }
  0x27 PF: > { %v1113_v5 = vld [vmem:[%s1326_s7 + $0x4] ss:$8 sps:$4 sm:$0xff]   ;;  %v1117_v7 = vld [vmem:[%s1326_s7] ss:$8 sps:$4 sm:$0xff]   ;;  %v1119_v9 = vld [vmem:[%s1326_s7 + $0x14] ss:$8 sps:$4 sm:$0xff]  }
  0x28   : > { %v1115_v6 = vld [vmem:[%s1326_s7 + $0x104] ss:$8 sps:$4 sm:$0xff]   ;;  %717 = vmatprep.subr.bf16.mxu1 %v1113_v5  ;;  %v1118_v8 = vld [vmem:[%s1326_s7 + $0x100] ss:$8 sps:$4 sm:$0xff]   ;;  %v1121_v10 = vld [vmem:[%s1326_s7 + $0x114] ss:$8 sps:$4 sm:$0xff]  }
  0x29   : > { %760 = vmatprep.subr.bf16.mxu0 %v1115_v6  ;;  %718 = vmatpush1.bf16.msra.mxu1 %v1117_v7  ;;  %v1123_v11 = vld [vmem:[%s1326_s7 + $0x10] ss:$8 sps:$4 sm:$0xff]   ;;  %v1125_v13 = vld [vmem:[%s1326_s7 + $0x24] ss:$8 sps:$4 sm:$0xff]   ;;  %v1129_v15 = vld [vmem:[%s1326_s7 + $0x20] ss:$8 sps:$4 sm:$0xff]  }
  0x2a   : > { %761 = vmatpush1.bf16.msra.mxu0 %v1118_v8  ;;  %719 = vmatprep.subr.bf16.mxu1 %v1119_v9  ;;  %v1124_v12 = vld [vmem:[%s1326_s7 + $0x110] ss:$8 sps:$4 sm:$0xff]   ;;  %v1127_v14 = vld [vmem:[%s1326_s7 + $0x124] ss:$8 sps:$4 sm:$0xff]   ;;  %v1130_v16 = vld [vmem:[%s1326_s7 + $0x120] ss:$8 sps:$4 sm:$0xff]  }
  0x2b   : > { %762 = vmatprep.subr.bf16.mxu0 %v1121_v10  ;;  %v1131_v17 = vld [vmem:[%s1326_s7 + $0x34] ss:$8 sps:$4 sm:$0xff]   ;;  %v1135_v19 = vld [vmem:[%s1326_s7 + $0x30] ss:$8 sps:$4 sm:$0xff]   ;;  %v1137_v21 = vld [vmem:[%s1326_s7 + $0x44] ss:$8 sps:$4 sm:$0xff]  }
  0x2c   : > { %v1133_v18 = vld [vmem:[%s1326_s7 + $0x134] ss:$8 sps:$4 sm:$0xff]   ;;  %v1136_v20 = vld [vmem:[%s1326_s7 + $0x130] ss:$8 sps:$4 sm:$0xff]   ;;  %v1139_v22 = vld [vmem:[%s1326_s7 + $0x144] ss:$8 sps:$4 sm:$0xff]  }
  0x2d   : > { %720 = vmatpush1.bf16.msra.mxu1 %v1123_v11  ;;  %v1141_v23 = vld [vmem:[%s1326_s7 + $0x40] ss:$8 sps:$4 sm:$0xff]   ;;  %v1143_v25 = vld [vmem:[%s1326_s7 + $0x54] ss:$8 sps:$4 sm:$0xff]   ;;  %v1147_v27 = vld [vmem:[%s1326_s7 + $0x50] ss:$8 sps:$4 sm:$0xff]  }
  0x2e   : > { %763 = vmatpush1.bf16.msra.mxu0 %v1124_v12  ;;  %721 = vmatprep.subr.bf16.mxu1 %v1125_v13  ;;  %v1142_v24 = vld [vmem:[%s1326_s7 + $0x140] ss:$8 sps:$4 sm:$0xff]   ;;  %v1145_v26 = vld [vmem:[%s1326_s7 + $0x154] ss:$8 sps:$4 sm:$0xff]   ;;  %v1148_v28 = vld [vmem:[%s1326_s7 + $0x150] ss:$8 sps:$4 sm:$0xff]  }
  0x2f   : > { %764 = vmatprep.subr.bf16.mxu0 %v1127_v14  ;;  %v1149_v29 = vld [vmem:[%s1326_s7 + $0x64] ss:$8 sps:$4 sm:$0xff]   ;;  %v1153_v31 = vld [vmem:[%s1326_s7 + $0x60] ss:$8 sps:$4 sm:$0xff]   ;;  %v1155_v33 = vld [vmem:[%s1326_s7 + $0x74] ss:$8 sps:$4 sm:$0xff]  }
  0x30   : > { %v1151_v30 = vld [vmem:[%s1326_s7 + $0x164] ss:$8 sps:$4 sm:$0xff]   ;;  %v1154_v32 = vld [vmem:[%s1326_s7 + $0x160] ss:$8 sps:$4 sm:$0xff]   ;;  %v1157_v34 = vld [vmem:[%s1326_s7 + $0x174] ss:$8 sps:$4 sm:$0xff]  }
  0x31   : > { %722 = vmatpush1.bf16.msra.mxu1 %v1129_v15  ;;  %v1159_v35 = vld [vmem:[%s1326_s7 + $0x70] ss:$8 sps:$4 sm:$0xff]   ;;  %v1161_v37 = vld [vmem:[%s1326_s7 + $0x84] ss:$8 sps:$4 sm:$0xff]   ;;  %v1165_v39 = vld [vmem:[%s1326_s7 + $0x80] ss:$8 sps:$4 sm:$0xff]  }
  0x32   : > { %765 = vmatpush1.bf16.msra.mxu0 %v1130_v16  ;;  %723 = vmatprep.subr.bf16.mxu1 %v1131_v17  ;;  %v1160_v36 = vld [vmem:[%s1326_s7 + $0x170] ss:$8 sps:$4 sm:$0xff]   ;;  %v1163_v38 = vld [vmem:[%s1326_s7 + $0x184] ss:$8 sps:$4 sm:$0xff]   ;;  %v1166_v40 = vld [vmem:[%s1326_s7 + $0x180] ss:$8 sps:$4 sm:$0xff]  }
  0x33   : > { %766 = vmatprep.subr.bf16.mxu0 %v1133_v18  ;;  %v1167_v41 = vld [vmem:[%s1326_s7 + $0x94] ss:$8 sps:$4 sm:$0xff]   ;;  %v1171_v43 = vld [vmem:[%s1326_s7 + $0x90] ss:$8 sps:$4 sm:$0xff]   ;;  %v1173_v45 = vld [vmem:[%s1326_s7 + $0xa4] ss:$8 sps:$4 sm:$0xff]  }
  0x34   : > { %v1169_v42 = vld [vmem:[%s1326_s7 + $0x194] ss:$8 sps:$4 sm:$0xff]   ;;  %v1172_v44 = vld [vmem:[%s1326_s7 + $0x190] ss:$8 sps:$4 sm:$0xff]   ;;  %v1175_v46 = vld [vmem:[%s1326_s7 + $0x1a4] ss:$8 sps:$4 sm:$0xff]  }
  0x35   : > { %724 = vmatpush1.bf16.msra.mxu1 %v1135_v19  ;;  %v1177_v47 = vld [vmem:[%s1326_s7 + $0xa0] ss:$8 sps:$4 sm:$0xff]   ;;  %v1179_v49 = vld [vmem:[%s1326_s7 + $0xb4] ss:$8 sps:$4 sm:$0xff]   ;;  %v1183_v51 = vld [vmem:[%s1326_s7 + $0xb0] ss:$8 sps:$4 sm:$0xff]  }
  0x36   : > { %767 = vmatpush1.bf16.msra.mxu0 %v1136_v20  ;;  %725 = vmatprep.subr.bf16.mxu1 %v1137_v21  ;;  %v1178_v48 = vld [vmem:[%s1326_s7 + $0x1a0] ss:$8 sps:$4 sm:$0xff]   ;;  %v1181_v50 = vld [vmem:[%s1326_s7 + $0x1b4] ss:$8 sps:$4 sm:$0xff]   ;;  %v1184_v53 = vld [vmem:[%s1326_s7 + $0x1b0] ss:$8 sps:$4 sm:$0xff]  }
  0x37   : > { %768 = vmatprep.subr.bf16.mxu0 %v1139_v22  ;;  %v1211_v52 = vld [vmem:[%s1328_s8 + $0x4] ss:$16 sps:$4 sm:$0xff]   ;;  %v1214_v56 = vld [vmem:[%s1328_s8 + $0xc] ss:$16 sps:$4 sm:$0xff]   ;;  %v1189_v57 = vld [vmem:[%s1326_s7 + $0xc0] ss:$8 sps:$4 sm:$0xff]  }
  0x38   : > { %v1185_v54 = vld [vmem:[%s1326_s7 + $0xc4] ss:$8 sps:$4 sm:$0xff]   ;;  %749 = vmatprep.mubr.bf16.mxu1 %v1211_v52  ;;  %792 = vmatprep.mubr.bf16.mxu0 %v1214_v56  ;;  %v1190_v58 = vld [vmem:[%s1326_s7 + $0x1c0] ss:$8 sps:$4 sm:$0xff]   ;;  %v1191_v59 = vld [vmem:[%s1326_s7 + $0xd4] ss:$8 sps:$4 sm:$0xff]  }
  0x39   : > { %726 = vmatpush1.bf16.msra.mxu1 %v1141_v23  ;;  %v1187_v55 = vld [vmem:[%s1326_s7 + $0x1c4] ss:$8 sps:$4 sm:$0xff]   ;;  %v1193_v60 = vld [vmem:[%s1326_s7 + $0x1d4] ss:$8 sps:$4 sm:$0xff]   ;;  %v1195_v61 = vld [vmem:[%s1326_s7 + $0xd0] ss:$8 sps:$4 sm:$0xff]  }
  0x3a   : > { %769 = vmatpush1.bf16.msra.mxu0 %v1142_v24  ;;  %727 = vmatprep.subr.bf16.mxu1 %v1143_v25  ;;  %v1196_v62 = vld [vmem:[%s1326_s7 + $0x1d0] ss:$8 sps:$4 sm:$0xff]   ;;  %v1197_v63 = vld [vmem:[%s1326_s7 + $0xe4] ss:$8 sps:$4 sm:$0xff]   ;;  %v1201_v1 = vld [vmem:[%s1326_s7 + $0xe0] ss:$8 sps:$4 sm:$0xff]  }
  0x3b   : > { %770 = vmatprep.subr.bf16.mxu0 %v1145_v26  ;;  %v1199_v0 = vld [vmem:[%s1326_s7 + $0x1e4] ss:$8 sps:$4 sm:$0xff]   ;;  %v1202_v2 = vld [vmem:[%s1326_s7 + $0x1e0] ss:$8 sps:$4 sm:$0xff]   ;;  %v1203_v3 = vld [vmem:[%s1326_s7 + $0xf4] ss:$8 sps:$4 sm:$0xff]  }
  0x3c   : > { %v1205_v4 = vld [vmem:[%s1326_s7 + $0x1f4] ss:$8 sps:$4 sm:$0xff]   ;;  %v1207_v5 = vld [vmem:[%s1326_s7 + $0xf0] ss:$8 sps:$4 sm:$0xff]   ;;  %v305_v10 = vld [vmem:[#allocation2] sm:$0xff]  ;;  %p1057_p11 = scmp.ne.s32.totalorder %s1245_s14, 1 }
  0x3d   : > { %728 = vmatpush1.bf16.msra.mxu1 %v1147_v27  ;;  %v1208_v6 = vld [vmem:[%s1326_s7 + $0x1f0] ss:$8 sps:$4 sm:$0xff]   ;;  %v306_v14 = vld [vmem:[#allocation2 + $0x8] sm:$0xff] }
  0x3e   : > { %771 = vmatpush1.bf16.msra.mxu0 %v1148_v28  ;;  %729 = vmatprep.subr.bf16.mxu1 %v1149_v29  ;;  %v1209_v7 = vld [vmem:[%s1328_s8] ss:$16 sps:$4 sm:$0xff]   ;;  %v1212_v8 = vld [vmem:[%s1328_s8 + $0x8] ss:$16 sps:$4 sm:$0xff]   ;;  %v821_v29 = vlaneseq (!%p1057_p11) }
  0x3f   : > { %772 = vmatprep.subr.bf16.mxu0 %v1151_v30  ;;  %v307_v18 = vld [vmem:[#allocation2 + $0x10] sm:$0xff]  ;;  %v308_v23 = vld [vmem:[#allocation2 + $0x18] sm:$0xff] }
  0x40   : > { %v822_v30 = vshrl.u32 (!%p1057_p11), %v821_v29, 7 }
  0x41   : > { %730 = vmatpush1.bf16.msra.mxu1 %v1153_v31  ;;  %v819_v31 = vld [vmem:[%s1426_s2] sm:$0x3] (!%p1057_p11) }
  0x42   : > { %773 = vmatpush1.bf16.msra.mxu0 %v1154_v32  ;;  %731 = vmatprep.subr.bf16.mxu1 %v1155_v33  ;;  %v823_v33 = vsub.s32 (!%p1057_p11), 0, %v822_v30 }
  0x43   : > { %774 = vmatprep.subr.bf16.mxu0 %v1157_v34  ;;  %v827_v34 = vsub.s32 (!%p1057_p11), 1, %v822_v30 }
  0x45   : > { %732 = vmatpush1.bf16.msra.mxu1 %v1159_v35 }
  0x46   : > { %775 = vmatpush1.bf16.msra.mxu0 %v1160_v36  ;;  %733 = vmatprep.subr.bf16.mxu1 %v1161_v37 }
  0x47   : > { %776 = vmatprep.subr.bf16.mxu0 %v1163_v38  ;;  %v824_v38 = vrot.slane (!%p1057_p11), %v819_v31, %v823_v33 }
  0x49   : > { %734 = vmatpush1.bf16.msra.mxu1 %v1165_v39  ;;  %v828_v39 = vrot.slane (!%p1057_p11), %v819_v31, %v827_v34 }
  0x4a   : > { %777 = vmatpush1.bf16.msra.mxu0 %v1166_v40  ;;  %735 = vmatprep.subr.bf16.mxu1 %v1167_v41 }
  0x4b   : > { %778 = vmatprep.subr.bf16.mxu0 %v1169_v42 }
  0x4d   : > { %736 = vmatpush1.bf16.msra.mxu1 %v1171_v43 }
  0x4e   : > { %779 = vmatpush1.bf16.msra.mxu0 %v1172_v44  ;;  %737 = vmatprep.subr.bf16.mxu1 %v1173_v45 }
  0x4f   : > { %780 = vmatprep.subr.bf16.mxu0 %v1175_v46 }
  0x51   : > { %738 = vmatpush1.bf16.msra.mxu1 %v1177_v47 }
  0x52   : > { %781 = vmatpush1.bf16.msra.mxu0 %v1178_v48  ;;  %739 = vmatprep.subr.bf16.mxu1 %v1179_v49 }
  0x53   : > { %782 = vmatprep.subr.bf16.mxu0 %v1181_v50 }
  0x55   : > { %740 = vmatpush1.bf16.msra.mxu1 %v1183_v51 }
  0x56   : > { %783 = vmatpush1.bf16.msra.mxu0 %v1184_v53  ;;  %741 = vmatprep.subr.bf16.mxu1 %v1185_v54 }
  0x57   : > { %784 = vmatprep.subr.bf16.mxu0 %v1187_v55 }
  0x59   : > { %742 = vmatpush1.bf16.msra.mxu1 %v1189_v57 }
  0x5a   : > { %785 = vmatpush1.bf16.msra.mxu0 %v1190_v58  ;;  %743 = vmatprep.subr.bf16.mxu1 %v1191_v59 }
  0x5b   : > { %786 = vmatprep.subr.bf16.mxu0 %v1193_v60 }
  0x5d   : > { %744 = vmatpush1.bf16.msra.mxu1 %v1195_v61 }
  0x5e   : > { %787 = vmatpush1.bf16.msra.mxu0 %v1196_v62  ;;  %745 = vmatprep.subr.bf16.mxu1 %v1197_v63 }
  0x5f   : > { %788 = vmatprep.subr.bf16.mxu0 %v1199_v0 }
  0x61   : > { %746 = vmatpush1.bf16.msra.mxu1 %v1201_v1 }
  0x62   : > { %789 = vmatpush1.bf16.msra.mxu0 %v1202_v2  ;;  %747 = vmatprep.subr.bf16.mxu1 %v1203_v3 }
  0x63   : > { %790 = vmatprep.subr.bf16.mxu0 %v1205_v4 }
  0x65   : > { %748 = vmatpush1.bf16.msra.mxu1 %v1207_v5 }
  0x66   : > { %791 = vmatpush1.bf16.msra.mxu0 %v1208_v6 }
  0x68   : > { %750 = vmatmul.mubr.bf16.vlgmr.msra.gmra.mrb[0].mxu1 %v1209_v7 }
  0x69   : > { %793 = vmatmul.mubr.bf16.vlgmr.msra.gmra.mrb[0].mxu0 %v1212_v8 }
 0x13b   : > { %v751_v9 = vpop.f32.mrb[0].mxu1 }
 0x13c   : > { %v794_v11 = vpop.f32.mrb[0].mxu0  ;;  %v753_v13 = vpop.f32.mrb[1].mxu1 }
 0x13d   : > { %v795_v12 = vadd.f32 %v794_v11, %v751_v9  ;;  %v796_v15 = vpop.f32.mrb[1].mxu0  ;;  %v755_v17 = vpop.f32.mrb[2].mxu1 }
 0x13e   : > { %v797_v16 = vadd.f32 %v796_v15, %v753_v13  ;;  %v798_v19 = vpop.f32.mrb[2].mxu0  ;;  %v757_v22 = vpop.f32.mrb[3].mxu1  ;;  %814 = sbr.rel (%p1057_p11) target bundleno = 339 (0x153), region = 63 }
 0x13f   : > { %v803_v20 = vadd.f32 %v795_v12, %v305_v10  ;;  %v799_v21 = vadd.f32 %v798_v19, %v755_v17  ;;  %v800_v24 = vpop.f32.mrb[3].mxu0 }
 0x140   : > { %v804_v25 = vadd.f32 %v797_v16, %v306_v14  ;;  %v801_v26 = vadd.f32 %v800_v24, %v757_v22 }
 0x141   : > { %807 = vst [vmem:[#allocation2] sm:$0xff] %v803_v20  ;;  %v805_v27 = vadd.f32 %v799_v21, %v307_v18 }
 0x142   : > { %808 = vst [vmem:[#allocation2 + $0x8] sm:$0xff] %v804_v25  ;;  %v806_v28 = vadd.f32 %v801_v26, %v308_v23 }
 0x143   : > { %809 = vst [vmem:[#allocation2 + $0x10] sm:$0xff] %v805_v27 }
 0x144   : > { %810 = vst [vmem:[#allocation2 + $0x18] sm:$0xff] %v806_v28 }
 0x148   : > { %v815_v32 = vld [vmem:[#allocation2] sm:$0xff] }
 0x149   : > { %v816_v35 = vld [vmem:[#allocation2 + $0x8] sm:$0xff]  ;;  %v831_v40 = vadd.f32 %v824_v38, %v815_v32 }
 0x14a   : > { %v817_v36 = vld [vmem:[#allocation2 + $0x10] sm:$0xff]  ;;  %v832_v41 = vadd.f32 %v828_v39, %v816_v35 }
 0x14b   : > { %v818_v37 = vld [vmem:[#allocation2 + $0x18] sm:$0xff]  ;;  %v833_v42 = vadd.f32 %v824_v38, %v817_v36  ;;  %v835_v44 = vmax.f32 %v831_v40, 0.0 }
 0x14c   : > { %v834_v43 = vadd.f32 %v828_v39, %v818_v37  ;;  %v836_v45 = vmax.f32 %v832_v41, 0.0 }
 0x14d   : > { %v837_v46 = vmax.f32 %v833_v42, 0.0 }
 0x14e   : > { %v838_v47 = vmax.f32 %v834_v43, 0.0  ;;  %v1066_v48 = vpack.c.bf16 %v836_v45, %v835_v44 }
 0x150   : > { %v1067_v49 = vpack.c.bf16 %v838_v47, %v837_v46  ;;  %851 = vst [vmem:[%s1427_s3] sm:$0xff] %v1066_v48 }
 0x152   : > { %852 = vst [vmem:[%s1427_s3 + $0x8] sm:$0xff] %v1067_v49 }
 0x153 PF: > { %s13_s16 = sadd.s32 1, %s1253_s16   ;;  %s1428_s12 = smov %s1241_s13 }
 0x154   : > { %p10_p12 = scmp.ge.s32.totalorder %s13_s16, 4   ;;  %s1429_s13 = smov %s1311_s20 }
 0x155   : > { %s1430_s14 = smov %s1249_s15  ;;  %s1431_s15 = smov %s1433_s17 }
 0x156   :  { %12 = sbr.rel (!%p10_p12) target bundleno = 3 (0x3), region = 104 }

// kernel: resnet50_forward.98
= control target key start
LH: loop header
LB: loop body
LE: loop exit
PB: predicated region body
PF: predicated region fallthrough
CT: control target
= control target key end

     0   :  { %s2051_s0 = inlined_call_operand.vmem [shape: bf16[16,1024], index: 0, kind: input, shape index: {}]   ;;  %s2052_s1 = inlined_call_operand.vmem [shape: bf16[1024,512], index: 1, kind: input, shape index: {}]   ;;  %s2053_s2 = inlined_call_operand.vmem [shape: f32[1,512], index: 2, kind: input, shape index: {}]   ;;  %s2054_s3 = inlined_call_operand.vmem [shape: bf16[16,512], index: 3, kind: output, shape index: {}]  }
   0x1   :  { %2056 = sst [smem:[#allocation7_spill]] %s2051_s0 }
   0x2   :  { %2057 = sst [smem:[#allocation8_spill]] %s2052_s1 }
   0x3   :  { %s1669_s12 = smov 0   ;;  %s1671_s13 = smov 0  }
   0x4   :  { %s1673_s14 = smov 0   ;;  %s1675_s15 = smov 0  }
   0x5   :  { %s1677_s16 = smov 0   ;;  %s1679_s17 = smov 0  }
   0x6   :  { %s1681_s18 = smov 0   ;;  %s1683_s19 = smov 0  }
   0x7   :  { %s1685_s20 = smov 0   ;;  %s1687_s21 = smov 0  }
   0x8   :  { %s1689_s22 = smov 0  }
   0x9 LB: > { %s1266_s23 = sadd.s32 4294967295, %s1646_s22   ;;  %s25_s24 = sadd.s32 1, %s1638_s20  ;;  %s1646_s22 = sphi %s1689_s22, %s13_s22   ;;  %s1642_s21 = sphi %s1687_s21, %s2074_s21   ;;  %s1638_s20 = sphi %s1685_s20, %s2073_s20   ;;  %s1634_s19 = sphi %s1683_s19, %s2072_s19   ;;  %s1630_s18 = sphi %s1681_s18, %s2071_s18   ;;  %s1626_s17 = sphi %s1679_s17, %s2070_s17   ;;  %s1622_s16 = sphi %s1677_s16, %s2069_s16   ;;  %s1618_s15 = sphi %s1675_s15, %s2068_s15   ;;  %s1614_s14 = sphi %s1673_s14, %s2067_s14   ;;  %s1610_s13 = sphi %s1671_s13, %s2066_s13   ;;  %s1606_s12 = sphi %s1669_s12, %s2065_s12  }
   0xa   : > { %p26_p0 = scmp.ge.s32.totalorder %s25_s24, 2  ;;  %s28_s25 = sadd.s32 1, %s1642_s21 }
   0xb   : > { %s41_s26 = sadd.s32 1, %s1626_s17  ;;  %p48_p1 = scmp.ne.s32.totalorder %s1626_s17, %s1622_s16 }
   0xc   : > { %s2076_s24 = smov (%p26_p0, %s25_s24), 0  ;;  %s2078_s25 = smov (!%p26_p0, %s28_s25), %s1642_s21 }
   0xd   : > { %s37_s27 = ssub.s32 %s1638_s20, %s2076_s24  ;;  %p49_p2 = scmp.eq.s32.totalorder %s1646_s22, 0 }
   0xe   : > { %p30_p3 = scmp.ge.s32.totalorder %s2078_s25, 2  ;;  %p39_p4 = scmp.eq.s32.totalorder %s37_s27, 0 }
   0xf   : > { %p1736_p5 = por %p49_p2, %p48_p1  ;;  %s69_s29 = sadd.s32 1, %s1618_s15 }
  0x10   : > { %s2080_s25 = smov (%p30_p3, %s2078_s25), 0  ;;  %p76_p6 = scmp.ne.s32.totalorder %s1618_s15, %s1614_s14 }
  0x11   : > { %2059 = sst [smem:[#allocation6_spill]] %s2080_s25  ;;  %s65_s4 = ssub.s32 %s1642_s21, %s2080_s25 }
  0x12   : > { %s1744_s30 = scalar_select %p39_p4, %s1626_s17, %s41_s26  }
  0x13   : > { %s66_s5 = sor.u32 %s65_s4, %s37_s27  ;;  %p121_p7 = scmp.eq.s32.totalorder %s65_s4, 0 }
  0x14   : > { %p67_p8 = scmp.eq.s32.totalorder %s66_s5, 0  ;;  %p1750_p9 = por %p76_p6, %p49_p2 }
  0x15   : > { %s123_s7 = sadd.s32 1, %s1610_s13  ;;  %p133_p10 = scmp.ne.s32.totalorder %s1610_s13, %s1606_s12 }
  0x16   : > { %s1758_s8 = scalar_select %p67_p8, %s1618_s15, %s69_s29  }
  0x17   : > { %s1761_s9 = scalar_select %p121_p7, %s1610_s13, %s123_s7  }
  0x18   : > { %p134_p11 = scmp.eq.s32.totalorder %s1266_s23, 3  ;;  %p1269_p13 = scmp.ge.s32.totalorder %s1646_s22, 4 }
  0x1a   : > { %p1763_p12 = por %p134_p11, %p133_p10  ;;  %156 = sbr.rel (%p1269_p13) target bundleno = 87 (0x57), region = 16 }
  0x21   : > { %159 = sbr.rel (!%p1736_p5) target bundleno = 45 (0x2d), region = 20  ;;  %s161_s11 = sand.u32 (%p1736_p5), 1, %s1626_s17  }
  0x22   : > { %s1360_s26 = sshll.u32 (%p1736_p5), %s1638_s20, 4  ;;  %s1270_s27 = sshll.u32 (%p1736_p5), %s161_s11, 5 }
  0x23   : > { %s2062_s0 = sld [smem:[#allocation7_spill]] (%p1736_p5)  ;;  %s163_s23 = scalar_lea.vmem (%p1736_p5), [#allocation3], %s1270_s27 }
  0x29   : > { %s169_s5 = scalar_lea.vmem %s2062_s0, %s1360_s26 }
  0x2a   : > { %v182_v0 = vld [vmem:[%s169_s5] sm:$0xff]  ;;  %v184_v1 = vld [vmem:[%s169_s5 + $0x8] sm:$0xff] }
  0x2b   : > { %v186_v2 = vld [vmem:[%s169_s5 + $0x20] sm:$0xff]  ;;  %183 = vst [vmem:[%s163_s23] sm:$0xff] %v182_v0  ;;  %185 = vst [vmem:[%s163_s23 + $0x8] sm:$0xff] %v184_v1  ;;  %v188_v3 = vld [vmem:[%s169_s5 + $0x28] sm:$0xff] }
  0x2c   : > { %187 = vst [vmem:[%s163_s23 + $0x10] sm:$0xff] %v186_v2  ;;  %189 = vst [vmem:[%s163_s23 + $0x18] sm:$0xff] %v188_v3 }
  0x2d PF: > { %195 = sbr.rel (!%p1750_p9) target bundleno = 87 (0x57), region = 43  ;;  %s197_s28 = sand.u32 (%p1750_p9), 1, %s1618_s15  }
  0x2e   : > { %s1275_s7 = sshll.u32 (%p1750_p9), %s1642_s21, 1  ;;  %s1273_s11 = sshll.u32 (%p1750_p9), %s197_s28, 9 }
  0x2f   : > { %s1361_s26 = sshll.u32 (%p1750_p9), %s1638_s20, 8  ;;  %s2063_s1 = sld [smem:[#allocation8_spill]] (%p1750_p9) }
  0x30   : > { %s203_s29 = sadd.s32 (%p1750_p9), %s1361_s26, %s1275_s7  ;;  %s1788_s6 = scalar_lea.vmem (%p1750_p9), [#allocation4], %s1273_s11 }
  0x31   : > { %s1277_s4 = sshll.u32 (%p1750_p9), %s203_s29, 2 }
  0x35   : > { %s1783_s25 = scalar_lea.vmem %s2063_s1, %s1277_s4 }
  0x36   : > { %v359_v4 = vld [vmem:[%s1783_s25] sm:$0xff]  ;;  %v361_v5 = vld [vmem:[%s1783_s25 + $0x10] sm:$0xff] }
  0x37   : > { %v363_v6 = vld [vmem:[%s1783_s25 + $0x20] sm:$0xff]  ;;  %360 = vst [vmem:[%s1788_s6] sm:$0xff] %v359_v4  ;;  %362 = vst [vmem:[%s1788_s6 + $0x8] sm:$0xff] %v361_v5  ;;  %v365_v7 = vld [vmem:[%s1783_s25 + $0x30] sm:$0xff] }
  0x38   : > { %364 = vst [vmem:[%s1788_s6 + $0x10] sm:$0xff] %v363_v6  ;;  %v367_v8 = vld [vmem:[%s1783_s25 + $0x40] sm:$0xff]  ;;  %v369_v9 = vld [vmem:[%s1783_s25 + $0x50] sm:$0xff]  ;;  %366 = vst [vmem:[%s1788_s6 + $0x18] sm:$0xff] %v365_v7 }
  0x39   : > { %368 = vst [vmem:[%s1788_s6 + $0x20] sm:$0xff] %v367_v8  ;;  %370 = vst [vmem:[%s1788_s6 + $0x28] sm:$0xff] %v369_v9  ;;  %v371_v10 = vld [vmem:[%s1783_s25 + $0x60] sm:$0xff]  ;;  %v373_v11 = vld [vmem:[%s1783_s25 + $0x70] sm:$0xff] }
  0x3a   : > { %v375_v12 = vld [vmem:[%s1783_s25 + $0x80] sm:$0xff]  ;;  %372 = vst [vmem:[%s1788_s6 + $0x30] sm:$0xff] %v371_v10  ;;  %374 = vst [vmem:[%s1788_s6 + $0x38] sm:$0xff] %v373_v11  ;;  %v377_v13 = vld [vmem:[%s1783_s25 + $0x90] sm:$0xff] }
  0x3b   : > { %376 = vst [vmem:[%s1788_s6 + $0x40] sm:$0xff] %v375_v12  ;;  %v379_v14 = vld [vmem:[%s1783_s25 + $0xa0] sm:$0xff]  ;;  %v381_v15 = vld [vmem:[%s1783_s25 + $0xb0] sm:$0xff]  ;;  %378 = vst [vmem:[%s1788_s6 + $0x48] sm:$0xff] %v377_v13 }
  0x3c   : > { %380 = vst [vmem:[%s1788_s6 + $0x50] sm:$0xff] %v379_v14  ;;  %382 = vst [vmem:[%s1788_s6 + $0x58] sm:$0xff] %v381_v15  ;;  %v383_v16 = vld [vmem:[%s1783_s25 + $0xc0] sm:$0xff]  ;;  %v385_v17 = vld [vmem:[%s1783_s25 + $0xd0] sm:$0xff] }
  0x3d   : > { %v387_v18 = vld [vmem:[%s1783_s25 + $0xe0] sm:$0xff]  ;;  %384 = vst [vmem:[%s1788_s6 + $0x60] sm:$0xff] %v383_v16  ;;  %386 = vst [vmem:[%s1788_s6 + $0x68] sm:$0xff] %v385_v17  ;;  %v389_v19 = vld [vmem:[%s1783_s25 + $0xf0] sm:$0xff] }
  0x3e   : > { %388 = vst [vmem:[%s1788_s6 + $0x70] sm:$0xff] %v387_v18  ;;  %v391_v20 = vld [vmem:[%s1783_s25 + $0x100] sm:$0xff]  ;;  %v393_v21 = vld [vmem:[%s1783_s25 + $0x110] sm:$0xff]  ;;  %390 = vst [vmem:[%s1788_s6 + $0x78] sm:$0xff] %v389_v19 }
  0x3f   : > { %392 = vst [vmem:[%s1788_s6 + $0x80] sm:$0xff] %v391_v20  ;;  %394 = vst [vmem:[%s1788_s6 + $0x88] sm:$0xff] %v393_v21  ;;  %v395_v22 = vld [vmem:[%s1783_s25 + $0x120] sm:$0xff]  ;;  %v397_v23 = vld [vmem:[%s1783_s25 + $0x130] sm:$0xff] }
  0x40   : > { %v399_v24 = vld [vmem:[%s1783_s25 + $0x140] sm:$0xff]  ;;  %396 = vst [vmem:[%s1788_s6 + $0x90] sm:$0xff] %v395_v22  ;;  %398 = vst [vmem:[%s1788_s6 + $0x98] sm:$0xff] %v397_v23  ;;  %v401_v25 = vld [vmem:[%s1783_s25 + $0x150] sm:$0xff] }
  0x41   : > { %400 = vst [vmem:[%s1788_s6 + $0xa0] sm:$0xff] %v399_v24  ;;  %v403_v26 = vld [vmem:[%s1783_s25 + $0x160] sm:$0xff]  ;;  %v405_v27 = vld [vmem:[%s1783_s25 + $0x170] sm:$0xff]  ;;  %402 = vst [vmem:[%s1788_s6 + $0xa8] sm:$0xff] %v401_v25 }
  0x42   : > { %404 = vst [vmem:[%s1788_s6 + $0xb0] sm:$0xff] %v403_v26  ;;  %406 = vst [vmem:[%s1788_s6 + $0xb8] sm:$0xff] %v405_v27  ;;  %v407_v28 = vld [vmem:[%s1783_s25 + $0x180] sm:$0xff]  ;;  %v409_v29 = vld [vmem:[%s1783_s25 + $0x190] sm:$0xff] }
  0x43   : > { %v411_v30 = vld [vmem:[%s1783_s25 + $0x1a0] sm:$0xff]  ;;  %408 = vst [vmem:[%s1788_s6 + $0xc0] sm:$0xff] %v407_v28  ;;  %410 = vst [vmem:[%s1788_s6 + $0xc8] sm:$0xff] %v409_v29  ;;  %v413_v31 = vld [vmem:[%s1783_s25 + $0x1b0] sm:$0xff] }
  0x44   : > { %412 = vst [vmem:[%s1788_s6 + $0xd0] sm:$0xff] %v411_v30  ;;  %v415_v32 = vld [vmem:[%s1783_s25 + $0x1c0] sm:$0xff]  ;;  %v417_v33 = vld [vmem:[%s1783_s25 + $0x1d0] sm:$0xff]  ;;  %414 = vst [vmem:[%s1788_s6 + $0xd8] sm:$0xff] %v413_v31 }
  0x45   : > { %416 = vst [vmem:[%s1788_s6 + $0xe0] sm:$0xff] %v415_v32  ;;  %418 = vst [vmem:[%s1788_s6 + $0xe8] sm:$0xff] %v417_v33  ;;  %v419_v34 = vld [vmem:[%s1783_s25 + $0x1e0] sm:$0xff]  ;;  %v421_v35 = vld [vmem:[%s1783_s25 + $0x1f0] sm:$0xff] }
  0x46   : > { %v423_v36 = vld [vmem:[%s1783_s25 + $0x200] sm:$0xff]  ;;  %420 = vst [vmem:[%s1788_s6 + $0xf0] sm:$0xff] %v419_v34  ;;  %422 = vst [vmem:[%s1788_s6 + $0xf8] sm:$0xff] %v421_v35  ;;  %v425_v37 = vld [vmem:[%s1783_s25 + $0x210] sm:$0xff] }
  0x47   : > { %424 = vst [vmem:[%s1788_s6 + $0x100] sm:$0xff] %v423_v36  ;;  %v427_v38 = vld [vmem:[%s1783_s25 + $0x220] sm:$0xff]  ;;  %v429_v39 = vld [vmem:[%s1783_s25 + $0x230] sm:$0xff]  ;;  %426 = vst [vmem:[%s1788_s6 + $0x108] sm:$0xff] %v425_v37 }
  0x48   : > { %428 = vst [vmem:[%s1788_s6 + $0x110] sm:$0xff] %v427_v38  ;;  %430 = vst [vmem:[%s1788_s6 + $0x118] sm:$0xff] %v429_v39  ;;  %v431_v40 = vld [vmem:[%s1783_s25 + $0x240] sm:$0xff]  ;;  %v433_v41 = vld [vmem:[%s1783_s25 + $0x250] sm:$0xff] }
  0x49   : > { %v435_v42 = vld [vmem:[%s1783_s25 + $0x260] sm:$0xff]  ;;  %432 = vst [vmem:[%s1788_s6 + $0x120] sm:$0xff] %v431_v40  ;;  %434 = vst [vmem:[%s1788_s6 + $0x128] sm:$0xff] %v433_v41  ;;  %v437_v43 = vld [vmem:[%s1783_s25 + $0x270] sm:$0xff] }
  0x4a   : > { %436 = vst [vmem:[%s1788_s6 + $0x130] sm:$0xff] %v435_v42  ;;  %v439_v44 = vld [vmem:[%s1783_s25 + $0x280] sm:$0xff]  ;;  %v441_v45 = vld [vmem:[%s1783_s25 + $0x290] sm:$0xff]  ;;  %438 = vst [vmem:[%s1788_s6 + $0x138] sm:$0xff] %v437_v43 }
  0x4b   : > { %440 = vst [vmem:[%s1788_s6 + $0x140] sm:$0xff] %v439_v44  ;;  %442 = vst [vmem:[%s1788_s6 + $0x148] sm:$0xff] %v441_v45  ;;  %v443_v46 = vld [vmem:[%s1783_s25 + $0x2a0] sm:$0xff]  ;;  %v445_v47 = vld [vmem:[%s1783_s25 + $0x2b0] sm:$0xff] }
  0x4c   : > { %v447_v48 = vld [vmem:[%s1783_s25 + $0x2c0] sm:$0xff]  ;;  %444 = vst [vmem:[%s1788_s6 + $0x150] sm:$0xff] %v443_v46  ;;  %446 = vst [vmem:[%s1788_s6 + $0x158] sm:$0xff] %v445_v47  ;;  %v449_v49 = vld [vmem:[%s1783_s25 + $0x2d0] sm:$0xff] }
  0x4d   : > { %448 = vst [vmem:[%s1788_s6 + $0x160] sm:$0xff] %v447_v48  ;;  %v451_v50 = vld [vmem:[%s1783_s25 + $0x2e0] sm:$0xff]  ;;  %v453_v51 = vld [vmem:[%s1783_s25 + $0x2f0] sm:$0xff]  ;;  %450 = vst [vmem:[%s1788_s6 + $0x168] sm:$0xff] %v449_v49 }
  0x4e   : > { %452 = vst [vmem:[%s1788_s6 + $0x170] sm:$0xff] %v451_v50  ;;  %454 = vst [vmem:[%s1788_s6 + $0x178] sm:$0xff] %v453_v51  ;;  %v455_v52 = vld [vmem:[%s1783_s25 + $0x300] sm:$0xff]  ;;  %v457_v53 = vld [vmem:[%s1783_s25 + $0x310] sm:$0xff] }
  0x4f   : > { %v459_v54 = vld [vmem:[%s1783_s25 + $0x320] sm:$0xff]  ;;  %456 = vst [vmem:[%s1788_s6 + $0x180] sm:$0xff] %v455_v52  ;;  %458 = vst [vmem:[%s1788_s6 + $0x188] sm:$0xff] %v457_v53  ;;  %v461_v55 = vld [vmem:[%s1783_s25 + $0x330] sm:$0xff] }
  0x50   : > { %460 = vst [vmem:[%s1788_s6 + $0x190] sm:$0xff] %v459_v54  ;;  %v463_v56 = vld [vmem:[%s1783_s25 + $0x340] sm:$0xff]  ;;  %v465_v57 = vld [vmem:[%s1783_s25 + $0x350] sm:$0xff]  ;;  %462 = vst [vmem:[%s1788_s6 + $0x198] sm:$0xff] %v461_v55 }
  0x51   : > { %464 = vst [vmem:[%s1788_s6 + $0x1a0] sm:$0xff] %v463_v56  ;;  %466 = vst [vmem:[%s1788_s6 + $0x1a8] sm:$0xff] %v465_v57  ;;  %v467_v58 = vld [vmem:[%s1783_s25 + $0x360] sm:$0xff]  ;;  %v469_v59 = vld [vmem:[%s1783_s25 + $0x370] sm:$0xff] }
  0x52   : > { %v471_v60 = vld [vmem:[%s1783_s25 + $0x380] sm:$0xff]  ;;  %468 = vst [vmem:[%s1788_s6 + $0x1b0] sm:$0xff] %v467_v58  ;;  %470 = vst [vmem:[%s1788_s6 + $0x1b8] sm:$0xff] %v469_v59  ;;  %v473_v61 = vld [vmem:[%s1783_s25 + $0x390] sm:$0xff] }
  0x53   : > { %472 = vst [vmem:[%s1788_s6 + $0x1c0] sm:$0xff] %v471_v60  ;;  %v475_v62 = vld [vmem:[%s1783_s25 + $0x3a0] sm:$0xff]  ;;  %v477_v63 = vld [vmem:[%s1783_s25 + $0x3b0] sm:$0xff]  ;;  %474 = vst [vmem:[%s1788_s6 + $0x1c8] sm:$0xff] %v473_v61 }
  0x54   : > { %476 = vst [vmem:[%s1788_s6 + $0x1d0] sm:$0xff] %v475_v62  ;;  %478 = vst [vmem:[%s1788_s6 + $0x1d8] sm:$0xff] %v477_v63  ;;  %v479_v0 = vld [vmem:[%s1783_s25 + $0x3c0] sm:$0xff]  ;;  %v481_v1 = vld [vmem:[%s1783_s25 + $0x3d0] sm:$0xff] }
  0x55   : > { %v483_v2 = vld [vmem:[%s1783_s25 + $0x3e0] sm:$0xff]  ;;  %480 = vst [vmem:[%s1788_s6 + $0x1e0] sm:$0xff] %v479_v0  ;;  %482 = vst [vmem:[%s1788_s6 + $0x1e8] sm:$0xff] %v481_v1  ;;  %v485_v3 = vld [vmem:[%s1783_s25 + $0x3f0] sm:$0xff] }
  0x56   : > { %484 = vst [vmem:[%s1788_s6 + $0x1f0] sm:$0xff] %v483_v2  ;;  %486 = vst [vmem:[%s1788_s6 + $0x1f8] sm:$0xff] %v485_v3 }
  0x57 PF: > { %p1278_p0 = scmp.ge.s32.totalorder %s1646_s22, 1  ;;  %p499_p1 = scmp.lt.s32.totalorder %s1646_s22, 5 }
  0x59   : > { %p500_p2 = pnand %p1278_p0, %p499_p1 }
  0x5a   : > { %s506_s0 = sand.u32 (!%p500_p2), 1, %s1622_s16   ;;  %s513_s5 = sand.u32 (!%p500_p2), 1, %s1614_s14  }
  0x5b   : > { %503 = sbr.rel (%p500_p2) target bundleno = 413 (0x19d), region = 85  ;;  %s1279_s23 = sshll.u32 (!%p500_p2), %s506_s0, 5 }
  0x5c   : > { %s1280_s28 = sshll.u32 (!%p500_p2), %s513_s5, 9  ;;  %s540_s7 = sand.u32 (!%p500_p2), 1, %s1606_s12  }
  0x5d   : > { %s1282_s11 = sshll.u32 (!%p500_p2), %s1634_s19, 1  ;;  %s1281_s25 = sshll.u32 (!%p500_p2), %s540_s7, 4 }
  0x5e   : > { %p548_p3 = scmp.lt.s32.totalorder (!%p500_p2), %s1282_s11, 3  ;;  %s1927_s27 = scalar_lea.vmem (!%p500_p2), [#allocation3], %s1279_s23 }
  0x5f   : > { %s1929_s6 = scalar_lea.vmem (!%p500_p2), [#allocation4], %s1280_s28  ;;  %s1931_s1 = scalar_lea.vmem (!%p500_p2), [#allocation5], %s1281_s25 }
  0x60   : > { %p1283_p4 = scmp.ne.s32.totalorder (!%p500_p2), %s1630_s18, 0 }
  0x62   : > { %s2082_s11 = smov (!%p548_p3, %s1282_s11), 3  ;;  %557 = sbr.rel (%p1283_p4) target bundleno = 105 (0x69), region = 97 }
  0x63   : > { %s550_s4 = scalar_lea.vmem %s2053_s2, %s2082_s11  ;;  %v1648_v4 = vmov (!%p1283_p4), 0.0  }
  0x64   : > { %558 = vst [vmem:[#allocation2] sm:$0xff] (!%p1283_p4), %v1648_v4  ;;  %559 = vst [vmem:[#allocation2 + $0x8] sm:$0xff] (!%p1283_p4), %v1648_v4 }
  0x65   : > { %560 = vst [vmem:[#allocation2 + $0x10] sm:$0xff] (!%p1283_p4), %v1648_v4  ;;  %561 = vst [vmem:[#allocation2 + $0x18] sm:$0xff] (!%p1283_p4), %v1648_v4 }
  0x69 PF: > { %v1458_v5 = vld [vmem:[%s1929_s6 + $0x4] ss:$8 sps:$4 sm:$0xff]   ;;  %v1462_v7 = vld [vmem:[%s1929_s6] ss:$8 sps:$4 sm:$0xff]   ;;  %v1464_v9 = vld [vmem:[%s1929_s6 + $0x14] ss:$8 sps:$4 sm:$0xff]  }
  0x6a   : > { %v1460_v6 = vld [vmem:[%s1929_s6 + $0x104] ss:$8 sps:$4 sm:$0xff]   ;;  %974 = vmatprep.subr.bf16.mxu1 %v1458_v5  ;;  %v1463_v8 = vld [vmem:[%s1929_s6 + $0x100] ss:$8 sps:$4 sm:$0xff]   ;;  %v1466_v10 = vld [vmem:[%s1929_s6 + $0x114] ss:$8 sps:$4 sm:$0xff]  }
  0x6b   : > { %1017 = vmatprep.subr.bf16.mxu0 %v1460_v6  ;;  %975 = vmatpush1.bf16.msra.mxu1 %v1462_v7  ;;  %v1468_v11 = vld [vmem:[%s1929_s6 + $0x10] ss:$8 sps:$4 sm:$0xff]   ;;  %v1470_v13 = vld [vmem:[%s1929_s6 + $0x24] ss:$8 sps:$4 sm:$0xff]   ;;  %v1474_v15 = vld [vmem:[%s1929_s6 + $0x20] ss:$8 sps:$4 sm:$0xff]  }
  0x6c   : > { %1018 = vmatpush1.bf16.msra.mxu0 %v1463_v8  ;;  %976 = vmatprep.subr.bf16.mxu1 %v1464_v9  ;;  %v1469_v12 = vld [vmem:[%s1929_s6 + $0x110] ss:$8 sps:$4 sm:$0xff]   ;;  %v1472_v14 = vld [vmem:[%s1929_s6 + $0x124] ss:$8 sps:$4 sm:$0xff]   ;;  %v1475_v16 = vld [vmem:[%s1929_s6 + $0x120] ss:$8 sps:$4 sm:$0xff]  }
  0x6d   : > { %1019 = vmatprep.subr.bf16.mxu0 %v1466_v10  ;;  %v1476_v17 = vld [vmem:[%s1929_s6 + $0x34] ss:$8 sps:$4 sm:$0xff]   ;;  %v1480_v19 = vld [vmem:[%s1929_s6 + $0x30] ss:$8 sps:$4 sm:$0xff]   ;;  %v1482_v21 = vld [vmem:[%s1929_s6 + $0x44] ss:$8 sps:$4 sm:$0xff]  }
  0x6e   : > { %v1478_v18 = vld [vmem:[%s1929_s6 + $0x134] ss:$8 sps:$4 sm:$0xff]   ;;  %v1481_v20 = vld [vmem:[%s1929_s6 + $0x130] ss:$8 sps:$4 sm:$0xff]   ;;  %v1484_v22 = vld [vmem:[%s1929_s6 + $0x144] ss:$8 sps:$4 sm:$0xff]  }
  0x6f   : > { %977 = vmatpush1.bf16.msra.mxu1 %v1468_v11  ;;  %v1486_v23 = vld [vmem:[%s1929_s6 + $0x40] ss:$8 sps:$4 sm:$0xff]   ;;  %v1488_v25 = vld [vmem:[%s1929_s6 + $0x54] ss:$8 sps:$4 sm:$0xff]   ;;  %v1492_v27 = vld [vmem:[%s1929_s6 + $0x50] ss:$8 sps:$4 sm:$0xff]  }
  0x70   : > { %1020 = vmatpush1.bf16.msra.mxu0 %v1469_v12  ;;  %978 = vmatprep.subr.bf16.mxu1 %v1470_v13  ;;  %v1487_v24 = vld [vmem:[%s1929_s6 + $0x140] ss:$8 sps:$4 sm:$0xff]   ;;  %v1490_v26 = vld [vmem:[%s1929_s6 + $0x154] ss:$8 sps:$4 sm:$0xff]   ;;  %v1493_v28 = vld [vmem:[%s1929_s6 + $0x150] ss:$8 sps:$4 sm:$0xff]  }
  0x71   : > { %1021 = vmatprep.subr.bf16.mxu0 %v1472_v14  ;;  %v1494_v29 = vld [vmem:[%s1929_s6 + $0x64] ss:$8 sps:$4 sm:$0xff]   ;;  %v1498_v31 = vld [vmem:[%s1929_s6 + $0x60] ss:$8 sps:$4 sm:$0xff]   ;;  %v1500_v33 = vld [vmem:[%s1929_s6 + $0x74] ss:$8 sps:$4 sm:$0xff]  }
  0x72   : > { %v1496_v30 = vld [vmem:[%s1929_s6 + $0x164] ss:$8 sps:$4 sm:$0xff]   ;;  %v1499_v32 = vld [vmem:[%s1929_s6 + $0x160] ss:$8 sps:$4 sm:$0xff]   ;;  %v1502_v34 = vld [vmem:[%s1929_s6 + $0x174] ss:$8 sps:$4 sm:$0xff]  }
  0x73   : > { %979 = vmatpush1.bf16.msra.mxu1 %v1474_v15  ;;  %v1504_v35 = vld [vmem:[%s1929_s6 + $0x70] ss:$8 sps:$4 sm:$0xff]   ;;  %v1506_v37 = vld [vmem:[%s1929_s6 + $0x84] ss:$8 sps:$4 sm:$0xff]   ;;  %v1510_v39 = vld [vmem:[%s1929_s6 + $0x80] ss:$8 sps:$4 sm:$0xff]  }
  0x74   : > { %1022 = vmatpush1.bf16.msra.mxu0 %v1475_v16  ;;  %980 = vmatprep.subr.bf16.mxu1 %v1476_v17  ;;  %v1505_v36 = vld [vmem:[%s1929_s6 + $0x170] ss:$8 sps:$4 sm:$0xff]   ;;  %v1508_v38 = vld [vmem:[%s1929_s6 + $0x184] ss:$8 sps:$4 sm:$0xff]   ;;  %v1511_v40 = vld [vmem:[%s1929_s6 + $0x180] ss:$8 sps:$4 sm:$0xff]  }
  0x75   : > { %1023 = vmatprep.subr.bf16.mxu0 %v1478_v18  ;;  %v1512_v41 = vld [vmem:[%s1929_s6 + $0x94] ss:$8 sps:$4 sm:$0xff]   ;;  %v1516_v43 = vld [vmem:[%s1929_s6 + $0x90] ss:$8 sps:$4 sm:$0xff]   ;;  %v1518_v45 = vld [vmem:[%s1929_s6 + $0xa4] ss:$8 sps:$4 sm:$0xff]  }
  0x76   : > { %v1514_v42 = vld [vmem:[%s1929_s6 + $0x194] ss:$8 sps:$4 sm:$0xff]   ;;  %v1517_v44 = vld [vmem:[%s1929_s6 + $0x190] ss:$8 sps:$4 sm:$0xff]   ;;  %v1520_v46 = vld [vmem:[%s1929_s6 + $0x1a4] ss:$8 sps:$4 sm:$0xff]  }
  0x77   : > { %981 = vmatpush1.bf16.msra.mxu1 %v1480_v19  ;;  %v1522_v47 = vld [vmem:[%s1929_s6 + $0xa0] ss:$8 sps:$4 sm:$0xff]   ;;  %v1524_v49 = vld [vmem:[%s1929_s6 + $0xb4] ss:$8 sps:$4 sm:$0xff]   ;;  %v1528_v51 = vld [vmem:[%s1929_s6 + $0xb0] ss:$8 sps:$4 sm:$0xff]  }
  0x78   : > { %1024 = vmatpush1.bf16.msra.mxu0 %v1481_v20  ;;  %982 = vmatprep.subr.bf16.mxu1 %v1482_v21  ;;  %v1523_v48 = vld [vmem:[%s1929_s6 + $0x1a0] ss:$8 sps:$4 sm:$0xff]   ;;  %v1526_v50 = vld [vmem:[%s1929_s6 + $0x1b4] ss:$8 sps:$4 sm:$0xff]   ;;  %v1529_v53 = vld [vmem:[%s1929_s6 + $0x1b0] ss:$8 sps:$4 sm:$0xff]  }
  0x79   : > { %1025 = vmatprep.subr.bf16.mxu0 %v1484_v22  ;;  %v1556_v52 = vld [vmem:[%s1927_s27 + $0x4] ss:$16 sps:$4 sm:$0xff]   ;;  %v1559_v56 = vld [vmem:[%s1927_s27 + $0xc] ss:$16 sps:$4 sm:$0xff]   ;;  %v1534_v57 = vld [vmem:[%s1929_s6 + $0xc0] ss:$8 sps:$4 sm:$0xff]  }
  0x7a   : > { %v1530_v54 = vld [vmem:[%s1929_s6 + $0xc4] ss:$8 sps:$4 sm:$0xff]   ;;  %1006 = vmatprep.mubr.bf16.mxu1 %v1556_v52  ;;  %1049 = vmatprep.mubr.bf16.mxu0 %v1559_v56  ;;  %v1535_v58 = vld [vmem:[%s1929_s6 + $0x1c0] ss:$8 sps:$4 sm:$0xff]   ;;  %v1536_v59 = vld [vmem:[%s1929_s6 + $0xd4] ss:$8 sps:$4 sm:$0xff]  }
  0x7b   : > { %983 = vmatpush1.bf16.msra.mxu1 %v1486_v23  ;;  %v1532_v55 = vld [vmem:[%s1929_s6 + $0x1c4] ss:$8 sps:$4 sm:$0xff]   ;;  %v1538_v60 = vld [vmem:[%s1929_s6 + $0x1d4] ss:$8 sps:$4 sm:$0xff]   ;;  %v1540_v61 = vld [vmem:[%s1929_s6 + $0xd0] ss:$8 sps:$4 sm:$0xff]  }
  0x7c   : > { %1026 = vmatpush1.bf16.msra.mxu0 %v1487_v24  ;;  %984 = vmatprep.subr.bf16.mxu1 %v1488_v25  ;;  %v1541_v62 = vld [vmem:[%s1929_s6 + $0x1d0] ss:$8 sps:$4 sm:$0xff]   ;;  %v1542_v63 = vld [vmem:[%s1929_s6 + $0xe4] ss:$8 sps:$4 sm:$0xff]   ;;  %v1546_v1 = vld [vmem:[%s1929_s6 + $0xe0] ss:$8 sps:$4 sm:$0xff]  }
  0x7d   : > { %1027 = vmatprep.subr.bf16.mxu0 %v1490_v26  ;;  %v1544_v0 = vld [vmem:[%s1929_s6 + $0x1e4] ss:$8 sps:$4 sm:$0xff]   ;;  %v1547_v2 = vld [vmem:[%s1929_s6 + $0x1e0] ss:$8 sps:$4 sm:$0xff]   ;;  %v1548_v3 = vld [vmem:[%s1929_s6 + $0xf4] ss:$8 sps:$4 sm:$0xff]  }
  0x7e   : > { %v1550_v4 = vld [vmem:[%s1929_s6 + $0x1f4] ss:$8 sps:$4 sm:$0xff]   ;;  %v1552_v5 = vld [vmem:[%s1929_s6 + $0xf0] ss:$8 sps:$4 sm:$0xff]   ;;  %v562_v10 = vld [vmem:[#allocation2] sm:$0xff]  ;;  %p1352_p5 = scmp.ne.s32.totalorder %s1630_s18, 1 }
  0x7f   : > { %985 = vmatpush1.bf16.msra.mxu1 %v1492_v27  ;;  %v1553_v6 = vld [vmem:[%s1929_s6 + $0x1f0] ss:$8 sps:$4 sm:$0xff]   ;;  %v563_v14 = vld [vmem:[#allocation2 + $0x8] sm:$0xff] }
  0x80   : > { %1028 = vmatpush1.bf16.msra.mxu0 %v1493_v28  ;;  %986 = vmatprep.subr.bf16.mxu1 %v1494_v29  ;;  %v1554_v7 = vld [vmem:[%s1927_s27] ss:$16 sps:$4 sm:$0xff]   ;;  %v1557_v8 = vld [vmem:[%s1927_s27 + $0x8] ss:$16 sps:$4 sm:$0xff]   ;;  %v1078_v29 = vlaneseq (!%p1352_p5) }
  0x81   : > { %1029 = vmatprep.subr.bf16.mxu0 %v1496_v30  ;;  %v564_v18 = vld [vmem:[#allocation2 + $0x10] sm:$0xff]  ;;  %v565_v23 = vld [vmem:[#allocation2 + $0x18] sm:$0xff] }
  0x82   : > { %v1079_v30 = vshrl.u32 (!%p1352_p5), %v1078_v29, 7 }
  0x83   : > { %987 = vmatpush1.bf16.msra.mxu1 %v1498_v31  ;;  %v1076_v31 = vld [vmem:[%s550_s4] sm:$0x3] (!%p1352_p5) }
  0x84   : > { %1030 = vmatpush1.bf16.msra.mxu0 %v1499_v32  ;;  %988 = vmatprep.subr.bf16.mxu1 %v1500_v33  ;;  %v1080_v33 = vsub.s32 (!%p1352_p5), 0, %v1079_v30 }
  0x85   : > { %1031 = vmatprep.subr.bf16.mxu0 %v1502_v34  ;;  %v1084_v34 = vsub.s32 (!%p1352_p5), 1, %v1079_v30 }
  0x87   : > { %989 = vmatpush1.bf16.msra.mxu1 %v1504_v35 }
  0x88   : > { %1032 = vmatpush1.bf16.msra.mxu0 %v1505_v36  ;;  %990 = vmatprep.subr.bf16.mxu1 %v1506_v37 }
  0x89   : > { %1033 = vmatprep.subr.bf16.mxu0 %v1508_v38  ;;  %v1081_v38 = vrot.slane (!%p1352_p5), %v1076_v31, %v1080_v33 }
  0x8b   : > { %991 = vmatpush1.bf16.msra.mxu1 %v1510_v39  ;;  %v1085_v39 = vrot.slane (!%p1352_p5), %v1076_v31, %v1084_v34 }
  0x8c   : > { %1034 = vmatpush1.bf16.msra.mxu0 %v1511_v40  ;;  %992 = vmatprep.subr.bf16.mxu1 %v1512_v41 }
  0x8d   : > { %1035 = vmatprep.subr.bf16.mxu0 %v1514_v42 }
  0x8f   : > { %993 = vmatpush1.bf16.msra.mxu1 %v1516_v43 }
  0x90   : > { %1036 = vmatpush1.bf16.msra.mxu0 %v1517_v44  ;;  %994 = vmatprep.subr.bf16.mxu1 %v1518_v45 }
  0x91   : > { %1037 = vmatprep.subr.bf16.mxu0 %v1520_v46 }
  0x93   : > { %995 = vmatpush1.bf16.msra.mxu1 %v1522_v47 }
  0x94   : > { %1038 = vmatpush1.bf16.msra.mxu0 %v1523_v48  ;;  %996 = vmatprep.subr.bf16.mxu1 %v1524_v49 }
  0x95   : > { %1039 = vmatprep.subr.bf16.mxu0 %v1526_v50 }
  0x97   : > { %997 = vmatpush1.bf16.msra.mxu1 %v1528_v51 }
  0x98   : > { %1040 = vmatpush1.bf16.msra.mxu0 %v1529_v53  ;;  %998 = vmatprep.subr.bf16.mxu1 %v1530_v54 }
  0x99   : > { %1041 = vmatprep.subr.bf16.mxu0 %v1532_v55 }
  0x9b   : > { %999 = vmatpush1.bf16.msra.mxu1 %v1534_v57 }
  0x9c   : > { %1042 = vmatpush1.bf16.msra.mxu0 %v1535_v58  ;;  %1000 = vmatprep.subr.bf16.mxu1 %v1536_v59 }
  0x9d   : > { %1043 = vmatprep.subr.bf16.mxu0 %v1538_v60 }
  0x9f   : > { %1001 = vmatpush1.bf16.msra.mxu1 %v1540_v61 }
  0xa0   : > { %1044 = vmatpush1.bf16.msra.mxu0 %v1541_v62  ;;  %1002 = vmatprep.subr.bf16.mxu1 %v1542_v63 }
  0xa1   : > { %1045 = vmatprep.subr.bf16.mxu0 %v1544_v0 }
  0xa3   : > { %1003 = vmatpush1.bf16.msra.mxu1 %v1546_v1 }
  0xa4   : > { %1046 = vmatpush1.bf16.msra.mxu0 %v1547_v2  ;;  %1004 = vmatprep.subr.bf16.mxu1 %v1548_v3 }
  0xa5   : > { %1047 = vmatprep.subr.bf16.mxu0 %v1550_v4 }
  0xa7   : > { %1005 = vmatpush1.bf16.msra.mxu1 %v1552_v5 }
  0xa8   : > { %1048 = vmatpush1.bf16.msra.mxu0 %v1553_v6 }
  0xaa   : > { %1007 = vmatmul.mubr.bf16.vlgmr.msra.gmra.mrb[0].mxu1 %v1554_v7 }
  0xab   : > { %1050 = vmatmul.mubr.bf16.vlgmr.msra.gmra.mrb[0].mxu0 %v1557_v8 }
 0x17d   : > { %v1008_v9 = vpop.f32.mrb[0].mxu1 }
 0x17e   : > { %v1051_v11 = vpop.f32.mrb[0].mxu0  ;;  %v1010_v13 = vpop.f32.mrb[1].mxu1 }
 0x17f   : > { %v1052_v12 = vadd.f32 %v1051_v11, %v1008_v9  ;;  %v1053_v15 = vpop.f32.mrb[1].mxu0  ;;  %v1012_v17 = vpop.f32.mrb[2].mxu1 }
 0x180   : > { %v1054_v16 = vadd.f32 %v1053_v15, %v1010_v13  ;;  %v1055_v19 = vpop.f32.mrb[2].mxu0  ;;  %v1014_v22 = vpop.f32.mrb[3].mxu1  ;;  %1071 = sbr.rel (%p1352_p5) target bundleno = 405 (0x195), region = 101 }
 0x181   : > { %v1060_v20 = vadd.f32 %v1052_v12, %v562_v10  ;;  %v1056_v21 = vadd.f32 %v1055_v19, %v1012_v17  ;;  %v1057_v24 = vpop.f32.mrb[3].mxu0 }
 0x182   : > { %v1061_v25 = vadd.f32 %v1054_v16, %v563_v14  ;;  %v1058_v26 = vadd.f32 %v1057_v24, %v1014_v22 }
 0x183   : > { %1064 = vst [vmem:[#allocation2] sm:$0xff] %v1060_v20  ;;  %v1062_v27 = vadd.f32 %v1056_v21, %v564_v18 }
 0x184   : > { %1065 = vst [vmem:[#allocation2 + $0x8] sm:$0xff] %v1061_v25  ;;  %v1063_v28 = vadd.f32 %v1058_v26, %v565_v23 }
 0x185   : > { %1066 = vst [vmem:[#allocation2 + $0x10] sm:$0xff] %v1062_v27 }
 0x186   : > { %1067 = vst [vmem:[#allocation2 + $0x18] sm:$0xff] %v1063_v28 }
 0x18a   : > { %v1072_v32 = vld [vmem:[#allocation2] sm:$0xff] }
 0x18b   : > { %v1073_v35 = vld [vmem:[#allocation2 + $0x8] sm:$0xff]  ;;  %v1088_v40 = vadd.f32 %v1081_v38, %v1072_v32 }
 0x18c   : > { %v1074_v36 = vld [vmem:[#allocation2 + $0x10] sm:$0xff]  ;;  %v1089_v41 = vadd.f32 %v1085_v39, %v1073_v35 }
 0x18d   : > { %v1075_v37 = vld [vmem:[#allocation2 + $0x18] sm:$0xff]  ;;  %v1090_v42 = vadd.f32 %v1081_v38, %v1074_v36  ;;  %v1092_v44 = vmax.f32 %v1088_v40, 0.0 }
 0x18e   : > { %v1091_v43 = vadd.f32 %v1085_v39, %v1075_v37  ;;  %v1093_v45 = vmax.f32 %v1089_v41, 0.0 }
 0x18f   : > { %v1094_v46 = vmax.f32 %v1090_v42, 0.0 }
 0x190   : > { %v1095_v47 = vmax.f32 %v1091_v43, 0.0  ;;  %v1362_v48 = vpack.c.bf16 %v1093_v45, %v1092_v44 }
 0x192   : > { %v1363_v49 = vpack.c.bf16 %v1095_v47, %v1094_v46  ;;  %1108 = vst [vmem:[%s1931_s1] sm:$0xff] %v1362_v48 }
 0x194   : > { %1109 = vst [vmem:[%s1931_s1 + $0x8] sm:$0xff] %v1363_v49 }
 0x195 PF: > { %1116 = sbr.rel (!%p1763_p12) target bundleno = 413 (0x19d), region = 105  ;;  %s1364_s16 = sshll.u32 (%p1763_p12), %s1634_s19, 3 }
 0x196   : > { %s1122_s5 = scalar_lea.vmem (%p1763_p12), %s2054_s3, %s1364_s16 }
 0x199   : > { %v1152_v50 = vld [vmem:[%s1931_s1] sm:$0xff] (%p1763_p12) }
 0x19a   : > { %1153 = vst [vmem:[%s1122_s5] sm:$0xff] (%p1763_p12), %v1152_v50 }
 0x19b   : > { %v1154_v51 = vld [vmem:[%s1931_s1 + $0x8] sm:$0xff] (%p1763_p12) }
 0x19c   : > { %1155 = vst [vmem:[%s1122_s5 + $0x10] sm:$0xff] %v1154_v51 }
 0x19d PF: > { %s13_s22 = sadd.s32 1, %s1646_s22   ;;  %s2064_s1 = sld [smem:[#allocation6_spill]] }
 0x19e   : > { %p10_p6 = scmp.ge.s32.totalorder %s13_s22, 6   ;;  %s2065_s12 = smov %s1610_s13 }
 0x19f   : > { %s2066_s13 = smov %s1761_s9  ;;  %s2067_s14 = smov %s1618_s15 }
 0x1a0   : > { %s2068_s15 = smov %s1758_s8  ;;  %s2069_s16 = smov %s1626_s17 }
 0x1a1   : > { %s2070_s17 = smov %s1744_s30  ;;  %s2071_s18 = smov %s1638_s20 }
 0x1a2   : > { %s2072_s19 = smov %s1642_s21  ;;  %s2073_s20 = smov %s2076_s24 }
 0x1a3   : > { %s2074_s21 = smov %s2064_s1  ;;  %12 = sbr.rel (!%p10_p6) target bundleno = 9 (0x9), region = 185 }

// kernel: resnet50_forward.99
= control target key start
LH: loop header
LB: loop body
LE: loop exit
PB: predicated region body
PF: predicated region fallthrough
CT: control target
= control target key end

     0   :  { %s2051_s0 = inlined_call_operand.vmem [shape: bf16[16,4608], index: 0, kind: input, shape index: {}]   ;;  %s2052_s1 = inlined_call_operand.vmem [shape: bf16[4608,512], index: 1, kind: input, shape index: {}]   ;;  %s2053_s2 = inlined_call_operand.vmem [shape: f32[1,512], index: 2, kind: input, shape index: {}]   ;;  %s2054_s3 = inlined_call_operand.vmem [shape: bf16[16,512], index: 3, kind: output, shape index: {}]  }
   0x1   :  { %2056 = sst [smem:[#allocation7_spill]] %s2051_s0 }
   0x2   :  { %2057 = sst [smem:[#allocation8_spill]] %s2052_s1 }
   0x3   :  { %s1669_s12 = smov 0   ;;  %s1671_s13 = smov 0  }
   0x4   :  { %s1673_s14 = smov 0   ;;  %s1675_s15 = smov 0  }
   0x5   :  { %s1677_s16 = smov 0   ;;  %s1679_s17 = smov 0  }
   0x6   :  { %s1681_s18 = smov 0   ;;  %s1683_s19 = smov 0  }
   0x7   :  { %s1685_s20 = smov 0   ;;  %s1687_s21 = smov 0  }
   0x8   :  { %s1689_s22 = smov 0  }
   0x9 LB: > { %s1266_s23 = sadd.s32 4294967295, %s1646_s22   ;;  %s25_s24 = sadd.s32 1, %s1638_s20  ;;  %s1646_s22 = sphi %s1689_s22, %s13_s22   ;;  %s1642_s21 = sphi %s1687_s21, %s2074_s21   ;;  %s1638_s20 = sphi %s1685_s20, %s2073_s20   ;;  %s1634_s19 = sphi %s1683_s19, %s2072_s19   ;;  %s1630_s18 = sphi %s1681_s18, %s2071_s18   ;;  %s1626_s17 = sphi %s1679_s17, %s2070_s17   ;;  %s1622_s16 = sphi %s1677_s16, %s2069_s16   ;;  %s1618_s15 = sphi %s1675_s15, %s2068_s15   ;;  %s1614_s14 = sphi %s1673_s14, %s2067_s14   ;;  %s1610_s13 = sphi %s1671_s13, %s2066_s13   ;;  %s1606_s12 = sphi %s1669_s12, %s2065_s12  }
   0xa   : > { %p26_p0 = scmp.ge.s32.totalorder %s25_s24, 9  ;;  %s28_s25 = sadd.s32 1, %s1642_s21 }
   0xb   : > { %s41_s26 = sadd.s32 1, %s1626_s17  ;;  %p48_p1 = scmp.ne.s32.totalorder %s1626_s17, %s1622_s16 }
   0xc   : > { %s2076_s24 = smov (%p26_p0, %s25_s24), 0  ;;  %s2078_s25 = smov (!%p26_p0, %s28_s25), %s1642_s21 }
   0xd   : > { %s37_s27 = ssub.s32 %s1638_s20, %s2076_s24  ;;  %p49_p2 = scmp.eq.s32.totalorder %s1646_s22, 0 }
   0xe   : > { %p30_p3 = scmp.ge.s32.totalorder %s2078_s25, 2  ;;  %p39_p4 = scmp.eq.s32.totalorder %s37_s27, 0 }
   0xf   : > { %p1736_p5 = por %p49_p2, %p48_p1  ;;  %s69_s29 = sadd.s32 1, %s1618_s15 }
  0x10   : > { %s2080_s25 = smov (%p30_p3, %s2078_s25), 0  ;;  %p76_p6 = scmp.ne.s32.totalorder %s1618_s15, %s1614_s14 }
  0x11   : > { %2059 = sst [smem:[#allocation6_spill]] %s2080_s25  ;;  %s65_s4 = ssub.s32 %s1642_s21, %s2080_s25 }
  0x12   : > { %s1744_s30 = scalar_select %p39_p4, %s1626_s17, %s41_s26  }
  0x13   : > { %s66_s5 = sor.u32 %s65_s4, %s37_s27  ;;  %p121_p7 = scmp.eq.s32.totalorder %s65_s4, 0 }
  0x14   : > { %p67_p8 = scmp.eq.s32.totalorder %s66_s5, 0  ;;  %p1750_p9 = por %p76_p6, %p49_p2 }
  0x15   : > { %s123_s7 = sadd.s32 1, %s1610_s13  ;;  %p133_p10 = scmp.ne.s32.totalorder %s1610_s13, %s1606_s12 }
  0x16   : > { %s1758_s8 = scalar_select %p67_p8, %s1618_s15, %s69_s29  }
  0x17   : > { %s1761_s9 = scalar_select %p121_p7, %s1610_s13, %s123_s7  }
  0x18   : > { %p134_p11 = scmp.eq.s32.totalorder %s1266_s23, 17  ;;  %p1269_p13 = scmp.ge.s32.totalorder %s1646_s22, 18 }
  0x1a   : > { %p1763_p12 = por %p134_p11, %p133_p10  ;;  %156 = sbr.rel (%p1269_p13) target bundleno = 87 (0x57), region = 16 }
  0x21   : > { %159 = sbr.rel (!%p1736_p5) target bundleno = 45 (0x2d), region = 20  ;;  %s161_s11 = sand.u32 (%p1736_p5), 1, %s1626_s17  }
  0x22   : > { %s1360_s26 = sshll.u32 (%p1736_p5), %s1638_s20, 4  ;;  %s1270_s27 = sshll.u32 (%p1736_p5), %s161_s11, 5 }
  0x23   : > { %s2062_s0 = sld [smem:[#allocation7_spill]] (%p1736_p5)  ;;  %s163_s23 = scalar_lea.vmem (%p1736_p5), [#allocation3], %s1270_s27 }
  0x29   : > { %s169_s5 = scalar_lea.vmem %s2062_s0, %s1360_s26 }
  0x2a   : > { %v182_v0 = vld [vmem:[%s169_s5] sm:$0xff]  ;;  %v184_v1 = vld [vmem:[%s169_s5 + $0x8] sm:$0xff]  ;;  %v186_v2 = vld [vmem:[%s169_s5 + $0x90] sm:$0xff] }
  0x2b   : > { %183 = vst [vmem:[%s163_s23] sm:$0xff] %v182_v0  ;;  %185 = vst [vmem:[%s163_s23 + $0x8] sm:$0xff] %v184_v1  ;;  %v188_v3 = vld [vmem:[%s169_s5 + $0x98] sm:$0xff] }
  0x2c   : > { %187 = vst [vmem:[%s163_s23 + $0x10] sm:$0xff] %v186_v2  ;;  %189 = vst [vmem:[%s163_s23 + $0x18] sm:$0xff] %v188_v3 }
  0x2d PF: > { %195 = sbr.rel (!%p1750_p9) target bundleno = 87 (0x57), region = 43  ;;  %s197_s28 = sand.u32 (%p1750_p9), 1, %s1618_s15  }
  0x2e   : > { %s1275_s7 = sshll.u32 (%p1750_p9), %s1642_s21, 1  ;;  %s1273_s11 = sshll.u32 (%p1750_p9), %s197_s28, 9 }
  0x2f   : > { %s1361_s26 = sshll.u32 (%p1750_p9), %s1638_s20, 8  ;;  %s2063_s1 = sld [smem:[#allocation8_spill]] (%p1750_p9) }
  0x30   : > { %s203_s29 = sadd.s32 (%p1750_p9), %s1361_s26, %s1275_s7  ;;  %s1788_s6 = scalar_lea.vmem (%p1750_p9), [#allocation4], %s1273_s11 }
  0x31   : > { %s1277_s4 = sshll.u32 (%p1750_p9), %s203_s29, 2 }
  0x35   : > { %s1783_s25 = scalar_lea.vmem %s2063_s1, %s1277_s4 }
  0x36   : > { %v359_v4 = vld [vmem:[%s1783_s25] sm:$0xff]  ;;  %v361_v5 = vld [vmem:[%s1783_s25 + $0x10] sm:$0xff] }
  0x37   : > { %v363_v6 = vld [vmem:[%s1783_s25 + $0x20] sm:$0xff]  ;;  %360 = vst [vmem:[%s1788_s6] sm:$0xff] %v359_v4  ;;  %362 = vst [vmem:[%s1788_s6 + $0x8] sm:$0xff] %v361_v5  ;;  %v365_v7 = vld [vmem:[%s1783_s25 + $0x30] sm:$0xff] }
  0x38   : > { %364 = vst [vmem:[%s1788_s6 + $0x10] sm:$0xff] %v363_v6  ;;  %v367_v8 = vld [vmem:[%s1783_s25 + $0x40] sm:$0xff]  ;;  %v369_v9 = vld [vmem:[%s1783_s25 + $0x50] sm:$0xff]  ;;  %366 = vst [vmem:[%s1788_s6 + $0x18] sm:$0xff] %v365_v7 }
  0x39   : > { %368 = vst [vmem:[%s1788_s6 + $0x20] sm:$0xff] %v367_v8  ;;  %370 = vst [vmem:[%s1788_s6 + $0x28] sm:$0xff] %v369_v9  ;;  %v371_v10 = vld [vmem:[%s1783_s25 + $0x60] sm:$0xff]  ;;  %v373_v11 = vld [vmem:[%s1783_s25 + $0x70] sm:$0xff] }
  0x3a   : > { %v375_v12 = vld [vmem:[%s1783_s25 + $0x80] sm:$0xff]  ;;  %372 = vst [vmem:[%s1788_s6 + $0x30] sm:$0xff] %v371_v10  ;;  %374 = vst [vmem:[%s1788_s6 + $0x38] sm:$0xff] %v373_v11  ;;  %v377_v13 = vld [vmem:[%s1783_s25 + $0x90] sm:$0xff] }
  0x3b   : > { %376 = vst [vmem:[%s1788_s6 + $0x40] sm:$0xff] %v375_v12  ;;  %v379_v14 = vld [vmem:[%s1783_s25 + $0xa0] sm:$0xff]  ;;  %v381_v15 = vld [vmem:[%s1783_s25 + $0xb0] sm:$0xff]  ;;  %378 = vst [vmem:[%s1788_s6 + $0x48] sm:$0xff] %v377_v13 }
  0x3c   : > { %380 = vst [vmem:[%s1788_s6 + $0x50] sm:$0xff] %v379_v14  ;;  %382 = vst [vmem:[%s1788_s6 + $0x58] sm:$0xff] %v381_v15  ;;  %v383_v16 = vld [vmem:[%s1783_s25 + $0xc0] sm:$0xff]  ;;  %v385_v17 = vld [vmem:[%s1783_s25 + $0xd0] sm:$0xff] }
  0x3d   : > { %v387_v18 = vld [vmem:[%s1783_s25 + $0xe0] sm:$0xff]  ;;  %384 = vst [vmem:[%s1788_s6 + $0x60] sm:$0xff] %v383_v16  ;;  %386 = vst [vmem:[%s1788_s6 + $0x68] sm:$0xff] %v385_v17  ;;  %v389_v19 = vld [vmem:[%s1783_s25 + $0xf0] sm:$0xff] }
  0x3e   : > { %388 = vst [vmem:[%s1788_s6 + $0x70] sm:$0xff] %v387_v18  ;;  %v391_v20 = vld [vmem:[%s1783_s25 + $0x100] sm:$0xff]  ;;  %v393_v21 = vld [vmem:[%s1783_s25 + $0x110] sm:$0xff]  ;;  %390 = vst [vmem:[%s1788_s6 + $0x78] sm:$0xff] %v389_v19 }
  0x3f   : > { %392 = vst [vmem:[%s1788_s6 + $0x80] sm:$0xff] %v391_v20  ;;  %394 = vst [vmem:[%s1788_s6 + $0x88] sm:$0xff] %v393_v21  ;;  %v395_v22 = vld [vmem:[%s1783_s25 + $0x120] sm:$0xff]  ;;  %v397_v23 = vld [vmem:[%s1783_s25 + $0x130] sm:$0xff] }
  0x40   : > { %v399_v24 = vld [vmem:[%s1783_s25 + $0x140] sm:$0xff]  ;;  %396 = vst [vmem:[%s1788_s6 + $0x90] sm:$0xff] %v395_v22  ;;  %398 = vst [vmem:[%s1788_s6 + $0x98] sm:$0xff] %v397_v23  ;;  %v401_v25 = vld [vmem:[%s1783_s25 + $0x150] sm:$0xff] }
  0x41   : > { %400 = vst [vmem:[%s1788_s6 + $0xa0] sm:$0xff] %v399_v24  ;;  %v403_v26 = vld [vmem:[%s1783_s25 + $0x160] sm:$0xff]  ;;  %v405_v27 = vld [vmem:[%s1783_s25 + $0x170] sm:$0xff]  ;;  %402 = vst [vmem:[%s1788_s6 + $0xa8] sm:$0xff] %v401_v25 }
  0x42   : > { %404 = vst [vmem:[%s1788_s6 + $0xb0] sm:$0xff] %v403_v26  ;;  %406 = vst [vmem:[%s1788_s6 + $0xb8] sm:$0xff] %v405_v27  ;;  %v407_v28 = vld [vmem:[%s1783_s25 + $0x180] sm:$0xff]  ;;  %v409_v29 = vld [vmem:[%s1783_s25 + $0x190] sm:$0xff] }
  0x43   : > { %v411_v30 = vld [vmem:[%s1783_s25 + $0x1a0] sm:$0xff]  ;;  %408 = vst [vmem:[%s1788_s6 + $0xc0] sm:$0xff] %v407_v28  ;;  %410 = vst [vmem:[%s1788_s6 + $0xc8] sm:$0xff] %v409_v29  ;;  %v413_v31 = vld [vmem:[%s1783_s25 + $0x1b0] sm:$0xff] }
  0x44   : > { %412 = vst [vmem:[%s1788_s6 + $0xd0] sm:$0xff] %v411_v30  ;;  %v415_v32 = vld [vmem:[%s1783_s25 + $0x1c0] sm:$0xff]  ;;  %v417_v33 = vld [vmem:[%s1783_s25 + $0x1d0] sm:$0xff]  ;;  %414 = vst [vmem:[%s1788_s6 + $0xd8] sm:$0xff] %v413_v31 }
  0x45   : > { %416 = vst [vmem:[%s1788_s6 + $0xe0] sm:$0xff] %v415_v32  ;;  %418 = vst [vmem:[%s1788_s6 + $0xe8] sm:$0xff] %v417_v33  ;;  %v419_v34 = vld [vmem:[%s1783_s25 + $0x1e0] sm:$0xff]  ;;  %v421_v35 = vld [vmem:[%s1783_s25 + $0x1f0] sm:$0xff] }
  0x46   : > { %v423_v36 = vld [vmem:[%s1783_s25 + $0x200] sm:$0xff]  ;;  %420 = vst [vmem:[%s1788_s6 + $0xf0] sm:$0xff] %v419_v34  ;;  %422 = vst [vmem:[%s1788_s6 + $0xf8] sm:$0xff] %v421_v35  ;;  %v425_v37 = vld [vmem:[%s1783_s25 + $0x210] sm:$0xff] }
  0x47   : > { %424 = vst [vmem:[%s1788_s6 + $0x100] sm:$0xff] %v423_v36  ;;  %v427_v38 = vld [vmem:[%s1783_s25 + $0x220] sm:$0xff]  ;;  %v429_v39 = vld [vmem:[%s1783_s25 + $0x230] sm:$0xff]  ;;  %426 = vst [vmem:[%s1788_s6 + $0x108] sm:$0xff] %v425_v37 }
  0x48   : > { %428 = vst [vmem:[%s1788_s6 + $0x110] sm:$0xff] %v427_v38  ;;  %430 = vst [vmem:[%s1788_s6 + $0x118] sm:$0xff] %v429_v39  ;;  %v431_v40 = vld [vmem:[%s1783_s25 + $0x240] sm:$0xff]  ;;  %v433_v41 = vld [vmem:[%s1783_s25 + $0x250] sm:$0xff] }
  0x49   : > { %v435_v42 = vld [vmem:[%s1783_s25 + $0x260] sm:$0xff]  ;;  %432 = vst [vmem:[%s1788_s6 + $0x120] sm:$0xff] %v431_v40  ;;  %434 = vst [vmem:[%s1788_s6 + $0x128] sm:$0xff] %v433_v41  ;;  %v437_v43 = vld [vmem:[%s1783_s25 + $0x270] sm:$0xff] }
  0x4a   : > { %436 = vst [vmem:[%s1788_s6 + $0x130] sm:$0xff] %v435_v42  ;;  %v439_v44 = vld [vmem:[%s1783_s25 + $0x280] sm:$0xff]  ;;  %v441_v45 = vld [vmem:[%s1783_s25 + $0x290] sm:$0xff]  ;;  %438 = vst [vmem:[%s1788_s6 + $0x138] sm:$0xff] %v437_v43 }
  0x4b   : > { %440 = vst [vmem:[%s1788_s6 + $0x140] sm:$0xff] %v439_v44  ;;  %442 = vst [vmem:[%s1788_s6 + $0x148] sm:$0xff] %v441_v45  ;;  %v443_v46 = vld [vmem:[%s1783_s25 + $0x2a0] sm:$0xff]  ;;  %v445_v47 = vld [vmem:[%s1783_s25 + $0x2b0] sm:$0xff] }
  0x4c   : > { %v447_v48 = vld [vmem:[%s1783_s25 + $0x2c0] sm:$0xff]  ;;  %444 = vst [vmem:[%s1788_s6 + $0x150] sm:$0xff] %v443_v46  ;;  %446 = vst [vmem:[%s1788_s6 + $0x158] sm:$0xff] %v445_v47  ;;  %v449_v49 = vld [vmem:[%s1783_s25 + $0x2d0] sm:$0xff] }
  0x4d   : > { %448 = vst [vmem:[%s1788_s6 + $0x160] sm:$0xff] %v447_v48  ;;  %v451_v50 = vld [vmem:[%s1783_s25 + $0x2e0] sm:$0xff]  ;;  %v453_v51 = vld [vmem:[%s1783_s25 + $0x2f0] sm:$0xff]  ;;  %450 = vst [vmem:[%s1788_s6 + $0x168] sm:$0xff] %v449_v49 }
  0x4e   : > { %452 = vst [vmem:[%s1788_s6 + $0x170] sm:$0xff] %v451_v50  ;;  %454 = vst [vmem:[%s1788_s6 + $0x178] sm:$0xff] %v453_v51  ;;  %v455_v52 = vld [vmem:[%s1783_s25 + $0x300] sm:$0xff]  ;;  %v457_v53 = vld [vmem:[%s1783_s25 + $0x310] sm:$0xff] }
  0x4f   : > { %v459_v54 = vld [vmem:[%s1783_s25 + $0x320] sm:$0xff]  ;;  %456 = vst [vmem:[%s1788_s6 + $0x180] sm:$0xff] %v455_v52  ;;  %458 = vst [vmem:[%s1788_s6 + $0x188] sm:$0xff] %v457_v53  ;;  %v461_v55 = vld [vmem:[%s1783_s25 + $0x330] sm:$0xff] }
  0x50   : > { %460 = vst [vmem:[%s1788_s6 + $0x190] sm:$0xff] %v459_v54  ;;  %v463_v56 = vld [vmem:[%s1783_s25 + $0x340] sm:$0xff]  ;;  %v465_v57 = vld [vmem:[%s1783_s25 + $0x350] sm:$0xff]  ;;  %462 = vst [vmem:[%s1788_s6 + $0x198] sm:$0xff] %v461_v55 }
  0x51   : > { %464 = vst [vmem:[%s1788_s6 + $0x1a0] sm:$0xff] %v463_v56  ;;  %466 = vst [vmem:[%s1788_s6 + $0x1a8] sm:$0xff] %v465_v57  ;;  %v467_v58 = vld [vmem:[%s1783_s25 + $0x360] sm:$0xff]  ;;  %v469_v59 = vld [vmem:[%s1783_s25 + $0x370] sm:$0xff] }
  0x52   : > { %v471_v60 = vld [vmem:[%s1783_s25 + $0x380] sm:$0xff]  ;;  %468 = vst [vmem:[%s1788_s6 + $0x1b0] sm:$0xff] %v467_v58  ;;  %470 = vst [vmem:[%s1788_s6 + $0x1b8] sm:$0xff] %v469_v59  ;;  %v473_v61 = vld [vmem:[%s1783_s25 + $0x390] sm:$0xff] }
  0x53   : > { %472 = vst [vmem:[%s1788_s6 + $0x1c0] sm:$0xff] %v471_v60  ;;  %v475_v62 = vld [vmem:[%s1783_s25 + $0x3a0] sm:$0xff]  ;;  %v477_v63 = vld [vmem:[%s1783_s25 + $0x3b0] sm:$0xff]  ;;  %474 = vst [vmem:[%s1788_s6 + $0x1c8] sm:$0xff] %v473_v61 }
  0x54   : > { %476 = vst [vmem:[%s1788_s6 + $0x1d0] sm:$0xff] %v475_v62  ;;  %478 = vst [vmem:[%s1788_s6 + $0x1d8] sm:$0xff] %v477_v63  ;;  %v479_v0 = vld [vmem:[%s1783_s25 + $0x3c0] sm:$0xff]  ;;  %v481_v1 = vld [vmem:[%s1783_s25 + $0x3d0] sm:$0xff] }
  0x55   : > { %v483_v2 = vld [vmem:[%s1783_s25 + $0x3e0] sm:$0xff]  ;;  %480 = vst [vmem:[%s1788_s6 + $0x1e0] sm:$0xff] %v479_v0  ;;  %482 = vst [vmem:[%s1788_s6 + $0x1e8] sm:$0xff] %v481_v1  ;;  %v485_v3 = vld [vmem:[%s1783_s25 + $0x3f0] sm:$0xff] }
  0x56   : > { %484 = vst [vmem:[%s1788_s6 + $0x1f0] sm:$0xff] %v483_v2  ;;  %486 = vst [vmem:[%s1788_s6 + $0x1f8] sm:$0xff] %v485_v3 }
  0x57 PF: > { %p1278_p0 = scmp.ge.s32.totalorder %s1646_s22, 1  ;;  %p499_p1 = scmp.lt.s32.totalorder %s1646_s22, 19 }
  0x59   : > { %p500_p2 = pnand %p1278_p0, %p499_p1 }
  0x5a   : > { %s506_s0 = sand.u32 (!%p500_p2), 1, %s1622_s16   ;;  %s513_s5 = sand.u32 (!%p500_p2), 1, %s1614_s14  }
  0x5b   : > { %503 = sbr.rel (%p500_p2) target bundleno = 413 (0x19d), region = 85  ;;  %s1279_s23 = sshll.u32 (!%p500_p2), %s506_s0, 5 }
  0x5c   : > { %s1280_s28 = sshll.u32 (!%p500_p2), %s513_s5, 9  ;;  %s540_s7 = sand.u32 (!%p500_p2), 1, %s1606_s12  }
  0x5d   : > { %s1282_s11 = sshll.u32 (!%p500_p2), %s1634_s19, 1  ;;  %s1281_s25 = sshll.u32 (!%p500_p2), %s540_s7, 4 }
  0x5e   : > { %p548_p3 = scmp.lt.s32.totalorder (!%p500_p2), %s1282_s11, 3  ;;  %s1927_s27 = scalar_lea.vmem (!%p500_p2), [#allocation3], %s1279_s23 }
  0x5f   : > { %s1929_s6 = scalar_lea.vmem (!%p500_p2), [#allocation4], %s1280_s28  ;;  %s1931_s1 = scalar_lea.vmem (!%p500_p2), [#allocation5], %s1281_s25 }
  0x60   : > { %p1283_p4 = scmp.ne.s32.totalorder (!%p500_p2), %s1630_s18, 0 }
  0x62   : > { %s2082_s11 = smov (!%p548_p3, %s1282_s11), 3  ;;  %557 = sbr.rel (%p1283_p4) target bundleno = 105 (0x69), region = 97 }
  0x63   : > { %s550_s4 = scalar_lea.vmem %s2053_s2, %s2082_s11  ;;  %v1648_v4 = vmov (!%p1283_p4), 0.0  }
  0x64   : > { %558 = vst [vmem:[#allocation2] sm:$0xff] (!%p1283_p4), %v1648_v4  ;;  %559 = vst [vmem:[#allocation2 + $0x8] sm:$0xff] (!%p1283_p4), %v1648_v4 }
  0x65   : > { %560 = vst [vmem:[#allocation2 + $0x10] sm:$0xff] (!%p1283_p4), %v1648_v4  ;;  %561 = vst [vmem:[#allocation2 + $0x18] sm:$0xff] (!%p1283_p4), %v1648_v4 }
  0x69 PF: > { %v1458_v5 = vld [vmem:[%s1929_s6 + $0x4] ss:$8 sps:$4 sm:$0xff]   ;;  %v1462_v7 = vld [vmem:[%s1929_s6] ss:$8 sps:$4 sm:$0xff]   ;;  %v1464_v9 = vld [vmem:[%s1929_s6 + $0x14] ss:$8 sps:$4 sm:$0xff]  }
  0x6a   : > { %v1460_v6 = vld [vmem:[%s1929_s6 + $0x104] ss:$8 sps:$4 sm:$0xff]   ;;  %974 = vmatprep.subr.bf16.mxu1 %v1458_v5  ;;  %v1463_v8 = vld [vmem:[%s1929_s6 + $0x100] ss:$8 sps:$4 sm:$0xff]   ;;  %v1466_v10 = vld [vmem:[%s1929_s6 + $0x114] ss:$8 sps:$4 sm:$0xff]  }
  0x6b   : > { %1017 = vmatprep.subr.bf16.mxu0 %v1460_v6  ;;  %975 = vmatpush1.bf16.msra.mxu1 %v1462_v7  ;;  %v1468_v11 = vld [vmem:[%s1929_s6 + $0x10] ss:$8 sps:$4 sm:$0xff]   ;;  %v1470_v13 = vld [vmem:[%s1929_s6 + $0x24] ss:$8 sps:$4 sm:$0xff]   ;;  %v1474_v15 = vld [vmem:[%s1929_s6 + $0x20] ss:$8 sps:$4 sm:$0xff]  }
  0x6c   : > { %1018 = vmatpush1.bf16.msra.mxu0 %v1463_v8  ;;  %976 = vmatprep.subr.bf16.mxu1 %v1464_v9  ;;  %v1469_v12 = vld [vmem:[%s1929_s6 + $0x110] ss:$8 sps:$4 sm:$0xff]   ;;  %v1472_v14 = vld [vmem:[%s1929_s6 + $0x124] ss:$8 sps:$4 sm:$0xff]   ;;  %v1475_v16 = vld [vmem:[%s1929_s6 + $0x120] ss:$8 sps:$4 sm:$0xff]  }
  0x6d   : > { %1019 = vmatprep.subr.bf16.mxu0 %v1466_v10  ;;  %v1476_v17 = vld [vmem:[%s1929_s6 + $0x34] ss:$8 sps:$4 sm:$0xff]   ;;  %v1480_v19 = vld [vmem:[%s1929_s6 + $0x30] ss:$8 sps:$4 sm:$0xff]   ;;  %v1482_v21 = vld [vmem:[%s1929_s6 + $0x44] ss:$8 sps:$4 sm:$0xff]  }
  0x6e   : > { %v1478_v18 = vld [vmem:[%s1929_s6 + $0x134] ss:$8 sps:$4 sm:$0xff]   ;;  %v1481_v20 = vld [vmem:[%s1929_s6 + $0x130] ss:$8 sps:$4 sm:$0xff]   ;;  %v1484_v22 = vld [vmem:[%s1929_s6 + $0x144] ss:$8 sps:$4 sm:$0xff]  }
  0x6f   : > { %977 = vmatpush1.bf16.msra.mxu1 %v1468_v11  ;;  %v1486_v23 = vld [vmem:[%s1929_s6 + $0x40] ss:$8 sps:$4 sm:$0xff]   ;;  %v1488_v25 = vld [vmem:[%s1929_s6 + $0x54] ss:$8 sps:$4 sm:$0xff]   ;;  %v1492_v27 = vld [vmem:[%s1929_s6 + $0x50] ss:$8 sps:$4 sm:$0xff]  }
  0x70   : > { %1020 = vmatpush1.bf16.msra.mxu0 %v1469_v12  ;;  %978 = vmatprep.subr.bf16.mxu1 %v1470_v13  ;;  %v1487_v24 = vld [vmem:[%s1929_s6 + $0x140] ss:$8 sps:$4 sm:$0xff]   ;;  %v1490_v26 = vld [vmem:[%s1929_s6 + $0x154] ss:$8 sps:$4 sm:$0xff]   ;;  %v1493_v28 = vld [vmem:[%s1929_s6 + $0x150] ss:$8 sps:$4 sm:$0xff]  }
  0x71   : > { %1021 = vmatprep.subr.bf16.mxu0 %v1472_v14  ;;  %v1494_v29 = vld [vmem:[%s1929_s6 + $0x64] ss:$8 sps:$4 sm:$0xff]   ;;  %v1498_v31 = vld [vmem:[%s1929_s6 + $0x60] ss:$8 sps:$4 sm:$0xff]   ;;  %v1500_v33 = vld [vmem:[%s1929_s6 + $0x74] ss:$8 sps:$4 sm:$0xff]  }
  0x72   : > { %v1496_v30 = vld [vmem:[%s1929_s6 + $0x164] ss:$8 sps:$4 sm:$0xff]   ;;  %v1499_v32 = vld [vmem:[%s1929_s6 + $0x160] ss:$8 sps:$4 sm:$0xff]   ;;  %v1502_v34 = vld [vmem:[%s1929_s6 + $0x174] ss:$8 sps:$4 sm:$0xff]  }
  0x73   : > { %979 = vmatpush1.bf16.msra.mxu1 %v1474_v15  ;;  %v1504_v35 = vld [vmem:[%s1929_s6 + $0x70] ss:$8 sps:$4 sm:$0xff]   ;;  %v1506_v37 = vld [vmem:[%s1929_s6 + $0x84] ss:$8 sps:$4 sm:$0xff]   ;;  %v1510_v39 = vld [vmem:[%s1929_s6 + $0x80] ss:$8 sps:$4 sm:$0xff]  }
  0x74   : > { %1022 = vmatpush1.bf16.msra.mxu0 %v1475_v16  ;;  %980 = vmatprep.subr.bf16.mxu1 %v1476_v17  ;;  %v1505_v36 = vld [vmem:[%s1929_s6 + $0x170] ss:$8 sps:$4 sm:$0xff]   ;;  %v1508_v38 = vld [vmem:[%s1929_s6 + $0x184] ss:$8 sps:$4 sm:$0xff]   ;;  %v1511_v40 = vld [vmem:[%s1929_s6 + $0x180] ss:$8 sps:$4 sm:$0xff]  }
  0x75   : > { %1023 = vmatprep.subr.bf16.mxu0 %v1478_v18  ;;  %v1512_v41 = vld [vmem:[%s1929_s6 + $0x94] ss:$8 sps:$4 sm:$0xff]   ;;  %v1516_v43 = vld [vmem:[%s1929_s6 + $0x90] ss:$8 sps:$4 sm:$0xff]   ;;  %v1518_v45 = vld [vmem:[%s1929_s6 + $0xa4] ss:$8 sps:$4 sm:$0xff]  }
  0x76   : > { %v1514_v42 = vld [vmem:[%s1929_s6 + $0x194] ss:$8 sps:$4 sm:$0xff]   ;;  %v1517_v44 = vld [vmem:[%s1929_s6 + $0x190] ss:$8 sps:$4 sm:$0xff]   ;;  %v1520_v46 = vld [vmem:[%s1929_s6 + $0x1a4] ss:$8 sps:$4 sm:$0xff]  }
  0x77   : > { %981 = vmatpush1.bf16.msra.mxu1 %v1480_v19  ;;  %v1522_v47 = vld [vmem:[%s1929_s6 + $0xa0] ss:$8 sps:$4 sm:$0xff]   ;;  %v1524_v49 = vld [vmem:[%s1929_s6 + $0xb4] ss:$8 sps:$4 sm:$0xff]   ;;  %v1528_v51 = vld [vmem:[%s1929_s6 + $0xb0] ss:$8 sps:$4 sm:$0xff]  }
  0x78   : > { %1024 = vmatpush1.bf16.msra.mxu0 %v1481_v20  ;;  %982 = vmatprep.subr.bf16.mxu1 %v1482_v21  ;;  %v1523_v48 = vld [vmem:[%s1929_s6 + $0x1a0] ss:$8 sps:$4 sm:$0xff]   ;;  %v1526_v50 = vld [vmem:[%s1929_s6 + $0x1b4] ss:$8 sps:$4 sm:$0xff]   ;;  %v1529_v53 = vld [vmem:[%s1929_s6 + $0x1b0] ss:$8 sps:$4 sm:$0xff]  }
  0x79   : > { %1025 = vmatprep.subr.bf16.mxu0 %v1484_v22  ;;  %v1556_v52 = vld [vmem:[%s1927_s27 + $0x4] ss:$16 sps:$4 sm:$0xff]   ;;  %v1559_v56 = vld [vmem:[%s1927_s27 + $0xc] ss:$16 sps:$4 sm:$0xff]   ;;  %v1534_v57 = vld [vmem:[%s1929_s6 + $0xc0] ss:$8 sps:$4 sm:$0xff]  }
  0x7a   : > { %v1530_v54 = vld [vmem:[%s1929_s6 + $0xc4] ss:$8 sps:$4 sm:$0xff]   ;;  %1006 = vmatprep.mubr.bf16.mxu1 %v1556_v52  ;;  %1049 = vmatprep.mubr.bf16.mxu0 %v1559_v56  ;;  %v1535_v58 = vld [vmem:[%s1929_s6 + $0x1c0] ss:$8 sps:$4 sm:$0xff]   ;;  %v1536_v59 = vld [vmem:[%s1929_s6 + $0xd4] ss:$8 sps:$4 sm:$0xff]  }
  0x7b   : > { %983 = vmatpush1.bf16.msra.mxu1 %v1486_v23  ;;  %v1532_v55 = vld [vmem:[%s1929_s6 + $0x1c4] ss:$8 sps:$4 sm:$0xff]   ;;  %v1538_v60 = vld [vmem:[%s1929_s6 + $0x1d4] ss:$8 sps:$4 sm:$0xff]   ;;  %v1540_v61 = vld [vmem:[%s1929_s6 + $0xd0] ss:$8 sps:$4 sm:$0xff]  }
  0x7c   : > { %1026 = vmatpush1.bf16.msra.mxu0 %v1487_v24  ;;  %984 = vmatprep.subr.bf16.mxu1 %v1488_v25  ;;  %v1541_v62 = vld [vmem:[%s1929_s6 + $0x1d0] ss:$8 sps:$4 sm:$0xff]   ;;  %v1542_v63 = vld [vmem:[%s1929_s6 + $0xe4] ss:$8 sps:$4 sm:$0xff]   ;;  %v1546_v1 = vld [vmem:[%s1929_s6 + $0xe0] ss:$8 sps:$4 sm:$0xff]  }
  0x7d   : > { %1027 = vmatprep.subr.bf16.mxu0 %v1490_v26  ;;  %v1544_v0 = vld [vmem:[%s1929_s6 + $0x1e4] ss:$8 sps:$4 sm:$0xff]   ;;  %v1547_v2 = vld [vmem:[%s1929_s6 + $0x1e0] ss:$8 sps:$4 sm:$0xff]   ;;  %v1548_v3 = vld [vmem:[%s1929_s6 + $0xf4] ss:$8 sps:$4 sm:$0xff]  }
  0x7e   : > { %v1550_v4 = vld [vmem:[%s1929_s6 + $0x1f4] ss:$8 sps:$4 sm:$0xff]   ;;  %v1552_v5 = vld [vmem:[%s1929_s6 + $0xf0] ss:$8 sps:$4 sm:$0xff]   ;;  %v562_v10 = vld [vmem:[#allocation2] sm:$0xff]  ;;  %p1352_p5 = scmp.ne.s32.totalorder %s1630_s18, 8 }
  0x7f   : > { %985 = vmatpush1.bf16.msra.mxu1 %v1492_v27  ;;  %v1553_v6 = vld [vmem:[%s1929_s6 + $0x1f0] ss:$8 sps:$4 sm:$0xff]   ;;  %v563_v14 = vld [vmem:[#allocation2 + $0x8] sm:$0xff] }
  0x80   : > { %1028 = vmatpush1.bf16.msra.mxu0 %v1493_v28  ;;  %986 = vmatprep.subr.bf16.mxu1 %v1494_v29  ;;  %v1554_v7 = vld [vmem:[%s1927_s27] ss:$16 sps:$4 sm:$0xff]   ;;  %v1557_v8 = vld [vmem:[%s1927_s27 + $0x8] ss:$16 sps:$4 sm:$0xff]   ;;  %v1078_v29 = vlaneseq (!%p1352_p5) }
  0x81   : > { %1029 = vmatprep.subr.bf16.mxu0 %v1496_v30  ;;  %v564_v18 = vld [vmem:[#allocation2 + $0x10] sm:$0xff]  ;;  %v565_v23 = vld [vmem:[#allocation2 + $0x18] sm:$0xff] }
  0x82   : > { %v1079_v30 = vshrl.u32 (!%p1352_p5), %v1078_v29, 7 }
  0x83   : > { %987 = vmatpush1.bf16.msra.mxu1 %v1498_v31  ;;  %v1076_v31 = vld [vmem:[%s550_s4] sm:$0x3] (!%p1352_p5) }
  0x84   : > { %1030 = vmatpush1.bf16.msra.mxu0 %v1499_v32  ;;  %988 = vmatprep.subr.bf16.mxu1 %v1500_v33  ;;  %v1080_v33 = vsub.s32 (!%p1352_p5), 0, %v1079_v30 }
  0x85   : > { %1031 = vmatprep.subr.bf16.mxu0 %v1502_v34  ;;  %v1084_v34 = vsub.s32 (!%p1352_p5), 1, %v1079_v30 }
  0x87   : > { %989 = vmatpush1.bf16.msra.mxu1 %v1504_v35 }
  0x88   : > { %1032 = vmatpush1.bf16.msra.mxu0 %v1505_v36  ;;  %990 = vmatprep.subr.bf16.mxu1 %v1506_v37 }
  0x89   : > { %1033 = vmatprep.subr.bf16.mxu0 %v1508_v38  ;;  %v1081_v38 = vrot.slane (!%p1352_p5), %v1076_v31, %v1080_v33 }
  0x8b   : > { %991 = vmatpush1.bf16.msra.mxu1 %v1510_v39  ;;  %v1085_v39 = vrot.slane (!%p1352_p5), %v1076_v31, %v1084_v34 }
  0x8c   : > { %1034 = vmatpush1.bf16.msra.mxu0 %v1511_v40  ;;  %992 = vmatprep.subr.bf16.mxu1 %v1512_v41 }
  0x8d   : > { %1035 = vmatprep.subr.bf16.mxu0 %v1514_v42 }
  0x8f   : > { %993 = vmatpush1.bf16.msra.mxu1 %v1516_v43 }
  0x90   : > { %1036 = vmatpush1.bf16.msra.mxu0 %v1517_v44  ;;  %994 = vmatprep.subr.bf16.mxu1 %v1518_v45 }
  0x91   : > { %1037 = vmatprep.subr.bf16.mxu0 %v1520_v46 }
  0x93   : > { %995 = vmatpush1.bf16.msra.mxu1 %v1522_v47 }
  0x94   : > { %1038 = vmatpush1.bf16.msra.mxu0 %v1523_v48  ;;  %996 = vmatprep.subr.bf16.mxu1 %v1524_v49 }
  0x95   : > { %1039 = vmatprep.subr.bf16.mxu0 %v1526_v50 }
  0x97   : > { %997 = vmatpush1.bf16.msra.mxu1 %v1528_v51 }
  0x98   : > { %1040 = vmatpush1.bf16.msra.mxu0 %v1529_v53  ;;  %998 = vmatprep.subr.bf16.mxu1 %v1530_v54 }
  0x99   : > { %1041 = vmatprep.subr.bf16.mxu0 %v1532_v55 }
  0x9b   : > { %999 = vmatpush1.bf16.msra.mxu1 %v1534_v57 }
  0x9c   : > { %1042 = vmatpush1.bf16.msra.mxu0 %v1535_v58  ;;  %1000 = vmatprep.subr.bf16.mxu1 %v1536_v59 }
  0x9d   : > { %1043 = vmatprep.subr.bf16.mxu0 %v1538_v60 }
  0x9f   : > { %1001 = vmatpush1.bf16.msra.mxu1 %v1540_v61 }
  0xa0   : > { %1044 = vmatpush1.bf16.msra.mxu0 %v1541_v62  ;;  %1002 = vmatprep.subr.bf16.mxu1 %v1542_v63 }
  0xa1   : > { %1045 = vmatprep.subr.bf16.mxu0 %v1544_v0 }
  0xa3   : > { %1003 = vmatpush1.bf16.msra.mxu1 %v1546_v1 }
  0xa4   : > { %1046 = vmatpush1.bf16.msra.mxu0 %v1547_v2  ;;  %1004 = vmatprep.subr.bf16.mxu1 %v1548_v3 }
  0xa5   : > { %1047 = vmatprep.subr.bf16.mxu0 %v1550_v4 }
  0xa7   : > { %1005 = vmatpush1.bf16.msra.mxu1 %v1552_v5 }
  0xa8   : > { %1048 = vmatpush1.bf16.msra.mxu0 %v1553_v6 }
  0xaa   : > { %1007 = vmatmul.mubr.bf16.vlgmr.msra.gmra.mrb[0].mxu1 %v1554_v7 }
  0xab   : > { %1050 = vmatmul.mubr.bf16.vlgmr.msra.gmra.mrb[0].mxu0 %v1557_v8 }
 0x17d   : > { %v1008_v9 = vpop.f32.mrb[0].mxu1 }
 0x17e   : > { %v1051_v11 = vpop.f32.mrb[0].mxu0  ;;  %v1010_v13 = vpop.f32.mrb[1].mxu1 }
 0x17f   : > { %v1052_v12 = vadd.f32 %v1051_v11, %v1008_v9  ;;  %v1053_v15 = vpop.f32.mrb[1].mxu0  ;;  %v1012_v17 = vpop.f32.mrb[2].mxu1 }
 0x180   : > { %v1054_v16 = vadd.f32 %v1053_v15, %v1010_v13  ;;  %v1055_v19 = vpop.f32.mrb[2].mxu0  ;;  %v1014_v22 = vpop.f32.mrb[3].mxu1  ;;  %1071 = sbr.rel (%p1352_p5) target bundleno = 405 (0x195), region = 101 }
 0x181   : > { %v1060_v20 = vadd.f32 %v1052_v12, %v562_v10  ;;  %v1056_v21 = vadd.f32 %v1055_v19, %v1012_v17  ;;  %v1057_v24 = vpop.f32.mrb[3].mxu0 }
 0x182   : > { %v1061_v25 = vadd.f32 %v1054_v16, %v563_v14  ;;  %v1058_v26 = vadd.f32 %v1057_v24, %v1014_v22 }
 0x183   : > { %1064 = vst [vmem:[#allocation2] sm:$0xff] %v1060_v20  ;;  %v1062_v27 = vadd.f32 %v1056_v21, %v564_v18 }
 0x184   : > { %1065 = vst [vmem:[#allocation2 + $0x8] sm:$0xff] %v1061_v25  ;;  %v1063_v28 = vadd.f32 %v1058_v26, %v565_v23 }
 0x185   : > { %1066 = vst [vmem:[#allocation2 + $0x10] sm:$0xff] %v1062_v27 }
 0x186   : > { %1067 = vst [vmem:[#allocation2 + $0x18] sm:$0xff] %v1063_v28 }
 0x18a   : > { %v1072_v32 = vld [vmem:[#allocation2] sm:$0xff] }
 0x18b   : > { %v1073_v35 = vld [vmem:[#allocation2 + $0x8] sm:$0xff]  ;;  %v1088_v40 = vadd.f32 %v1081_v38, %v1072_v32 }
 0x18c   : > { %v1074_v36 = vld [vmem:[#allocation2 + $0x10] sm:$0xff]  ;;  %v1089_v41 = vadd.f32 %v1085_v39, %v1073_v35 }
 0x18d   : > { %v1075_v37 = vld [vmem:[#allocation2 + $0x18] sm:$0xff]  ;;  %v1090_v42 = vadd.f32 %v1081_v38, %v1074_v36  ;;  %v1092_v44 = vmax.f32 %v1088_v40, 0.0 }
 0x18e   : > { %v1091_v43 = vadd.f32 %v1085_v39, %v1075_v37  ;;  %v1093_v45 = vmax.f32 %v1089_v41, 0.0 }
 0x18f   : > { %v1094_v46 = vmax.f32 %v1090_v42, 0.0 }
 0x190   : > { %v1095_v47 = vmax.f32 %v1091_v43, 0.0  ;;  %v1362_v48 = vpack.c.bf16 %v1093_v45, %v1092_v44 }
 0x192   : > { %v1363_v49 = vpack.c.bf16 %v1095_v47, %v1094_v46  ;;  %1108 = vst [vmem:[%s1931_s1] sm:$0xff] %v1362_v48 }
 0x194   : > { %1109 = vst [vmem:[%s1931_s1 + $0x8] sm:$0xff] %v1363_v49 }
 0x195 PF: > { %1116 = sbr.rel (!%p1763_p12) target bundleno = 413 (0x19d), region = 105  ;;  %s1364_s16 = sshll.u32 (%p1763_p12), %s1634_s19, 3 }
 0x196   : > { %s1122_s5 = scalar_lea.vmem (%p1763_p12), %s2054_s3, %s1364_s16 }
 0x199   : > { %v1152_v50 = vld [vmem:[%s1931_s1] sm:$0xff] (%p1763_p12) }
 0x19a   : > { %1153 = vst [vmem:[%s1122_s5] sm:$0xff] (%p1763_p12), %v1152_v50 }
 0x19b   : > { %v1154_v51 = vld [vmem:[%s1931_s1 + $0x8] sm:$0xff] (%p1763_p12) }
 0x19c   : > { %1155 = vst [vmem:[%s1122_s5 + $0x10] sm:$0xff] %v1154_v51 }
 0x19d PF: > { %s13_s22 = sadd.s32 1, %s1646_s22   ;;  %s2064_s1 = sld [smem:[#allocation6_spill]] }
 0x19e   : > { %p10_p6 = scmp.ge.s32.totalorder %s13_s22, 20   ;;  %s2065_s12 = smov %s1610_s13 }
 0x19f   : > { %s2066_s13 = smov %s1761_s9  ;;  %s2067_s14 = smov %s1618_s15 }
 0x1a0   : > { %s2068_s15 = smov %s1758_s8  ;;  %s2069_s16 = smov %s1626_s17 }
 0x1a1   : > { %s2070_s17 = smov %s1744_s30  ;;  %s2071_s18 = smov %s1638_s20 }
 0x1a2   : > { %s2072_s19 = smov %s1642_s21  ;;  %s2073_s20 = smov %s2076_s24 }
 0x1a3   : > { %s2074_s21 = smov %s2064_s1  ;;  %12 = sbr.rel (!%p10_p6) target bundleno = 9 (0x9), region = 185 }

// kernel: resnet50_forward.100
= control target key start
LH: loop header
LB: loop body
LE: loop exit
PB: predicated region body
PF: predicated region fallthrough
CT: control target
= control target key end

     0   :  { %s2047_s0 = inlined_call_operand.vmem [shape: bf16[16,1024], index: 0, kind: input, shape index: {}]   ;;  %s2048_s1 = inlined_call_operand.vmem [shape: bf16[1024,2048], index: 1, kind: input, shape index: {}]   ;;  %s2049_s2 = inlined_call_operand.vmem [shape: f32[1,2048], index: 2, kind: input, shape index: {}]   ;;  %s2050_s3 = inlined_call_operand.vmem [shape: bf16[16,2048], index: 3, kind: output, shape index: {}]  }
   0x1   :  { %2052 = sst [smem:[#allocation7_spill]] %s2047_s0 }
   0x2   :  { %2053 = sst [smem:[#allocation8_spill]] %s2048_s1 }
   0x3   :  { %s1665_s12 = smov 0   ;;  %s1667_s13 = smov 0  }
   0x4   :  { %s1669_s14 = smov 0   ;;  %s1671_s15 = smov 0  }
   0x5   :  { %s1673_s16 = smov 0   ;;  %s1675_s17 = smov 0  }
   0x6   :  { %s1677_s18 = smov 0   ;;  %s1679_s19 = smov 0  }
   0x7   :  { %s1681_s20 = smov 0   ;;  %s1683_s21 = smov 0  }
   0x8   :  { %s1685_s22 = smov 0  }
   0x9 LB: > { %s1262_s23 = sadd.s32 4294967295, %s1642_s22   ;;  %s25_s24 = sadd.s32 1, %s1634_s20  ;;  %s1642_s22 = sphi %s1685_s22, %s13_s22   ;;  %s1638_s21 = sphi %s1683_s21, %s2070_s21   ;;  %s1634_s20 = sphi %s1681_s20, %s2069_s20   ;;  %s1630_s19 = sphi %s1679_s19, %s2068_s19   ;;  %s1626_s18 = sphi %s1677_s18, %s2067_s18   ;;  %s1622_s17 = sphi %s1675_s17, %s2066_s17   ;;  %s1618_s16 = sphi %s1673_s16, %s2065_s16   ;;  %s1614_s15 = sphi %s1671_s15, %s2064_s15   ;;  %s1610_s14 = sphi %s1669_s14, %s2063_s14   ;;  %s1606_s13 = sphi %s1667_s13, %s2062_s13   ;;  %s1602_s12 = sphi %s1665_s12, %s2061_s12  }
   0xa   : > { %p26_p0 = scmp.ge.s32.totalorder %s25_s24, 2  ;;  %s28_s25 = sadd.s32 1, %s1638_s21 }
   0xb   : > { %s41_s26 = sadd.s32 1, %s1622_s17  ;;  %p48_p1 = scmp.ne.s32.totalorder %s1622_s17, %s1618_s16 }
   0xc   : > { %s2072_s24 = smov (%p26_p0, %s25_s24), 0  ;;  %s2074_s25 = smov (!%p26_p0, %s28_s25), %s1638_s21 }
   0xd   : > { %s37_s27 = ssub.s32 %s1634_s20, %s2072_s24  ;;  %p49_p2 = scmp.eq.s32.totalorder %s1642_s22, 0 }
   0xe   : > { %p30_p3 = scmp.ge.s32.totalorder %s2074_s25, 8  ;;  %p39_p4 = scmp.eq.s32.totalorder %s37_s27, 0 }
   0xf   : > { %p1732_p5 = por %p49_p2, %p48_p1  ;;  %s69_s29 = sadd.s32 1, %s1614_s15 }
  0x10   : > { %s2076_s25 = smov (%p30_p3, %s2074_s25), 0  ;;  %p76_p6 = scmp.ne.s32.totalorder %s1614_s15, %s1610_s14 }
  0x11   : > { %2055 = sst [smem:[#allocation6_spill]] %s2076_s25  ;;  %s65_s4 = ssub.s32 %s1638_s21, %s2076_s25 }
  0x12   : > { %s1740_s30 = scalar_select %p39_p4, %s1622_s17, %s41_s26  }
  0x13   : > { %s66_s5 = sor.u32 %s65_s4, %s37_s27  ;;  %p121_p7 = scmp.eq.s32.totalorder %s65_s4, 0 }
  0x14   : > { %p67_p8 = scmp.eq.s32.totalorder %s66_s5, 0  ;;  %p1746_p9 = por %p76_p6, %p49_p2 }
  0x15   : > { %s123_s7 = sadd.s32 1, %s1606_s13  ;;  %p133_p10 = scmp.ne.s32.totalorder %s1606_s13, %s1602_s12 }
  0x16   : > { %s1754_s8 = scalar_select %p67_p8, %s1614_s15, %s69_s29  }
  0x17   : > { %s1757_s9 = scalar_select %p121_p7, %s1606_s13, %s123_s7  }
  0x18   : > { %p134_p11 = scmp.eq.s32.totalorder %s1262_s23, 15  ;;  %p1265_p13 = scmp.ge.s32.totalorder %s1642_s22, 16 }
  0x1a   : > { %p1759_p12 = por %p134_p11, %p133_p10  ;;  %156 = sbr.rel (%p1265_p13) target bundleno = 119 (0x77), region = 16 }
  0x21   : > { %159 = sbr.rel (!%p1732_p5) target bundleno = 45 (0x2d), region = 20  ;;  %s161_s11 = sand.u32 (%p1732_p5), 1, %s1622_s17  }
  0x22   : > { %s1356_s26 = sshll.u32 (%p1732_p5), %s1634_s20, 4  ;;  %s1266_s27 = sshll.u32 (%p1732_p5), %s161_s11, 5 }
  0x23   : > { %s2058_s0 = sld [smem:[#allocation7_spill]] (%p1732_p5)  ;;  %s163_s23 = scalar_lea.vmem (%p1732_p5), [#allocation3], %s1266_s27 }
  0x29   : > { %s169_s5 = scalar_lea.vmem %s2058_s0, %s1356_s26 }
  0x2a   : > { %v182_v0 = vld [vmem:[%s169_s5] sm:$0xff]  ;;  %v184_v1 = vld [vmem:[%s169_s5 + $0x8] sm:$0xff] }
  0x2b   : > { %v186_v2 = vld [vmem:[%s169_s5 + $0x20] sm:$0xff]  ;;  %183 = vst [vmem:[%s163_s23] sm:$0xff] %v182_v0  ;;  %185 = vst [vmem:[%s163_s23 + $0x8] sm:$0xff] %v184_v1  ;;  %v188_v3 = vld [vmem:[%s169_s5 + $0x28] sm:$0xff] }
  0x2c   : > { %187 = vst [vmem:[%s163_s23 + $0x10] sm:$0xff] %v186_v2  ;;  %189 = vst [vmem:[%s163_s23 + $0x18] sm:$0xff] %v188_v3 }
  0x2d PF: > { %195 = sbr.rel (!%p1746_p9) target bundleno = 119 (0x77), region = 43  ;;  %s197_s28 = sand.u32 (%p1746_p9), 1, %s1614_s15  }
  0x2e   : > { %s1271_s7 = sshll.u32 (%p1746_p9), %s1638_s21, 1  ;;  %s1269_s11 = sshll.u32 (%p1746_p9), %s197_s28, 9 }
  0x2f   : > { %s1357_s26 = sshll.u32 (%p1746_p9), %s1634_s20, 10  ;;  %s2059_s1 = sld [smem:[#allocation8_spill]] (%p1746_p9) }
  0x30   : > { %s203_s29 = sadd.s32 (%p1746_p9), %s1357_s26, %s1271_s7  ;;  %s1784_s6 = scalar_lea.vmem (%p1746_p9), [#allocation4], %s1269_s11 }
  0x31   : > { %s1273_s4 = sshll.u32 (%p1746_p9), %s203_s29, 2 }
  0x35   : > { %s1779_s25 = scalar_lea.vmem %s2059_s1, %s1273_s4 }
  0x36   : > { %v359_v4 = vld [vmem:[%s1779_s25] sm:$0xff] }
  0x37   : > { %v361_v5 = vld [vmem:[%s1779_s25 + $0x40] sm:$0xff]  ;;  %360 = vst [vmem:[%s1784_s6] sm:$0xff] %v359_v4 }
  0x38   : > { %v363_v6 = vld [vmem:[%s1779_s25 + $0x80] sm:$0xff]  ;;  %362 = vst [vmem:[%s1784_s6 + $0x8] sm:$0xff] %v361_v5 }
  0x39   : > { %364 = vst [vmem:[%s1784_s6 + $0x10] sm:$0xff] %v363_v6  ;;  %v365_v7 = vld [vmem:[%s1779_s25 + $0xc0] sm:$0xff] }
  0x3a   : > { %v367_v8 = vld [vmem:[%s1779_s25 + $0x100] sm:$0xff]  ;;  %366 = vst [vmem:[%s1784_s6 + $0x18] sm:$0xff] %v365_v7 }
  0x3b   : > { %v369_v9 = vld [vmem:[%s1779_s25 + $0x140] sm:$0xff]  ;;  %368 = vst [vmem:[%s1784_s6 + $0x20] sm:$0xff] %v367_v8 }
  0x3c   : > { %370 = vst [vmem:[%s1784_s6 + $0x28] sm:$0xff] %v369_v9  ;;  %v371_v10 = vld [vmem:[%s1779_s25 + $0x180] sm:$0xff] }
  0x3d   : > { %v373_v11 = vld [vmem:[%s1779_s25 + $0x1c0] sm:$0xff]  ;;  %372 = vst [vmem:[%s1784_s6 + $0x30] sm:$0xff] %v371_v10 }
  0x3e   : > { %v375_v12 = vld [vmem:[%s1779_s25 + $0x200] sm:$0xff]  ;;  %374 = vst [vmem:[%s1784_s6 + $0x38] sm:$0xff] %v373_v11 }
  0x3f   : > { %376 = vst [vmem:[%s1784_s6 + $0x40] sm:$0xff] %v375_v12  ;;  %v377_v13 = vld [vmem:[%s1779_s25 + $0x240] sm:$0xff] }
  0x40   : > { %v379_v14 = vld [vmem:[%s1779_s25 + $0x280] sm:$0xff]  ;;  %378 = vst [vmem:[%s1784_s6 + $0x48] sm:$0xff] %v377_v13 }
  0x41   : > { %v381_v15 = vld [vmem:[%s1779_s25 + $0x2c0] sm:$0xff]  ;;  %380 = vst [vmem:[%s1784_s6 + $0x50] sm:$0xff] %v379_v14 }
  0x42   : > { %382 = vst [vmem:[%s1784_s6 + $0x58] sm:$0xff] %v381_v15  ;;  %v383_v16 = vld [vmem:[%s1779_s25 + $0x300] sm:$0xff] }
  0x43   : > { %v385_v17 = vld [vmem:[%s1779_s25 + $0x340] sm:$0xff]  ;;  %384 = vst [vmem:[%s1784_s6 + $0x60] sm:$0xff] %v383_v16 }
  0x44   : > { %v387_v18 = vld [vmem:[%s1779_s25 + $0x380] sm:$0xff]  ;;  %386 = vst [vmem:[%s1784_s6 + $0x68] sm:$0xff] %v385_v17 }
  0x45   : > { %388 = vst [vmem:[%s1784_s6 + $0x70] sm:$0xff] %v387_v18  ;;  %v389_v19 = vld [vmem:[%s1779_s25 + $0x3c0] sm:$0xff] }
  0x46   : > { %v391_v20 = vld [vmem:[%s1779_s25 + $0x400] sm:$0xff]  ;;  %390 = vst [vmem:[%s1784_s6 + $0x78] sm:$0xff] %v389_v19 }
  0x47   : > { %v393_v21 = vld [vmem:[%s1779_s25 + $0x440] sm:$0xff]  ;;  %392 = vst [vmem:[%s1784_s6 + $0x80] sm:$0xff] %v391_v20 }
  0x48   : > { %394 = vst [vmem:[%s1784_s6 + $0x88] sm:$0xff] %v393_v21  ;;  %v395_v22 = vld [vmem:[%s1779_s25 + $0x480] sm:$0xff] }
  0x49   : > { %v397_v23 = vld [vmem:[%s1779_s25 + $0x4c0] sm:$0xff]  ;;  %396 = vst [vmem:[%s1784_s6 + $0x90] sm:$0xff] %v395_v22 }
  0x4a   : > { %v399_v24 = vld [vmem:[%s1779_s25 + $0x500] sm:$0xff]  ;;  %398 = vst [vmem:[%s1784_s6 + $0x98] sm:$0xff] %v397_v23 }
  0x4b   : > { %400 = vst [vmem:[%s1784_s6 + $0xa0] sm:$0xff] %v399_v24  ;;  %v401_v25 = vld [vmem:[%s1779_s25 + $0x540] sm:$0xff] }
  0x4c   : > { %v403_v26 = vld [vmem:[%s1779_s25 + $0x580] sm:$0xff]  ;;  %402 = vst [vmem:[%s1784_s6 + $0xa8] sm:$0xff] %v401_v25 }
  0x4d   : > { %v405_v27 = vld [vmem:[%s1779_s25 + $0x5c0] sm:$0xff]  ;;  %404 = vst [vmem:[%s1784_s6 + $0xb0] sm:$0xff] %v403_v26 }
  0x4e   : > { %406 = vst [vmem:[%s1784_s6 + $0xb8] sm:$0xff] %v405_v27  ;;  %v407_v28 = vld [vmem:[%s1779_s25 + $0x600] sm:$0xff] }
  0x4f   : > { %v409_v29 = vld [vmem:[%s1779_s25 + $0x640] sm:$0xff]  ;;  %408 = vst [vmem:[%s1784_s6 + $0xc0] sm:$0xff] %v407_v28 }
  0x50   : > { %v411_v30 = vld [vmem:[%s1779_s25 + $0x680] sm:$0xff]  ;;  %410 = vst [vmem:[%s1784_s6 + $0xc8] sm:$0xff] %v409_v29 }
  0x51   : > { %412 = vst [vmem:[%s1784_s6 + $0xd0] sm:$0xff] %v411_v30  ;;  %v413_v31 = vld [vmem:[%s1779_s25 + $0x6c0] sm:$0xff] }
  0x52   : > { %v415_v32 = vld [vmem:[%s1779_s25 + $0x700] sm:$0xff]  ;;  %414 = vst [vmem:[%s1784_s6 + $0xd8] sm:$0xff] %v413_v31 }
  0x53   : > { %v417_v33 = vld [vmem:[%s1779_s25 + $0x740] sm:$0xff]  ;;  %416 = vst [vmem:[%s1784_s6 + $0xe0] sm:$0xff] %v415_v32 }
  0x54   : > { %418 = vst [vmem:[%s1784_s6 + $0xe8] sm:$0xff] %v417_v33  ;;  %v419_v34 = vld [vmem:[%s1779_s25 + $0x780] sm:$0xff] }
  0x55   : > { %v421_v35 = vld [vmem:[%s1779_s25 + $0x7c0] sm:$0xff]  ;;  %420 = vst [vmem:[%s1784_s6 + $0xf0] sm:$0xff] %v419_v34 }
  0x56   : > { %v423_v36 = vld [vmem:[%s1779_s25 + $0x800] sm:$0xff]  ;;  %422 = vst [vmem:[%s1784_s6 + $0xf8] sm:$0xff] %v421_v35 }
  0x57   : > { %424 = vst [vmem:[%s1784_s6 + $0x100] sm:$0xff] %v423_v36  ;;  %v425_v37 = vld [vmem:[%s1779_s25 + $0x840] sm:$0xff] }
  0x58   : > { %v427_v38 = vld [vmem:[%s1779_s25 + $0x880] sm:$0xff]  ;;  %426 = vst [vmem:[%s1784_s6 + $0x108] sm:$0xff] %v425_v37 }
  0x59   : > { %v429_v39 = vld [vmem:[%s1779_s25 + $0x8c0] sm:$0xff]  ;;  %428 = vst [vmem:[%s1784_s6 + $0x110] sm:$0xff] %v427_v38 }
  0x5a   : > { %430 = vst [vmem:[%s1784_s6 + $0x118] sm:$0xff] %v429_v39  ;;  %v431_v40 = vld [vmem:[%s1779_s25 + $0x900] sm:$0xff] }
  0x5b   : > { %v433_v41 = vld [vmem:[%s1779_s25 + $0x940] sm:$0xff]  ;;  %432 = vst [vmem:[%s1784_s6 + $0x120] sm:$0xff] %v431_v40 }
  0x5c   : > { %v435_v42 = vld [vmem:[%s1779_s25 + $0x980] sm:$0xff]  ;;  %434 = vst [vmem:[%s1784_s6 + $0x128] sm:$0xff] %v433_v41 }
  0x5d   : > { %436 = vst [vmem:[%s1784_s6 + $0x130] sm:$0xff] %v435_v42  ;;  %v437_v43 = vld [vmem:[%s1779_s25 + $0x9c0] sm:$0xff] }
  0x5e   : > { %v439_v44 = vld [vmem:[%s1779_s25 + $0xa00] sm:$0xff]  ;;  %438 = vst [vmem:[%s1784_s6 + $0x138] sm:$0xff] %v437_v43 }
  0x5f   : > { %v441_v45 = vld [vmem:[%s1779_s25 + $0xa40] sm:$0xff]  ;;  %440 = vst [vmem:[%s1784_s6 + $0x140] sm:$0xff] %v439_v44 }
  0x60   : > { %442 = vst [vmem:[%s1784_s6 + $0x148] sm:$0xff] %v441_v45  ;;  %v443_v46 = vld [vmem:[%s1779_s25 + $0xa80] sm:$0xff] }
  0x61   : > { %v445_v47 = vld [vmem:[%s1779_s25 + $0xac0] sm:$0xff]  ;;  %444 = vst [vmem:[%s1784_s6 + $0x150] sm:$0xff] %v443_v46 }
  0x62   : > { %v447_v48 = vld [vmem:[%s1779_s25 + $0xb00] sm:$0xff]  ;;  %446 = vst [vmem:[%s1784_s6 + $0x158] sm:$0xff] %v445_v47 }
  0x63   : > { %448 = vst [vmem:[%s1784_s6 + $0x160] sm:$0xff] %v447_v48  ;;  %v449_v49 = vld [vmem:[%s1779_s25 + $0xb40] sm:$0xff] }
  0x64   : > { %v451_v50 = vld [vmem:[%s1779_s25 + $0xb80] sm:$0xff]  ;;  %450 = vst [vmem:[%s1784_s6 + $0x168] sm:$0xff] %v449_v49 }
  0x65   : > { %v453_v51 = vld [vmem:[%s1779_s25 + $0xbc0] sm:$0xff]  ;;  %452 = vst [vmem:[%s1784_s6 + $0x170] sm:$0xff] %v451_v50 }
  0x66   : > { %454 = vst [vmem:[%s1784_s6 + $0x178] sm:$0xff] %v453_v51  ;;  %v455_v52 = vld [vmem:[%s1779_s25 + $0xc00] sm:$0xff] }
  0x67   : > { %v457_v53 = vld [vmem:[%s1779_s25 + $0xc40] sm:$0xff]  ;;  %456 = vst [vmem:[%s1784_s6 + $0x180] sm:$0xff] %v455_v52 }
  0x68   : > { %v459_v54 = vld [vmem:[%s1779_s25 + $0xc80] sm:$0xff]  ;;  %458 = vst [vmem:[%s1784_s6 + $0x188] sm:$0xff] %v457_v53 }
  0x69   : > { %460 = vst [vmem:[%s1784_s6 + $0x190] sm:$0xff] %v459_v54  ;;  %v461_v55 = vld [vmem:[%s1779_s25 + $0xcc0] sm:$0xff] }
  0x6a   : > { %v463_v56 = vld [vmem:[%s1779_s25 + $0xd00] sm:$0xff]  ;;  %462 = vst [vmem:[%s1784_s6 + $0x198] sm:$0xff] %v461_v55 }
  0x6b   : > { %v465_v57 = vld [vmem:[%s1779_s25 + $0xd40] sm:$0xff]  ;;  %464 = vst [vmem:[%s1784_s6 + $0x1a0] sm:$0xff] %v463_v56 }
  0x6c   : > { %466 = vst [vmem:[%s1784_s6 + $0x1a8] sm:$0xff] %v465_v57  ;;  %v467_v58 = vld [vmem:[%s1779_s25 + $0xd80] sm:$0xff] }
  0x6d   : > { %v469_v59 = vld [vmem:[%s1779_s25 + $0xdc0] sm:$0xff]  ;;  %468 = vst [vmem:[%s1784_s6 + $0x1b0] sm:$0xff] %v467_v58 }
  0x6e   : > { %v471_v60 = vld [vmem:[%s1779_s25 + $0xe00] sm:$0xff]  ;;  %470 = vst [vmem:[%s1784_s6 + $0x1b8] sm:$0xff] %v469_v59 }
  0x6f   : > { %472 = vst [vmem:[%s1784_s6 + $0x1c0] sm:$0xff] %v471_v60  ;;  %v473_v61 = vld [vmem:[%s1779_s25 + $0xe40] sm:$0xff] }
  0x70   : > { %v475_v62 = vld [vmem:[%s1779_s25 + $0xe80] sm:$0xff]  ;;  %474 = vst [vmem:[%s1784_s6 + $0x1c8] sm:$0xff] %v473_v61 }
  0x71   : > { %v477_v63 = vld [vmem:[%s1779_s25 + $0xec0] sm:$0xff]  ;;  %476 = vst [vmem:[%s1784_s6 + $0x1d0] sm:$0xff] %v475_v62 }
  0x72   : > { %478 = vst [vmem:[%s1784_s6 + $0x1d8] sm:$0xff] %v477_v63  ;;  %v479_v0 = vld [vmem:[%s1779_s25 + $0xf00] sm:$0xff] }
  0x73   : > { %v481_v1 = vld [vmem:[%s1779_s25 + $0xf40] sm:$0xff]  ;;  %480 = vst [vmem:[%s1784_s6 + $0x1e0] sm:$0xff] %v479_v0 }
  0x74   : > { %v483_v2 = vld [vmem:[%s1779_s25 + $0xf80] sm:$0xff]  ;;  %482 = vst [vmem:[%s1784_s6 + $0x1e8] sm:$0xff] %v481_v1 }
  0x75   : > { %484 = vst [vmem:[%s1784_s6 + $0x1f0] sm:$0xff] %v483_v2  ;;  %v485_v3 = vld [vmem:[%s1779_s25 + $0xfc0] sm:$0xff] }
  0x76   : > { %486 = vst [vmem:[%s1784_s6 + $0x1f8] sm:$0xff] %v485_v3 }
  0x77 PF: > { %p1274_p0 = scmp.ge.s32.totalorder %s1642_s22, 1  ;;  %p499_p1 = scmp.lt.s32.totalorder %s1642_s22, 17 }
  0x79   : > { %p500_p2 = pnand %p1274_p0, %p499_p1 }
  0x7a   : > { %s506_s0 = sand.u32 (!%p500_p2), 1, %s1618_s16   ;;  %s513_s5 = sand.u32 (!%p500_p2), 1, %s1610_s14  }
  0x7b   : > { %503 = sbr.rel (%p500_p2) target bundleno = 443 (0x1bb), region = 85  ;;  %s1275_s23 = sshll.u32 (!%p500_p2), %s506_s0, 5 }
  0x7c   : > { %s1276_s28 = sshll.u32 (!%p500_p2), %s513_s5, 9  ;;  %s540_s7 = sand.u32 (!%p500_p2), 1, %s1602_s12  }
  0x7d   : > { %s1278_s11 = sshll.u32 (!%p500_p2), %s1630_s19, 1  ;;  %s1277_s25 = sshll.u32 (!%p500_p2), %s540_s7, 4 }
  0x7e   : > { %p548_p3 = scmp.lt.s32.totalorder (!%p500_p2), %s1278_s11, 15  ;;  %s1923_s27 = scalar_lea.vmem (!%p500_p2), [#allocation3], %s1275_s23 }
  0x7f   : > { %s1925_s6 = scalar_lea.vmem (!%p500_p2), [#allocation4], %s1276_s28  ;;  %s1927_s1 = scalar_lea.vmem (!%p500_p2), [#allocation5], %s1277_s25 }
  0x80   : > { %p1279_p4 = scmp.ne.s32.totalorder (!%p500_p2), %s1626_s18, 0 }
  0x82   : > { %s2078_s11 = smov (!%p548_p3, %s1278_s11), 15  ;;  %557 = sbr.rel (%p1279_p4) target bundleno = 137 (0x89), region = 97 }
  0x83   : > { %s550_s4 = scalar_lea.vmem %s2049_s2, %s2078_s11  ;;  %v1644_v4 = vmov (!%p1279_p4), 0.0  }
  0x84   : > { %558 = vst [vmem:[#allocation2] sm:$0xff] (!%p1279_p4), %v1644_v4  ;;  %559 = vst [vmem:[#allocation2 + $0x8] sm:$0xff] (!%p1279_p4), %v1644_v4 }
  0x85   : > { %560 = vst [vmem:[#allocation2 + $0x10] sm:$0xff] (!%p1279_p4), %v1644_v4  ;;  %561 = vst [vmem:[#allocation2 + $0x18] sm:$0xff] (!%p1279_p4), %v1644_v4 }
  0x89 PF: > { %v1454_v5 = vld [vmem:[%s1925_s6 + $0x4] ss:$8 sps:$4 sm:$0xff]   ;;  %v1458_v7 = vld [vmem:[%s1925_s6] ss:$8 sps:$4 sm:$0xff]   ;;  %v1460_v9 = vld [vmem:[%s1925_s6 + $0x14] ss:$8 sps:$4 sm:$0xff]  }
  0x8a   : > { %v1456_v6 = vld [vmem:[%s1925_s6 + $0x104] ss:$8 sps:$4 sm:$0xff]   ;;  %974 = vmatprep.subr.bf16.mxu1 %v1454_v5  ;;  %v1459_v8 = vld [vmem:[%s1925_s6 + $0x100] ss:$8 sps:$4 sm:$0xff]   ;;  %v1462_v10 = vld [vmem:[%s1925_s6 + $0x114] ss:$8 sps:$4 sm:$0xff]  }
  0x8b   : > { %1017 = vmatprep.subr.bf16.mxu0 %v1456_v6  ;;  %975 = vmatpush1.bf16.msra.mxu1 %v1458_v7  ;;  %v1464_v11 = vld [vmem:[%s1925_s6 + $0x10] ss:$8 sps:$4 sm:$0xff]   ;;  %v1466_v13 = vld [vmem:[%s1925_s6 + $0x24] ss:$8 sps:$4 sm:$0xff]   ;;  %v1470_v15 = vld [vmem:[%s1925_s6 + $0x20] ss:$8 sps:$4 sm:$0xff]  }
  0x8c   : > { %1018 = vmatpush1.bf16.msra.mxu0 %v1459_v8  ;;  %976 = vmatprep.subr.bf16.mxu1 %v1460_v9  ;;  %v1465_v12 = vld [vmem:[%s1925_s6 + $0x110] ss:$8 sps:$4 sm:$0xff]   ;;  %v1468_v14 = vld [vmem:[%s1925_s6 + $0x124] ss:$8 sps:$4 sm:$0xff]   ;;  %v1471_v16 = vld [vmem:[%s1925_s6 + $0x120] ss:$8 sps:$4 sm:$0xff]  }
  0x8d   : > { %1019 = vmatprep.subr.bf16.mxu0 %v1462_v10  ;;  %v1472_v17 = vld [vmem:[%s1925_s6 + $0x34] ss:$8 sps:$4 sm:$0xff]   ;;  %v1476_v19 = vld [vmem:[%s1925_s6 + $0x30] ss:$8 sps:$4 sm:$0xff]   ;;  %v1478_v21 = vld [vmem:[%s1925_s6 + $0x44] ss:$8 sps:$4 sm:$0xff]  }
  0x8e   : > { %v1474_v18 = vld [vmem:[%s1925_s6 + $0x134] ss:$8 sps:$4 sm:$0xff]   ;;  %v1477_v20 = vld [vmem:[%s1925_s6 + $0x130] ss:$8 sps:$4 sm:$0xff]   ;;  %v1480_v22 = vld [vmem:[%s1925_s6 + $0x144] ss:$8 sps:$4 sm:$0xff]  }
  0x8f   : > { %977 = vmatpush1.bf16.msra.mxu1 %v1464_v11  ;;  %v1482_v23 = vld [vmem:[%s1925_s6 + $0x40] ss:$8 sps:$4 sm:$0xff]   ;;  %v1484_v25 = vld [vmem:[%s1925_s6 + $0x54] ss:$8 sps:$4 sm:$0xff]   ;;  %v1488_v27 = vld [vmem:[%s1925_s6 + $0x50] ss:$8 sps:$4 sm:$0xff]  }
  0x90   : > { %1020 = vmatpush1.bf16.msra.mxu0 %v1465_v12  ;;  %978 = vmatprep.subr.bf16.mxu1 %v1466_v13  ;;  %v1483_v24 = vld [vmem:[%s1925_s6 + $0x140] ss:$8 sps:$4 sm:$0xff]   ;;  %v1486_v26 = vld [vmem:[%s1925_s6 + $0x154] ss:$8 sps:$4 sm:$0xff]   ;;  %v1489_v28 = vld [vmem:[%s1925_s6 + $0x150] ss:$8 sps:$4 sm:$0xff]  }
  0x91   : > { %1021 = vmatprep.subr.bf16.mxu0 %v1468_v14  ;;  %v1490_v29 = vld [vmem:[%s1925_s6 + $0x64] ss:$8 sps:$4 sm:$0xff]   ;;  %v1494_v31 = vld [vmem:[%s1925_s6 + $0x60] ss:$8 sps:$4 sm:$0xff]   ;;  %v1496_v33 = vld [vmem:[%s1925_s6 + $0x74] ss:$8 sps:$4 sm:$0xff]  }
  0x92   : > { %v1492_v30 = vld [vmem:[%s1925_s6 + $0x164] ss:$8 sps:$4 sm:$0xff]   ;;  %v1495_v32 = vld [vmem:[%s1925_s6 + $0x160] ss:$8 sps:$4 sm:$0xff]   ;;  %v1498_v34 = vld [vmem:[%s1925_s6 + $0x174] ss:$8 sps:$4 sm:$0xff]  }
  0x93   : > { %979 = vmatpush1.bf16.msra.mxu1 %v1470_v15  ;;  %v1500_v35 = vld [vmem:[%s1925_s6 + $0x70] ss:$8 sps:$4 sm:$0xff]   ;;  %v1502_v37 = vld [vmem:[%s1925_s6 + $0x84] ss:$8 sps:$4 sm:$0xff]   ;;  %v1506_v39 = vld [vmem:[%s1925_s6 + $0x80] ss:$8 sps:$4 sm:$0xff]  }
  0x94   : > { %1022 = vmatpush1.bf16.msra.mxu0 %v1471_v16  ;;  %980 = vmatprep.subr.bf16.mxu1 %v1472_v17  ;;  %v1501_v36 = vld [vmem:[%s1925_s6 + $0x170] ss:$8 sps:$4 sm:$0xff]   ;;  %v1504_v38 = vld [vmem:[%s1925_s6 + $0x184] ss:$8 sps:$4 sm:$0xff]   ;;  %v1507_v40 = vld [vmem:[%s1925_s6 + $0x180] ss:$8 sps:$4 sm:$0xff]  }
  0x95   : > { %1023 = vmatprep.subr.bf16.mxu0 %v1474_v18  ;;  %v1508_v41 = vld [vmem:[%s1925_s6 + $0x94] ss:$8 sps:$4 sm:$0xff]   ;;  %v1512_v43 = vld [vmem:[%s1925_s6 + $0x90] ss:$8 sps:$4 sm:$0xff]   ;;  %v1514_v45 = vld [vmem:[%s1925_s6 + $0xa4] ss:$8 sps:$4 sm:$0xff]  }
  0x96   : > { %v1510_v42 = vld [vmem:[%s1925_s6 + $0x194] ss:$8 sps:$4 sm:$0xff]   ;;  %v1513_v44 = vld [vmem:[%s1925_s6 + $0x190] ss:$8 sps:$4 sm:$0xff]   ;;  %v1516_v46 = vld [vmem:[%s1925_s6 + $0x1a4] ss:$8 sps:$4 sm:$0xff]  }
  0x97   : > { %981 = vmatpush1.bf16.msra.mxu1 %v1476_v19  ;;  %v1518_v47 = vld [vmem:[%s1925_s6 + $0xa0] ss:$8 sps:$4 sm:$0xff]   ;;  %v1520_v49 = vld [vmem:[%s1925_s6 + $0xb4] ss:$8 sps:$4 sm:$0xff]   ;;  %v1524_v51 = vld [vmem:[%s1925_s6 + $0xb0] ss:$8 sps:$4 sm:$0xff]  }
  0x98   : > { %1024 = vmatpush1.bf16.msra.mxu0 %v1477_v20  ;;  %982 = vmatprep.subr.bf16.mxu1 %v1478_v21  ;;  %v1519_v48 = vld [vmem:[%s1925_s6 + $0x1a0] ss:$8 sps:$4 sm:$0xff]   ;;  %v1522_v50 = vld [vmem:[%s1925_s6 + $0x1b4] ss:$8 sps:$4 sm:$0xff]   ;;  %v1525_v53 = vld [vmem:[%s1925_s6 + $0x1b0] ss:$8 sps:$4 sm:$0xff]  }
  0x99   : > { %1025 = vmatprep.subr.bf16.mxu0 %v1480_v22  ;;  %v1552_v52 = vld [vmem:[%s1923_s27 + $0x4] ss:$16 sps:$4 sm:$0xff]   ;;  %v1555_v56 = vld [vmem:[%s1923_s27 + $0xc] ss:$16 sps:$4 sm:$0xff]   ;;  %v1530_v57 = vld [vmem:[%s1925_s6 + $0xc0] ss:$8 sps:$4 sm:$0xff]  }
  0x9a   : > { %v1526_v54 = vld [vmem:[%s1925_s6 + $0xc4] ss:$8 sps:$4 sm:$0xff]   ;;  %1006 = vmatprep.mubr.bf16.mxu1 %v1552_v52  ;;  %1049 = vmatprep.mubr.bf16.mxu0 %v1555_v56  ;;  %v1531_v58 = vld [vmem:[%s1925_s6 + $0x1c0] ss:$8 sps:$4 sm:$0xff]   ;;  %v1532_v59 = vld [vmem:[%s1925_s6 + $0xd4] ss:$8 sps:$4 sm:$0xff]  }
  0x9b   : > { %983 = vmatpush1.bf16.msra.mxu1 %v1482_v23  ;;  %v1528_v55 = vld [vmem:[%s1925_s6 + $0x1c4] ss:$8 sps:$4 sm:$0xff]   ;;  %v1534_v60 = vld [vmem:[%s1925_s6 + $0x1d4] ss:$8 sps:$4 sm:$0xff]   ;;  %v1536_v61 = vld [vmem:[%s1925_s6 + $0xd0] ss:$8 sps:$4 sm:$0xff]  }
  0x9c   : > { %1026 = vmatpush1.bf16.msra.mxu0 %v1483_v24  ;;  %984 = vmatprep.subr.bf16.mxu1 %v1484_v25  ;;  %v1537_v62 = vld [vmem:[%s1925_s6 + $0x1d0] ss:$8 sps:$4 sm:$0xff]   ;;  %v1538_v63 = vld [vmem:[%s1925_s6 + $0xe4] ss:$8 sps:$4 sm:$0xff]   ;;  %v1542_v1 = vld [vmem:[%s1925_s6 + $0xe0] ss:$8 sps:$4 sm:$0xff]  }
  0x9d   : > { %1027 = vmatprep.subr.bf16.mxu0 %v1486_v26  ;;  %v1540_v0 = vld [vmem:[%s1925_s6 + $0x1e4] ss:$8 sps:$4 sm:$0xff]   ;;  %v1543_v2 = vld [vmem:[%s1925_s6 + $0x1e0] ss:$8 sps:$4 sm:$0xff]   ;;  %v1544_v3 = vld [vmem:[%s1925_s6 + $0xf4] ss:$8 sps:$4 sm:$0xff]  }
  0x9e   : > { %v1546_v4 = vld [vmem:[%s1925_s6 + $0x1f4] ss:$8 sps:$4 sm:$0xff]   ;;  %v1548_v5 = vld [vmem:[%s1925_s6 + $0xf0] ss:$8 sps:$4 sm:$0xff]   ;;  %v562_v10 = vld [vmem:[#allocation2] sm:$0xff]  ;;  %p1348_p5 = scmp.ne.s32.totalorder %s1626_s18, 1 }
  0x9f   : > { %985 = vmatpush1.bf16.msra.mxu1 %v1488_v27  ;;  %v1549_v6 = vld [vmem:[%s1925_s6 + $0x1f0] ss:$8 sps:$4 sm:$0xff]   ;;  %v563_v14 = vld [vmem:[#allocation2 + $0x8] sm:$0xff] }
  0xa0   : > { %1028 = vmatpush1.bf16.msra.mxu0 %v1489_v28  ;;  %986 = vmatprep.subr.bf16.mxu1 %v1490_v29  ;;  %v1550_v7 = vld [vmem:[%s1923_s27] ss:$16 sps:$4 sm:$0xff]   ;;  %v1553_v8 = vld [vmem:[%s1923_s27 + $0x8] ss:$16 sps:$4 sm:$0xff]   ;;  %v1078_v29 = vlaneseq (!%p1348_p5) }
  0xa1   : > { %1029 = vmatprep.subr.bf16.mxu0 %v1492_v30  ;;  %v564_v18 = vld [vmem:[#allocation2 + $0x10] sm:$0xff]  ;;  %v565_v23 = vld [vmem:[#allocation2 + $0x18] sm:$0xff] }
  0xa2   : > { %v1079_v30 = vshrl.u32 (!%p1348_p5), %v1078_v29, 7 }
  0xa3   : > { %987 = vmatpush1.bf16.msra.mxu1 %v1494_v31  ;;  %v1076_v31 = vld [vmem:[%s550_s4] sm:$0x3] (!%p1348_p5) }
  0xa4   : > { %1030 = vmatpush1.bf16.msra.mxu0 %v1495_v32  ;;  %988 = vmatprep.subr.bf16.mxu1 %v1496_v33  ;;  %v1080_v33 = vsub.s32 (!%p1348_p5), 0, %v1079_v30 }
  0xa5   : > { %1031 = vmatprep.subr.bf16.mxu0 %v1498_v34  ;;  %v1084_v34 = vsub.s32 (!%p1348_p5), 1, %v1079_v30 }
  0xa7   : > { %989 = vmatpush1.bf16.msra.mxu1 %v1500_v35 }
  0xa8   : > { %1032 = vmatpush1.bf16.msra.mxu0 %v1501_v36  ;;  %990 = vmatprep.subr.bf16.mxu1 %v1502_v37 }
  0xa9   : > { %1033 = vmatprep.subr.bf16.mxu0 %v1504_v38  ;;  %v1081_v38 = vrot.slane (!%p1348_p5), %v1076_v31, %v1080_v33 }
  0xab   : > { %991 = vmatpush1.bf16.msra.mxu1 %v1506_v39  ;;  %v1085_v39 = vrot.slane (!%p1348_p5), %v1076_v31, %v1084_v34 }
  0xac   : > { %1034 = vmatpush1.bf16.msra.mxu0 %v1507_v40  ;;  %992 = vmatprep.subr.bf16.mxu1 %v1508_v41 }
  0xad   : > { %1035 = vmatprep.subr.bf16.mxu0 %v1510_v42 }
  0xaf   : > { %993 = vmatpush1.bf16.msra.mxu1 %v1512_v43 }
  0xb0   : > { %1036 = vmatpush1.bf16.msra.mxu0 %v1513_v44  ;;  %994 = vmatprep.subr.bf16.mxu1 %v1514_v45 }
  0xb1   : > { %1037 = vmatprep.subr.bf16.mxu0 %v1516_v46 }
  0xb3   : > { %995 = vmatpush1.bf16.msra.mxu1 %v1518_v47 }
  0xb4   : > { %1038 = vmatpush1.bf16.msra.mxu0 %v1519_v48  ;;  %996 = vmatprep.subr.bf16.mxu1 %v1520_v49 }
  0xb5   : > { %1039 = vmatprep.subr.bf16.mxu0 %v1522_v50 }
  0xb7   : > { %997 = vmatpush1.bf16.msra.mxu1 %v1524_v51 }
  0xb8   : > { %1040 = vmatpush1.bf16.msra.mxu0 %v1525_v53  ;;  %998 = vmatprep.subr.bf16.mxu1 %v1526_v54 }
  0xb9   : > { %1041 = vmatprep.subr.bf16.mxu0 %v1528_v55 }
  0xbb   : > { %999 = vmatpush1.bf16.msra.mxu1 %v1530_v57 }
  0xbc   : > { %1042 = vmatpush1.bf16.msra.mxu0 %v1531_v58  ;;  %1000 = vmatprep.subr.bf16.mxu1 %v1532_v59 }
  0xbd   : > { %1043 = vmatprep.subr.bf16.mxu0 %v1534_v60 }
  0xbf   : > { %1001 = vmatpush1.bf16.msra.mxu1 %v1536_v61 }
  0xc0   : > { %1044 = vmatpush1.bf16.msra.mxu0 %v1537_v62  ;;  %1002 = vmatprep.subr.bf16.mxu1 %v1538_v63 }
  0xc1   : > { %1045 = vmatprep.subr.bf16.mxu0 %v1540_v0 }
  0xc3   : > { %1003 = vmatpush1.bf16.msra.mxu1 %v1542_v1 }
  0xc4   : > { %1046 = vmatpush1.bf16.msra.mxu0 %v1543_v2  ;;  %1004 = vmatprep.subr.bf16.mxu1 %v1544_v3 }
  0xc5   : > { %1047 = vmatprep.subr.bf16.mxu0 %v1546_v4 }
  0xc7   : > { %1005 = vmatpush1.bf16.msra.mxu1 %v1548_v5 }
  0xc8   : > { %1048 = vmatpush1.bf16.msra.mxu0 %v1549_v6 }
  0xca   : > { %1007 = vmatmul.mubr.bf16.vlgmr.msra.gmra.mrb[0].mxu1 %v1550_v7 }
  0xcb   : > { %1050 = vmatmul.mubr.bf16.vlgmr.msra.gmra.mrb[0].mxu0 %v1553_v8 }
 0x19d   : > { %v1008_v9 = vpop.f32.mrb[0].mxu1 }
 0x19e   : > { %v1051_v11 = vpop.f32.mrb[0].mxu0  ;;  %v1010_v13 = vpop.f32.mrb[1].mxu1 }
 0x19f   : > { %v1052_v12 = vadd.f32 %v1051_v11, %v1008_v9  ;;  %v1053_v15 = vpop.f32.mrb[1].mxu0  ;;  %v1012_v17 = vpop.f32.mrb[2].mxu1 }
 0x1a0   : > { %v1054_v16 = vadd.f32 %v1053_v15, %v1010_v13  ;;  %v1055_v19 = vpop.f32.mrb[2].mxu0  ;;  %v1014_v22 = vpop.f32.mrb[3].mxu1  ;;  %1071 = sbr.rel (%p1348_p5) target bundleno = 435 (0x1b3), region = 101 }
 0x1a1   : > { %v1060_v20 = vadd.f32 %v1052_v12, %v562_v10  ;;  %v1056_v21 = vadd.f32 %v1055_v19, %v1012_v17  ;;  %v1057_v24 = vpop.f32.mrb[3].mxu0 }
 0x1a2   : > { %v1061_v25 = vadd.f32 %v1054_v16, %v563_v14  ;;  %v1058_v26 = vadd.f32 %v1057_v24, %v1014_v22 }
 0x1a3   : > { %1064 = vst [vmem:[#allocation2] sm:$0xff] %v1060_v20  ;;  %v1062_v27 = vadd.f32 %v1056_v21, %v564_v18 }
 0x1a4   : > { %1065 = vst [vmem:[#allocation2 + $0x8] sm:$0xff] %v1061_v25  ;;  %v1063_v28 = vadd.f32 %v1058_v26, %v565_v23 }
 0x1a5   : > { %1066 = vst [vmem:[#allocation2 + $0x10] sm:$0xff] %v1062_v27 }
 0x1a6   : > { %1067 = vst [vmem:[#allocation2 + $0x18] sm:$0xff] %v1063_v28 }
 0x1aa   : > { %v1072_v32 = vld [vmem:[#allocation2] sm:$0xff] }
 0x1ab   : > { %v1073_v35 = vld [vmem:[#allocation2 + $0x8] sm:$0xff]  ;;  %v1088_v40 = vadd.f32 %v1081_v38, %v1072_v32 }
 0x1ac   : > { %v1074_v36 = vld [vmem:[#allocation2 + $0x10] sm:$0xff]  ;;  %v1089_v41 = vadd.f32 %v1085_v39, %v1073_v35 }
 0x1ad   : > { %v1075_v37 = vld [vmem:[#allocation2 + $0x18] sm:$0xff]  ;;  %v1090_v42 = vadd.f32 %v1081_v38, %v1074_v36 }
 0x1ae   : > { %v1091_v43 = vadd.f32 %v1085_v39, %v1075_v37  ;;  %v1358_v44 = vpack.c.bf16 %v1089_v41, %v1088_v40 }
 0x1b0   : > { %v1359_v45 = vpack.c.bf16 %v1091_v43, %v1090_v42  ;;  %1104 = vst [vmem:[%s1927_s1] sm:$0xff] %v1358_v44 }
 0x1b2   : > { %1105 = vst [vmem:[%s1927_s1 + $0x8] sm:$0xff] %v1359_v45 }
 0x1b3 PF: > { %1112 = sbr.rel (!%p1759_p12) target bundleno = 443 (0x1bb), region = 105  ;;  %s1360_s16 = sshll.u32 (%p1759_p12), %s1630_s19, 3 }
 0x1b4   : > { %s1118_s5 = scalar_lea.vmem (%p1759_p12), %s2050_s3, %s1360_s16 }
 0x1b7   : > { %v1148_v46 = vld [vmem:[%s1927_s1] sm:$0xff] (%p1759_p12) }
 0x1b8   : > { %1149 = vst [vmem:[%s1118_s5] sm:$0xff] (%p1759_p12), %v1148_v46 }
 0x1b9   : > { %v1150_v47 = vld [vmem:[%s1927_s1 + $0x8] sm:$0xff] (%p1759_p12) }
 0x1ba   : > { %1151 = vst [vmem:[%s1118_s5 + $0x40] sm:$0xff] %v1150_v47 }
 0x1bb PF: > { %s13_s22 = sadd.s32 1, %s1642_s22   ;;  %s2060_s1 = sld [smem:[#allocation6_spill]] }
 0x1bc   : > { %p10_p6 = scmp.ge.s32.totalorder %s13_s22, 18   ;;  %s2061_s12 = smov %s1606_s13 }
 0x1bd   : > { %s2062_s13 = smov %s1757_s9  ;;  %s2063_s14 = smov %s1614_s15 }
 0x1be   : > { %s2064_s15 = smov %s1754_s8  ;;  %s2065_s16 = smov %s1622_s17 }
 0x1bf   : > { %s2066_s17 = smov %s1740_s30  ;;  %s2067_s18 = smov %s1634_s20 }
 0x1c0   : > { %s2068_s19 = smov %s1638_s21  ;;  %s2069_s20 = smov %s2072_s24 }
 0x1c1   : > { %s2070_s21 = smov %s2060_s1  ;;  %12 = sbr.rel (!%p10_p6) target bundleno = 9 (0x9), region = 185 }

// kernel: resnet50_forward.101
= control target key start
LH: loop header
LB: loop body
LE: loop exit
PB: predicated region body
PF: predicated region fallthrough
CT: control target
= control target key end

     0   :  { %s1681_s15 = smov 0   ;;  %s1683_s16 = smov 0   ;;  %s1988_s0 = inlined_call_operand.vmem [shape: bf16[16,512], index: 0, kind: input, shape index: {}]   ;;  %s1989_s1 = inlined_call_operand.vmem [shape: bf16[512,2048], index: 1, kind: input, shape index: {}]   ;;  %s1990_s2 = inlined_call_operand.vmem [shape: f32[1,2048], index: 2, kind: input, shape index: {}]   ;;  %s1991_s3 = inlined_call_operand.vmem [shape: bf16[16,2048], index: 3, kind: input, shape index: {}]   ;;  %s1992_s4 = inlined_call_operand.vmem [shape: bf16[16,2048], index: 4, kind: output, shape index: {}]  }
   0x1   :  { %s1685_s17 = smov 0   ;;  %s1687_s18 = smov 0  }
   0x2   :  { %s1689_s19 = smov 0  }
   0x3 LB: > { %s29_s20 = sadd.s32 1, %s1650_s18  ;;  %s1374_s21 = sadd.s32 4294967295, %s1654_s19   ;;  %s1654_s19 = sphi %s1689_s19, %s14_s19   ;;  %s1650_s18 = sphi %s1687_s18, %s1998_s18   ;;  %s1646_s17 = sphi %s1685_s17, %s1997_s17   ;;  %s1642_s16 = sphi %s1683_s16, %s1996_s16   ;;  %s1638_s15 = sphi %s1681_s15, %s1995_s15  }
   0x4   : > { %p31_p0 = scmp.ge.s32.totalorder %s29_s20, 8  ;;  %p77_p1 = scmp.ne.s32.totalorder %s1642_s16, %s1638_s15 }
   0x5   : > { %p78_p2 = scmp.eq.s32.totalorder %s1654_s19, 0  ;;  %p163_p4 = scmp.eq.s32.totalorder %s1374_s21, 7 }
   0x6   : > { %s2000_s20 = smov (%p31_p0, %s29_s20), 0  ;;  %s70_s24 = sadd.s32 1, %s1642_s16 }
   0x7   : > { %p1713_p3 = por %p78_p2, %p77_p1  ;;  %s66_s23 = ssub.s32 %s1650_s18, %s2000_s20 }
   0x8   : > { %p68_p5 = scmp.eq.s32.totalorder %s66_s23, 0  ;;  %p1720_p6 = por %p163_p4, %p77_p1 }
   0x9   : > { %p1378_p7 = scmp.ge.s32.totalorder %s1654_s19, 8 }
   0xa   : > { %s1725_s26 = scalar_select %p68_p5, %s1642_s16, %s70_s24  }
   0xb   : > { %200 = sbr.rel (%p1378_p7) target bundleno = 93 (0x5d), region = 20 }
  0x12   : > { %203 = sbr.rel (!%p1713_p3) target bundleno = 86 (0x56), region = 24  ;;  %s205_s27 = sand.u32 (%p1713_p3), 1, %s1642_s16  }
  0x13   : > { %s1465_s28 = sshll.u32 (%p1713_p3), %s1650_s18, 3  ;;  %s1379_s29 = sshll.u32 (%p1713_p3), %s205_s27, 9 }
  0x14   : > { %s1735_s6 = scalar_lea.vmem (%p1713_p3), %s1989_s1, %s1465_s28  ;;  %s1740_s7 = scalar_lea.vmem (%p1713_p3), [#allocation3], %s1379_s29 }
  0x15   : > { %v367_v0 = vld [vmem:[%s1735_s6] sm:$0xff] (%p1713_p3) }
  0x16   : > { %v369_v1 = vld [vmem:[%s1735_s6 + $0x40] sm:$0xff] (%p1713_p3)  ;;  %368 = vst [vmem:[%s1740_s7] sm:$0xff] (%p1713_p3), %v367_v0 }
  0x17   : > { %v371_v2 = vld [vmem:[%s1735_s6 + $0x80] sm:$0xff] (%p1713_p3)  ;;  %370 = vst [vmem:[%s1740_s7 + $0x8] sm:$0xff] (%p1713_p3), %v369_v1 }
  0x18   : > { %372 = vst [vmem:[%s1740_s7 + $0x10] sm:$0xff] (%p1713_p3), %v371_v2  ;;  %v373_v3 = vld [vmem:[%s1735_s6 + $0xc0] sm:$0xff] (%p1713_p3) }
  0x19   : > { %v375_v4 = vld [vmem:[%s1735_s6 + $0x100] sm:$0xff]  ;;  %374 = vst [vmem:[%s1740_s7 + $0x18] sm:$0xff] %v373_v3 }
  0x1a   : > { %v377_v5 = vld [vmem:[%s1735_s6 + $0x140] sm:$0xff]  ;;  %376 = vst [vmem:[%s1740_s7 + $0x20] sm:$0xff] %v375_v4 }
  0x1b   : > { %378 = vst [vmem:[%s1740_s7 + $0x28] sm:$0xff] %v377_v5  ;;  %v379_v6 = vld [vmem:[%s1735_s6 + $0x180] sm:$0xff] }
  0x1c   : > { %v381_v7 = vld [vmem:[%s1735_s6 + $0x1c0] sm:$0xff]  ;;  %380 = vst [vmem:[%s1740_s7 + $0x30] sm:$0xff] %v379_v6 }
  0x1d   : > { %v383_v8 = vld [vmem:[%s1735_s6 + $0x200] sm:$0xff]  ;;  %382 = vst [vmem:[%s1740_s7 + $0x38] sm:$0xff] %v381_v7 }
  0x1e   : > { %384 = vst [vmem:[%s1740_s7 + $0x40] sm:$0xff] %v383_v8  ;;  %v385_v9 = vld [vmem:[%s1735_s6 + $0x240] sm:$0xff] }
  0x1f   : > { %v387_v10 = vld [vmem:[%s1735_s6 + $0x280] sm:$0xff]  ;;  %386 = vst [vmem:[%s1740_s7 + $0x48] sm:$0xff] %v385_v9 }
  0x20   : > { %v389_v11 = vld [vmem:[%s1735_s6 + $0x2c0] sm:$0xff]  ;;  %388 = vst [vmem:[%s1740_s7 + $0x50] sm:$0xff] %v387_v10 }
  0x21   : > { %390 = vst [vmem:[%s1740_s7 + $0x58] sm:$0xff] %v389_v11  ;;  %v391_v12 = vld [vmem:[%s1735_s6 + $0x300] sm:$0xff] }
  0x22   : > { %v393_v13 = vld [vmem:[%s1735_s6 + $0x340] sm:$0xff]  ;;  %392 = vst [vmem:[%s1740_s7 + $0x60] sm:$0xff] %v391_v12 }
  0x23   : > { %v395_v14 = vld [vmem:[%s1735_s6 + $0x380] sm:$0xff]  ;;  %394 = vst [vmem:[%s1740_s7 + $0x68] sm:$0xff] %v393_v13 }
  0x24   : > { %396 = vst [vmem:[%s1740_s7 + $0x70] sm:$0xff] %v395_v14  ;;  %v397_v15 = vld [vmem:[%s1735_s6 + $0x3c0] sm:$0xff] }
  0x25   : > { %v399_v16 = vld [vmem:[%s1735_s6 + $0x400] sm:$0xff]  ;;  %398 = vst [vmem:[%s1740_s7 + $0x78] sm:$0xff] %v397_v15 }
  0x26   : > { %v401_v17 = vld [vmem:[%s1735_s6 + $0x440] sm:$0xff]  ;;  %400 = vst [vmem:[%s1740_s7 + $0x80] sm:$0xff] %v399_v16 }
  0x27   : > { %402 = vst [vmem:[%s1740_s7 + $0x88] sm:$0xff] %v401_v17  ;;  %v403_v18 = vld [vmem:[%s1735_s6 + $0x480] sm:$0xff] }
  0x28   : > { %v405_v19 = vld [vmem:[%s1735_s6 + $0x4c0] sm:$0xff]  ;;  %404 = vst [vmem:[%s1740_s7 + $0x90] sm:$0xff] %v403_v18 }
  0x29   : > { %v407_v20 = vld [vmem:[%s1735_s6 + $0x500] sm:$0xff]  ;;  %406 = vst [vmem:[%s1740_s7 + $0x98] sm:$0xff] %v405_v19 }
  0x2a   : > { %408 = vst [vmem:[%s1740_s7 + $0xa0] sm:$0xff] %v407_v20  ;;  %v409_v21 = vld [vmem:[%s1735_s6 + $0x540] sm:$0xff] }
  0x2b   : > { %v411_v22 = vld [vmem:[%s1735_s6 + $0x580] sm:$0xff]  ;;  %410 = vst [vmem:[%s1740_s7 + $0xa8] sm:$0xff] %v409_v21 }
  0x2c   : > { %v413_v23 = vld [vmem:[%s1735_s6 + $0x5c0] sm:$0xff]  ;;  %412 = vst [vmem:[%s1740_s7 + $0xb0] sm:$0xff] %v411_v22 }
  0x2d   : > { %414 = vst [vmem:[%s1740_s7 + $0xb8] sm:$0xff] %v413_v23  ;;  %v415_v24 = vld [vmem:[%s1735_s6 + $0x600] sm:$0xff] }
  0x2e   : > { %v417_v25 = vld [vmem:[%s1735_s6 + $0x640] sm:$0xff]  ;;  %416 = vst [vmem:[%s1740_s7 + $0xc0] sm:$0xff] %v415_v24 }
  0x2f   : > { %v419_v26 = vld [vmem:[%s1735_s6 + $0x680] sm:$0xff]  ;;  %418 = vst [vmem:[%s1740_s7 + $0xc8] sm:$0xff] %v417_v25 }
  0x30   : > { %420 = vst [vmem:[%s1740_s7 + $0xd0] sm:$0xff] %v419_v26  ;;  %v421_v27 = vld [vmem:[%s1735_s6 + $0x6c0] sm:$0xff] }
  0x31   : > { %v423_v28 = vld [vmem:[%s1735_s6 + $0x700] sm:$0xff]  ;;  %422 = vst [vmem:[%s1740_s7 + $0xd8] sm:$0xff] %v421_v27 }
  0x32   : > { %v425_v29 = vld [vmem:[%s1735_s6 + $0x740] sm:$0xff]  ;;  %424 = vst [vmem:[%s1740_s7 + $0xe0] sm:$0xff] %v423_v28 }
  0x33   : > { %426 = vst [vmem:[%s1740_s7 + $0xe8] sm:$0xff] %v425_v29  ;;  %v427_v30 = vld [vmem:[%s1735_s6 + $0x780] sm:$0xff] }
  0x34   : > { %v429_v31 = vld [vmem:[%s1735_s6 + $0x7c0] sm:$0xff]  ;;  %428 = vst [vmem:[%s1740_s7 + $0xf0] sm:$0xff] %v427_v30 }
  0x35   : > { %v431_v32 = vld [vmem:[%s1735_s6 + $0x800] sm:$0xff]  ;;  %430 = vst [vmem:[%s1740_s7 + $0xf8] sm:$0xff] %v429_v31 }
  0x36   : > { %432 = vst [vmem:[%s1740_s7 + $0x100] sm:$0xff] %v431_v32  ;;  %v433_v33 = vld [vmem:[%s1735_s6 + $0x840] sm:$0xff] }
  0x37   : > { %v435_v34 = vld [vmem:[%s1735_s6 + $0x880] sm:$0xff]  ;;  %434 = vst [vmem:[%s1740_s7 + $0x108] sm:$0xff] %v433_v33 }
  0x38   : > { %v437_v35 = vld [vmem:[%s1735_s6 + $0x8c0] sm:$0xff]  ;;  %436 = vst [vmem:[%s1740_s7 + $0x110] sm:$0xff] %v435_v34 }
  0x39   : > { %438 = vst [vmem:[%s1740_s7 + $0x118] sm:$0xff] %v437_v35  ;;  %v439_v36 = vld [vmem:[%s1735_s6 + $0x900] sm:$0xff] }
  0x3a   : > { %v441_v37 = vld [vmem:[%s1735_s6 + $0x940] sm:$0xff]  ;;  %440 = vst [vmem:[%s1740_s7 + $0x120] sm:$0xff] %v439_v36 }
  0x3b   : > { %v443_v38 = vld [vmem:[%s1735_s6 + $0x980] sm:$0xff]  ;;  %442 = vst [vmem:[%s1740_s7 + $0x128] sm:$0xff] %v441_v37 }
  0x3c   : > { %444 = vst [vmem:[%s1740_s7 + $0x130] sm:$0xff] %v443_v38  ;;  %v445_v39 = vld [vmem:[%s1735_s6 + $0x9c0] sm:$0xff] }
  0x3d   : > { %v447_v40 = vld [vmem:[%s1735_s6 + $0xa00] sm:$0xff]  ;;  %446 = vst [vmem:[%s1740_s7 + $0x138] sm:$0xff] %v445_v39 }
  0x3e   : > { %v449_v41 = vld [vmem:[%s1735_s6 + $0xa40] sm:$0xff]  ;;  %448 = vst [vmem:[%s1740_s7 + $0x140] sm:$0xff] %v447_v40 }
  0x3f   : > { %450 = vst [vmem:[%s1740_s7 + $0x148] sm:$0xff] %v449_v41  ;;  %v451_v42 = vld [vmem:[%s1735_s6 + $0xa80] sm:$0xff] }
  0x40   : > { %v453_v43 = vld [vmem:[%s1735_s6 + $0xac0] sm:$0xff]  ;;  %452 = vst [vmem:[%s1740_s7 + $0x150] sm:$0xff] %v451_v42 }
  0x41   : > { %v455_v44 = vld [vmem:[%s1735_s6 + $0xb00] sm:$0xff]  ;;  %454 = vst [vmem:[%s1740_s7 + $0x158] sm:$0xff] %v453_v43 }
  0x42   : > { %456 = vst [vmem:[%s1740_s7 + $0x160] sm:$0xff] %v455_v44  ;;  %v457_v45 = vld [vmem:[%s1735_s6 + $0xb40] sm:$0xff] }
  0x43   : > { %v459_v46 = vld [vmem:[%s1735_s6 + $0xb80] sm:$0xff]  ;;  %458 = vst [vmem:[%s1740_s7 + $0x168] sm:$0xff] %v457_v45 }
  0x44   : > { %v461_v47 = vld [vmem:[%s1735_s6 + $0xbc0] sm:$0xff]  ;;  %460 = vst [vmem:[%s1740_s7 + $0x170] sm:$0xff] %v459_v46 }
  0x45   : > { %462 = vst [vmem:[%s1740_s7 + $0x178] sm:$0xff] %v461_v47  ;;  %v463_v48 = vld [vmem:[%s1735_s6 + $0xc00] sm:$0xff] }
  0x46   : > { %v465_v49 = vld [vmem:[%s1735_s6 + $0xc40] sm:$0xff]  ;;  %464 = vst [vmem:[%s1740_s7 + $0x180] sm:$0xff] %v463_v48 }
  0x47   : > { %v467_v50 = vld [vmem:[%s1735_s6 + $0xc80] sm:$0xff]  ;;  %466 = vst [vmem:[%s1740_s7 + $0x188] sm:$0xff] %v465_v49 }
  0x48   : > { %468 = vst [vmem:[%s1740_s7 + $0x190] sm:$0xff] %v467_v50  ;;  %v469_v51 = vld [vmem:[%s1735_s6 + $0xcc0] sm:$0xff] }
  0x49   : > { %v471_v52 = vld [vmem:[%s1735_s6 + $0xd00] sm:$0xff]  ;;  %470 = vst [vmem:[%s1740_s7 + $0x198] sm:$0xff] %v469_v51 }
  0x4a   : > { %v473_v53 = vld [vmem:[%s1735_s6 + $0xd40] sm:$0xff]  ;;  %472 = vst [vmem:[%s1740_s7 + $0x1a0] sm:$0xff] %v471_v52 }
  0x4b   : > { %474 = vst [vmem:[%s1740_s7 + $0x1a8] sm:$0xff] %v473_v53  ;;  %v475_v54 = vld [vmem:[%s1735_s6 + $0xd80] sm:$0xff] }
  0x4c   : > { %v477_v55 = vld [vmem:[%s1735_s6 + $0xdc0] sm:$0xff]  ;;  %476 = vst [vmem:[%s1740_s7 + $0x1b0] sm:$0xff] %v475_v54 }
  0x4d   : > { %v479_v56 = vld [vmem:[%s1735_s6 + $0xe00] sm:$0xff]  ;;  %478 = vst [vmem:[%s1740_s7 + $0x1b8] sm:$0xff] %v477_v55 }
  0x4e   : > { %480 = vst [vmem:[%s1740_s7 + $0x1c0] sm:$0xff] %v479_v56  ;;  %v481_v57 = vld [vmem:[%s1735_s6 + $0xe40] sm:$0xff] }
  0x4f   : > { %v483_v58 = vld [vmem:[%s1735_s6 + $0xe80] sm:$0xff]  ;;  %482 = vst [vmem:[%s1740_s7 + $0x1c8] sm:$0xff] %v481_v57 }
  0x50   : > { %v485_v59 = vld [vmem:[%s1735_s6 + $0xec0] sm:$0xff]  ;;  %484 = vst [vmem:[%s1740_s7 + $0x1d0] sm:$0xff] %v483_v58 }
  0x51   : > { %486 = vst [vmem:[%s1740_s7 + $0x1d8] sm:$0xff] %v485_v59  ;;  %v487_v60 = vld [vmem:[%s1735_s6 + $0xf00] sm:$0xff] }
  0x52   : > { %v489_v61 = vld [vmem:[%s1735_s6 + $0xf40] sm:$0xff]  ;;  %488 = vst [vmem:[%s1740_s7 + $0x1e0] sm:$0xff] %v487_v60 }
  0x53   : > { %v491_v62 = vld [vmem:[%s1735_s6 + $0xf80] sm:$0xff]  ;;  %490 = vst [vmem:[%s1740_s7 + $0x1e8] sm:$0xff] %v489_v61 }
  0x54   : > { %492 = vst [vmem:[%s1740_s7 + $0x1f0] sm:$0xff] %v491_v62  ;;  %v493_v63 = vld [vmem:[%s1735_s6 + $0xfc0] sm:$0xff] }
  0x55   : > { %494 = vst [vmem:[%s1740_s7 + $0x1f8] sm:$0xff] %v493_v63 }
  0x56 PF: > { %508 = sbr.rel (!%p1713_p3) target bundleno = 93 (0x5d), region = 66  ;;  %s510_s8 = sand.u32 (%p1713_p3), 1, %s1642_s16  }
  0x57   : > { %s1466_s9 = sshll.u32 (%p1713_p3), %s1650_s18, 3  ;;  %s1382_s10 = sshll.u32 (%p1713_p3), %s510_s8, 4 }
  0x58   : > { %s518_s13 = scalar_lea.vmem (%p1713_p3), %s1991_s3, %s1466_s9  ;;  %s512_s14 = scalar_lea.vmem (%p1713_p3), [#allocation4], %s1382_s10 }
  0x59   : > { %v548_v0 = vld [vmem:[%s518_s13] sm:$0xff] (%p1713_p3) }
  0x5a   : > { %v550_v1 = vld [vmem:[%s518_s13 + $0x40] sm:$0xff] (%p1713_p3)  ;;  %549 = vst [vmem:[%s512_s14] sm:$0xff] (%p1713_p3), %v548_v0 }
  0x5b   : > { %551 = vst [vmem:[%s512_s14 + $0x8] sm:$0xff] (%p1713_p3), %v550_v1 }
  0x5d PF: > { %p1385_p8 = scmp.ge.s32.totalorder %s1654_s19, 1  ;;  %p556_p9 = scmp.lt.s32.totalorder %s1654_s19, 9 }
  0x5f   : > { %p557_p10 = pnand %p1385_p8, %p556_p9 }
  0x60   : > { %s563_s21 = sand.u32 (!%p557_p10), 1, %s1638_s15   ;;  %v1612_v2 = vld [vmem:[%s1988_s0 + $0x4] ss:$16 sps:$4 sm:$0xff] (!%p557_p10)   ;;  %v1615_v3 = vld [vmem:[%s1988_s0 + $0xc] ss:$16 sps:$4 sm:$0xff] (!%p557_p10)   ;;  %s1389_s8 = sshll.u32 (!%p557_p10), %s1646_s17, 1 }
  0x61   : > { %560 = sbr.rel (%p557_p10) target bundleno = 399 (0x18f), region = 104  ;;  %s1386_s22 = sshll.u32 (!%p557_p10), %s563_s21, 9  ;;  %1087 = vmatprep.mubr.bf16.mxu1 (!%p557_p10), %v1612_v2  ;;  %1130 = vmatprep.mubr.bf16.mxu0 (!%p557_p10), %v1615_v3 }
  0x62   : > { %s1885_s29 = scalar_lea.vmem (!%p557_p10), [#allocation3], %s1386_s22  ;;  %p627_p11 = scmp.lt.s32.totalorder (!%p557_p10), %s1389_s8, 15 }
  0x63   : > { %v1514_v4 = vld [vmem:[%s1885_s29 + $0x4] ss:$8 sps:$4 sm:$0xff] (!%p557_p10)   ;;  %v1518_v6 = vld [vmem:[%s1885_s29] ss:$8 sps:$4 sm:$0xff] (!%p557_p10)   ;;  %v1520_v8 = vld [vmem:[%s1885_s29 + $0x14] ss:$8 sps:$4 sm:$0xff] (!%p557_p10)  }
  0x64   : > { %v1516_v5 = vld [vmem:[%s1885_s29 + $0x104] ss:$8 sps:$4 sm:$0xff] (!%p557_p10)   ;;  %1055 = vmatprep.subr.bf16.mxu1 (!%p557_p10), %v1514_v4  ;;  %v1519_v7 = vld [vmem:[%s1885_s29 + $0x100] ss:$8 sps:$4 sm:$0xff] (!%p557_p10)   ;;  %v1522_v9 = vld [vmem:[%s1885_s29 + $0x114] ss:$8 sps:$4 sm:$0xff] (!%p557_p10)  }
  0x65   : > { %1098 = vmatprep.subr.bf16.mxu0 (!%p557_p10), %v1516_v5  ;;  %1056 = vmatpush1.bf16.msra.mxu1 (!%p557_p10), %v1518_v6  ;;  %v1524_v10 = vld [vmem:[%s1885_s29 + $0x10] ss:$8 sps:$4 sm:$0xff] (!%p557_p10)   ;;  %v1526_v12 = vld [vmem:[%s1885_s29 + $0x24] ss:$8 sps:$4 sm:$0xff] (!%p557_p10)   ;;  %v1530_v14 = vld [vmem:[%s1885_s29 + $0x20] ss:$8 sps:$4 sm:$0xff] (!%p557_p10)   ;;  %v1158_v6 = vlaneseq (!%p557_p10) }
  0x66   : > { %1099 = vmatpush1.bf16.msra.mxu0 (!%p557_p10), %v1519_v7  ;;  %1057 = vmatprep.subr.bf16.mxu1 (!%p557_p10), %v1520_v8  ;;  %v1525_v11 = vld [vmem:[%s1885_s29 + $0x110] ss:$8 sps:$4 sm:$0xff] (!%p557_p10)   ;;  %v1528_v13 = vld [vmem:[%s1885_s29 + $0x124] ss:$8 sps:$4 sm:$0xff] (!%p557_p10)   ;;  %v1531_v15 = vld [vmem:[%s1885_s29 + $0x120] ss:$8 sps:$4 sm:$0xff] (!%p557_p10)  }
  0x67   : > { %1100 = vmatprep.subr.bf16.mxu0 (!%p557_p10), %v1522_v9  ;;  %v1532_v16 = vld [vmem:[%s1885_s29 + $0x34] ss:$8 sps:$4 sm:$0xff] (!%p557_p10)   ;;  %v1536_v18 = vld [vmem:[%s1885_s29 + $0x30] ss:$8 sps:$4 sm:$0xff] (!%p557_p10)   ;;  %v1538_v20 = vld [vmem:[%s1885_s29 + $0x44] ss:$8 sps:$4 sm:$0xff] (!%p557_p10)  }
  0x68   : > { %v1534_v17 = vld [vmem:[%s1885_s29 + $0x134] ss:$8 sps:$4 sm:$0xff]   ;;  %v1537_v19 = vld [vmem:[%s1885_s29 + $0x130] ss:$8 sps:$4 sm:$0xff]   ;;  %v1540_v21 = vld [vmem:[%s1885_s29 + $0x144] ss:$8 sps:$4 sm:$0xff]  }
  0x69   : > { %1058 = vmatpush1.bf16.msra.mxu1 %v1524_v10  ;;  %v1542_v22 = vld [vmem:[%s1885_s29 + $0x40] ss:$8 sps:$4 sm:$0xff]   ;;  %v1544_v24 = vld [vmem:[%s1885_s29 + $0x54] ss:$8 sps:$4 sm:$0xff]   ;;  %v1548_v26 = vld [vmem:[%s1885_s29 + $0x50] ss:$8 sps:$4 sm:$0xff]  }
  0x6a   : > { %1101 = vmatpush1.bf16.msra.mxu0 %v1525_v11  ;;  %1059 = vmatprep.subr.bf16.mxu1 %v1526_v12  ;;  %v1543_v23 = vld [vmem:[%s1885_s29 + $0x140] ss:$8 sps:$4 sm:$0xff]   ;;  %v1546_v25 = vld [vmem:[%s1885_s29 + $0x154] ss:$8 sps:$4 sm:$0xff]   ;;  %v1549_v27 = vld [vmem:[%s1885_s29 + $0x150] ss:$8 sps:$4 sm:$0xff]  }
  0x6b   : > { %1102 = vmatprep.subr.bf16.mxu0 %v1528_v13  ;;  %v1550_v28 = vld [vmem:[%s1885_s29 + $0x64] ss:$8 sps:$4 sm:$0xff]   ;;  %v1554_v30 = vld [vmem:[%s1885_s29 + $0x60] ss:$8 sps:$4 sm:$0xff]   ;;  %v1556_v32 = vld [vmem:[%s1885_s29 + $0x74] ss:$8 sps:$4 sm:$0xff]  }
  0x6c   : > { %v1552_v29 = vld [vmem:[%s1885_s29 + $0x164] ss:$8 sps:$4 sm:$0xff]   ;;  %v1555_v31 = vld [vmem:[%s1885_s29 + $0x160] ss:$8 sps:$4 sm:$0xff]   ;;  %v1558_v33 = vld [vmem:[%s1885_s29 + $0x174] ss:$8 sps:$4 sm:$0xff]  }
  0x6d   : > { %1060 = vmatpush1.bf16.msra.mxu1 %v1530_v14  ;;  %v1560_v34 = vld [vmem:[%s1885_s29 + $0x70] ss:$8 sps:$4 sm:$0xff]   ;;  %v1562_v36 = vld [vmem:[%s1885_s29 + $0x84] ss:$8 sps:$4 sm:$0xff]   ;;  %v1566_v38 = vld [vmem:[%s1885_s29 + $0x80] ss:$8 sps:$4 sm:$0xff]  }
  0x6e   : > { %1103 = vmatpush1.bf16.msra.mxu0 %v1531_v15  ;;  %1061 = vmatprep.subr.bf16.mxu1 %v1532_v16  ;;  %v1561_v35 = vld [vmem:[%s1885_s29 + $0x170] ss:$8 sps:$4 sm:$0xff]   ;;  %v1564_v37 = vld [vmem:[%s1885_s29 + $0x184] ss:$8 sps:$4 sm:$0xff]   ;;  %v1567_v39 = vld [vmem:[%s1885_s29 + $0x180] ss:$8 sps:$4 sm:$0xff]  }
  0x6f   : > { %1104 = vmatprep.subr.bf16.mxu0 %v1534_v17  ;;  %v1568_v40 = vld [vmem:[%s1885_s29 + $0x94] ss:$8 sps:$4 sm:$0xff]   ;;  %v1572_v42 = vld [vmem:[%s1885_s29 + $0x90] ss:$8 sps:$4 sm:$0xff]   ;;  %v1574_v44 = vld [vmem:[%s1885_s29 + $0xa4] ss:$8 sps:$4 sm:$0xff]  }
  0x70   : > { %v1570_v41 = vld [vmem:[%s1885_s29 + $0x194] ss:$8 sps:$4 sm:$0xff]   ;;  %v1573_v43 = vld [vmem:[%s1885_s29 + $0x190] ss:$8 sps:$4 sm:$0xff]   ;;  %v1576_v45 = vld [vmem:[%s1885_s29 + $0x1a4] ss:$8 sps:$4 sm:$0xff]  }
  0x71   : > { %1062 = vmatpush1.bf16.msra.mxu1 %v1536_v18  ;;  %v1578_v46 = vld [vmem:[%s1885_s29 + $0xa0] ss:$8 sps:$4 sm:$0xff]   ;;  %v1580_v48 = vld [vmem:[%s1885_s29 + $0xb4] ss:$8 sps:$4 sm:$0xff]   ;;  %v1584_v50 = vld [vmem:[%s1885_s29 + $0xb0] ss:$8 sps:$4 sm:$0xff]  }
  0x72   : > { %1105 = vmatpush1.bf16.msra.mxu0 %v1537_v19  ;;  %1063 = vmatprep.subr.bf16.mxu1 %v1538_v20  ;;  %v1579_v47 = vld [vmem:[%s1885_s29 + $0x1a0] ss:$8 sps:$4 sm:$0xff]   ;;  %v1582_v49 = vld [vmem:[%s1885_s29 + $0x1b4] ss:$8 sps:$4 sm:$0xff]   ;;  %v1585_v51 = vld [vmem:[%s1885_s29 + $0x1b0] ss:$8 sps:$4 sm:$0xff]  }
  0x73   : > { %1106 = vmatprep.subr.bf16.mxu0 %v1540_v21  ;;  %v1586_v52 = vld [vmem:[%s1885_s29 + $0xc4] ss:$8 sps:$4 sm:$0xff]   ;;  %v1590_v54 = vld [vmem:[%s1885_s29 + $0xc0] ss:$8 sps:$4 sm:$0xff]   ;;  %v1592_v56 = vld [vmem:[%s1885_s29 + $0xd4] ss:$8 sps:$4 sm:$0xff]  }
  0x74   : > { %v1588_v53 = vld [vmem:[%s1885_s29 + $0x1c4] ss:$8 sps:$4 sm:$0xff]   ;;  %v1591_v55 = vld [vmem:[%s1885_s29 + $0x1c0] ss:$8 sps:$4 sm:$0xff]   ;;  %v1594_v57 = vld [vmem:[%s1885_s29 + $0x1d4] ss:$8 sps:$4 sm:$0xff]  }
  0x75   : > { %1064 = vmatpush1.bf16.msra.mxu1 %v1542_v22  ;;  %v1596_v58 = vld [vmem:[%s1885_s29 + $0xd0] ss:$8 sps:$4 sm:$0xff]   ;;  %v1598_v60 = vld [vmem:[%s1885_s29 + $0xe4] ss:$8 sps:$4 sm:$0xff]   ;;  %v1602_v62 = vld [vmem:[%s1885_s29 + $0xe0] ss:$8 sps:$4 sm:$0xff]  }
  0x76   : > { %1107 = vmatpush1.bf16.msra.mxu0 %v1543_v23  ;;  %1065 = vmatprep.subr.bf16.mxu1 %v1544_v24  ;;  %v1597_v59 = vld [vmem:[%s1885_s29 + $0x1d0] ss:$8 sps:$4 sm:$0xff]   ;;  %v1600_v61 = vld [vmem:[%s1885_s29 + $0x1e4] ss:$8 sps:$4 sm:$0xff]   ;;  %v1603_v63 = vld [vmem:[%s1885_s29 + $0x1e0] ss:$8 sps:$4 sm:$0xff]  }
  0x77   : > { %1108 = vmatprep.subr.bf16.mxu0 %v1546_v25  ;;  %v1604_v0 = vld [vmem:[%s1885_s29 + $0xf4] ss:$8 sps:$4 sm:$0xff]   ;;  %v1608_v2 = vld [vmem:[%s1885_s29 + $0xf0] ss:$8 sps:$4 sm:$0xff]   ;;  %s2002_s8 = smov (!%p627_p11, %s1389_s8), 15  ;;  %v1159_v7 = vshrl.u32 %v1158_v6, 7 }
  0x78   : > { %v1606_v1 = vld [vmem:[%s1885_s29 + $0x1f4] ss:$8 sps:$4 sm:$0xff]   ;;  %v1609_v3 = vld [vmem:[%s1885_s29 + $0x1f0] ss:$8 sps:$4 sm:$0xff]   ;;  %s1960_s9 = sshll.u32 %s563_s21, 4  ;;  %s629_s12 = scalar_lea.vmem %s1990_s2, %s2002_s8 }
  0x79   : > { %1066 = vmatpush1.bf16.msra.mxu1 %v1548_v26  ;;  %v1610_v4 = vld [vmem:[%s1988_s0] ss:$16 sps:$4 sm:$0xff]   ;;  %v1613_v5 = vld [vmem:[%s1988_s0 + $0x8] ss:$16 sps:$4 sm:$0xff]   ;;  %v1160_v8 = vsub.s32 0, %v1159_v7  ;;  %v1164_v10 = vsub.s32 1, %v1159_v7 }
  0x7a   : > { %1109 = vmatpush1.bf16.msra.mxu0 %v1549_v27  ;;  %1067 = vmatprep.subr.bf16.mxu1 %v1550_v28  ;;  %v1156_v9 = vld [vmem:[%s629_s12] sm:$0x3]  ;;  %s572_s13 = scalar_lea.vmem [#allocation4], %s1960_s9  ;;  %s611_s15 = scalar_lea.vmem [#allocation5], %s1960_s9 }
  0x7b   : > { %1110 = vmatprep.subr.bf16.mxu0 %v1552_v29  ;;  %v1172_v11 = vld [vmem:[%s572_s13] sm:$0xff]  ;;  %v1161_v12 = vrot.slane %v1156_v9, %v1160_v8  ;;  %v1165_v15 = vrot.slane %v1156_v9, %v1164_v10  ;;  %v1173_v16 = vld [vmem:[%s572_s13 + $0x8] sm:$0xff]  ;;  %s1469_s14 = sshll.u32 (%p1720_p6), %s1646_s17, 3 }
  0x7c   : > { %v1174_v18 = vunpack.c.l.bf16 %v1172_v11  ;;  %v1175_v22 = vunpack.c.h.bf16 %v1172_v11  ;;  %v1176_v27 = vunpack.c.l.bf16 %v1173_v16  ;;  %s1212_s23 = scalar_lea.vmem (%p1720_p6), %s1992_s4, %s1469_s14 }
  0x7d   : > { %1068 = vmatpush1.bf16.msra.mxu1 %v1554_v30 }
  0x7e   : > { %1111 = vmatpush1.bf16.msra.mxu0 %v1555_v31  ;;  %1069 = vmatprep.subr.bf16.mxu1 %v1556_v32  ;;  %v1177_v32 = vunpack.c.h.bf16 %v1173_v16 }
  0x7f   : > { %1112 = vmatprep.subr.bf16.mxu0 %v1558_v33 }
  0x81   : > { %1070 = vmatpush1.bf16.msra.mxu1 %v1560_v34 }
  0x82   : > { %1113 = vmatpush1.bf16.msra.mxu0 %v1561_v35  ;;  %1071 = vmatprep.subr.bf16.mxu1 %v1562_v36 }
  0x83   : > { %1114 = vmatprep.subr.bf16.mxu0 %v1564_v37 }
  0x85   : > { %1072 = vmatpush1.bf16.msra.mxu1 %v1566_v38 }
  0x86   : > { %1115 = vmatpush1.bf16.msra.mxu0 %v1567_v39  ;;  %1073 = vmatprep.subr.bf16.mxu1 %v1568_v40 }
  0x87   : > { %1116 = vmatprep.subr.bf16.mxu0 %v1570_v41 }
  0x89   : > { %1074 = vmatpush1.bf16.msra.mxu1 %v1572_v42 }
  0x8a   : > { %1117 = vmatpush1.bf16.msra.mxu0 %v1573_v43  ;;  %1075 = vmatprep.subr.bf16.mxu1 %v1574_v44 }
  0x8b   : > { %1118 = vmatprep.subr.bf16.mxu0 %v1576_v45 }
  0x8d   : > { %1076 = vmatpush1.bf16.msra.mxu1 %v1578_v46 }
  0x8e   : > { %1119 = vmatpush1.bf16.msra.mxu0 %v1579_v47  ;;  %1077 = vmatprep.subr.bf16.mxu1 %v1580_v48 }
  0x8f   : > { %1120 = vmatprep.subr.bf16.mxu0 %v1582_v49 }
  0x91   : > { %1078 = vmatpush1.bf16.msra.mxu1 %v1584_v50 }
  0x92   : > { %1121 = vmatpush1.bf16.msra.mxu0 %v1585_v51  ;;  %1079 = vmatprep.subr.bf16.mxu1 %v1586_v52 }
  0x93   : > { %1122 = vmatprep.subr.bf16.mxu0 %v1588_v53 }
  0x95   : > { %1080 = vmatpush1.bf16.msra.mxu1 %v1590_v54 }
  0x96   : > { %1123 = vmatpush1.bf16.msra.mxu0 %v1591_v55  ;;  %1081 = vmatprep.subr.bf16.mxu1 %v1592_v56 }
  0x97   : > { %1124 = vmatprep.subr.bf16.mxu0 %v1594_v57 }
  0x99   : > { %1082 = vmatpush1.bf16.msra.mxu1 %v1596_v58 }
  0x9a   : > { %1125 = vmatpush1.bf16.msra.mxu0 %v1597_v59  ;;  %1083 = vmatprep.subr.bf16.mxu1 %v1598_v60 }
  0x9b   : > { %1126 = vmatprep.subr.bf16.mxu0 %v1600_v61 }
  0x9d   : > { %1084 = vmatpush1.bf16.msra.mxu1 %v1602_v62 }
  0x9e   : > { %1127 = vmatpush1.bf16.msra.mxu0 %v1603_v63  ;;  %1085 = vmatprep.subr.bf16.mxu1 %v1604_v0 }
  0x9f   : > { %1128 = vmatprep.subr.bf16.mxu0 %v1606_v1 }
  0xa1   : > { %1086 = vmatpush1.bf16.msra.mxu1 %v1608_v2 }
  0xa2   : > { %1129 = vmatpush1.bf16.msra.mxu0 %v1609_v3 }
  0xa4   : > { %1088 = vmatmul.mubr.bf16.vlgmr.msra.gmra.mrb[0].mxu1 %v1610_v4 }
  0xa5   : > { %1131 = vmatmul.mubr.bf16.vlgmr.msra.gmra.mrb[0].mxu0 %v1613_v5 }
 0x177   : > { %v1089_v13 = vpop.f32.mrb[0].mxu1 }
 0x178   : > { %v1132_v14 = vpop.f32.mrb[0].mxu0  ;;  %v1091_v19 = vpop.f32.mrb[1].mxu1 }
 0x179   : > { %v1133_v17 = vadd.f32 %v1132_v14, %v1089_v13  ;;  %v1134_v20 = vpop.f32.mrb[1].mxu0  ;;  %v1093_v23 = vpop.f32.mrb[2].mxu1 }
 0x17a   : > { %v1135_v21 = vadd.f32 %v1134_v20, %v1091_v19  ;;  %v1136_v24 = vpop.f32.mrb[2].mxu0  ;;  %v1095_v28 = vpop.f32.mrb[3].mxu1 }
 0x17b   : > { %v1168_v25 = vadd.f32 %v1161_v12, %v1133_v17  ;;  %v1137_v26 = vadd.f32 %v1136_v24, %v1093_v23  ;;  %v1138_v29 = vpop.f32.mrb[3].mxu0 }
 0x17c   : > { %v1169_v30 = vadd.f32 %v1165_v15, %v1135_v21  ;;  %v1139_v31 = vadd.f32 %v1138_v29, %v1095_v28 }
 0x17d   : > { %v1178_v33 = vadd.f32 %v1174_v18, %v1168_v25  ;;  %v1170_v34 = vadd.f32 %v1161_v12, %v1137_v26 }
 0x17e   : > { %v1179_v35 = vadd.f32 %v1175_v22, %v1169_v30  ;;  %v1171_v36 = vadd.f32 %v1165_v15, %v1139_v31 }
 0x17f   : > { %v1182_v37 = vmax.f32 %v1178_v33, 0.0  ;;  %v1180_v38 = vadd.f32 %v1176_v27, %v1170_v34 }
 0x180   : > { %v1183_v39 = vmax.f32 %v1179_v35, 0.0  ;;  %v1181_v40 = vadd.f32 %v1177_v32, %v1171_v36  ;;  %1206 = sbr.rel (!%p1720_p6) target bundleno = 399 (0x18f), region = 124 }
 0x181   : > { %v1184_v41 = vmax.f32 %v1180_v38, 0.0 }
 0x182   : > { %v1467_v42 = vpack.c.bf16 %v1183_v39, %v1182_v37  ;;  %v1185_v43 = vmax.f32 %v1181_v40, 0.0 }
 0x184   : > { %1198 = vst [vmem:[%s611_s15] sm:$0xff] %v1467_v42  ;;  %v1468_v44 = vpack.c.bf16 %v1185_v43, %v1184_v41 }
 0x186   : > { %1199 = vst [vmem:[%s611_s15 + $0x8] sm:$0xff] %v1468_v44 }
 0x18b   : > { %v1242_v45 = vld [vmem:[%s611_s15] sm:$0xff] }
 0x18c   : > { %1243 = vst [vmem:[%s1212_s23] sm:$0xff] %v1242_v45 }
 0x18d   : > { %v1244_v46 = vld [vmem:[%s611_s15 + $0x8] sm:$0xff] }
 0x18e   : > { %1245 = vst [vmem:[%s1212_s23 + $0x40] sm:$0xff] %v1244_v46 }
 0x18f PF: > { %s14_s19 = sadd.s32 1, %s1654_s19   ;;  %s1995_s15 = smov %s1642_s16 }
 0x190   : > { %p11_p12 = scmp.ge.s32.totalorder %s14_s19, 10   ;;  %s1996_s16 = smov %s1725_s26 }
 0x191   : > { %s1997_s17 = smov %s1650_s18  ;;  %s1998_s18 = smov %s2000_s20 }
 0x192   :  { %13 = sbr.rel (!%p11_p12) target bundleno = 3 (0x3), region = 207 }

// kernel: resnet50_forward.102
= control target key start
LH: loop header
LB: loop body
LE: loop exit
PB: predicated region body
PF: predicated region fallthrough
CT: control target
= control target key end

     0   :  { %s2051_s0 = inlined_call_operand.vmem [shape: bf16[16,2048], index: 0, kind: input, shape index: {}]   ;;  %s2052_s1 = inlined_call_operand.vmem [shape: bf16[2048,512], index: 1, kind: input, shape index: {}]   ;;  %s2053_s2 = inlined_call_operand.vmem [shape: f32[1,512], index: 2, kind: input, shape index: {}]   ;;  %s2054_s3 = inlined_call_operand.vmem [shape: bf16[16,512], index: 3, kind: output, shape index: {}]  }
   0x1   :  { %2056 = sst [smem:[#allocation7_spill]] %s2051_s0 }
   0x2   :  { %2057 = sst [smem:[#allocation8_spill]] %s2052_s1 }
   0x3   :  { %s1669_s12 = smov 0   ;;  %s1671_s13 = smov 0  }
   0x4   :  { %s1673_s14 = smov 0   ;;  %s1675_s15 = smov 0  }
   0x5   :  { %s1677_s16 = smov 0   ;;  %s1679_s17 = smov 0  }
   0x6   :  { %s1681_s18 = smov 0   ;;  %s1683_s19 = smov 0  }
   0x7   :  { %s1685_s20 = smov 0   ;;  %s1687_s21 = smov 0  }
   0x8   :  { %s1689_s22 = smov 0  }
   0x9 LB: > { %s1266_s23 = sadd.s32 4294967295, %s1646_s22   ;;  %s25_s24 = sadd.s32 1, %s1638_s20  ;;  %s1646_s22 = sphi %s1689_s22, %s13_s22   ;;  %s1642_s21 = sphi %s1687_s21, %s2074_s21   ;;  %s1638_s20 = sphi %s1685_s20, %s2073_s20   ;;  %s1634_s19 = sphi %s1683_s19, %s2072_s19   ;;  %s1630_s18 = sphi %s1681_s18, %s2071_s18   ;;  %s1626_s17 = sphi %s1679_s17, %s2070_s17   ;;  %s1622_s16 = sphi %s1677_s16, %s2069_s16   ;;  %s1618_s15 = sphi %s1675_s15, %s2068_s15   ;;  %s1614_s14 = sphi %s1673_s14, %s2067_s14   ;;  %s1610_s13 = sphi %s1671_s13, %s2066_s13   ;;  %s1606_s12 = sphi %s1669_s12, %s2065_s12  }
   0xa   : > { %p26_p0 = scmp.ge.s32.totalorder %s25_s24, 4  ;;  %s28_s25 = sadd.s32 1, %s1642_s21 }
   0xb   : > { %s41_s26 = sadd.s32 1, %s1626_s17  ;;  %p48_p1 = scmp.ne.s32.totalorder %s1626_s17, %s1622_s16 }
   0xc   : > { %s2076_s24 = smov (%p26_p0, %s25_s24), 0  ;;  %s2078_s25 = smov (!%p26_p0, %s28_s25), %s1642_s21 }
   0xd   : > { %s37_s27 = ssub.s32 %s1638_s20, %s2076_s24  ;;  %p49_p2 = scmp.eq.s32.totalorder %s1646_s22, 0 }
   0xe   : > { %p30_p3 = scmp.ge.s32.totalorder %s2078_s25, 2  ;;  %p39_p4 = scmp.eq.s32.totalorder %s37_s27, 0 }
   0xf   : > { %p1736_p5 = por %p49_p2, %p48_p1  ;;  %s69_s29 = sadd.s32 1, %s1618_s15 }
  0x10   : > { %s2080_s25 = smov (%p30_p3, %s2078_s25), 0  ;;  %p76_p6 = scmp.ne.s32.totalorder %s1618_s15, %s1614_s14 }
  0x11   : > { %2059 = sst [smem:[#allocation6_spill]] %s2080_s25  ;;  %s65_s4 = ssub.s32 %s1642_s21, %s2080_s25 }
  0x12   : > { %s1744_s30 = scalar_select %p39_p4, %s1626_s17, %s41_s26  }
  0x13   : > { %s66_s5 = sor.u32 %s65_s4, %s37_s27  ;;  %p121_p7 = scmp.eq.s32.totalorder %s65_s4, 0 }
  0x14   : > { %p67_p8 = scmp.eq.s32.totalorder %s66_s5, 0  ;;  %p1750_p9 = por %p76_p6, %p49_p2 }
  0x15   : > { %s123_s7 = sadd.s32 1, %s1610_s13  ;;  %p133_p10 = scmp.ne.s32.totalorder %s1610_s13, %s1606_s12 }
  0x16   : > { %s1758_s8 = scalar_select %p67_p8, %s1618_s15, %s69_s29  }
  0x17   : > { %s1761_s9 = scalar_select %p121_p7, %s1610_s13, %s123_s7  }
  0x18   : > { %p134_p11 = scmp.eq.s32.totalorder %s1266_s23, 7  ;;  %p1269_p13 = scmp.ge.s32.totalorder %s1646_s22, 8 }
  0x1a   : > { %p1763_p12 = por %p134_p11, %p133_p10  ;;  %156 = sbr.rel (%p1269_p13) target bundleno = 87 (0x57), region = 16 }
  0x21   : > { %159 = sbr.rel (!%p1736_p5) target bundleno = 45 (0x2d), region = 20  ;;  %s161_s11 = sand.u32 (%p1736_p5), 1, %s1626_s17  }
  0x22   : > { %s1360_s26 = sshll.u32 (%p1736_p5), %s1638_s20, 4  ;;  %s1270_s27 = sshll.u32 (%p1736_p5), %s161_s11, 5 }
  0x23   : > { %s2062_s0 = sld [smem:[#allocation7_spill]] (%p1736_p5)  ;;  %s163_s23 = scalar_lea.vmem (%p1736_p5), [#allocation3], %s1270_s27 }
  0x29   : > { %s169_s5 = scalar_lea.vmem %s2062_s0, %s1360_s26 }
  0x2a   : > { %v182_v0 = vld [vmem:[%s169_s5] sm:$0xff]  ;;  %v184_v1 = vld [vmem:[%s169_s5 + $0x8] sm:$0xff] }
  0x2b   : > { %v186_v2 = vld [vmem:[%s169_s5 + $0x40] sm:$0xff]  ;;  %183 = vst [vmem:[%s163_s23] sm:$0xff] %v182_v0  ;;  %185 = vst [vmem:[%s163_s23 + $0x8] sm:$0xff] %v184_v1  ;;  %v188_v3 = vld [vmem:[%s169_s5 + $0x48] sm:$0xff] }
  0x2c   : > { %187 = vst [vmem:[%s163_s23 + $0x10] sm:$0xff] %v186_v2  ;;  %189 = vst [vmem:[%s163_s23 + $0x18] sm:$0xff] %v188_v3 }
  0x2d PF: > { %195 = sbr.rel (!%p1750_p9) target bundleno = 87 (0x57), region = 43  ;;  %s197_s28 = sand.u32 (%p1750_p9), 1, %s1618_s15  }
  0x2e   : > { %s1275_s7 = sshll.u32 (%p1750_p9), %s1642_s21, 1  ;;  %s1273_s11 = sshll.u32 (%p1750_p9), %s197_s28, 9 }
  0x2f   : > { %s1361_s26 = sshll.u32 (%p1750_p9), %s1638_s20, 8  ;;  %s2063_s1 = sld [smem:[#allocation8_spill]] (%p1750_p9) }
  0x30   : > { %s203_s29 = sadd.s32 (%p1750_p9), %s1361_s26, %s1275_s7  ;;  %s1788_s6 = scalar_lea.vmem (%p1750_p9), [#allocation4], %s1273_s11 }
  0x31   : > { %s1277_s4 = sshll.u32 (%p1750_p9), %s203_s29, 2 }
  0x35   : > { %s1783_s25 = scalar_lea.vmem %s2063_s1, %s1277_s4 }
  0x36   : > { %v359_v4 = vld [vmem:[%s1783_s25] sm:$0xff]  ;;  %v361_v5 = vld [vmem:[%s1783_s25 + $0x10] sm:$0xff] }
  0x37   : > { %v363_v6 = vld [vmem:[%s1783_s25 + $0x20] sm:$0xff]  ;;  %360 = vst [vmem:[%s1788_s6] sm:$0xff] %v359_v4  ;;  %362 = vst [vmem:[%s1788_s6 + $0x8] sm:$0xff] %v361_v5  ;;  %v365_v7 = vld [vmem:[%s1783_s25 + $0x30] sm:$0xff] }
  0x38   : > { %364 = vst [vmem:[%s1788_s6 + $0x10] sm:$0xff] %v363_v6  ;;  %v367_v8 = vld [vmem:[%s1783_s25 + $0x40] sm:$0xff]  ;;  %v369_v9 = vld [vmem:[%s1783_s25 + $0x50] sm:$0xff]  ;;  %366 = vst [vmem:[%s1788_s6 + $0x18] sm:$0xff] %v365_v7 }
  0x39   : > { %368 = vst [vmem:[%s1788_s6 + $0x20] sm:$0xff] %v367_v8  ;;  %370 = vst [vmem:[%s1788_s6 + $0x28] sm:$0xff] %v369_v9  ;;  %v371_v10 = vld [vmem:[%s1783_s25 + $0x60] sm:$0xff]  ;;  %v373_v11 = vld [vmem:[%s1783_s25 + $0x70] sm:$0xff] }
  0x3a   : > { %v375_v12 = vld [vmem:[%s1783_s25 + $0x80] sm:$0xff]  ;;  %372 = vst [vmem:[%s1788_s6 + $0x30] sm:$0xff] %v371_v10  ;;  %374 = vst [vmem:[%s1788_s6 + $0x38] sm:$0xff] %v373_v11  ;;  %v377_v13 = vld [vmem:[%s1783_s25 + $0x90] sm:$0xff] }
  0x3b   : > { %376 = vst [vmem:[%s1788_s6 + $0x40] sm:$0xff] %v375_v12  ;;  %v379_v14 = vld [vmem:[%s1783_s25 + $0xa0] sm:$0xff]  ;;  %v381_v15 = vld [vmem:[%s1783_s25 + $0xb0] sm:$0xff]  ;;  %378 = vst [vmem:[%s1788_s6 + $0x48] sm:$0xff] %v377_v13 }
  0x3c   : > { %380 = vst [vmem:[%s1788_s6 + $0x50] sm:$0xff] %v379_v14  ;;  %382 = vst [vmem:[%s1788_s6 + $0x58] sm:$0xff] %v381_v15  ;;  %v383_v16 = vld [vmem:[%s1783_s25 + $0xc0] sm:$0xff]  ;;  %v385_v17 = vld [vmem:[%s1783_s25 + $0xd0] sm:$0xff] }
  0x3d   : > { %v387_v18 = vld [vmem:[%s1783_s25 + $0xe0] sm:$0xff]  ;;  %384 = vst [vmem:[%s1788_s6 + $0x60] sm:$0xff] %v383_v16  ;;  %386 = vst [vmem:[%s1788_s6 + $0x68] sm:$0xff] %v385_v17  ;;  %v389_v19 = vld [vmem:[%s1783_s25 + $0xf0] sm:$0xff] }
  0x3e   : > { %388 = vst [vmem:[%s1788_s6 + $0x70] sm:$0xff] %v387_v18  ;;  %v391_v20 = vld [vmem:[%s1783_s25 + $0x100] sm:$0xff]  ;;  %v393_v21 = vld [vmem:[%s1783_s25 + $0x110] sm:$0xff]  ;;  %390 = vst [vmem:[%s1788_s6 + $0x78] sm:$0xff] %v389_v19 }
  0x3f   : > { %392 = vst [vmem:[%s1788_s6 + $0x80] sm:$0xff] %v391_v20  ;;  %394 = vst [vmem:[%s1788_s6 + $0x88] sm:$0xff] %v393_v21  ;;  %v395_v22 = vld [vmem:[%s1783_s25 + $0x120] sm:$0xff]  ;;  %v397_v23 = vld [vmem:[%s1783_s25 + $0x130] sm:$0xff] }
  0x40   : > { %v399_v24 = vld [vmem:[%s1783_s25 + $0x140] sm:$0xff]  ;;  %396 = vst [vmem:[%s1788_s6 + $0x90] sm:$0xff] %v395_v22  ;;  %398 = vst [vmem:[%s1788_s6 + $0x98] sm:$0xff] %v397_v23  ;;  %v401_v25 = vld [vmem:[%s1783_s25 + $0x150] sm:$0xff] }
  0x41   : > { %400 = vst [vmem:[%s1788_s6 + $0xa0] sm:$0xff] %v399_v24  ;;  %v403_v26 = vld [vmem:[%s1783_s25 + $0x160] sm:$0xff]  ;;  %v405_v27 = vld [vmem:[%s1783_s25 + $0x170] sm:$0xff]  ;;  %402 = vst [vmem:[%s1788_s6 + $0xa8] sm:$0xff] %v401_v25 }
  0x42   : > { %404 = vst [vmem:[%s1788_s6 + $0xb0] sm:$0xff] %v403_v26  ;;  %406 = vst [vmem:[%s1788_s6 + $0xb8] sm:$0xff] %v405_v27  ;;  %v407_v28 = vld [vmem:[%s1783_s25 + $0x180] sm:$0xff]  ;;  %v409_v29 = vld [vmem:[%s1783_s25 + $0x190] sm:$0xff] }
  0x43   : > { %v411_v30 = vld [vmem:[%s1783_s25 + $0x1a0] sm:$0xff]  ;;  %408 = vst [vmem:[%s1788_s6 + $0xc0] sm:$0xff] %v407_v28  ;;  %410 = vst [vmem:[%s1788_s6 + $0xc8] sm:$0xff] %v409_v29  ;;  %v413_v31 = vld [vmem:[%s1783_s25 + $0x1b0] sm:$0xff] }
  0x44   : > { %412 = vst [vmem:[%s1788_s6 + $0xd0] sm:$0xff] %v411_v30  ;;  %v415_v32 = vld [vmem:[%s1783_s25 + $0x1c0] sm:$0xff]  ;;  %v417_v33 = vld [vmem:[%s1783_s25 + $0x1d0] sm:$0xff]  ;;  %414 = vst [vmem:[%s1788_s6 + $0xd8] sm:$0xff] %v413_v31 }
  0x45   : > { %416 = vst [vmem:[%s1788_s6 + $0xe0] sm:$0xff] %v415_v32  ;;  %418 = vst [vmem:[%s1788_s6 + $0xe8] sm:$0xff] %v417_v33  ;;  %v419_v34 = vld [vmem:[%s1783_s25 + $0x1e0] sm:$0xff]  ;;  %v421_v35 = vld [vmem:[%s1783_s25 + $0x1f0] sm:$0xff] }
  0x46   : > { %v423_v36 = vld [vmem:[%s1783_s25 + $0x200] sm:$0xff]  ;;  %420 = vst [vmem:[%s1788_s6 + $0xf0] sm:$0xff] %v419_v34  ;;  %422 = vst [vmem:[%s1788_s6 + $0xf8] sm:$0xff] %v421_v35  ;;  %v425_v37 = vld [vmem:[%s1783_s25 + $0x210] sm:$0xff] }
  0x47   : > { %424 = vst [vmem:[%s1788_s6 + $0x100] sm:$0xff] %v423_v36  ;;  %v427_v38 = vld [vmem:[%s1783_s25 + $0x220] sm:$0xff]  ;;  %v429_v39 = vld [vmem:[%s1783_s25 + $0x230] sm:$0xff]  ;;  %426 = vst [vmem:[%s1788_s6 + $0x108] sm:$0xff] %v425_v37 }
  0x48   : > { %428 = vst [vmem:[%s1788_s6 + $0x110] sm:$0xff] %v427_v38  ;;  %430 = vst [vmem:[%s1788_s6 + $0x118] sm:$0xff] %v429_v39  ;;  %v431_v40 = vld [vmem:[%s1783_s25 + $0x240] sm:$0xff]  ;;  %v433_v41 = vld [vmem:[%s1783_s25 + $0x250] sm:$0xff] }
  0x49   : > { %v435_v42 = vld [vmem:[%s1783_s25 + $0x260] sm:$0xff]  ;;  %432 = vst [vmem:[%s1788_s6 + $0x120] sm:$0xff] %v431_v40  ;;  %434 = vst [vmem:[%s1788_s6 + $0x128] sm:$0xff] %v433_v41  ;;  %v437_v43 = vld [vmem:[%s1783_s25 + $0x270] sm:$0xff] }
  0x4a   : > { %436 = vst [vmem:[%s1788_s6 + $0x130] sm:$0xff] %v435_v42  ;;  %v439_v44 = vld [vmem:[%s1783_s25 + $0x280] sm:$0xff]  ;;  %v441_v45 = vld [vmem:[%s1783_s25 + $0x290] sm:$0xff]  ;;  %438 = vst [vmem:[%s1788_s6 + $0x138] sm:$0xff] %v437_v43 }
  0x4b   : > { %440 = vst [vmem:[%s1788_s6 + $0x140] sm:$0xff] %v439_v44  ;;  %442 = vst [vmem:[%s1788_s6 + $0x148] sm:$0xff] %v441_v45  ;;  %v443_v46 = vld [vmem:[%s1783_s25 + $0x2a0] sm:$0xff]  ;;  %v445_v47 = vld [vmem:[%s1783_s25 + $0x2b0] sm:$0xff] }
  0x4c   : > { %v447_v48 = vld [vmem:[%s1783_s25 + $0x2c0] sm:$0xff]  ;;  %444 = vst [vmem:[%s1788_s6 + $0x150] sm:$0xff] %v443_v46  ;;  %446 = vst [vmem:[%s1788_s6 + $0x158] sm:$0xff] %v445_v47  ;;  %v449_v49 = vld [vmem:[%s1783_s25 + $0x2d0] sm:$0xff] }
  0x4d   : > { %448 = vst [vmem:[%s1788_s6 + $0x160] sm:$0xff] %v447_v48  ;;  %v451_v50 = vld [vmem:[%s1783_s25 + $0x2e0] sm:$0xff]  ;;  %v453_v51 = vld [vmem:[%s1783_s25 + $0x2f0] sm:$0xff]  ;;  %450 = vst [vmem:[%s1788_s6 + $0x168] sm:$0xff] %v449_v49 }
  0x4e   : > { %452 = vst [vmem:[%s1788_s6 + $0x170] sm:$0xff] %v451_v50  ;;  %454 = vst [vmem:[%s1788_s6 + $0x178] sm:$0xff] %v453_v51  ;;  %v455_v52 = vld [vmem:[%s1783_s25 + $0x300] sm:$0xff]  ;;  %v457_v53 = vld [vmem:[%s1783_s25 + $0x310] sm:$0xff] }
  0x4f   : > { %v459_v54 = vld [vmem:[%s1783_s25 + $0x320] sm:$0xff]  ;;  %456 = vst [vmem:[%s1788_s6 + $0x180] sm:$0xff] %v455_v52  ;;  %458 = vst [vmem:[%s1788_s6 + $0x188] sm:$0xff] %v457_v53  ;;  %v461_v55 = vld [vmem:[%s1783_s25 + $0x330] sm:$0xff] }
  0x50   : > { %460 = vst [vmem:[%s1788_s6 + $0x190] sm:$0xff] %v459_v54  ;;  %v463_v56 = vld [vmem:[%s1783_s25 + $0x340] sm:$0xff]  ;;  %v465_v57 = vld [vmem:[%s1783_s25 + $0x350] sm:$0xff]  ;;  %462 = vst [vmem:[%s1788_s6 + $0x198] sm:$0xff] %v461_v55 }
  0x51   : > { %464 = vst [vmem:[%s1788_s6 + $0x1a0] sm:$0xff] %v463_v56  ;;  %466 = vst [vmem:[%s1788_s6 + $0x1a8] sm:$0xff] %v465_v57  ;;  %v467_v58 = vld [vmem:[%s1783_s25 + $0x360] sm:$0xff]  ;;  %v469_v59 = vld [vmem:[%s1783_s25 + $0x370] sm:$0xff] }
  0x52   : > { %v471_v60 = vld [vmem:[%s1783_s25 + $0x380] sm:$0xff]  ;;  %468 = vst [vmem:[%s1788_s6 + $0x1b0] sm:$0xff] %v467_v58  ;;  %470 = vst [vmem:[%s1788_s6 + $0x1b8] sm:$0xff] %v469_v59  ;;  %v473_v61 = vld [vmem:[%s1783_s25 + $0x390] sm:$0xff] }
  0x53   : > { %472 = vst [vmem:[%s1788_s6 + $0x1c0] sm:$0xff] %v471_v60  ;;  %v475_v62 = vld [vmem:[%s1783_s25 + $0x3a0] sm:$0xff]  ;;  %v477_v63 = vld [vmem:[%s1783_s25 + $0x3b0] sm:$0xff]  ;;  %474 = vst [vmem:[%s1788_s6 + $0x1c8] sm:$0xff] %v473_v61 }
  0x54   : > { %476 = vst [vmem:[%s1788_s6 + $0x1d0] sm:$0xff] %v475_v62  ;;  %478 = vst [vmem:[%s1788_s6 + $0x1d8] sm:$0xff] %v477_v63  ;;  %v479_v0 = vld [vmem:[%s1783_s25 + $0x3c0] sm:$0xff]  ;;  %v481_v1 = vld [vmem:[%s1783_s25 + $0x3d0] sm:$0xff] }
  0x55   : > { %v483_v2 = vld [vmem:[%s1783_s25 + $0x3e0] sm:$0xff]  ;;  %480 = vst [vmem:[%s1788_s6 + $0x1e0] sm:$0xff] %v479_v0  ;;  %482 = vst [vmem:[%s1788_s6 + $0x1e8] sm:$0xff] %v481_v1  ;;  %v485_v3 = vld [vmem:[%s1783_s25 + $0x3f0] sm:$0xff] }
  0x56   : > { %484 = vst [vmem:[%s1788_s6 + $0x1f0] sm:$0xff] %v483_v2  ;;  %486 = vst [vmem:[%s1788_s6 + $0x1f8] sm:$0xff] %v485_v3 }
  0x57 PF: > { %p1278_p0 = scmp.ge.s32.totalorder %s1646_s22, 1  ;;  %p499_p1 = scmp.lt.s32.totalorder %s1646_s22, 9 }
  0x59   : > { %p500_p2 = pnand %p1278_p0, %p499_p1 }
  0x5a   : > { %s506_s0 = sand.u32 (!%p500_p2), 1, %s1622_s16   ;;  %s513_s5 = sand.u32 (!%p500_p2), 1, %s1614_s14  }
  0x5b   : > { %503 = sbr.rel (%p500_p2) target bundleno = 413 (0x19d), region = 85  ;;  %s1279_s23 = sshll.u32 (!%p500_p2), %s506_s0, 5 }
  0x5c   : > { %s1280_s28 = sshll.u32 (!%p500_p2), %s513_s5, 9  ;;  %s540_s7 = sand.u32 (!%p500_p2), 1, %s1606_s12  }
  0x5d   : > { %s1282_s11 = sshll.u32 (!%p500_p2), %s1634_s19, 1  ;;  %s1281_s25 = sshll.u32 (!%p500_p2), %s540_s7, 4 }
  0x5e   : > { %p548_p3 = scmp.lt.s32.totalorder (!%p500_p2), %s1282_s11, 3  ;;  %s1927_s27 = scalar_lea.vmem (!%p500_p2), [#allocation3], %s1279_s23 }
  0x5f   : > { %s1929_s6 = scalar_lea.vmem (!%p500_p2), [#allocation4], %s1280_s28  ;;  %s1931_s1 = scalar_lea.vmem (!%p500_p2), [#allocation5], %s1281_s25 }
  0x60   : > { %p1283_p4 = scmp.ne.s32.totalorder (!%p500_p2), %s1630_s18, 0 }
  0x62   : > { %s2082_s11 = smov (!%p548_p3, %s1282_s11), 3  ;;  %557 = sbr.rel (%p1283_p4) target bundleno = 105 (0x69), region = 97 }
  0x63   : > { %s550_s4 = scalar_lea.vmem %s2053_s2, %s2082_s11  ;;  %v1648_v4 = vmov (!%p1283_p4), 0.0  }
  0x64   : > { %558 = vst [vmem:[#allocation2] sm:$0xff] (!%p1283_p4), %v1648_v4  ;;  %559 = vst [vmem:[#allocation2 + $0x8] sm:$0xff] (!%p1283_p4), %v1648_v4 }
  0x65   : > { %560 = vst [vmem:[#allocation2 + $0x10] sm:$0xff] (!%p1283_p4), %v1648_v4  ;;  %561 = vst [vmem:[#allocation2 + $0x18] sm:$0xff] (!%p1283_p4), %v1648_v4 }
  0x69 PF: > { %v1458_v5 = vld [vmem:[%s1929_s6 + $0x4] ss:$8 sps:$4 sm:$0xff]   ;;  %v1462_v7 = vld [vmem:[%s1929_s6] ss:$8 sps:$4 sm:$0xff]   ;;  %v1464_v9 = vld [vmem:[%s1929_s6 + $0x14] ss:$8 sps:$4 sm:$0xff]  }
  0x6a   : > { %v1460_v6 = vld [vmem:[%s1929_s6 + $0x104] ss:$8 sps:$4 sm:$0xff]   ;;  %974 = vmatprep.subr.bf16.mxu1 %v1458_v5  ;;  %v1463_v8 = vld [vmem:[%s1929_s6 + $0x100] ss:$8 sps:$4 sm:$0xff]   ;;  %v1466_v10 = vld [vmem:[%s1929_s6 + $0x114] ss:$8 sps:$4 sm:$0xff]  }
  0x6b   : > { %1017 = vmatprep.subr.bf16.mxu0 %v1460_v6  ;;  %975 = vmatpush1.bf16.msra.mxu1 %v1462_v7  ;;  %v1468_v11 = vld [vmem:[%s1929_s6 + $0x10] ss:$8 sps:$4 sm:$0xff]   ;;  %v1470_v13 = vld [vmem:[%s1929_s6 + $0x24] ss:$8 sps:$4 sm:$0xff]   ;;  %v1474_v15 = vld [vmem:[%s1929_s6 + $0x20] ss:$8 sps:$4 sm:$0xff]  }
  0x6c   : > { %1018 = vmatpush1.bf16.msra.mxu0 %v1463_v8  ;;  %976 = vmatprep.subr.bf16.mxu1 %v1464_v9  ;;  %v1469_v12 = vld [vmem:[%s1929_s6 + $0x110] ss:$8 sps:$4 sm:$0xff]   ;;  %v1472_v14 = vld [vmem:[%s1929_s6 + $0x124] ss:$8 sps:$4 sm:$0xff]   ;;  %v1475_v16 = vld [vmem:[%s1929_s6 + $0x120] ss:$8 sps:$4 sm:$0xff]  }
  0x6d   : > { %1019 = vmatprep.subr.bf16.mxu0 %v1466_v10  ;;  %v1476_v17 = vld [vmem:[%s1929_s6 + $0x34] ss:$8 sps:$4 sm:$0xff]   ;;  %v1480_v19 = vld [vmem:[%s1929_s6 + $0x30] ss:$8 sps:$4 sm:$0xff]   ;;  %v1482_v21 = vld [vmem:[%s1929_s6 + $0x44] ss:$8 sps:$4 sm:$0xff]  }
  0x6e   : > { %v1478_v18 = vld [vmem:[%s1929_s6 + $0x134] ss:$8 sps:$4 sm:$0xff]   ;;  %v1481_v20 = vld [vmem:[%s1929_s6 + $0x130] ss:$8 sps:$4 sm:$0xff]   ;;  %v1484_v22 = vld [vmem:[%s1929_s6 + $0x144] ss:$8 sps:$4 sm:$0xff]  }
  0x6f   : > { %977 = vmatpush1.bf16.msra.mxu1 %v1468_v11  ;;  %v1486_v23 = vld [vmem:[%s1929_s6 + $0x40] ss:$8 sps:$4 sm:$0xff]   ;;  %v1488_v25 = vld [vmem:[%s1929_s6 + $0x54] ss:$8 sps:$4 sm:$0xff]   ;;  %v1492_v27 = vld [vmem:[%s1929_s6 + $0x50] ss:$8 sps:$4 sm:$0xff]  }
  0x70   : > { %1020 = vmatpush1.bf16.msra.mxu0 %v1469_v12  ;;  %978 = vmatprep.subr.bf16.mxu1 %v1470_v13  ;;  %v1487_v24 = vld [vmem:[%s1929_s6 + $0x140] ss:$8 sps:$4 sm:$0xff]   ;;  %v1490_v26 = vld [vmem:[%s1929_s6 + $0x154] ss:$8 sps:$4 sm:$0xff]   ;;  %v1493_v28 = vld [vmem:[%s1929_s6 + $0x150] ss:$8 sps:$4 sm:$0xff]  }
  0x71   : > { %1021 = vmatprep.subr.bf16.mxu0 %v1472_v14  ;;  %v1494_v29 = vld [vmem:[%s1929_s6 + $0x64] ss:$8 sps:$4 sm:$0xff]   ;;  %v1498_v31 = vld [vmem:[%s1929_s6 + $0x60] ss:$8 sps:$4 sm:$0xff]   ;;  %v1500_v33 = vld [vmem:[%s1929_s6 + $0x74] ss:$8 sps:$4 sm:$0xff]  }
  0x72   : > { %v1496_v30 = vld [vmem:[%s1929_s6 + $0x164] ss:$8 sps:$4 sm:$0xff]   ;;  %v1499_v32 = vld [vmem:[%s1929_s6 + $0x160] ss:$8 sps:$4 sm:$0xff]   ;;  %v1502_v34 = vld [vmem:[%s1929_s6 + $0x174] ss:$8 sps:$4 sm:$0xff]  }
  0x73   : > { %979 = vmatpush1.bf16.msra.mxu1 %v1474_v15  ;;  %v1504_v35 = vld [vmem:[%s1929_s6 + $0x70] ss:$8 sps:$4 sm:$0xff]   ;;  %v1506_v37 = vld [vmem:[%s1929_s6 + $0x84] ss:$8 sps:$4 sm:$0xff]   ;;  %v1510_v39 = vld [vmem:[%s1929_s6 + $0x80] ss:$8 sps:$4 sm:$0xff]  }
  0x74   : > { %1022 = vmatpush1.bf16.msra.mxu0 %v1475_v16  ;;  %980 = vmatprep.subr.bf16.mxu1 %v1476_v17  ;;  %v1505_v36 = vld [vmem:[%s1929_s6 + $0x170] ss:$8 sps:$4 sm:$0xff]   ;;  %v1508_v38 = vld [vmem:[%s1929_s6 + $0x184] ss:$8 sps:$4 sm:$0xff]   ;;  %v1511_v40 = vld [vmem:[%s1929_s6 + $0x180] ss:$8 sps:$4 sm:$0xff]  }
  0x75   : > { %1023 = vmatprep.subr.bf16.mxu0 %v1478_v18  ;;  %v1512_v41 = vld [vmem:[%s1929_s6 + $0x94] ss:$8 sps:$4 sm:$0xff]   ;;  %v1516_v43 = vld [vmem:[%s1929_s6 + $0x90] ss:$8 sps:$4 sm:$0xff]   ;;  %v1518_v45 = vld [vmem:[%s1929_s6 + $0xa4] ss:$8 sps:$4 sm:$0xff]  }
  0x76   : > { %v1514_v42 = vld [vmem:[%s1929_s6 + $0x194] ss:$8 sps:$4 sm:$0xff]   ;;  %v1517_v44 = vld [vmem:[%s1929_s6 + $0x190] ss:$8 sps:$4 sm:$0xff]   ;;  %v1520_v46 = vld [vmem:[%s1929_s6 + $0x1a4] ss:$8 sps:$4 sm:$0xff]  }
  0x77   : > { %981 = vmatpush1.bf16.msra.mxu1 %v1480_v19  ;;  %v1522_v47 = vld [vmem:[%s1929_s6 + $0xa0] ss:$8 sps:$4 sm:$0xff]   ;;  %v1524_v49 = vld [vmem:[%s1929_s6 + $0xb4] ss:$8 sps:$4 sm:$0xff]   ;;  %v1528_v51 = vld [vmem:[%s1929_s6 + $0xb0] ss:$8 sps:$4 sm:$0xff]  }
  0x78   : > { %1024 = vmatpush1.bf16.msra.mxu0 %v1481_v20  ;;  %982 = vmatprep.subr.bf16.mxu1 %v1482_v21  ;;  %v1523_v48 = vld [vmem:[%s1929_s6 + $0x1a0] ss:$8 sps:$4 sm:$0xff]   ;;  %v1526_v50 = vld [vmem:[%s1929_s6 + $0x1b4] ss:$8 sps:$4 sm:$0xff]   ;;  %v1529_v53 = vld [vmem:[%s1929_s6 + $0x1b0] ss:$8 sps:$4 sm:$0xff]  }
  0x79   : > { %1025 = vmatprep.subr.bf16.mxu0 %v1484_v22  ;;  %v1556_v52 = vld [vmem:[%s1927_s27 + $0x4] ss:$16 sps:$4 sm:$0xff]   ;;  %v1559_v56 = vld [vmem:[%s1927_s27 + $0xc] ss:$16 sps:$4 sm:$0xff]   ;;  %v1534_v57 = vld [vmem:[%s1929_s6 + $0xc0] ss:$8 sps:$4 sm:$0xff]  }
  0x7a   : > { %v1530_v54 = vld [vmem:[%s1929_s6 + $0xc4] ss:$8 sps:$4 sm:$0xff]   ;;  %1006 = vmatprep.mubr.bf16.mxu1 %v1556_v52  ;;  %1049 = vmatprep.mubr.bf16.mxu0 %v1559_v56  ;;  %v1535_v58 = vld [vmem:[%s1929_s6 + $0x1c0] ss:$8 sps:$4 sm:$0xff]   ;;  %v1536_v59 = vld [vmem:[%s1929_s6 + $0xd4] ss:$8 sps:$4 sm:$0xff]  }
  0x7b   : > { %983 = vmatpush1.bf16.msra.mxu1 %v1486_v23  ;;  %v1532_v55 = vld [vmem:[%s1929_s6 + $0x1c4] ss:$8 sps:$4 sm:$0xff]   ;;  %v1538_v60 = vld [vmem:[%s1929_s6 + $0x1d4] ss:$8 sps:$4 sm:$0xff]   ;;  %v1540_v61 = vld [vmem:[%s1929_s6 + $0xd0] ss:$8 sps:$4 sm:$0xff]  }
  0x7c   : > { %1026 = vmatpush1.bf16.msra.mxu0 %v1487_v24  ;;  %984 = vmatprep.subr.bf16.mxu1 %v1488_v25  ;;  %v1541_v62 = vld [vmem:[%s1929_s6 + $0x1d0] ss:$8 sps:$4 sm:$0xff]   ;;  %v1542_v63 = vld [vmem:[%s1929_s6 + $0xe4] ss:$8 sps:$4 sm:$0xff]   ;;  %v1546_v1 = vld [vmem:[%s1929_s6 + $0xe0] ss:$8 sps:$4 sm:$0xff]  }
  0x7d   : > { %1027 = vmatprep.subr.bf16.mxu0 %v1490_v26  ;;  %v1544_v0 = vld [vmem:[%s1929_s6 + $0x1e4] ss:$8 sps:$4 sm:$0xff]   ;;  %v1547_v2 = vld [vmem:[%s1929_s6 + $0x1e0] ss:$8 sps:$4 sm:$0xff]   ;;  %v1548_v3 = vld [vmem:[%s1929_s6 + $0xf4] ss:$8 sps:$4 sm:$0xff]  }
  0x7e   : > { %v1550_v4 = vld [vmem:[%s1929_s6 + $0x1f4] ss:$8 sps:$4 sm:$0xff]   ;;  %v1552_v5 = vld [vmem:[%s1929_s6 + $0xf0] ss:$8 sps:$4 sm:$0xff]   ;;  %v562_v10 = vld [vmem:[#allocation2] sm:$0xff]  ;;  %p1352_p5 = scmp.ne.s32.totalorder %s1630_s18, 3 }
  0x7f   : > { %985 = vmatpush1.bf16.msra.mxu1 %v1492_v27  ;;  %v1553_v6 = vld [vmem:[%s1929_s6 + $0x1f0] ss:$8 sps:$4 sm:$0xff]   ;;  %v563_v14 = vld [vmem:[#allocation2 + $0x8] sm:$0xff] }
  0x80   : > { %1028 = vmatpush1.bf16.msra.mxu0 %v1493_v28  ;;  %986 = vmatprep.subr.bf16.mxu1 %v1494_v29  ;;  %v1554_v7 = vld [vmem:[%s1927_s27] ss:$16 sps:$4 sm:$0xff]   ;;  %v1557_v8 = vld [vmem:[%s1927_s27 + $0x8] ss:$16 sps:$4 sm:$0xff]   ;;  %v1078_v29 = vlaneseq (!%p1352_p5) }
  0x81   : > { %1029 = vmatprep.subr.bf16.mxu0 %v1496_v30  ;;  %v564_v18 = vld [vmem:[#allocation2 + $0x10] sm:$0xff]  ;;  %v565_v23 = vld [vmem:[#allocation2 + $0x18] sm:$0xff] }
  0x82   : > { %v1079_v30 = vshrl.u32 (!%p1352_p5), %v1078_v29, 7 }
  0x83   : > { %987 = vmatpush1.bf16.msra.mxu1 %v1498_v31  ;;  %v1076_v31 = vld [vmem:[%s550_s4] sm:$0x3] (!%p1352_p5) }
  0x84   : > { %1030 = vmatpush1.bf16.msra.mxu0 %v1499_v32  ;;  %988 = vmatprep.subr.bf16.mxu1 %v1500_v33  ;;  %v1080_v33 = vsub.s32 (!%p1352_p5), 0, %v1079_v30 }
  0x85   : > { %1031 = vmatprep.subr.bf16.mxu0 %v1502_v34  ;;  %v1084_v34 = vsub.s32 (!%p1352_p5), 1, %v1079_v30 }
  0x87   : > { %989 = vmatpush1.bf16.msra.mxu1 %v1504_v35 }
  0x88   : > { %1032 = vmatpush1.bf16.msra.mxu0 %v1505_v36  ;;  %990 = vmatprep.subr.bf16.mxu1 %v1506_v37 }
  0x89   : > { %1033 = vmatprep.subr.bf16.mxu0 %v1508_v38  ;;  %v1081_v38 = vrot.slane (!%p1352_p5), %v1076_v31, %v1080_v33 }
  0x8b   : > { %991 = vmatpush1.bf16.msra.mxu1 %v1510_v39  ;;  %v1085_v39 = vrot.slane (!%p1352_p5), %v1076_v31, %v1084_v34 }
  0x8c   : > { %1034 = vmatpush1.bf16.msra.mxu0 %v1511_v40  ;;  %992 = vmatprep.subr.bf16.mxu1 %v1512_v41 }
  0x8d   : > { %1035 = vmatprep.subr.bf16.mxu0 %v1514_v42 }
  0x8f   : > { %993 = vmatpush1.bf16.msra.mxu1 %v1516_v43 }
  0x90   : > { %1036 = vmatpush1.bf16.msra.mxu0 %v1517_v44  ;;  %994 = vmatprep.subr.bf16.mxu1 %v1518_v45 }
  0x91   : > { %1037 = vmatprep.subr.bf16.mxu0 %v1520_v46 }
  0x93   : > { %995 = vmatpush1.bf16.msra.mxu1 %v1522_v47 }
  0x94   : > { %1038 = vmatpush1.bf16.msra.mxu0 %v1523_v48  ;;  %996 = vmatprep.subr.bf16.mxu1 %v1524_v49 }
  0x95   : > { %1039 = vmatprep.subr.bf16.mxu0 %v1526_v50 }
  0x97   : > { %997 = vmatpush1.bf16.msra.mxu1 %v1528_v51 }
  0x98   : > { %1040 = vmatpush1.bf16.msra.mxu0 %v1529_v53  ;;  %998 = vmatprep.subr.bf16.mxu1 %v1530_v54 }
  0x99   : > { %1041 = vmatprep.subr.bf16.mxu0 %v1532_v55 }
  0x9b   : > { %999 = vmatpush1.bf16.msra.mxu1 %v1534_v57 }
  0x9c   : > { %1042 = vmatpush1.bf16.msra.mxu0 %v1535_v58  ;;  %1000 = vmatprep.subr.bf16.mxu1 %v1536_v59 }
  0x9d   : > { %1043 = vmatprep.subr.bf16.mxu0 %v1538_v60 }
  0x9f   : > { %1001 = vmatpush1.bf16.msra.mxu1 %v1540_v61 }
  0xa0   : > { %1044 = vmatpush1.bf16.msra.mxu0 %v1541_v62  ;;  %1002 = vmatprep.subr.bf16.mxu1 %v1542_v63 }
  0xa1   : > { %1045 = vmatprep.subr.bf16.mxu0 %v1544_v0 }
  0xa3   : > { %1003 = vmatpush1.bf16.msra.mxu1 %v1546_v1 }
  0xa4   : > { %1046 = vmatpush1.bf16.msra.mxu0 %v1547_v2  ;;  %1004 = vmatprep.subr.bf16.mxu1 %v1548_v3 }
  0xa5   : > { %1047 = vmatprep.subr.bf16.mxu0 %v1550_v4 }
  0xa7   : > { %1005 = vmatpush1.bf16.msra.mxu1 %v1552_v5 }
  0xa8   : > { %1048 = vmatpush1.bf16.msra.mxu0 %v1553_v6 }
  0xaa   : > { %1007 = vmatmul.mubr.bf16.vlgmr.msra.gmra.mrb[0].mxu1 %v1554_v7 }
  0xab   : > { %1050 = vmatmul.mubr.bf16.vlgmr.msra.gmra.mrb[0].mxu0 %v1557_v8 }
 0x17d   : > { %v1008_v9 = vpop.f32.mrb[0].mxu1 }
 0x17e   : > { %v1051_v11 = vpop.f32.mrb[0].mxu0  ;;  %v1010_v13 = vpop.f32.mrb[1].mxu1 }
 0x17f   : > { %v1052_v12 = vadd.f32 %v1051_v11, %v1008_v9  ;;  %v1053_v15 = vpop.f32.mrb[1].mxu0  ;;  %v1012_v17 = vpop.f32.mrb[2].mxu1 }
 0x180   : > { %v1054_v16 = vadd.f32 %v1053_v15, %v1010_v13  ;;  %v1055_v19 = vpop.f32.mrb[2].mxu0  ;;  %v1014_v22 = vpop.f32.mrb[3].mxu1  ;;  %1071 = sbr.rel (%p1352_p5) target bundleno = 405 (0x195), region = 101 }
 0x181   : > { %v1060_v20 = vadd.f32 %v1052_v12, %v562_v10  ;;  %v1056_v21 = vadd.f32 %v1055_v19, %v1012_v17  ;;  %v1057_v24 = vpop.f32.mrb[3].mxu0 }
 0x182   : > { %v1061_v25 = vadd.f32 %v1054_v16, %v563_v14  ;;  %v1058_v26 = vadd.f32 %v1057_v24, %v1014_v22 }
 0x183   : > { %1064 = vst [vmem:[#allocation2] sm:$0xff] %v1060_v20  ;;  %v1062_v27 = vadd.f32 %v1056_v21, %v564_v18 }
 0x184   : > { %1065 = vst [vmem:[#allocation2 + $0x8] sm:$0xff] %v1061_v25  ;;  %v1063_v28 = vadd.f32 %v1058_v26, %v565_v23 }
 0x185   : > { %1066 = vst [vmem:[#allocation2 + $0x10] sm:$0xff] %v1062_v27 }
 0x186   : > { %1067 = vst [vmem:[#allocation2 + $0x18] sm:$0xff] %v1063_v28 }
 0x18a   : > { %v1072_v32 = vld [vmem:[#allocation2] sm:$0xff] }
 0x18b   : > { %v1073_v35 = vld [vmem:[#allocation2 + $0x8] sm:$0xff]  ;;  %v1088_v40 = vadd.f32 %v1081_v38, %v1072_v32 }
 0x18c   : > { %v1074_v36 = vld [vmem:[#allocation2 + $0x10] sm:$0xff]  ;;  %v1089_v41 = vadd.f32 %v1085_v39, %v1073_v35 }
 0x18d   : > { %v1075_v37 = vld [vmem:[#allocation2 + $0x18] sm:$0xff]  ;;  %v1090_v42 = vadd.f32 %v1081_v38, %v1074_v36  ;;  %v1092_v44 = vmax.f32 %v1088_v40, 0.0 }
 0x18e   : > { %v1091_v43 = vadd.f32 %v1085_v39, %v1075_v37  ;;  %v1093_v45 = vmax.f32 %v1089_v41, 0.0 }
 0x18f   : > { %v1094_v46 = vmax.f32 %v1090_v42, 0.0 }
 0x190   : > { %v1095_v47 = vmax.f32 %v1091_v43, 0.0  ;;  %v1362_v48 = vpack.c.bf16 %v1093_v45, %v1092_v44 }
 0x192   : > { %v1363_v49 = vpack.c.bf16 %v1095_v47, %v1094_v46  ;;  %1108 = vst [vmem:[%s1931_s1] sm:$0xff] %v1362_v48 }
 0x194   : > { %1109 = vst [vmem:[%s1931_s1 + $0x8] sm:$0xff] %v1363_v49 }
 0x195 PF: > { %1116 = sbr.rel (!%p1763_p12) target bundleno = 413 (0x19d), region = 105  ;;  %s1364_s16 = sshll.u32 (%p1763_p12), %s1634_s19, 3 }
 0x196   : > { %s1122_s5 = scalar_lea.vmem (%p1763_p12), %s2054_s3, %s1364_s16 }
 0x199   : > { %v1152_v50 = vld [vmem:[%s1931_s1] sm:$0xff] (%p1763_p12) }
 0x19a   : > { %1153 = vst [vmem:[%s1122_s5] sm:$0xff] (%p1763_p12), %v1152_v50 }
 0x19b   : > { %v1154_v51 = vld [vmem:[%s1931_s1 + $0x8] sm:$0xff] (%p1763_p12) }
 0x19c   : > { %1155 = vst [vmem:[%s1122_s5 + $0x10] sm:$0xff] %v1154_v51 }
 0x19d PF: > { %s13_s22 = sadd.s32 1, %s1646_s22   ;;  %s2064_s1 = sld [smem:[#allocation6_spill]] }
 0x19e   : > { %p10_p6 = scmp.ge.s32.totalorder %s13_s22, 10   ;;  %s2065_s12 = smov %s1610_s13 }
 0x19f   : > { %s2066_s13 = smov %s1761_s9  ;;  %s2067_s14 = smov %s1618_s15 }
 0x1a0   : > { %s2068_s15 = smov %s1758_s8  ;;  %s2069_s16 = smov %s1626_s17 }
 0x1a1   : > { %s2070_s17 = smov %s1744_s30  ;;  %s2071_s18 = smov %s1638_s20 }
 0x1a2   : > { %s2072_s19 = smov %s1642_s21  ;;  %s2073_s20 = smov %s2076_s24 }
 0x1a3   : > { %s2074_s21 = smov %s2064_s1  ;;  %12 = sbr.rel (!%p10_p6) target bundleno = 9 (0x9), region = 185 }

</bundles_post_ra>
